<compile_context>
chip_gen: v5e
topology: v5e:2x2
jax: 0.10.0
libtpu: 0.0.40
codegen_flags: <defaults>
</compile_context>

<pallas_src>
import jax
import jax.numpy as jnp
from jax.experimental import pallas as pl
from jax.experimental.pallas import tpu as pltpu

BETA = 0.5            # irrelevant at t=0 since mem0 == 0
THRESHOLD = 1.0       # snn.Leaky default
KSIZE = 5             # both convs are 5x5, valid padding, stride 1
C1P = 16              # conv1 Cout padded 12 -> 16  (8x less writeback than 128)
C2P = 128             # conv2 Cout padded 64 -> 128 (lane dense, internal only)
FCP = 128             # fc Cout padded 10 -> 128    (lane dense f32 outputs)
CONV1_ROW_CAP = 4096  # rows/block, v7x-safe (v6e/v5e with 128 MiB VMEM: ~8192)
CONV2_IMG_CAP = 128   # images/block = 2048 conv2-output rows, v7x-safe
VMEM_LIMIT = 32 * 1024 * 1024


def _pick_images_per_block(batch, *, cap, need_mult8):
    """Largest images-per-block g with: g divides batch, g <= cap, and the
    resulting second-minor block dim legal (multiple of 8, or == full dim).
    Prefers a split (grid >= 2) so both v7x TensorCores get work."""
    cands = [g for g in range(1, min(cap, batch) + 1) if batch % g == 0]

    def ok(g):
        return (not need_mult8) or (g % 8 == 0) or (g == batch)

    split = [g for g in cands if ok(g) and g <= batch // 2]
    anyok = [g for g in cands if ok(g)]
    if split:
        return max(split)
    if anyok:
        return max(anyok)
    return batch  # degenerate fallback: one block = whole batch (== full dim)


# ----------------------------------------------------------------------------
# Pallas kernels
# ----------------------------------------------------------------------------
def _conv1_pool_lif_kernel(p_ref, w_ref, b_ref, spk_ref):
    """conv1 (im2col matmul) + 2x2 max-pool + one Leaky-LIF step -> spikes.

    p_ref  : (4, bm, 25) bf16  im2col patches, one slab per pool-window position
    w_ref  : (25, 16)   bf16   conv1 weight, Cout padded 12 -> 16
    b_ref  : (1, 16)    f32
    spk_ref: (bm, 16)   bf16
    """
    w = w_ref[...]
    # Running max over the 4 pool positions keeps a single (bm, 16) f32 live.
    cur = jnp.dot(p_ref[0], w, preferred_element_type=jnp.float32)
    for q in range(1, 4):
        cur = jnp.maximum(
            cur, jnp.dot(p_ref[q], w, preferred_element_type=jnp.float32))
    # bias is per-channel constant, so add-after-max == max-after-add
    cur = cur + b_ref[...]
    # Leaky t=0, mem0 = 0, reset="subtract": mem = cur, spk = heaviside(cur-1)
    spk_ref[...] = (cur > THRESHOLD).astype(spk_ref.dtype)


def _conv2_fc_lif_kernel(p_ref, w2_ref, b2_ref, wfc_ref, bfc_ref,
                         spk3_ref, mem3_ref):
    """conv2 + 2x2 max-pool + lif2 + fc1 + lif3, fully fused.

    p_ref  : (16, 4, gb, 300) bf16  conv2 im2col patches; dim0 = pooled output
             position p = ph*4+pw, dim1 = pre-pool position in the 2x2 window
    w2_ref : (300, 128) bf16        conv2 weight, Cout padded 64 -> 128
    b2_ref : (1, 128)   f32
    wfc_ref: (16, 128, 128) bf16    fc1 weight per pooled position (cin/cout pad)
    bfc_ref: (1, 128)   f32
    outputs: spk3 / mem3 (gb, 128) f32 (first 10 lanes real)
    """
    gb = p_ref.shape[2]
    nout = wfc_ref.shape[2]
    w2 = w2_ref[...]
    fc_acc = jnp.zeros((gb, nout), jnp.float32)
    for p in range(16):                              # static, unrolled
        cur = jnp.dot(p_ref[p, 0], w2, preferred_element_type=jnp.float32)
        for q in range(1, 4):
            cur = jnp.maximum(
                cur, jnp.dot(p_ref[p, q], w2,
                             preferred_element_type=jnp.float32))
        cur = cur + b2_ref[...]
        # lif2: spikes for this pooled position; padded channels give cur == 0
        spk2 = (cur > THRESHOLD).astype(jnp.bfloat16)   # never leaves VMEM
        fc_acc = fc_acc + jnp.dot(spk2, wfc_ref[p],
                                  preferred_element_type=jnp.float32)
    cur3 = fc_acc + bfc_ref[...]
    spk3_ref[...] = (cur3 > THRESHOLD).astype(spk3_ref.dtype)
    mem3_ref[...] = cur3        # pre-reset membrane (snnTorch default reset_delay)


# ----------------------------------------------------------------------------
# pallas_call wrappers: grid over rows/images, weights & biases VMEM-resident
# ----------------------------------------------------------------------------
def conv1_pool_lif(patches, w, b):
    # patches: (4, B*144, 25) bf16 ; w: (25, 16) bf16 ; b: (1, 16) f32
    _, n1, k = patches.shape
    cout = w.shape[1]
    batch = n1 // 144
    g = _pick_images_per_block(batch, cap=max(1, CONV1_ROW_CAP // 144),
                               need_mult8=False)
    bm = 144 * g                                     # divides n1; multiple of 16
    return pl.pallas_call(
        _conv1_pool_lif_kernel,
        grid=(n1 // bm,),
        in_specs=[
            pl.BlockSpec((4, bm, k), lambda m: (0, m, 0)),
            pl.BlockSpec((k, cout), lambda m: (0, 0)),     # resident every step
            pl.BlockSpec((1, cout), lambda m: (0, 0)),
        ],
        out_specs=pl.BlockSpec((bm, cout), lambda m: (m, 0)),
        out_shape=jax.ShapeDtypeStruct((n1, cout), jnp.bfloat16),
        compiler_params=pltpu.CompilerParams(
            dimension_semantics=("parallel",),
            vmem_limit_bytes=VMEM_LIMIT),
    )(patches, w, b)


def conv2_fc_lif(patches, w2, b2, wfc, bfc):
    # patches: (16, 4, B, 300) bf16 ; w2: (300, 128) bf16 ; b2: (1, 128) f32
    # wfc: (16, 128, 128) bf16 ; bfc: (1, 128) f32
    _, _, batch, k = patches.shape
    g = _pick_images_per_block(batch, cap=CONV2_IMG_CAP, need_mult8=True)
    out_sd = jax.ShapeDtypeStruct((batch, FCP), jnp.float32)
    spk3, mem3 = pl.pallas_call(
        _conv2_fc_lif_kernel,
        grid=(batch // g,),
        in_specs=[
            pl.BlockSpec((16, 4, g, k), lambda m: (0, 0, m, 0)),
            pl.BlockSpec((k, C2P), lambda m: (0, 0)),
            pl.BlockSpec((1, C2P), lambda m: (0, 0)),
            pl.BlockSpec((16, C2P, FCP), lambda m: (0, 0, 0)),
            pl.BlockSpec((1, FCP), lambda m: (0, 0)),
        ],
        out_specs=(pl.BlockSpec((g, FCP), lambda m: (m, 0)),
                   pl.BlockSpec((g, FCP), lambda m: (m, 0))),
        out_shape=(out_sd, out_sd),
        compiler_params=pltpu.CompilerParams(
            dimension_semantics=("parallel",),
            vmem_limit_bytes=VMEM_LIMIT),
    )(patches, w2, b2, wfc, bfc)
    return spk3, mem3


# ----------------------------------------------------------------------------
# XLA glue: im2col patch construction (bf16; no f32 blow-up)
# ----------------------------------------------------------------------------
def _conv1_patch_groups(x_nhwc):
    """x: (B, 28, 28, 1) bf16 -> (4, B*144, 25), grouped by 2x2 pool position.
    Row order within each group: (b, ph, pw)."""
    b = x_nhwc.shape[0]
    oh = 28 - KSIZE + 1                               # 24
    cols = []
    for di in range(KSIZE):
        for dj in range(KSIZE):
            cols.append(x_nhwc[:, di:di + oh, dj:dj + oh, :])
    pat = jnp.concatenate(cols, axis=-1)              # (B, 24, 24, 25)
    groups = []
    for qi in range(2):
        for qj in range(2):
            gslab = pat[:, qi::2, qj::2, :]           # (B, 12, 12, 25)
            groups.append(gslab.reshape(b * 144, KSIZE * KSIZE))
    return jnp.stack(groups, axis=0)                  # (4, B*144, 25)


def _conv2_patch_groups(spk1_nhwc):
    """spk1: (B, 12, 12, 12) bf16 -> (16, 4, B, 300), pooled-position-major.
    dim0: pooled position p = ph*4 + pw; dim1: pre-pool position q = qi*2 + qj."""
    b = spk1_nhwc.shape[0]
    oh = 12 - KSIZE + 1                               # 8
    cols = []
    for di in range(KSIZE):
        for dj in range(KSIZE):
            cols.append(spk1_nhwc[:, di:di + oh, dj:dj + oh, :])
    pat = jnp.concatenate(cols, axis=-1)              # (B, 8, 8, 300)
    pat = pat.reshape(b, 4, 2, 4, 2, KSIZE * KSIZE * 12)   # (B, ph, qi, pw, qj, K)
    pat = jnp.transpose(pat, (1, 3, 2, 4, 0, 5))      # (ph, pw, qi, qj, B, K)
    return pat.reshape(16, 4, b, KSIZE * KSIZE * 12)  # (16, 4, B, 300)


# ----------------------------------------------------------------------------
# One-time weight packing (call OUTSIDE jit): OIHW -> matmul matrices, bf16,
# padded Cout; fc weight reorganized per pooled position (no per-call transpose).
# ----------------------------------------------------------------------------
def pack_params(params):
    w1, b1, w2, b2, wfc, bfc = params

    # conv1: OIHW (12,1,5,5) -> (25, 16); rows ordered (di, dj, cin)
    w1m = jnp.transpose(w1, (2, 3, 1, 0)).reshape(KSIZE * KSIZE, 12)
    w1m = jnp.pad(w1m, ((0, 0), (0, C1P - 12))).astype(jnp.bfloat16)
    b1m = jnp.pad(b1.reshape(1, 12), ((0, 0), (0, C1P - 12))).astype(jnp.float32)

    # conv2: OIHW (64,12,5,5) -> (300, 128); rows ordered (di, dj, cin)
    w2m = jnp.transpose(w2, (2, 3, 1, 0)).reshape(KSIZE * KSIZE * 12, 64)
    w2m = jnp.pad(w2m, ((0, 0), (0, C2P - 64))).astype(jnp.bfloat16)
    b2m = jnp.pad(b2.reshape(1, 64), ((0, 0), (0, C2P - 64))).astype(jnp.float32)

    # fc1: torch flattens spk2 NCHW -> index c*16 + ph*4 + pw.  Regroup the
    # (10, 1024) weight per pooled position p = ph*4+pw -> (16, c, o), pad to
    # (16, 128, 128) so each pooled spike tile does one (gb,128)@(128,128) dot.
    wfc_r = wfc.reshape(10, 64, 4, 4)                 # (o, c, ph, pw)
    wfc_r = jnp.transpose(wfc_r, (2, 3, 1, 0)).reshape(16, 64, 10)   # (p, c, o)
    wfcm = jnp.pad(wfc_r, ((0, 0), (0, C2P - 64), (0, FCP - 10))).astype(jnp.bfloat16)
    bfcm = jnp.pad(bfc.reshape(1, 10), ((0, 0), (0, FCP - 10))).astype(jnp.float32)

    return (w1m, b1m, w2m, b2m, wfcm, bfcm)


# ----------------------------------------------------------------------------
# Full Net.forward
# ----------------------------------------------------------------------------
def net_forward(x_nchw, packed):
    w1m, b1m, w2m, b2m, wfcm, bfcm = packed
    bsz = x_nchw.shape[0]
    x = jnp.transpose(x_nchw, (0, 2, 3, 1)).astype(jnp.bfloat16)    # NHWC bf16

    # conv1(1->12, 5x5) + maxpool(2) + lif1   (kernel 1)
    p1 = _conv1_patch_groups(x)                       # (4, B*144, 25) bf16
    spk1 = conv1_pool_lif(p1, w1m, b1m)               # (B*144, 16) bf16, {0,1}
    spk1 = spk1.reshape(bsz, 12, 12, C1P)[..., :12]   # NHWC, pad channels are 0

    # conv2(12->64, 5x5) + maxpool(2) + lif2 + fc1(1024->10) + lif3  (kernel 2)
    p2 = _conv2_patch_groups(spk1)                    # (16, 4, B, 300) bf16
    spk3, mem3 = conv2_fc_lif(p2, w2m, b2m, wfcm, bfcm)   # (B, 128) f32 each
    return spk3[:, :10], mem3[:, :10]


if __name__ == "__main__":
    key = jax.random.PRNGKey(0)
    k1, k2, k3, k4, k5, k6, kx = jax.random.split(key, 7)

    # Deterministic synthetic parameters, PyTorch-convention shapes.
    w1 = jax.random.normal(k1, (12, 1, 5, 5), jnp.float32) * 0.2    # conv1 OIHW
    b1 = jax.random.normal(k2, (12,), jnp.float32) * 0.1
    w2 = jax.random.normal(k3, (64, 12, 5, 5), jnp.float32) * 0.06  # conv2 OIHW
    b2 = jax.random.normal(k4, (64,), jnp.float32) * 0.1
    wfc = jax.random.normal(k5, (10, 64 * 4 * 4), jnp.float32) * 0.03
    bfc = jax.random.normal(k6, (10,), jnp.float32) * 0.1

    # Weight packing happens once, outside the jitted forward.
    packed = jax.tree_util.tree_map(
        jax.block_until_ready, pack_params((w1, b1, w2, b2, wfc, bfc)))

    # Small batch; spatial must be 28x28 so that 64*4*4 feeds fc1 (as in MNIST).
    x = jax.random.normal(kx, (2, 1, 28, 28), jnp.float32)

    spk3, mem3 = jax.jit(net_forward)(x, packed)
    jax.block_until_ready((spk3, mem3))

    assert spk3.shape == (2, 10) and mem3.shape == (2, 10)
    assert spk3.dtype == jnp.float32 and mem3.dtype == jnp.float32
    assert bool(jnp.all(jnp.isfinite(mem3)))
    # spikes are exactly {0, 1}
    assert bool(jnp.all((spk3 == 0.0) | (spk3 == 1.0)))
    print("KERNEL_OK")
</pallas_src>

<mosaic_0001>
module attributes {stable_mosaic.version = 11 : i64} {
  func.func @_conv1_pool_lif_kernel(%arg0: i32, %arg1: memref<4x144x25xbf16, #tpu.memory_space<vmem>>, %arg2: memref<25x16xbf16, #tpu.memory_space<vmem>>, %arg3: memref<1x16xf32, #tpu.memory_space<vmem>>, %arg4: memref<144x16xbf16, #tpu.memory_space<vmem>>) attributes {dimension_semantics = [#tpu.dimension_semantics<parallel>], iteration_bounds = array<i64: 2>, scalar_prefetch = 0 : i64, scratch_operands = 0 : i64, tpu.core_type = #tpu.core_type<tc>, window_params = [{transform_indices = @transform_0, window_bounds = array<i64: 4, 144, 25>}, {pipeline_mode = #tpu.pipeline_mode<synchronous>, transform_indices = @transform_1, window_bounds = array<i64: 25, 16>}, {pipeline_mode = #tpu.pipeline_mode<synchronous>, transform_indices = @transform_2, window_bounds = array<i64: 1, 16>}, {transform_indices = @transform_3, window_bounds = array<i64: 144, 16>}]} {
    %c0 = arith.constant 0 : index
    %c0_0 = arith.constant 0 : index
    %0 = vector.load %arg2[%c0, %c0_0] : memref<25x16xbf16, #tpu.memory_space<vmem>>, vector<25x16xbf16>
    %c0_1 = arith.constant 0 : index
    %c0_2 = arith.constant 0 : index
    %c0_3 = arith.constant 0 : index
    %1 = vector.load %arg1[%c0_1, %c0_2, %c0_3] : memref<4x144x25xbf16, #tpu.memory_space<vmem>>, vector<1x144x25xbf16>
    %2 = vector.shape_cast %1 : vector<1x144x25xbf16> to vector<144x25xbf16>
    %cst = arith.constant dense<0.000000e+00> : vector<144x16xf32>
    %3 = tpu.matmul %2, %0, %cst {dimension_numbers = #tpu.dot_dimension_numbers<[1], [0], [0], [1], [0, 0, 1, 1], [], []>} : vector<144x25xbf16>, vector<25x16xbf16>, vector<144x16xf32> -> vector<144x16xf32>
    %c1 = arith.constant 1 : index
    %c0_4 = arith.constant 0 : index
    %c0_5 = arith.constant 0 : index
    %4 = vector.load %arg1[%c1, %c0_4, %c0_5] : memref<4x144x25xbf16, #tpu.memory_space<vmem>>, vector<1x144x25xbf16>
    %5 = vector.shape_cast %4 : vector<1x144x25xbf16> to vector<144x25xbf16>
    %cst_6 = arith.constant dense<0.000000e+00> : vector<144x16xf32>
    %6 = tpu.matmul %5, %0, %cst_6 {dimension_numbers = #tpu.dot_dimension_numbers<[1], [0], [0], [1], [0, 0, 1, 1], [], []>} : vector<144x25xbf16>, vector<25x16xbf16>, vector<144x16xf32> -> vector<144x16xf32>
    %7 = arith.maximumf %3, %6 : vector<144x16xf32>
    %c2 = arith.constant 2 : index
    %c0_7 = arith.constant 0 : index
    %c0_8 = arith.constant 0 : index
    %8 = vector.load %arg1[%c2, %c0_7, %c0_8] : memref<4x144x25xbf16, #tpu.memory_space<vmem>>, vector<1x144x25xbf16>
    %9 = vector.shape_cast %8 : vector<1x144x25xbf16> to vector<144x25xbf16>
    %cst_9 = arith.constant dense<0.000000e+00> : vector<144x16xf32>
    %10 = tpu.matmul %9, %0, %cst_9 {dimension_numbers = #tpu.dot_dimension_numbers<[1], [0], [0], [1], [0, 0, 1, 1], [], []>} : vector<144x25xbf16>, vector<25x16xbf16>, vector<144x16xf32> -> vector<144x16xf32>
    %11 = arith.maximumf %7, %10 : vector<144x16xf32>
    %c3 = arith.constant 3 : index
    %c0_10 = arith.constant 0 : index
    %c0_11 = arith.constant 0 : index
    %12 = vector.load %arg1[%c3, %c0_10, %c0_11] : memref<4x144x25xbf16, #tpu.memory_space<vmem>>, vector<1x144x25xbf16>
    %13 = vector.shape_cast %12 : vector<1x144x25xbf16> to vector<144x25xbf16>
    %cst_12 = arith.constant dense<0.000000e+00> : vector<144x16xf32>
    %14 = tpu.matmul %13, %0, %cst_12 {dimension_numbers = #tpu.dot_dimension_numbers<[1], [0], [0], [1], [0, 0, 1, 1], [], []>} : vector<144x25xbf16>, vector<25x16xbf16>, vector<144x16xf32> -> vector<144x16xf32>
    %15 = arith.maximumf %11, %14 : vector<144x16xf32>
    %c0_13 = arith.constant 0 : index
    %c0_14 = arith.constant 0 : index
    %16 = vector.load %arg3[%c0_13, %c0_14] : memref<1x16xf32, #tpu.memory_space<vmem>>, vector<1x16xf32>
    %17 = vector.broadcast %16 : vector<1x16xf32> to vector<144x16xf32>
    %18 = arith.addf %15, %17 : vector<144x16xf32>
    %cst_15 = arith.constant 1.000000e+00 : f32
    %19 = vector.broadcast %cst_15 : f32 to vector<144x16xf32>
    %20 = arith.cmpf ogt, %18, %19 : vector<144x16xf32>
    %21 = arith.extui %20 : vector<144x16xi1> to vector<144x16xi32>
    %22 = arith.sitofp %21 : vector<144x16xi32> to vector<144x16xf32>
    %23 = arith.truncf %22 : vector<144x16xf32> to vector<144x16xbf16>
    %c0_16 = arith.constant 0 : index
    %c0_17 = arith.constant 0 : index
    %24 = vector.load %arg4[%c0_16, %c0_17] : memref<144x16xbf16, #tpu.memory_space<vmem>>, vector<144x16xbf16>
    tpu.vector_store %arg4[%c0_16, %c0_17], %23 {strides = array<i32>} : memref<144x16xbf16, #tpu.memory_space<vmem>>, vector<144x16xbf16>,
    return
  }
  func.func @transform_0(%arg0: i32) -> (i32, i32, i32) {
    %c0_i32 = arith.constant 0 : i32
    %c0_i32_0 = arith.constant 0 : i32
    %c0_i32_1 = arith.constant 0 : i32
    return %c0_i32, %arg0, %c0_i32_0 : i32, i32, i32
  }
  func.func @transform_1(%arg0: i32) -> (i32, i32) {
    %c0_i32 = arith.constant 0 : i32
    %c0_i32_0 = arith.constant 0 : i32
    %c0_i32_1 = arith.constant 0 : i32
    return %c0_i32, %c0_i32_0 : i32, i32
  }
  func.func @transform_2(%arg0: i32) -> (i32, i32) {
    %c0_i32 = arith.constant 0 : i32
    %c0_i32_0 = arith.constant 0 : i32
    %c0_i32_1 = arith.constant 0 : i32
    return %c0_i32, %c0_i32_0 : i32, i32
  }
  func.func @transform_3(%arg0: i32) -> (i32, i32) {
    %c0_i32 = arith.constant 0 : i32
    %c0_i32_0 = arith.constant 0 : i32
    return %arg0, %c0_i32 : i32, i32
  }
}

module attributes {stable_mosaic.version = 11 : i64} {
  func.func @_conv2_fc_lif_kernel(%arg0: i32, %arg1: memref<16x4x2x300xbf16, #tpu.memory_space<vmem>>, %arg2: memref<300x128xbf16, #tpu.memory_space<vmem>>, %arg3: memref<1x128xf32, #tpu.memory_space<vmem>>, %arg4: memref<16x128x128xbf16, #tpu.memory_space<vmem>>, %arg5: memref<1x128xf32, #tpu.memory_space<vmem>>, %arg6: memref<2x128xf32, #tpu.memory_space<vmem>>, %arg7: memref<2x128xf32, #tpu.memory_space<vmem>>) attributes {dimension_semantics = [#tpu.dimension_semantics<parallel>], iteration_bounds = array<i64: 1>, scalar_prefetch = 0 : i64, scratch_operands = 0 : i64, tpu.core_type = #tpu.core_type<tc>, window_params = [{transform_indices = @transform_0, window_bounds = array<i64: 16, 4, 2, 300>}, {pipeline_mode = #tpu.pipeline_mode<synchronous>, transform_indices = @transform_1, window_bounds = array<i64: 300, 128>}, {pipeline_mode = #tpu.pipeline_mode<synchronous>, transform_indices = @transform_2, window_bounds = array<i64: 1, 128>}, {pipeline_mode = #tpu.pipeline_mode<synchronous>, transform_indices = @transform_3, window_bounds = array<i64: 16, 128, 128>}, {pipeline_mode = #tpu.pipeline_mode<synchronous>, transform_indices = @transform_4, window_bounds = array<i64: 1, 128>}, {transform_indices = @transform_5, window_bounds = array<i64: 2, 128>}, {transform_indices = @transform_6, window_bounds = array<i64: 2, 128>}]} {
    %c0 = arith.constant 0 : index
    %c0_0 = arith.constant 0 : index
    %0 = vector.load %arg2[%c0, %c0_0] : memref<300x128xbf16, #tpu.memory_space<vmem>>, vector<300x128xbf16>
    %cst = arith.constant 0.000000e+00 : f32
    %1 = vector.broadcast %cst : f32 to vector<2x128xf32>
    %c0_1 = arith.constant 0 : index
    %c0_2 = arith.constant 0 : index
    %c0_3 = arith.constant 0 : index
    %c0_4 = arith.constant 0 : index
    %2 = vector.load %arg1[%c0_1, %c0_2, %c0_3, %c0_4] : memref<16x4x2x300xbf16, #tpu.memory_space<vmem>>, vector<1x1x2x300xbf16>
    %3 = vector.shape_cast %2 : vector<1x1x2x300xbf16> to vector<2x300xbf16>
    %cst_5 = arith.constant dense<0.000000e+00> : vector<2x128xf32>
    %4 = tpu.matmul %3, %0, %cst_5 {dimension_numbers = #tpu.dot_dimension_numbers<[1], [0], [0], [1], [0, 0, 1, 1], [], []>} : vector<2x300xbf16>, vector<300x128xbf16>, vector<2x128xf32> -> vector<2x128xf32>
    %c0_6 = arith.constant 0 : index
    %c1 = arith.constant 1 : index
    %c0_7 = arith.constant 0 : index
    %c0_8 = arith.constant 0 : index
    %5 = vector.load %arg1[%c0_6, %c1, %c0_7, %c0_8] : memref<16x4x2x300xbf16, #tpu.memory_space<vmem>>, vector<1x1x2x300xbf16>
    %6 = vector.shape_cast %5 : vector<1x1x2x300xbf16> to vector<2x300xbf16>
    %cst_9 = arith.constant dense<0.000000e+00> : vector<2x128xf32>
    %7 = tpu.matmul %6, %0, %cst_9 {dimension_numbers = #tpu.dot_dimension_numbers<[1], [0], [0], [1], [0, 0, 1, 1], [], []>} : vector<2x300xbf16>, vector<300x128xbf16>, vector<2x128xf32> -> vector<2x128xf32>
    %8 = arith.maximumf %4, %7 : vector<2x128xf32>
    %c0_10 = arith.constant 0 : index
    %c2 = arith.constant 2 : index
    %c0_11 = arith.constant 0 : index
    %c0_12 = arith.constant 0 : index
    %9 = vector.load %arg1[%c0_10, %c2, %c0_11, %c0_12] : memref<16x4x2x300xbf16, #tpu.memory_space<vmem>>, vector<1x1x2x300xbf16>
    %10 = vector.shape_cast %9 : vector<1x1x2x300xbf16> to vector<2x300xbf16>
    %cst_13 = arith.constant dense<0.000000e+00> : vector<2x128xf32>
    %11 = tpu.matmul %10, %0, %cst_13 {dimension_numbers = #tpu.dot_dimension_numbers<[1], [0], [0], [1], [0, 0, 1, 1], [], []>} : vector<2x300xbf16>, vector<300x128xbf16>, vector<2x128xf32> -> vector<2x128xf32>
    %12 = arith.maximumf %8, %11 : vector<2x128xf32>
    %c0_14 = arith.constant 0 : index
    %c3 = arith.constant 3 : index
    %c0_15 = arith.constant 0 : index
    %c0_16 = arith.constant 0 : index
    %13 = vector.load %arg1[%c0_14, %c3, %c0_15, %c0_16] : memref<16x4x2x300xbf16, #tpu.memory_space<vmem>>, vector<1x1x2x300xbf16>
    %14 = vector.shape_cast %13 : vector<1x1x2x300xbf16> to vector<2x300xbf16>
    %cst_17 = arith.constant dense<0.000000e+00> : vector<2x128xf32>
    %15 = tpu.matmul %14, %0, %cst_17 {dimension_numbers = #tpu.dot_dimension_numbers<[1], [0], [0], [1], [0, 0, 1, 1], [], []>} : vector<2x300xbf16>, vector<300x128xbf16>, vector<2x128xf32> -> vector<2x128xf32>
    %16 = arith.maximumf %12, %15 : vector<2x128xf32>
    %c0_18 = arith.constant 0 : index
    %c0_19 = arith.constant 0 : index
    %17 = vector.load %arg3[%c0_18, %c0_19] : memref<1x128xf32, #tpu.memory_space<vmem>>, vector<1x128xf32>
    %18 = vector.broadcast %17 : vector<1x128xf32> to vector<2x128xf32>
    %19 = arith.addf %16, %18 : vector<2x128xf32>
    %cst_20 = arith.constant 1.000000e+00 : f32
    %20 = vector.broadcast %cst_20 : f32 to vector<2x128xf32>
    %21 = arith.cmpf ogt, %19, %20 : vector<2x128xf32>
    %22 = arith.extui %21 : vector<2x128xi1> to vector<2x128xi32>
    %23 = arith.sitofp %22 : vector<2x128xi32> to vector<2x128xf32>
    %24 = arith.truncf %23 : vector<2x128xf32> to vector<2x128xbf16>
    %c0_21 = arith.constant 0 : index
    %c0_22 = arith.constant 0 : index
    %c0_23 = arith.constant 0 : index
    %25 = vector.load %arg4[%c0_21, %c0_22, %c0_23] : memref<16x128x128xbf16, #tpu.memory_space<vmem>>, vector<1x128x128xbf16>
    %26 = vector.shape_cast %25 : vector<1x128x128xbf16> to vector<128x128xbf16>
    %cst_24 = arith.constant dense<0.000000e+00> : vector<2x128xf32>
    %27 = tpu.matmul %24, %26, %cst_24 {dimension_numbers = #tpu.dot_dimension_numbers<[1], [0], [0], [1], [0, 0, 1, 1], [], []>} : vector<2x128xbf16>, vector<128x128xbf16>, vector<2x128xf32> -> vector<2x128xf32>
    %28 = arith.addf %1, %27 : vector<2x128xf32>
    %c1_25 = arith.constant 1 : index
    %c0_26 = arith.constant 0 : index
    %c0_27 = arith.constant 0 : index
    %c0_28 = arith.constant 0 : index
    %29 = vector.load %arg1[%c1_25, %c0_26, %c0_27, %c0_28] : memref<16x4x2x300xbf16, #tpu.memory_space<vmem>>, vector<1x1x2x300xbf16>
    %30 = vector.shape_cast %29 : vector<1x1x2x300xbf16> to vector<2x300xbf16>
    %cst_29 = arith.constant dense<0.000000e+00> : vector<2x128xf32>
    %31 = tpu.matmul %30, %0, %cst_29 {dimension_numbers = #tpu.dot_dimension_numbers<[1], [0], [0], [1], [0, 0, 1, 1], [], []>} : vector<2x300xbf16>, vector<300x128xbf16>, vector<2x128xf32> -> vector<2x128xf32>
    %c1_30 = arith.constant 1 : index
    %c1_31 = arith.constant 1 : index
    %c0_32 = arith.constant 0 : index
    %c0_33 = arith.constant 0 : index
    %32 = vector.load %arg1[%c1_30, %c1_31, %c0_32, %c0_33] : memref<16x4x2x300xbf16, #tpu.memory_space<vmem>>, vector<1x1x2x300xbf16>
    %33 = vector.shape_cast %32 : vector<1x1x2x300xbf16> to vector<2x300xbf16>
    %cst_34 = arith.constant dense<0.000000e+00> : vector<2x128xf32>
    %34 = tpu.matmul %33, %0, %cst_34 {dimension_numbers = #tpu.dot_dimension_numbers<[1], [0], [0], [1], [0, 0, 1, 1], [], []>} : vector<2x300xbf16>, vector<300x128xbf16>, vector<2x128xf32> -> vector<2x128xf32>
    %35 = arith.maximumf %31, %34 : vector<2x128xf32>
    %c1_35 = arith.constant 1 : index
    %c2_36 = arith.constant 2 : index
    %c0_37 = arith.constant 0 : index
    %c0_38 = arith.constant 0 : index
    %36 = vector.load %arg1[%c1_35, %c2_36, %c0_37, %c0_38] : memref<16x4x2x300xbf16, #tpu.memory_space<vmem>>, vector<1x1x2x300xbf16>
    %37 = vector.shape_cast %36 : vector<1x1x2x300xbf16> to vector<2x300xbf16>
    %cst_39 = arith.constant dense<0.000000e+00> : vector<2x128xf32>
    %38 = tpu.matmul %37, %0, %cst_39 {dimension_numbers = #tpu.dot_dimension_numbers<[1], [0], [0], [1], [0, 0, 1, 1], [], []>} : vector<2x300xbf16>, vector<300x128xbf16>, vector<2x128xf32> -> vector<2x128xf32>
    %39 = arith.maximumf %35, %38 : vector<2x128xf32>
    %c1_40 = arith.constant 1 : index
    %c3_41 = arith.constant 3 : index
    %c0_42 = arith.constant 0 : index
    %c0_43 = arith.constant 0 : index
    %40 = vector.load %arg1[%c1_40, %c3_41, %c0_42, %c0_43] : memref<16x4x2x300xbf16, #tpu.memory_space<vmem>>, vector<1x1x2x300xbf16>
    %41 = vector.shape_cast %40 : vector<1x1x2x300xbf16> to vector<2x300xbf16>
    %cst_44 = arith.constant dense<0.000000e+00> : vector<2x128xf32>
    %42 = tpu.matmul %41, %0, %cst_44 {dimension_numbers = #tpu.dot_dimension_numbers<[1], [0], [0], [1], [0, 0, 1, 1], [], []>} : vector<2x300xbf16>, vector<300x128xbf16>, vector<2x128xf32> -> vector<2x128xf32>
    %43 = arith.maximumf %39, %42 : vector<2x128xf32>
    %c0_45 = arith.constant 0 : index
    %c0_46 = arith.constant 0 : index
    %44 = vector.load %arg3[%c0_45, %c0_46] : memref<1x128xf32, #tpu.memory_space<vmem>>, vector<1x128xf32>
    %45 = vector.broadcast %44 : vector<1x128xf32> to vector<2x128xf32>
    %46 = arith.addf %43, %45 : vector<2x128xf32>
    %cst_47 = arith.constant 1.000000e+00 : f32
    %47 = vector.broadcast %cst_47 : f32 to vector<2x128xf32>
    %48 = arith.cmpf ogt, %46, %47 : vector<2x128xf32>
    %49 = arith.extui %48 : vector<2x128xi1> to vector<2x128xi32>
    %50 = arith.sitofp %49 : vector<2x128xi32> to vector<2x128xf32>
    %51 = arith.truncf %50 : vector<2x128xf32> to vector<2x128xbf16>
    %c1_48 = arith.constant 1 : index
    %c0_49 = arith.constant 0 : index
    %c0_50 = arith.constant 0 : index
    %52 = vector.load %arg4[%c1_48, %c0_49, %c0_50] : memref<16x128x128xbf16, #tpu.memory_space<vmem>>, vector<1x128x128xbf16>
    %53 = vector.shape_cast %52 : vector<1x128x128xbf16> to vector<128x128xbf16>
    %cst_51 = arith.constant dense<0.000000e+00> : vector<2x128xf32>
    %54 = tpu.matmul %51, %53, %cst_51 {dimension_numbers = #tpu.dot_dimension_numbers<[1], [0], [0], [1], [0, 0, 1, 1], [], []>} : vector<2x128xbf16>, vector<128x128xbf16>, vector<2x128xf32> -> vector<2x128xf32>
    %55 = arith.addf %28, %54 : vector<2x128xf32>
    %c2_52 = arith.constant 2 : index
    %c0_53 = arith.constant 0 : index
    %c0_54 = arith.constant 0 : index
    %c0_55 = arith.constant 0 : index
    %56 = vector.load %arg1[%c2_52, %c0_53, %c0_54, %c0_55] : memref<16x4x2x300xbf16, #tpu.memory_space<vmem>>, vector<1x1x2x300xbf16>
    %57 = vector.shape_cast %56 : vector<1x1x2x300xbf16> to vector<2x300xbf16>
    %cst_56 = arith.constant dense<0.000000e+00> : vector<2x128xf32>
    %58 = tpu.matmul %57, %0, %cst_56 {dimension_numbers = #tpu.dot_dimension_numbers<[1], [0], [0], [1], [0, 0, 1, 1], [], []>} : vector<2x300xbf16>, vector<300x128xbf16>, vector<2x128xf32> -> vector<2x128xf32>
    %c2_57 = arith.constant 2 : index
    %c1_58 = arith.constant 1 : index
    %c0_59 = arith.constant 0 : index
    %c0_60 = arith.constant 0 : index
    %59 = vector.load %arg1[%c2_57, %c1_58, %c0_59, %c0_60] : memref<16x4x2x300xbf16, #tpu.memory_space<vmem>>, vector<1x1x2x300xbf16>
    %60 = vector.shape_cast %59 : vector<1x1x2x300xbf16> to vector<2x300xbf16>
    %cst_61 = arith.constant dense<0.000000e+00> : vector<2x128xf32>
    %61 = tpu.matmul %60, %0, %cst_61 {dimension_numbers = #tpu.dot_dimension_numbers<[1], [0], [0], [1], [0, 0, 1, 1], [], []>} : vector<2x300xbf16>, vector<300x128xbf16>, vector<2x128xf32> -> vector<2x128xf32>
    %62 = arith.maximumf %58, %61 : vector<2x128xf32>
    %c2_62 = arith.constant 2 : index
    %c2_63 = arith.constant 2 : index
    %c0_64 = arith.constant 0 : index
    %c0_65 = arith.constant 0 : index
    %63 = vector.load %arg1[%c2_62, %c2_63, %c0_64, %c0_65] : memref<16x4x2x300xbf16, #tpu.memory_space<vmem>>, vector<1x1x2x300xbf16>
    %64 = vector.shape_cast %63 : vector<1x1x2x300xbf16> to vector<2x300xbf16>
    %cst_66 = arith.constant dense<0.000000e+00> : vector<2x128xf32>
    %65 = tpu.matmul %64, %0, %cst_66 {dimension_numbers = #tpu.dot_dimension_numbers<[1], [0], [0], [1], [0, 0, 1, 1], [], []>} : vector<2x300xbf16>, vector<300x128xbf16>, vector<2x128xf32> -> vector<2x128xf32>
    %66 = arith.maximumf %62, %65 : vector<2x128xf32>
    %c2_67 = arith.constant 2 : index
    %c3_68 = arith.constant 3 : index
    %c0_69 = arith.constant 0 : index
    %c0_70 = arith.constant 0 : index
    %67 = vector.load %arg1[%c2_67, %c3_68, %c0_69, %c0_70] : memref<16x4x2x300xbf16, #tpu.memory_space<vmem>>, vector<1x1x2x300xbf16>
    %68 = vector.shape_cast %67 : vector<1x1x2x300xbf16> to vector<2x300xbf16>
    %cst_71 = arith.constant dense<0.000000e+00> : vector<2x128xf32>
    %69 = tpu.matmul %68, %0, %cst_71 {dimension_numbers = #tpu.dot_dimension_numbers<[1], [0], [0], [1], [0, 0, 1, 1], [], []>} : vector<2x300xbf16>, vector<300x128xbf16>, vector<2x128xf32> -> vector<2x128xf32>
    %70 = arith.maximumf %66, %69 : vector<2x128xf32>
    %c0_72 = arith.constant 0 : index
    %c0_73 = arith.constant 0 : index
    %71 = vector.load %arg3[%c0_72, %c0_73] : memref<1x128xf32, #tpu.memory_space<vmem>>, vector<1x128xf32>
    %72 = vector.broadcast %71 : vector<1x128xf32> to vector<2x128xf32>
    %73 = arith.addf %70, %72 : vector<2x128xf32>
    %cst_74 = arith.constant 1.000000e+00 : f32
    %74 = vector.broadcast %cst_74 : f32 to vector<2x128xf32>
    %75 = arith.cmpf ogt, %73, %74 : vector<2x128xf32>
    %76 = arith.extui %75 : vector<2x128xi1> to vector<2x128xi32>
    %77 = arith.sitofp %76 : vector<2x128xi32> to vector<2x128xf32>
    %78 = arith.truncf %77 : vector<2x128xf32> to vector<2x128xbf16>
    %c2_75 = arith.constant 2 : index
    %c0_76 = arith.constant 0 : index
    %c0_77 = arith.constant 0 : index
    %79 = vector.load %arg4[%c2_75, %c0_76, %c0_77] : memref<16x128x128xbf16, #tpu.memory_space<vmem>>, vector<1x128x128xbf16>
    %80 = vector.shape_cast %79 : vector<1x128x128xbf16> to vector<128x128xbf16>
    %cst_78 = arith.constant dense<0.000000e+00> : vector<2x128xf32>
    %81 = tpu.matmul %78, %80, %cst_78 {dimension_numbers = #tpu.dot_dimension_numbers<[1], [0], [0], [1], [0, 0, 1, 1], [], []>} : vector<2x128xbf16>, vector<128x128xbf16>, vector<2x128xf32> -> vector<2x128xf32>
    %82 = arith.addf %55, %81 : vector<2x128xf32>
    %c3_79 = arith.constant 3 : index
    %c0_80 = arith.constant 0 : index
    %c0_81 = arith.constant 0 : index
    %c0_82 = arith.constant 0 : index
    %83 = vector.load %arg1[%c3_79, %c0_80, %c0_81, %c0_82] : memref<16x4x2x300xbf16, #tpu.memory_space<vmem>>, vector<1x1x2x300xbf16>
    %84 = vector.shape_cast %83 : vector<1x1x2x300xbf16> to vector<2x300xbf16>
    %cst_83 = arith.constant dense<0.000000e+00> : vector<2x128xf32>
    %85 = tpu.matmul %84, %0, %cst_83 {dimension_numbers = #tpu.dot_dimension_numbers<[1], [0], [0], [1], [0, 0, 1, 1], [], []>} : vector<2x300xbf16>, vector<300x128xbf16>, vector<2x128xf32> -> vector<2x128xf32>
    %c3_84 = arith.constant 3 : index
    %c1_85 = arith.constant 1 : index
    %c0_86 = arith.constant 0 : index
    %c0_87 = arith.constant 0 : index
    %86 = vector.load %arg1[%c3_84, %c1_85, %c0_86, %c0_87] : memref<16x4x2x300xbf16, #tpu.memory_space<vmem>>, vector<1x1x2x300xbf16>
    %87 = vector.shape_cast %86 : vector<1x1x2x300xbf16> to vector<2x300xbf16>
    %cst_88 = arith.constant dense<0.000000e+00> : vector<2x128xf32>
    %88 = tpu.matmul %87, %0, %cst_88 {dimension_numbers = #tpu.dot_dimension_numbers<[1], [0], [0], [1], [0, 0, 1, 1], [], []>} : vector<2x300xbf16>, vector<300x128xbf16>, vector<2x128xf32> -> vector<2x128xf32>
    %89 = arith.maximumf %85, %88 : vector<2x128xf32>
    %c3_89 = arith.constant 3 : index
    %c2_90 = arith.constant 2 : index
    %c0_91 = arith.constant 0 : index
    %c0_92 = arith.constant 0 : index
    %90 = vector.load %arg1[%c3_89, %c2_90, %c0_91, %c0_92] : memref<16x4x2x300xbf16, #tpu.memory_space<vmem>>, vector<1x1x2x300xbf16>
    %91 = vector.shape_cast %90 : vector<1x1x2x300xbf16> to vector<2x300xbf16>
    %cst_93 = arith.constant dense<0.000000e+00> : vector<2x128xf32>
    %92 = tpu.matmul %91, %0, %cst_93 {dimension_numbers = #tpu.dot_dimension_numbers<[1], [0], [0], [1], [0, 0, 1, 1], [], []>} : vector<2x300xbf16>, vector<300x128xbf16>, vector<2x128xf32> -> vector<2x128xf32>
    %93 = arith.maximumf %89, %92 : vector<2x128xf32>
    %c3_94 = arith.constant 3 : index
    %c3_95 = arith.constant 3 : index
    %c0_96 = arith.constant 0 : index
    %c0_97 = arith.constant 0 : index
    %94 = vector.load %arg1[%c3_94, %c3_95, %c0_96, %c0_97] : memref<16x4x2x300xbf16, #tpu.memory_space<vmem>>, vector<1x1x2x300xbf16>
    %95 = vector.shape_cast %94 : vector<1x1x2x300xbf16> to vector<2x300xbf16>
    %cst_98 = arith.constant dense<0.000000e+00> : vector<2x128xf32>
    %96 = tpu.matmul %95, %0, %cst_98 {dimension_numbers = #tpu.dot_dimension_numbers<[1], [0], [0], [1], [0, 0, 1, 1], [], []>} : vector<2x300xbf16>, vector<300x128xbf16>, vector<2x128xf32> -> vector<2x128xf32>
    %97 = arith.maximumf %93, %96 : vector<2x128xf32>
    %c0_99 = arith.constant 0 : index
    %c0_100 = arith.constant 0 : index
    %98 = vector.load %arg3[%c0_99, %c0_100] : memref<1x128xf32, #tpu.memory_space<vmem>>, vector<1x128xf32>
    %99 = vector.broadcast %98 : vector<1x128xf32> to vector<2x128xf32>
    %100 = arith.addf %97, %99 : vector<2x128xf32>
    %cst_101 = arith.constant 1.000000e+00 : f32
    %101 = vector.broadcast %cst_101 : f32 to vector<2x128xf32>
    %102 = arith.cmpf ogt, %100, %101 : vector<2x128xf32>
    %103 = arith.extui %102 : vector<2x128xi1> to vector<2x128xi32>
    %104 = arith.sitofp %103 : vector<2x128xi32> to vector<2x128xf32>
    %105 = arith.truncf %104 : vector<2x128xf32> to vector<2x128xbf16>
    %c3_102 = arith.constant 3 : index
    %c0_103 = arith.constant 0 : index
    %c0_104 = arith.constant 0 : index
    %106 = vector.load %arg4[%c3_102, %c0_103, %c0_104] : memref<16x128x128xbf16, #tpu.memory_space<vmem>>, vector<1x128x128xbf16>
    %107 = vector.shape_cast %106 : vector<1x128x128xbf16> to vector<128x128xbf16>
    %cst_105 = arith.constant dense<0.000000e+00> : vector<2x128xf32>
    %108 = tpu.matmul %105, %107, %cst_105 {dimension_numbers = #tpu.dot_dimension_numbers<[1], [0], [0], [1], [0, 0, 1, 1], [], []>} : vector<2x128xbf16>, vector<128x128xbf16>, vector<2x128xf32> -> vector<2x128xf32>
    %109 = arith.addf %82, %108 : vector<2x128xf32>
    %c4 = arith.constant 4 : index
    %c0_106 = arith.constant 0 : index
    %c0_107 = arith.constant 0 : index
    %c0_108 = arith.constant 0 : index
    %110 = vector.load %arg1[%c4, %c0_106, %c0_107, %c0_108] : memref<16x4x2x300xbf16, #tpu.memory_space<vmem>>, vector<1x1x2x300xbf16>
    %111 = vector.shape_cast %110 : vector<1x1x2x300xbf16> to vector<2x300xbf16>
    %cst_109 = arith.constant dense<0.000000e+00> : vector<2x128xf32>
    %112 = tpu.matmul %111, %0, %cst_109 {dimension_numbers = #tpu.dot_dimension_numbers<[1], [0], [0], [1], [0, 0, 1, 1], [], []>} : vector<2x300xbf16>, vector<300x128xbf16>, vector<2x128xf32> -> vector<2x128xf32>
    %c4_110 = arith.constant 4 : index
    %c1_111 = arith.constant 1 : index
    %c0_112 = arith.constant 0 : index
    %c0_113 = arith.constant 0 : index
    %113 = vector.load %arg1[%c4_110, %c1_111, %c0_112, %c0_113] : memref<16x4x2x300xbf16, #tpu.memory_space<vmem>>, vector<1x1x2x300xbf16>
    %114 = vector.shape_cast %113 : vector<1x1x2x300xbf16> to vector<2x300xbf16>
    %cst_114 = arith.constant dense<0.000000e+00> : vector<2x128xf32>
    %115 = tpu.matmul %114, %0, %cst_114 {dimension_numbers = #tpu.dot_dimension_numbers<[1], [0], [0], [1], [0, 0, 1, 1], [], []>} : vector<2x300xbf16>, vector<300x128xbf16>, vector<2x128xf32> -> vector<2x128xf32>
    %116 = arith.maximumf %112, %115 : vector<2x128xf32>
    %c4_115 = arith.constant 4 : index
    %c2_116 = arith.constant 2 : index
    %c0_117 = arith.constant 0 : index
    %c0_118 = arith.constant 0 : index
    %117 = vector.load %arg1[%c4_115, %c2_116, %c0_117, %c0_118] : memref<16x4x2x300xbf16, #tpu.memory_space<vmem>>, vector<1x1x2x300xbf16>
    %118 = vector.shape_cast %117 : vector<1x1x2x300xbf16> to vector<2x300xbf16>
    %cst_119 = arith.constant dense<0.000000e+00> : vector<2x128xf32>
    %119 = tpu.matmul %118, %0, %cst_119 {dimension_numbers = #tpu.dot_dimension_numbers<[1], [0], [0], [1], [0, 0, 1, 1], [], []>} : vector<2x300xbf16>, vector<300x128xbf16>, vector<2x128xf32> -> vector<2x128xf32>
    %120 = arith.maximumf %116, %119 : vector<2x128xf32>
    %c4_120 = arith.constant 4 : index
    %c3_121 = arith.constant 3 : index
    %c0_122 = arith.constant 0 : index
    %c0_123 = arith.constant 0 : index
    %121 = vector.load %arg1[%c4_120, %c3_121, %c0_122, %c0_123] : memref<16x4x2x300xbf16, #tpu.memory_space<vmem>>, vector<1x1x2x300xbf16>
    %122 = vector.shape_cast %121 : vector<1x1x2x300xbf16> to vector<2x300xbf16>
    %cst_124 = arith.constant dense<0.000000e+00> : vector<2x128xf32>
    %123 = tpu.matmul %122, %0, %cst_124 {dimension_numbers = #tpu.dot_dimension_numbers<[1], [0], [0], [1], [0, 0, 1, 1], [], []>} : vector<2x300xbf16>, vector<300x128xbf16>, vector<2x128xf32> -> vector<2x128xf32>
    %124 = arith.maximumf %120, %123 : vector<2x128xf32>
    %c0_125 = arith.constant 0 : index
    %c0_126 = arith.constant 0 : index
    %125 = vector.load %arg3[%c0_125, %c0_126] : memref<1x128xf32, #tpu.memory_space<vmem>>, vector<1x128xf32>
    %126 = vector.broadcast %125 : vector<1x128xf32> to vector<2x128xf32>
    %127 = arith.addf %124, %126 : vector<2x128xf32>
    %cst_127 = arith.constant 1.000000e+00 : f32
    %128 = vector.broadcast %cst_127 : f32 to vector<2x128xf32>
    %129 = arith.cmpf ogt, %127, %128 : vector<2x128xf32>
    %130 = arith.extui %129 : vector<2x128xi1> to vector<2x128xi32>
    %131 = arith.sitofp %130 : vector<2x128xi32> to vector<2x128xf32>
    %132 = arith.truncf %131 : vector<2x128xf32> to vector<2x128xbf16>
    %c4_128 = arith.constant 4 : index
    %c0_129 = arith.constant 0 : index
    %c0_130 = arith.constant 0 : index
    %133 = vector.load %arg4[%c4_128, %c0_129, %c0_130] : memref<16x128x128xbf16, #tpu.memory_space<vmem>>, vector<1x128x128xbf16>
    %134 = vector.shape_cast %133 : vector<1x128x128xbf16> to vector<128x128xbf16>
    %cst_131 = arith.constant dense<0.000000e+00> : vector<2x128xf32>
    %135 = tpu.matmul %132, %134, %cst_131 {dimension_numbers = #tpu.dot_dimension_numbers<[1], [0], [0], [1], [0, 0, 1, 1], [], []>} : vector<2x128xbf16>, vector<128x128xbf16>, vector<2x128xf32> -> vector<2x128xf32>
    %136 = arith.addf %109, %135 : vector<2x128xf32>
    %c5 = arith.constant 5 : index
    %c0_132 = arith.constant 0 : index
    %c0_133 = arith.constant 0 : index
    %c0_134 = arith.constant 0 : index
    %137 = vector.load %arg1[%c5, %c0_132, %c0_133, %c0_134] : memref<16x4x2x300xbf16, #tpu.memory_space<vmem>>, vector<1x1x2x300xbf16>
    %138 = vector.shape_cast %137 : vector<1x1x2x300xbf16> to vector<2x300xbf16>
    %cst_135 = arith.constant dense<0.000000e+00> : vector<2x128xf32>
    %139 = tpu.matmul %138, %0, %cst_135 {dimension_numbers = #tpu.dot_dimension_numbers<[1], [0], [0], [1], [0, 0, 1, 1], [], []>} : vector<2x300xbf16>, vector<300x128xbf16>, vector<2x128xf32> -> vector<2x128xf32>
    %c5_136 = arith.constant 5 : index
    %c1_137 = arith.constant 1 : index
    %c0_138 = arith.constant 0 : index
    %c0_139 = arith.constant 0 : index
    %140 = vector.load %arg1[%c5_136, %c1_137, %c0_138, %c0_139] : memref<16x4x2x300xbf16, #tpu.memory_space<vmem>>, vector<1x1x2x300xbf16>
    %141 = vector.shape_cast %140 : vector<1x1x2x300xbf16> to vector<2x300xbf16>
    %cst_140 = arith.constant dense<0.000000e+00> : vector<2x128xf32>
    %142 = tpu.matmul %141, %0, %cst_140 {dimension_numbers = #tpu.dot_dimension_numbers<[1], [0], [0], [1], [0, 0, 1, 1], [], []>} : vector<2x300xbf16>, vector<300x128xbf16>, vector<2x128xf32> -> vector<2x128xf32>
    %143 = arith.maximumf %139, %142 : vector<2x128xf32>
    %c5_141 = arith.constant 5 : index
    %c2_142 = arith.constant 2 : index
    %c0_143 = arith.constant 0 : index
    %c0_144 = arith.constant 0 : index
    %144 = vector.load %arg1[%c5_141, %c2_142, %c0_143, %c0_144] : memref<16x4x2x300xbf16, #tpu.memory_space<vmem>>, vector<1x1x2x300xbf16>
    %145 = vector.shape_cast %144 : vector<1x1x2x300xbf16> to vector<2x300xbf16>
    %cst_145 = arith.constant dense<0.000000e+00> : vector<2x128xf32>
    %146 = tpu.matmul %145, %0, %cst_145 {dimension_numbers = #tpu.dot_dimension_numbers<[1], [0], [0], [1], [0, 0, 1, 1], [], []>} : vector<2x300xbf16>, vector<300x128xbf16>, vector<2x128xf32> -> vector<2x128xf32>
    %147 = arith.maximumf %143, %146 : vector<2x128xf32>
    %c5_146 = arith.constant 5 : index
    %c3_147 = arith.constant 3 : index
    %c0_148 = arith.constant 0 : index
    %c0_149 = arith.constant 0 : index
    %148 = vector.load %arg1[%c5_146, %c3_147, %c0_148, %c0_149] : memref<16x4x2x300xbf16, #tpu.memory_space<vmem>>, vector<1x1x2x300xbf16>
    %149 = vector.shape_cast %148 : vector<1x1x2x300xbf16> to vector<2x300xbf16>
    %cst_150 = arith.constant dense<0.000000e+00> : vector<2x128xf32>
    %150 = tpu.matmul %149, %0, %cst_150 {dimension_numbers = #tpu.dot_dimension_numbers<[1], [0], [0], [1], [0, 0, 1, 1], [], []>} : vector<2x300xbf16>, vector<300x128xbf16>, vector<2x128xf32> -> vector<2x128xf32>
    %151 = arith.maximumf %147, %150 : vector<2x128xf32>
    %c0_151 = arith.constant 0 : index
    %c0_152 = arith.constant 0 : index
    %152 = vector.load %arg3[%c0_151, %c0_152] : memref<1x128xf32, #tpu.memory_space<vmem>>, vector<1x128xf32>
    %153 = vector.broadcast %152 : vector<1x128xf32> to vector<2x128xf32>
    %154 = arith.addf %151, %153 : vector<2x128xf32>
    %cst_153 = arith.constant 1.000000e+00 : f32
    %155 = vector.broadcast %cst_153 : f32 to vector<2x128xf32>
    %156 = arith.cmpf ogt, %154, %155 : vector<2x128xf32>
    %157 = arith.extui %156 : vector<2x128xi1> to vector<2x128xi32>
    %158 = arith.sitofp %157 : vector<2x128xi32> to vector<2x128xf32>
    %159 = arith.truncf %158 : vector<2x128xf32> to vector<2x128xbf16>
    %c5_154 = arith.constant 5 : index
    %c0_155 = arith.constant 0 : index
    %c0_156 = arith.constant 0 : index
    %160 = vector.load %arg4[%c5_154, %c0_155, %c0_156] : memref<16x128x128xbf16, #tpu.memory_space<vmem>>, vector<1x128x128xbf16>
    %161 = vector.shape_cast %160 : vector<1x128x128xbf16> to vector<128x128xbf16>
    %cst_157 = arith.constant dense<0.000000e+00> : vector<2x128xf32>
    %162 = tpu.matmul %159, %161, %cst_157 {dimension_numbers = #tpu.dot_dimension_numbers<[1], [0], [0], [1], [0, 0, 1, 1], [], []>} : vector<2x128xbf16>, vector<128x128xbf16>, vector<2x128xf32> -> vector<2x128xf32>
    %163 = arith.addf %136, %162 : vector<2x128xf32>
    %c6 = arith.constant 6 : index
    %c0_158 = arith.constant 0 : index
    %c0_159 = arith.constant 0 : index
    %c0_160 = arith.constant 0 : index
    %164 = vector.load %arg1[%c6, %c0_158, %c0_159, %c0_160] : memref<16x4x2x300xbf16, #tpu.memory_space<vmem>>, vector<1x1x2x300xbf16>
    %165 = vector.shape_cast %164 : vector<1x1x2x300xbf16> to vector<2x300xbf16>
    %cst_161 = arith.constant dense<0.000000e+00> : vector<2x128xf32>
    %166 = tpu.matmul %165, %0, %cst_161 {dimension_numbers = #tpu.dot_dimension_numbers<[1], [0], [0], [1], [0, 0, 1, 1], [], []>} : vector<2x300xbf16>, vector<300x128xbf16>, vector<2x128xf32> -> vector<2x128xf32>
    %c6_162 = arith.constant 6 : index
    %c1_163 = arith.constant 1 : index
    %c0_164 = arith.constant 0 : index
    %c0_165 = arith.constant 0 : index
    %167 = vector.load %arg1[%c6_162, %c1_163, %c0_164, %c0_165] : memref<16x4x2x300xbf16, #tpu.memory_space<vmem>>, vector<1x1x2x300xbf16>
    %168 = vector.shape_cast %167 : vector<1x1x2x300xbf16> to vector<2x300xbf16>
    %cst_166 = arith.constant dense<0.000000e+00> : vector<2x128xf32>
    %169 = tpu.matmul %168, %0, %cst_166 {dimension_numbers = #tpu.dot_dimension_numbers<[1], [0], [0], [1], [0, 0, 1, 1], [], []>} : vector<2x300xbf16>, vector<300x128xbf16>, vector<2x128xf32> -> vector<2x128xf32>
    %170 = arith.maximumf %166, %169 : vector<2x128xf32>
    %c6_167 = arith.constant 6 : index
    %c2_168 = arith.constant 2 : index
    %c0_169 = arith.constant 0 : index
    %c0_170 = arith.constant 0 : index
    %171 = vector.load %arg1[%c6_167, %c2_168, %c0_169, %c0_170] : memref<16x4x2x300xbf16, #tpu.memory_space<vmem>>, vector<1x1x2x300xbf16>
    %172 = vector.shape_cast %171 : vector<1x1x2x300xbf16> to vector<2x300xbf16>
    %cst_171 = arith.constant dense<0.000000e+00> : vector<2x128xf32>
    %173 = tpu.matmul %172, %0, %cst_171 {dimension_numbers = #tpu.dot_dimension_numbers<[1], [0], [0], [1], [0, 0, 1, 1], [], []>} : vector<2x300xbf16>, vector<300x128xbf16>, vector<2x128xf32> -> vector<2x128xf32>
    %174 = arith.maximumf %170, %173 : vector<2x128xf32>
    %c6_172 = arith.constant 6 : index
    %c3_173 = arith.constant 3 : index
    %c0_174 = arith.constant 0 : index
    %c0_175 = arith.constant 0 : index
    %175 = vector.load %arg1[%c6_172, %c3_173, %c0_174, %c0_175] : memref<16x4x2x300xbf16, #tpu.memory_space<vmem>>, vector<1x1x2x300xbf16>
    %176 = vector.shape_cast %175 : vector<1x1x2x300xbf16> to vector<2x300xbf16>
    %cst_176 = arith.constant dense<0.000000e+00> : vector<2x128xf32>
    %177 = tpu.matmul %176, %0, %cst_176 {dimension_numbers = #tpu.dot_dimension_numbers<[1], [0], [0], [1], [0, 0, 1, 1], [], []>} : vector<2x300xbf16>, vector<300x128xbf16>, vector<2x128xf32> -> vector<2x128xf32>
    %178 = arith.maximumf %174, %177 : vector<2x128xf32>
    %c0_177 = arith.constant 0 : index
    %c0_178 = arith.constant 0 : index
    %179 = vector.load %arg3[%c0_177, %c0_178] : memref<1x128xf32, #tpu.memory_space<vmem>>, vector<1x128xf32>
    %180 = vector.broadcast %179 : vector<1x128xf32> to vector<2x128xf32>
    %181 = arith.addf %178, %180 : vector<2x128xf32>
    %cst_179 = arith.constant 1.000000e+00 : f32
    %182 = vector.broadcast %cst_179 : f32 to vector<2x128xf32>
    %183 = arith.cmpf ogt, %181, %182 : vector<2x128xf32>
    %184 = arith.extui %183 : vector<2x128xi1> to vector<2x128xi32>
    %185 = arith.sitofp %184 : vector<2x128xi32> to vector<2x128xf32>
    %186 = arith.truncf %185 : vector<2x128xf32> to vector<2x128xbf16>
    %c6_180 = arith.constant 6 : index
    %c0_181 = arith.constant 0 : index
    %c0_182 = arith.constant 0 : index
    %187 = vector.load %arg4[%c6_180, %c0_181, %c0_182] : memref<16x128x128xbf16, #tpu.memory_space<vmem>>, vector<1x128x128xbf16>
    %188 = vector.shape_cast %187 : vector<1x128x128xbf16> to vector<128x128xbf16>
    %cst_183 = arith.constant dense<0.000000e+00> : vector<2x128xf32>
    %189 = tpu.matmul %186, %188, %cst_183 {dimension_numbers = #tpu.dot_dimension_numbers<[1], [0], [0], [1], [0, 0, 1, 1], [], []>} : vector<2x128xbf16>, vector<128x128xbf16>, vector<2x128xf32> -> vector<2x128xf32>
    %190 = arith.addf %163, %189 : vector<2x128xf32>
    %c7 = arith.constant 7 : index
    %c0_184 = arith.constant 0 : index
    %c0_185 = arith.constant 0 : index
    %c0_186 = arith.constant 0 : index
    %191 = vector.load %arg1[%c7, %c0_184, %c0_185, %c0_186] : memref<16x4x2x300xbf16, #tpu.memory_space<vmem>>, vector<1x1x2x300xbf16>
    %192 = vector.shape_cast %191 : vector<1x1x2x300xbf16> to vector<2x300xbf16>
    %cst_187 = arith.constant dense<0.000000e+00> : vector<2x128xf32>
    %193 = tpu.matmul %192, %0, %cst_187 {dimension_numbers = #tpu.dot_dimension_numbers<[1], [0], [0], [1], [0, 0, 1, 1], [], []>} : vector<2x300xbf16>, vector<300x128xbf16>, vector<2x128xf32> -> vector<2x128xf32>
    %c7_188 = arith.constant 7 : index
    %c1_189 = arith.constant 1 : index
    %c0_190 = arith.constant 0 : index
    %c0_191 = arith.constant 0 : index
    %194 = vector.load %arg1[%c7_188, %c1_189, %c0_190, %c0_191] : memref<16x4x2x300xbf16, #tpu.memory_space<vmem>>, vector<1x1x2x300xbf16>
    %195 = vector.shape_cast %194 : vector<1x1x2x300xbf16> to vector<2x300xbf16>
    %cst_192 = arith.constant dense<0.000000e+00> : vector<2x128xf32>
    %196 = tpu.matmul %195, %0, %cst_192 {dimension_numbers = #tpu.dot_dimension_numbers<[1], [0], [0], [1], [0, 0, 1, 1], [], []>} : vector<2x300xbf16>, vector<300x128xbf16>, vector<2x128xf32> -> vector<2x128xf32>
    %197 = arith.maximumf %193, %196 : vector<2x128xf32>
    %c7_193 = arith.constant 7 : index
    %c2_194 = arith.constant 2 : index
    %c0_195 = arith.constant 0 : index
    %c0_196 = arith.constant 0 : index
    %198 = vector.load %arg1[%c7_193, %c2_194, %c0_195, %c0_196] : memref<16x4x2x300xbf16, #tpu.memory_space<vmem>>, vector<1x1x2x300xbf16>
    %199 = vector.shape_cast %198 : vector<1x1x2x300xbf16> to vector<2x300xbf16>
    %cst_197 = arith.constant dense<0.000000e+00> : vector<2x128xf32>
    %200 = tpu.matmul %199, %0, %cst_197 {dimension_numbers = #tpu.dot_dimension_numbers<[1], [0], [0], [1], [0, 0, 1, 1], [], []>} : vector<2x300xbf16>, vector<300x128xbf16>, vector<2x128xf32> -> vector<2x128xf32>
    %201 = arith.maximumf %197, %200 : vector<2x128xf32>
    %c7_198 = arith.constant 7 : index
    %c3_199 = arith.constant 3 : index
    %c0_200 = arith.constant 0 : index
    %c0_201 = arith.constant 0 : index
    %202 = vector.load %arg1[%c7_198, %c3_199, %c0_200, %c0_201] : memref<16x4x2x300xbf16, #tpu.memory_space<vmem>>, vector<1x1x2x300xbf16>
    %203 = vector.shape_cast %202 : vector<1x1x2x300xbf16> to vector<2x300xbf16>
    %cst_202 = arith.constant dense<0.000000e+00> : vector<2x128xf32>
    %204 = tpu.matmul %203, %0, %cst_202 {dimension_numbers = #tpu.dot_dimension_numbers<[1], [0], [0], [1], [0, 0, 1, 1], [], []>} : vector<2x300xbf16>, vector<300x128xbf16>, vector<2x128xf32> -> vector<2x128xf32>
    %205 = arith.maximumf %201, %204 : vector<2x128xf32>
    %c0_203 = arith.constant 0 : index
    %c0_204 = arith.constant 0 : index
    %206 = vector.load %arg3[%c0_203, %c0_204] : memref<1x128xf32, #tpu.memory_space<vmem>>, vector<1x128xf32>
    %207 = vector.broadcast %206 : vector<1x128xf32> to vector<2x128xf32>
    %208 = arith.addf %205, %207 : vector<2x128xf32>
    %cst_205 = arith.constant 1.000000e+00 : f32
    %209 = vector.broadcast %cst_205 : f32 to vector<2x128xf32>
    %210 = arith.cmpf ogt, %208, %209 : vector<2x128xf32>
    %211 = arith.extui %210 : vector<2x128xi1> to vector<2x128xi32>
    %212 = arith.sitofp %211 : vector<2x128xi32> to vector<2x128xf32>
    %213 = arith.truncf %212 : vector<2x128xf32> to vector<2x128xbf16>
    %c7_206 = arith.constant 7 : index
    %c0_207 = arith.constant 0 : index
    %c0_208 = arith.constant 0 : index
    %214 = vector.load %arg4[%c7_206, %c0_207, %c0_208] : memref<16x128x128xbf16, #tpu.memory_space<vmem>>, vector<1x128x128xbf16>
    %215 = vector.shape_cast %214 : vector<1x128x128xbf16> to vector<128x128xbf16>
    %cst_209 = arith.constant dense<0.000000e+00> : vector<2x128xf32>
    %216 = tpu.matmul %213, %215, %cst_209 {dimension_numbers = #tpu.dot_dimension_numbers<[1], [0], [0], [1], [0, 0, 1, 1], [], []>} : vector<2x128xbf16>, vector<128x128xbf16>, vector<2x128xf32> -> vector<2x128xf32>
    %217 = arith.addf %190, %216 : vector<2x128xf32>
    %c8 = arith.constant 8 : index
    %c0_210 = arith.constant 0 : index
    %c0_211 = arith.constant 0 : index
    %c0_212 = arith.constant 0 : index
    %218 = vector.load %arg1[%c8, %c0_210, %c0_211, %c0_212] : memref<16x4x2x300xbf16, #tpu.memory_space<vmem>>, vector<1x1x2x300xbf16>
    %219 = vector.shape_cast %218 : vector<1x1x2x300xbf16> to vector<2x300xbf16>
    %cst_213 = arith.constant dense<0.000000e+00> : vector<2x128xf32>
    %220 = tpu.matmul %219, %0, %cst_213 {dimension_numbers = #tpu.dot_dimension_numbers<[1], [0], [0], [1], [0, 0, 1, 1], [], []>} : vector<2x300xbf16>, vector<300x128xbf16>, vector<2x128xf32> -> vector<2x128xf32>
    %c8_214 = arith.constant 8 : index
    %c1_215 = arith.constant 1 : index
    %c0_216 = arith.constant 0 : index
    %c0_217 = arith.constant 0 : index
    %221 = vector.load %arg1[%c8_214, %c1_215, %c0_216, %c0_217] : memref<16x4x2x300xbf16, #tpu.memory_space<vmem>>, vector<1x1x2x300xbf16>
    %222 = vector.shape_cast %221 : vector<1x1x2x300xbf16> to vector<2x300xbf16>
    %cst_218 = arith.constant dense<0.000000e+00> : vector<2x128xf32>
    %223 = tpu.matmul %222, %0, %cst_218 {dimension_numbers = #tpu.dot_dimension_numbers<[1], [0], [0], [1], [0, 0, 1, 1], [], []>} : vector<2x300xbf16>, vector<300x128xbf16>, vector<2x128xf32> -> vector<2x128xf32>
    %224 = arith.maximumf %220, %223 : vector<2x128xf32>
    %c8_219 = arith.constant 8 : index
    %c2_220 = arith.constant 2 : index
    %c0_221 = arith.constant 0 : index
    %c0_222 = arith.constant 0 : index
    %225 = vector.load %arg1[%c8_219, %c2_220, %c0_221, %c0_222] : memref<16x4x2x300xbf16, #tpu.memory_space<vmem>>, vector<1x1x2x300xbf16>
    %226 = vector.shape_cast %225 : vector<1x1x2x300xbf16> to vector<2x300xbf16>
    %cst_223 = arith.constant dense<0.000000e+00> : vector<2x128xf32>
    %227 = tpu.matmul %226, %0, %cst_223 {dimension_numbers = #tpu.dot_dimension_numbers<[1], [0], [0], [1], [0, 0, 1, 1], [], []>} : vector<2x300xbf16>, vector<300x128xbf16>, vector<2x128xf32> -> vector<2x128xf32>
    %228 = arith.maximumf %224, %227 : vector<2x128xf32>
    %c8_224 = arith.constant 8 : index
    %c3_225 = arith.constant 3 : index
    %c0_226 = arith.constant 0 : index
    %c0_227 = arith.constant 0 : index
    %229 = vector.load %arg1[%c8_224, %c3_225, %c0_226, %c0_227] : memref<16x4x2x300xbf16, #tpu.memory_space<vmem>>, vector<1x1x2x300xbf16>
    %230 = vector.shape_cast %229 : vector<1x1x2x300xbf16> to vector<2x300xbf16>
    %cst_228 = arith.constant dense<0.000000e+00> : vector<2x128xf32>
    %231 = tpu.matmul %230, %0, %cst_228 {dimension_numbers = #tpu.dot_dimension_numbers<[1], [0], [0], [1], [0, 0, 1, 1], [], []>} : vector<2x300xbf16>, vector<300x128xbf16>, vector<2x128xf32> -> vector<2x128xf32>
    %232 = arith.maximumf %228, %231 : vector<2x128xf32>
    %c0_229 = arith.constant 0 : index
    %c0_230 = arith.constant 0 : index
    %233 = vector.load %arg3[%c0_229, %c0_230] : memref<1x128xf32, #tpu.memory_space<vmem>>, vector<1x128xf32>
    %234 = vector.broadcast %233 : vector<1x128xf32> to vector<2x128xf32>
    %235 = arith.addf %232, %234 : vector<2x128xf32>
    %cst_231 = arith.constant 1.000000e+00 : f32
    %236 = vector.broadcast %cst_231 : f32 to vector<2x128xf32>
    %237 = arith.cmpf ogt, %235, %236 : vector<2x128xf32>
    %238 = arith.extui %237 : vector<2x128xi1> to vector<2x128xi32>
    %239 = arith.sitofp %238 : vector<2x128xi32> to vector<2x128xf32>
    %240 = arith.truncf %239 : vector<2x128xf32> to vector<2x128xbf16>
    %c8_232 = arith.constant 8 : index
    %c0_233 = arith.constant 0 : index
    %c0_234 = arith.constant 0 : index
    %241 = vector.load %arg4[%c8_232, %c0_233, %c0_234] : memref<16x128x128xbf16, #tpu.memory_space<vmem>>, vector<1x128x128xbf16>
    %242 = vector.shape_cast %241 : vector<1x128x128xbf16> to vector<128x128xbf16>
    %cst_235 = arith.constant dense<0.000000e+00> : vector<2x128xf32>
    %243 = tpu.matmul %240, %242, %cst_235 {dimension_numbers = #tpu.dot_dimension_numbers<[1], [0], [0], [1], [0, 0, 1, 1], [], []>} : vector<2x128xbf16>, vector<128x128xbf16>, vector<2x128xf32> -> vector<2x128xf32>
    %244 = arith.addf %217, %243 : vector<2x128xf32>
    %c9 = arith.constant 9 : index
    %c0_236 = arith.constant 0 : index
    %c0_237 = arith.constant 0 : index
    %c0_238 = arith.constant 0 : index
    %245 = vector.load %arg1[%c9, %c0_236, %c0_237, %c0_238] : memref<16x4x2x300xbf16, #tpu.memory_space<vmem>>, vector<1x1x2x300xbf16>
    %246 = vector.shape_cast %245 : vector<1x1x2x300xbf16> to vector<2x300xbf16>
    %cst_239 = arith.constant dense<0.000000e+00> : vector<2x128xf32>
    %247 = tpu.matmul %246, %0, %cst_239 {dimension_numbers = #tpu.dot_dimension_numbers<[1], [0], [0], [1], [0, 0, 1, 1], [], []>} : vector<2x300xbf16>, vector<300x128xbf16>, vector<2x128xf32> -> vector<2x128xf32>
    %c9_240 = arith.constant 9 : index
    %c1_241 = arith.constant 1 : index
    %c0_242 = arith.constant 0 : index
    %c0_243 = arith.constant 0 : index
    %248 = vector.load %arg1[%c9_240, %c1_241, %c0_242, %c0_243] : memref<16x4x2x300xbf16, #tpu.memory_space<vmem>>, vector<1x1x2x300xbf16>
    %249 = vector.shape_cast %248 : vector<1x1x2x300xbf16> to vector<2x300xbf16>
    %cst_244 = arith.constant dense<0.000000e+00> : vector<2x128xf32>
    %250 = tpu.matmul %249, %0, %cst_244 {dimension_numbers = #tpu.dot_dimension_numbers<[1], [0], [0], [1], [0, 0, 1, 1], [], []>} : vector<2x300xbf16>, vector<300x128xbf16>, vector<2x128xf32> -> vector<2x128xf32>
    %251 = arith.maximumf %247, %250 : vector<2x128xf32>
    %c9_245 = arith.constant 9 : index
    %c2_246 = arith.constant 2 : index
    %c0_247 = arith.constant 0 : index
    %c0_248 = arith.constant 0 : index
    %252 = vector.load %arg1[%c9_245, %c2_246, %c0_247, %c0_248] : memref<16x4x2x300xbf16, #tpu.memory_space<vmem>>, vector<1x1x2x300xbf16>
    %253 = vector.shape_cast %252 : vector<1x1x2x300xbf16> to vector<2x300xbf16>
    %cst_249 = arith.constant dense<0.000000e+00> : vector<2x128xf32>
    %254 = tpu.matmul %253, %0, %cst_249 {dimension_numbers = #tpu.dot_dimension_numbers<[1], [0], [0], [1], [0, 0, 1, 1], [], []>} : vector<2x300xbf16>, vector<300x128xbf16>, vector<2x128xf32> -> vector<2x128xf32>
    %255 = arith.maximumf %251, %254 : vector<2x128xf32>
    %c9_250 = arith.constant 9 : index
    %c3_251 = arith.constant 3 : index
    %c0_252 = arith.constant 0 : index
    %c0_253 = arith.constant 0 : index
    %256 = vector.load %arg1[%c9_250, %c3_251, %c0_252, %c0_253] : memref<16x4x2x300xbf16, #tpu.memory_space<vmem>>, vector<1x1x2x300xbf16>
    %257 = vector.shape_cast %256 : vector<1x1x2x300xbf16> to vector<2x300xbf16>
    %cst_254 = arith.constant dense<0.000000e+00> : vector<2x128xf32>
    %258 = tpu.matmul %257, %0, %cst_254 {dimension_numbers = #tpu.dot_dimension_numbers<[1], [0], [0], [1], [0, 0, 1, 1], [], []>} : vector<2x300xbf16>, vector<300x128xbf16>, vector<2x128xf32> -> vector<2x128xf32>
    %259 = arith.maximumf %255, %258 : vector<2x128xf32>
    %c0_255 = arith.constant 0 : index
    %c0_256 = arith.constant 0 : index
    %260 = vector.load %arg3[%c0_255, %c0_256] : memref<1x128xf32, #tpu.memory_space<vmem>>, vector<1x128xf32>
    %261 = vector.broadcast %260 : vector<1x128xf32> to vector<2x128xf32>
    %262 = arith.addf %259, %261 : vector<2x128xf32>
    %cst_257 = arith.constant 1.000000e+00 : f32
    %263 = vector.broadcast %cst_257 : f32 to vector<2x128xf32>
    %264 = arith.cmpf ogt, %262, %263 : vector<2x128xf32>
    %265 = arith.extui %264 : vector<2x128xi1> to vector<2x128xi32>
    %266 = arith.sitofp %265 : vector<2x128xi32> to vector<2x128xf32>
    %267 = arith.truncf %266 : vector<2x128xf32> to vector<2x128xbf16>
    %c9_258 = arith.constant 9 : index
    %c0_259 = arith.constant 0 : index
    %c0_260 = arith.constant 0 : index
    %268 = vector.load %arg4[%c9_258, %c0_259, %c0_260] : memref<16x128x128xbf16, #tpu.memory_space<vmem>>, vector<1x128x128xbf16>
    %269 = vector.shape_cast %268 : vector<1x128x128xbf16> to vector<128x128xbf16>
    %cst_261 = arith.constant dense<0.000000e+00> : vector<2x128xf32>
    %270 = tpu.matmul %267, %269, %cst_261 {dimension_numbers = #tpu.dot_dimension_numbers<[1], [0], [0], [1], [0, 0, 1, 1], [], []>} : vector<2x128xbf16>, vector<128x128xbf16>, vector<2x128xf32> -> vector<2x128xf32>
    %271 = arith.addf %244, %270 : vector<2x128xf32>
    %c10 = arith.constant 10 : index
    %c0_262 = arith.constant 0 : index
    %c0_263 = arith.constant 0 : index
    %c0_264 = arith.constant 0 : index
    %272 = vector.load %arg1[%c10, %c0_262, %c0_263, %c0_264] : memref<16x4x2x300xbf16, #tpu.memory_space<vmem>>, vector<1x1x2x300xbf16>
    %273 = vector.shape_cast %272 : vector<1x1x2x300xbf16> to vector<2x300xbf16>
    %cst_265 = arith.constant dense<0.000000e+00> : vector<2x128xf32>
    %274 = tpu.matmul %273, %0, %cst_265 {dimension_numbers = #tpu.dot_dimension_numbers<[1], [0], [0], [1], [0, 0, 1, 1], [], []>} : vector<2x300xbf16>, vector<300x128xbf16>, vector<2x128xf32> -> vector<2x128xf32>
    %c10_266 = arith.constant 10 : index
    %c1_267 = arith.constant 1 : index
    %c0_268 = arith.constant 0 : index
    %c0_269 = arith.constant 0 : index
    %275 = vector.load %arg1[%c10_266, %c1_267, %c0_268, %c0_269] : memref<16x4x2x300xbf16, #tpu.memory_space<vmem>>, vector<1x1x2x300xbf16>
    %276 = vector.shape_cast %275 : vector<1x1x2x300xbf16> to vector<2x300xbf16>
    %cst_270 = arith.constant dense<0.000000e+00> : vector<2x128xf32>
    %277 = tpu.matmul %276, %0, %cst_270 {dimension_numbers = #tpu.dot_dimension_numbers<[1], [0], [0], [1], [0, 0, 1, 1], [], []>} : vector<2x300xbf16>, vector<300x128xbf16>, vector<2x128xf32> -> vector<2x128xf32>
    %278 = arith.maximumf %274, %277 : vector<2x128xf32>
    %c10_271 = arith.constant 10 : index
    %c2_272 = arith.constant 2 : index
    %c0_273 = arith.constant 0 : index
    %c0_274 = arith.constant 0 : index
    %279 = vector.load %arg1[%c10_271, %c2_272, %c0_273, %c0_274] : memref<16x4x2x300xbf16, #tpu.memory_space<vmem>>, vector<1x1x2x300xbf16>
    %280 = vector.shape_cast %279 : vector<1x1x2x300xbf16> to vector<2x300xbf16>
    %cst_275 = arith.constant dense<0.000000e+00> : vector<2x128xf32>
    %281 = tpu.matmul %280, %0, %cst_275 {dimension_numbers = #tpu.dot_dimension_numbers<[1], [0], [0], [1], [0, 0, 1, 1], [], []>} : vector<2x300xbf16>, vector<300x128xbf16>, vector<2x128xf32> -> vector<2x128xf32>
    %282 = arith.maximumf %278, %281 : vector<2x128xf32>
    %c10_276 = arith.constant 10 : index
    %c3_277 = arith.constant 3 : index
    %c0_278 = arith.constant 0 : index
    %c0_279 = arith.constant 0 : index
    %283 = vector.load %arg1[%c10_276, %c3_277, %c0_278, %c0_279] : memref<16x4x2x300xbf16, #tpu.memory_space<vmem>>, vector<1x1x2x300xbf16>
    %284 = vector.shape_cast %283 : vector<1x1x2x300xbf16> to vector<2x300xbf16>
    %cst_280 = arith.constant dense<0.000000e+00> : vector<2x128xf32>
    %285 = tpu.matmul %284, %0, %cst_280 {dimension_numbers = #tpu.dot_dimension_numbers<[1], [0], [0], [1], [0, 0, 1, 1], [], []>} : vector<2x300xbf16>, vector<300x128xbf16>, vector<2x128xf32> -> vector<2x128xf32>
    %286 = arith.maximumf %282, %285 : vector<2x128xf32>
    %c0_281 = arith.constant 0 : index
    %c0_282 = arith.constant 0 : index
    %287 = vector.load %arg3[%c0_281, %c0_282] : memref<1x128xf32, #tpu.memory_space<vmem>>, vector<1x128xf32>
    %288 = vector.broadcast %287 : vector<1x128xf32> to vector<2x128xf32>
    %289 = arith.addf %286, %288 : vector<2x128xf32>
    %cst_283 = arith.constant 1.000000e+00 : f32
    %290 = vector.broadcast %cst_283 : f32 to vector<2x128xf32>
    %291 = arith.cmpf ogt, %289, %290 : vector<2x128xf32>
    %292 = arith.extui %291 : vector<2x128xi1> to vector<2x128xi32>
    %293 = arith.sitofp %292 : vector<2x128xi32> to vector<2x128xf32>
    %294 = arith.truncf %293 : vector<2x128xf32> to vector<2x128xbf16>
    %c10_284 = arith.constant 10 : index
    %c0_285 = arith.constant 0 : index
    %c0_286 = arith.constant 0 : index
    %295 = vector.load %arg4[%c10_284, %c0_285, %c0_286] : memref<16x128x128xbf16, #tpu.memory_space<vmem>>, vector<1x128x128xbf16>
    %296 = vector.shape_cast %295 : vector<1x128x128xbf16> to vector<128x128xbf16>
    %cst_287 = arith.constant dense<0.000000e+00> : vector<2x128xf32>
    %297 = tpu.matmul %294, %296, %cst_287 {dimension_numbers = #tpu.dot_dimension_numbers<[1], [0], [0], [1], [0, 0, 1, 1], [], []>} : vector<2x128xbf16>, vector<128x128xbf16>, vector<2x128xf32> -> vector<2x128xf32>
    %298 = arith.addf %271, %297 : vector<2x128xf32>
    %c11 = arith.constant 11 : index
    %c0_288 = arith.constant 0 : index
    %c0_289 = arith.constant 0 : index
    %c0_290 = arith.constant 0 : index
    %299 = vector.load %arg1[%c11, %c0_288, %c0_289, %c0_290] : memref<16x4x2x300xbf16, #tpu.memory_space<vmem>>, vector<1x1x2x300xbf16>
    %300 = vector.shape_cast %299 : vector<1x1x2x300xbf16> to vector<2x300xbf16>
    %cst_291 = arith.constant dense<0.000000e+00> : vector<2x128xf32>
    %301 = tpu.matmul %300, %0, %cst_291 {dimension_numbers = #tpu.dot_dimension_numbers<[1], [0], [0], [1], [0, 0, 1, 1], [], []>} : vector<2x300xbf16>, vector<300x128xbf16>, vector<2x128xf32> -> vector<2x128xf32>
    %c11_292 = arith.constant 11 : index
    %c1_293 = arith.constant 1 : index
    %c0_294 = arith.constant 0 : index
    %c0_295 = arith.constant 0 : index
    %302 = vector.load %arg1[%c11_292, %c1_293, %c0_294, %c0_295] : memref<16x4x2x300xbf16, #tpu.memory_space<vmem>>, vector<1x1x2x300xbf16>
    %303 = vector.shape_cast %302 : vector<1x1x2x300xbf16> to vector<2x300xbf16>
    %cst_296 = arith.constant dense<0.000000e+00> : vector<2x128xf32>
    %304 = tpu.matmul %303, %0, %cst_296 {dimension_numbers = #tpu.dot_dimension_numbers<[1], [0], [0], [1], [0, 0, 1, 1], [], []>} : vector<2x300xbf16>, vector<300x128xbf16>, vector<2x128xf32> -> vector<2x128xf32>
    %305 = arith.maximumf %301, %304 : vector<2x128xf32>
    %c11_297 = arith.constant 11 : index
    %c2_298 = arith.constant 2 : index
    %c0_299 = arith.constant 0 : index
    %c0_300 = arith.constant 0 : index
    %306 = vector.load %arg1[%c11_297, %c2_298, %c0_299, %c0_300] : memref<16x4x2x300xbf16, #tpu.memory_space<vmem>>, vector<1x1x2x300xbf16>
    %307 = vector.shape_cast %306 : vector<1x1x2x300xbf16> to vector<2x300xbf16>
    %cst_301 = arith.constant dense<0.000000e+00> : vector<2x128xf32>
    %308 = tpu.matmul %307, %0, %cst_301 {dimension_numbers = #tpu.dot_dimension_numbers<[1], [0], [0], [1], [0, 0, 1, 1], [], []>} : vector<2x300xbf16>, vector<300x128xbf16>, vector<2x128xf32> -> vector<2x128xf32>
    %309 = arith.maximumf %305, %308 : vector<2x128xf32>
    %c11_302 = arith.constant 11 : index
    %c3_303 = arith.constant 3 : index
    %c0_304 = arith.constant 0 : index
    %c0_305 = arith.constant 0 : index
    %310 = vector.load %arg1[%c11_302, %c3_303, %c0_304, %c0_305] : memref<16x4x2x300xbf16, #tpu.memory_space<vmem>>, vector<1x1x2x300xbf16>
    %311 = vector.shape_cast %310 : vector<1x1x2x300xbf16> to vector<2x300xbf16>
    %cst_306 = arith.constant dense<0.000000e+00> : vector<2x128xf32>
    %312 = tpu.matmul %311, %0, %cst_306 {dimension_numbers = #tpu.dot_dimension_numbers<[1], [0], [0], [1], [0, 0, 1, 1], [], []>} : vector<2x300xbf16>, vector<300x128xbf16>, vector<2x128xf32> -> vector<2x128xf32>
    %313 = arith.maximumf %309, %312 : vector<2x128xf32>
    %c0_307 = arith.constant 0 : index
    %c0_308 = arith.constant 0 : index
    %314 = vector.load %arg3[%c0_307, %c0_308] : memref<1x128xf32, #tpu.memory_space<vmem>>, vector<1x128xf32>
    %315 = vector.broadcast %314 : vector<1x128xf32> to vector<2x128xf32>
    %316 = arith.addf %313, %315 : vector<2x128xf32>
    %cst_309 = arith.constant 1.000000e+00 : f32
    %317 = vector.broadcast %cst_309 : f32 to vector<2x128xf32>
    %318 = arith.cmpf ogt, %316, %317 : vector<2x128xf32>
    %319 = arith.extui %318 : vector<2x128xi1> to vector<2x128xi32>
    %320 = arith.sitofp %319 : vector<2x128xi32> to vector<2x128xf32>
    %321 = arith.truncf %320 : vector<2x128xf32> to vector<2x128xbf16>
    %c11_310 = arith.constant 11 : index
    %c0_311 = arith.constant 0 : index
    %c0_312 = arith.constant 0 : index
    %322 = vector.load %arg4[%c11_310, %c0_311, %c0_312] : memref<16x128x128xbf16, #tpu.memory_space<vmem>>, vector<1x128x128xbf16>
    %323 = vector.shape_cast %322 : vector<1x128x128xbf16> to vector<128x128xbf16>
    %cst_313 = arith.constant dense<0.000000e+00> : vector<2x128xf32>
    %324 = tpu.matmul %321, %323, %cst_313 {dimension_numbers = #tpu.dot_dimension_numbers<[1], [0], [0], [1], [0, 0, 1, 1], [], []>} : vector<2x128xbf16>, vector<128x128xbf16>, vector<2x128xf32> -> vector<2x128xf32>
    %325 = arith.addf %298, %324 : vector<2x128xf32>
    %c12 = arith.constant 12 : index
    %c0_314 = arith.constant 0 : index
    %c0_315 = arith.constant 0 : index
    %c0_316 = arith.constant 0 : index
    %326 = vector.load %arg1[%c12, %c0_314, %c0_315, %c0_316] : memref<16x4x2x300xbf16, #tpu.memory_space<vmem>>, vector<1x1x2x300xbf16>
    %327 = vector.shape_cast %326 : vector<1x1x2x300xbf16> to vector<2x300xbf16>
    %cst_317 = arith.constant dense<0.000000e+00> : vector<2x128xf32>
    %328 = tpu.matmul %327, %0, %cst_317 {dimension_numbers = #tpu.dot_dimension_numbers<[1], [0], [0], [1], [0, 0, 1, 1], [], []>} : vector<2x300xbf16>, vector<300x128xbf16>, vector<2x128xf32> -> vector<2x128xf32>
    %c12_318 = arith.constant 12 : index
    %c1_319 = arith.constant 1 : index
    %c0_320 = arith.constant 0 : index
    %c0_321 = arith.constant 0 : index
    %329 = vector.load %arg1[%c12_318, %c1_319, %c0_320, %c0_321] : memref<16x4x2x300xbf16, #tpu.memory_space<vmem>>, vector<1x1x2x300xbf16>
    %330 = vector.shape_cast %329 : vector<1x1x2x300xbf16> to vector<2x300xbf16>
    %cst_322 = arith.constant dense<0.000000e+00> : vector<2x128xf32>
    %331 = tpu.matmul %330, %0, %cst_322 {dimension_numbers = #tpu.dot_dimension_numbers<[1], [0], [0], [1], [0, 0, 1, 1], [], []>} : vector<2x300xbf16>, vector<300x128xbf16>, vector<2x128xf32> -> vector<2x128xf32>
    %332 = arith.maximumf %328, %331 : vector<2x128xf32>
    %c12_323 = arith.constant 12 : index
    %c2_324 = arith.constant 2 : index
    %c0_325 = arith.constant 0 : index
    %c0_326 = arith.constant 0 : index
    %333 = vector.load %arg1[%c12_323, %c2_324, %c0_325, %c0_326] : memref<16x4x2x300xbf16, #tpu.memory_space<vmem>>, vector<1x1x2x300xbf16>
    %334 = vector.shape_cast %333 : vector<1x1x2x300xbf16> to vector<2x300xbf16>
    %cst_327 = arith.constant dense<0.000000e+00> : vector<2x128xf32>
    %335 = tpu.matmul %334, %0, %cst_327 {dimension_numbers = #tpu.dot_dimension_numbers<[1], [0], [0], [1], [0, 0, 1, 1], [], []>} : vector<2x300xbf16>, vector<300x128xbf16>, vector<2x128xf32> -> vector<2x128xf32>
    %336 = arith.maximumf %332, %335 : vector<2x128xf32>
    %c12_328 = arith.constant 12 : index
    %c3_329 = arith.constant 3 : index
    %c0_330 = arith.constant 0 : index
    %c0_331 = arith.constant 0 : index
    %337 = vector.load %arg1[%c12_328, %c3_329, %c0_330, %c0_331] : memref<16x4x2x300xbf16, #tpu.memory_space<vmem>>, vector<1x1x2x300xbf16>
    %338 = vector.shape_cast %337 : vector<1x1x2x300xbf16> to vector<2x300xbf16>
    %cst_332 = arith.constant dense<0.000000e+00> : vector<2x128xf32>
    %339 = tpu.matmul %338, %0, %cst_332 {dimension_numbers = #tpu.dot_dimension_numbers<[1], [0], [0], [1], [0, 0, 1, 1], [], []>} : vector<2x300xbf16>, vector<300x128xbf16>, vector<2x128xf32> -> vector<2x128xf32>
    %340 = arith.maximumf %336, %339 : vector<2x128xf32>
    %c0_333 = arith.constant 0 : index
    %c0_334 = arith.constant 0 : index
    %341 = vector.load %arg3[%c0_333, %c0_334] : memref<1x128xf32, #tpu.memory_space<vmem>>, vector<1x128xf32>
    %342 = vector.broadcast %341 : vector<1x128xf32> to vector<2x128xf32>
    %343 = arith.addf %340, %342 : vector<2x128xf32>
    %cst_335 = arith.constant 1.000000e+00 : f32
    %344 = vector.broadcast %cst_335 : f32 to vector<2x128xf32>
    %345 = arith.cmpf ogt, %343, %344 : vector<2x128xf32>
    %346 = arith.extui %345 : vector<2x128xi1> to vector<2x128xi32>
    %347 = arith.sitofp %346 : vector<2x128xi32> to vector<2x128xf32>
    %348 = arith.truncf %347 : vector<2x128xf32> to vector<2x128xbf16>
    %c12_336 = arith.constant 12 : index
    %c0_337 = arith.constant 0 : index
    %c0_338 = arith.constant 0 : index
    %349 = vector.load %arg4[%c12_336, %c0_337, %c0_338] : memref<16x128x128xbf16, #tpu.memory_space<vmem>>, vector<1x128x128xbf16>
    %350 = vector.shape_cast %349 : vector<1x128x128xbf16> to vector<128x128xbf16>
    %cst_339 = arith.constant dense<0.000000e+00> : vector<2x128xf32>
    %351 = tpu.matmul %348, %350, %cst_339 {dimension_numbers = #tpu.dot_dimension_numbers<[1], [0], [0], [1], [0, 0, 1, 1], [], []>} : vector<2x128xbf16>, vector<128x128xbf16>, vector<2x128xf32> -> vector<2x128xf32>
    %352 = arith.addf %325, %351 : vector<2x128xf32>
    %c13 = arith.constant 13 : index
    %c0_340 = arith.constant 0 : index
    %c0_341 = arith.constant 0 : index
    %c0_342 = arith.constant 0 : index
    %353 = vector.load %arg1[%c13, %c0_340, %c0_341, %c0_342] : memref<16x4x2x300xbf16, #tpu.memory_space<vmem>>, vector<1x1x2x300xbf16>
    %354 = vector.shape_cast %353 : vector<1x1x2x300xbf16> to vector<2x300xbf16>
    %cst_343 = arith.constant dense<0.000000e+00> : vector<2x128xf32>
    %355 = tpu.matmul %354, %0, %cst_343 {dimension_numbers = #tpu.dot_dimension_numbers<[1], [0], [0], [1], [0, 0, 1, 1], [], []>} : vector<2x300xbf16>, vector<300x128xbf16>, vector<2x128xf32> -> vector<2x128xf32>
    %c13_344 = arith.constant 13 : index
    %c1_345 = arith.constant 1 : index
    %c0_346 = arith.constant 0 : index
    %c0_347 = arith.constant 0 : index
    %356 = vector.load %arg1[%c13_344, %c1_345, %c0_346, %c0_347] : memref<16x4x2x300xbf16, #tpu.memory_space<vmem>>, vector<1x1x2x300xbf16>
    %357 = vector.shape_cast %356 : vector<1x1x2x300xbf16> to vector<2x300xbf16>
    %cst_348 = arith.constant dense<0.000000e+00> : vector<2x128xf32>
    %358 = tpu.matmul %357, %0, %cst_348 {dimension_numbers = #tpu.dot_dimension_numbers<[1], [0], [0], [1], [0, 0, 1, 1], [], []>} : vector<2x300xbf16>, vector<300x128xbf16>, vector<2x128xf32> -> vector<2x128xf32>
    %359 = arith.maximumf %355, %358 : vector<2x128xf32>
    %c13_349 = arith.constant 13 : index
    %c2_350 = arith.constant 2 : index
    %c0_351 = arith.constant 0 : index
    %c0_352 = arith.constant 0 : index
    %360 = vector.load %arg1[%c13_349, %c2_350, %c0_351, %c0_352] : memref<16x4x2x300xbf16, #tpu.memory_space<vmem>>, vector<1x1x2x300xbf16>
    %361 = vector.shape_cast %360 : vector<1x1x2x300xbf16> to vector<2x300xbf16>
    %cst_353 = arith.constant dense<0.000000e+00> : vector<2x128xf32>
    %362 = tpu.matmul %361, %0, %cst_353 {dimension_numbers = #tpu.dot_dimension_numbers<[1], [0], [0], [1], [0, 0, 1, 1], [], []>} : vector<2x300xbf16>, vector<300x128xbf16>, vector<2x128xf32> -> vector<2x128xf32>
    %363 = arith.maximumf %359, %362 : vector<2x128xf32>
    %c13_354 = arith.constant 13 : index
    %c3_355 = arith.constant 3 : index
    %c0_356 = arith.constant 0 : index
    %c0_357 = arith.constant 0 : index
    %364 = vector.load %arg1[%c13_354, %c3_355, %c0_356, %c0_357] : memref<16x4x2x300xbf16, #tpu.memory_space<vmem>>, vector<1x1x2x300xbf16>
    %365 = vector.shape_cast %364 : vector<1x1x2x300xbf16> to vector<2x300xbf16>
    %cst_358 = arith.constant dense<0.000000e+00> : vector<2x128xf32>
    %366 = tpu.matmul %365, %0, %cst_358 {dimension_numbers = #tpu.dot_dimension_numbers<[1], [0], [0], [1], [0, 0, 1, 1], [], []>} : vector<2x300xbf16>, vector<300x128xbf16>, vector<2x128xf32> -> vector<2x128xf32>
    %367 = arith.maximumf %363, %366 : vector<2x128xf32>
    %c0_359 = arith.constant 0 : index
    %c0_360 = arith.constant 0 : index
    %368 = vector.load %arg3[%c0_359, %c0_360] : memref<1x128xf32, #tpu.memory_space<vmem>>, vector<1x128xf32>
    %369 = vector.broadcast %368 : vector<1x128xf32> to vector<2x128xf32>
    %370 = arith.addf %367, %369 : vector<2x128xf32>
    %cst_361 = arith.constant 1.000000e+00 : f32
    %371 = vector.broadcast %cst_361 : f32 to vector<2x128xf32>
    %372 = arith.cmpf ogt, %370, %371 : vector<2x128xf32>
    %373 = arith.extui %372 : vector<2x128xi1> to vector<2x128xi32>
    %374 = arith.sitofp %373 : vector<2x128xi32> to vector<2x128xf32>
    %375 = arith.truncf %374 : vector<2x128xf32> to vector<2x128xbf16>
    %c13_362 = arith.constant 13 : index
    %c0_363 = arith.constant 0 : index
    %c0_364 = arith.constant 0 : index
    %376 = vector.load %arg4[%c13_362, %c0_363, %c0_364] : memref<16x128x128xbf16, #tpu.memory_space<vmem>>, vector<1x128x128xbf16>
    %377 = vector.shape_cast %376 : vector<1x128x128xbf16> to vector<128x128xbf16>
    %cst_365 = arith.constant dense<0.000000e+00> : vector<2x128xf32>
    %378 = tpu.matmul %375, %377, %cst_365 {dimension_numbers = #tpu.dot_dimension_numbers<[1], [0], [0], [1], [0, 0, 1, 1], [], []>} : vector<2x128xbf16>, vector<128x128xbf16>, vector<2x128xf32> -> vector<2x128xf32>
    %379 = arith.addf %352, %378 : vector<2x128xf32>
    %c14 = arith.constant 14 : index
    %c0_366 = arith.constant 0 : index
    %c0_367 = arith.constant 0 : index
    %c0_368 = arith.constant 0 : index
    %380 = vector.load %arg1[%c14, %c0_366, %c0_367, %c0_368] : memref<16x4x2x300xbf16, #tpu.memory_space<vmem>>, vector<1x1x2x300xbf16>
    %381 = vector.shape_cast %380 : vector<1x1x2x300xbf16> to vector<2x300xbf16>
    %cst_369 = arith.constant dense<0.000000e+00> : vector<2x128xf32>
    %382 = tpu.matmul %381, %0, %cst_369 {dimension_numbers = #tpu.dot_dimension_numbers<[1], [0], [0], [1], [0, 0, 1, 1], [], []>} : vector<2x300xbf16>, vector<300x128xbf16>, vector<2x128xf32> -> vector<2x128xf32>
    %c14_370 = arith.constant 14 : index
    %c1_371 = arith.constant 1 : index
    %c0_372 = arith.constant 0 : index
    %c0_373 = arith.constant 0 : index
    %383 = vector.load %arg1[%c14_370, %c1_371, %c0_372, %c0_373] : memref<16x4x2x300xbf16, #tpu.memory_space<vmem>>, vector<1x1x2x300xbf16>
    %384 = vector.shape_cast %383 : vector<1x1x2x300xbf16> to vector<2x300xbf16>
    %cst_374 = arith.constant dense<0.000000e+00> : vector<2x128xf32>
    %385 = tpu.matmul %384, %0, %cst_374 {dimension_numbers = #tpu.dot_dimension_numbers<[1], [0], [0], [1], [0, 0, 1, 1], [], []>} : vector<2x300xbf16>, vector<300x128xbf16>, vector<2x128xf32> -> vector<2x128xf32>
    %386 = arith.maximumf %382, %385 : vector<2x128xf32>
    %c14_375 = arith.constant 14 : index
    %c2_376 = arith.constant 2 : index
    %c0_377 = arith.constant 0 : index
    %c0_378 = arith.constant 0 : index
    %387 = vector.load %arg1[%c14_375, %c2_376, %c0_377, %c0_378] : memref<16x4x2x300xbf16, #tpu.memory_space<vmem>>, vector<1x1x2x300xbf16>
    %388 = vector.shape_cast %387 : vector<1x1x2x300xbf16> to vector<2x300xbf16>
    %cst_379 = arith.constant dense<0.000000e+00> : vector<2x128xf32>
    %389 = tpu.matmul %388, %0, %cst_379 {dimension_numbers = #tpu.dot_dimension_numbers<[1], [0], [0], [1], [0, 0, 1, 1], [], []>} : vector<2x300xbf16>, vector<300x128xbf16>, vector<2x128xf32> -> vector<2x128xf32>
    %390 = arith.maximumf %386, %389 : vector<2x128xf32>
    %c14_380 = arith.constant 14 : index
    %c3_381 = arith.constant 3 : index
    %c0_382 = arith.constant 0 : index
    %c0_383 = arith.constant 0 : index
    %391 = vector.load %arg1[%c14_380, %c3_381, %c0_382, %c0_383] : memref<16x4x2x300xbf16, #tpu.memory_space<vmem>>, vector<1x1x2x300xbf16>
    %392 = vector.shape_cast %391 : vector<1x1x2x300xbf16> to vector<2x300xbf16>
    %cst_384 = arith.constant dense<0.000000e+00> : vector<2x128xf32>
    %393 = tpu.matmul %392, %0, %cst_384 {dimension_numbers = #tpu.dot_dimension_numbers<[1], [0], [0], [1], [0, 0, 1, 1], [], []>} : vector<2x300xbf16>, vector<300x128xbf16>, vector<2x128xf32> -> vector<2x128xf32>
    %394 = arith.maximumf %390, %393 : vector<2x128xf32>
    %c0_385 = arith.constant 0 : index
    %c0_386 = arith.constant 0 : index
    %395 = vector.load %arg3[%c0_385, %c0_386] : memref<1x128xf32, #tpu.memory_space<vmem>>, vector<1x128xf32>
    %396 = vector.broadcast %395 : vector<1x128xf32> to vector<2x128xf32>
    %397 = arith.addf %394, %396 : vector<2x128xf32>
    %cst_387 = arith.constant 1.000000e+00 : f32
    %398 = vector.broadcast %cst_387 : f32 to vector<2x128xf32>
    %399 = arith.cmpf ogt, %397, %398 : vector<2x128xf32>
    %400 = arith.extui %399 : vector<2x128xi1> to vector<2x128xi32>
    %401 = arith.sitofp %400 : vector<2x128xi32> to vector<2x128xf32>
    %402 = arith.truncf %401 : vector<2x128xf32> to vector<2x128xbf16>
    %c14_388 = arith.constant 14 : index
    %c0_389 = arith.constant 0 : index
    %c0_390 = arith.constant 0 : index
    %403 = vector.load %arg4[%c14_388, %c0_389, %c0_390] : memref<16x128x128xbf16, #tpu.memory_space<vmem>>, vector<1x128x128xbf16>
    %404 = vector.shape_cast %403 : vector<1x128x128xbf16> to vector<128x128xbf16>
    %cst_391 = arith.constant dense<0.000000e+00> : vector<2x128xf32>
    %405 = tpu.matmul %402, %404, %cst_391 {dimension_numbers = #tpu.dot_dimension_numbers<[1], [0], [0], [1], [0, 0, 1, 1], [], []>} : vector<2x128xbf16>, vector<128x128xbf16>, vector<2x128xf32> -> vector<2x128xf32>
    %406 = arith.addf %379, %405 : vector<2x128xf32>
    %c15 = arith.constant 15 : index
    %c0_392 = arith.constant 0 : index
    %c0_393 = arith.constant 0 : index
    %c0_394 = arith.constant 0 : index
    %407 = vector.load %arg1[%c15, %c0_392, %c0_393, %c0_394] : memref<16x4x2x300xbf16, #tpu.memory_space<vmem>>, vector<1x1x2x300xbf16>
    %408 = vector.shape_cast %407 : vector<1x1x2x300xbf16> to vector<2x300xbf16>
    %cst_395 = arith.constant dense<0.000000e+00> : vector<2x128xf32>
    %409 = tpu.matmul %408, %0, %cst_395 {dimension_numbers = #tpu.dot_dimension_numbers<[1], [0], [0], [1], [0, 0, 1, 1], [], []>} : vector<2x300xbf16>, vector<300x128xbf16>, vector<2x128xf32> -> vector<2x128xf32>
    %c15_396 = arith.constant 15 : index
    %c1_397 = arith.constant 1 : index
    %c0_398 = arith.constant 0 : index
    %c0_399 = arith.constant 0 : index
    %410 = vector.load %arg1[%c15_396, %c1_397, %c0_398, %c0_399] : memref<16x4x2x300xbf16, #tpu.memory_space<vmem>>, vector<1x1x2x300xbf16>
    %411 = vector.shape_cast %410 : vector<1x1x2x300xbf16> to vector<2x300xbf16>
    %cst_400 = arith.constant dense<0.000000e+00> : vector<2x128xf32>
    %412 = tpu.matmul %411, %0, %cst_400 {dimension_numbers = #tpu.dot_dimension_numbers<[1], [0], [0], [1], [0, 0, 1, 1], [], []>} : vector<2x300xbf16>, vector<300x128xbf16>, vector<2x128xf32> -> vector<2x128xf32>
    %413 = arith.maximumf %409, %412 : vector<2x128xf32>
    %c15_401 = arith.constant 15 : index
    %c2_402 = arith.constant 2 : index
    %c0_403 = arith.constant 0 : index
    %c0_404 = arith.constant 0 : index
    %414 = vector.load %arg1[%c15_401, %c2_402, %c0_403, %c0_404] : memref<16x4x2x300xbf16, #tpu.memory_space<vmem>>, vector<1x1x2x300xbf16>
    %415 = vector.shape_cast %414 : vector<1x1x2x300xbf16> to vector<2x300xbf16>
    %cst_405 = arith.constant dense<0.000000e+00> : vector<2x128xf32>
    %416 = tpu.matmul %415, %0, %cst_405 {dimension_numbers = #tpu.dot_dimension_numbers<[1], [0], [0], [1], [0, 0, 1, 1], [], []>} : vector<2x300xbf16>, vector<300x128xbf16>, vector<2x128xf32> -> vector<2x128xf32>
    %417 = arith.maximumf %413, %416 : vector<2x128xf32>
    %c15_406 = arith.constant 15 : index
    %c3_407 = arith.constant 3 : index
    %c0_408 = arith.constant 0 : index
    %c0_409 = arith.constant 0 : index
    %418 = vector.load %arg1[%c15_406, %c3_407, %c0_408, %c0_409] : memref<16x4x2x300xbf16, #tpu.memory_space<vmem>>, vector<1x1x2x300xbf16>
    %419 = vector.shape_cast %418 : vector<1x1x2x300xbf16> to vector<2x300xbf16>
    %cst_410 = arith.constant dense<0.000000e+00> : vector<2x128xf32>
    %420 = tpu.matmul %419, %0, %cst_410 {dimension_numbers = #tpu.dot_dimension_numbers<[1], [0], [0], [1], [0, 0, 1, 1], [], []>} : vector<2x300xbf16>, vector<300x128xbf16>, vector<2x128xf32> -> vector<2x128xf32>
    %421 = arith.maximumf %417, %420 : vector<2x128xf32>
    %c0_411 = arith.constant 0 : index
    %c0_412 = arith.constant 0 : index
    %422 = vector.load %arg3[%c0_411, %c0_412] : memref<1x128xf32, #tpu.memory_space<vmem>>, vector<1x128xf32>
    %423 = vector.broadcast %422 : vector<1x128xf32> to vector<2x128xf32>
    %424 = arith.addf %421, %423 : vector<2x128xf32>
    %cst_413 = arith.constant 1.000000e+00 : f32
    %425 = vector.broadcast %cst_413 : f32 to vector<2x128xf32>
    %426 = arith.cmpf ogt, %424, %425 : vector<2x128xf32>
    %427 = arith.extui %426 : vector<2x128xi1> to vector<2x128xi32>
    %428 = arith.sitofp %427 : vector<2x128xi32> to vector<2x128xf32>
    %429 = arith.truncf %428 : vector<2x128xf32> to vector<2x128xbf16>
    %c15_414 = arith.constant 15 : index
    %c0_415 = arith.constant 0 : index
    %c0_416 = arith.constant 0 : index
    %430 = vector.load %arg4[%c15_414, %c0_415, %c0_416] : memref<16x128x128xbf16, #tpu.memory_space<vmem>>, vector<1x128x128xbf16>
    %431 = vector.shape_cast %430 : vector<1x128x128xbf16> to vector<128x128xbf16>
    %cst_417 = arith.constant dense<0.000000e+00> : vector<2x128xf32>
    %432 = tpu.matmul %429, %431, %cst_417 {dimension_numbers = #tpu.dot_dimension_numbers<[1], [0], [0], [1], [0, 0, 1, 1], [], []>} : vector<2x128xbf16>, vector<128x128xbf16>, vector<2x128xf32> -> vector<2x128xf32>
    %433 = arith.addf %406, %432 : vector<2x128xf32>
    %c0_418 = arith.constant 0 : index
    %c0_419 = arith.constant 0 : index
    %434 = vector.load %arg5[%c0_418, %c0_419] : memref<1x128xf32, #tpu.memory_space<vmem>>, vector<1x128xf32>
    %435 = vector.broadcast %434 : vector<1x128xf32> to vector<2x128xf32>
    %436 = arith.addf %433, %435 : vector<2x128xf32>
    %cst_420 = arith.constant 1.000000e+00 : f32
    %437 = vector.broadcast %cst_420 : f32 to vector<2x128xf32>
    %438 = arith.cmpf ogt, %436, %437 : vector<2x128xf32>
    %439 = arith.extui %438 : vector<2x128xi1> to vector<2x128xi32>
    %440 = arith.sitofp %439 : vector<2x128xi32> to vector<2x128xf32>
    %c0_421 = arith.constant 0 : index
    %c0_422 = arith.constant 0 : index
    %441 = vector.load %arg6[%c0_421, %c0_422] : memref<2x128xf32, #tpu.memory_space<vmem>>, vector<2x128xf32>
    tpu.vector_store %arg6[%c0_421, %c0_422], %440 {strides = array<i32>} : memref<2x128xf32, #tpu.memory_space<vmem>>, vector<2x128xf32>,
    %c0_423 = arith.constant 0 : index
    %c0_424 = arith.constant 0 : index
    %442 = vector.load %arg7[%c0_423, %c0_424] : memref<2x128xf32, #tpu.memory_space<vmem>>, vector<2x128xf32>
    tpu.vector_store %arg7[%c0_423, %c0_424], %436 {strides = array<i32>} : memref<2x128xf32, #tpu.memory_space<vmem>>, vector<2x128xf32>,
    return
  }
  func.func @transform_0(%arg0: i32) -> (i32, i32, i32, i32) {
    %c0_i32 = arith.constant 0 : i32
    %c0_i32_0 = arith.constant 0 : i32
    %c0_i32_1 = arith.constant 0 : i32
    %c0_i32_2 = arith.constant 0 : i32
    return %c0_i32, %c0_i32_0, %arg0, %c0_i32_1 : i32, i32, i32, i32
  }
  func.func @transform_1(%arg0: i32) -> (i32, i32) {
    %c0_i32 = arith.constant 0 : i32
    %c0_i32_0 = arith.constant 0 : i32
    %c0_i32_1 = arith.constant 0 : i32
    return %c0_i32, %c0_i32_0 : i32, i32
  }
  func.func @transform_2(%arg0: i32) -> (i32, i32) {
    %c0_i32 = arith.constant 0 : i32
    %c0_i32_0 = arith.constant 0 : i32
    %c0_i32_1 = arith.constant 0 : i32
    return %c0_i32, %c0_i32_0 : i32, i32
  }
  func.func @transform_3(%arg0: i32) -> (i32, i32, i32) {
    %c0_i32 = arith.constant 0 : i32
    %c0_i32_0 = arith.constant 0 : i32
    %c0_i32_1 = arith.constant 0 : i32
    %c0_i32_2 = arith.constant 0 : i32
    return %c0_i32, %c0_i32_0, %c0_i32_1 : i32, i32, i32
  }
  func.func @transform_4(%arg0: i32) -> (i32, i32) {
    %c0_i32 = arith.constant 0 : i32
    %c0_i32_0 = arith.constant 0 : i32
    %c0_i32_1 = arith.constant 0 : i32
    return %c0_i32, %c0_i32_0 : i32, i32
  }
  func.func @transform_5(%arg0: i32) -> (i32, i32) {
    %c0_i32 = arith.constant 0 : i32
    %c0_i32_0 = arith.constant 0 : i32
    return %arg0, %c0_i32 : i32, i32
  }
  func.func @transform_6(%arg0: i32) -> (i32, i32) {
    %c0_i32 = arith.constant 0 : i32
    %c0_i32_0 = arith.constant 0 : i32
    return %arg0, %c0_i32 : i32, i32
  }
}

</mosaic_0001>

<bundles_post_ra>
// kernel: net_forward.2
= control target key start
LH: loop header
LB: loop body
LE: loop exit
PB: predicated region body
PF: predicated region fallthrough
CT: control target
= control target key end

     0   :  { %s1716_s12 = smov 0   ;;  %s1718_s13 = smov 0   ;;  %s2006_s0 = inlined_call_operand.vmem [shape: bf16[4,288,25], index: 0, kind: input, shape index: {}]   ;;  %s2007_s1 = inlined_call_operand.vmem [shape: bf16[25,16], index: 1, kind: input, shape index: {}]   ;;  %s2008_s2 = inlined_call_operand.vmem [shape: f32[1,16], index: 2, kind: input, shape index: {}]   ;;  %s2009_s3 = inlined_call_operand.vmem [shape: bf16[288,16], index: 3, kind: output, shape index: {}]  }
   0x1   :  { %s1720_s14 = smov 0  }
   0x2 LB: > { %s1333_s15 = sadd.s32 4294967295, %s1692_s14   ;;  %s1733_s16 = sadd.s32 1, %s1692_s14   ;;  %s1692_s14 = sphi %s1720_s14, %s2012_s14   ;;  %s1688_s13 = sphi %s1718_s13, %s2011_s13   ;;  %s1684_s12 = sphi %s1716_s12, %s2010_s12  }
   0x3   : > { %s17_s17 = ssub.s32 %s1692_s14, %s1733_s16  ;;  %s20_s18 = sadd.s32 1, %s1688_s13 }
   0x4   : > { %p18_p0 = scmp.eq.s32.totalorder %s17_s17, 0  ;;  %p27_p1 = scmp.ne.s32.totalorder %s1688_s13, %s1684_s12 }
   0x5   : > { %p28_p2 = scmp.eq.s32.totalorder %s1692_s14, 0  ;;  %p1336_p4 = scmp.ge.s32.totalorder %s1692_s14, 2 }
   0x6   : > { %s1742_s19 = scalar_select %p18_p0, %s1688_s13, %s20_s18  }
   0x7   : > { %p29_p3 = por %p28_p2, %p27_p1  ;;  %127 = sbr.rel (%p1336_p4) target bundleno = 53 (0x35), region = 24 }
   0xc   : > { %130 = sbr.rel (!%p29_p3) target bundleno = 53 (0x35), region = 28  ;;  %s132_s20 = sand.u32 (%p29_p3), 1, %s1688_s13  }
   0xd   : > { %s1602_s21 = smul.u32 (%p29_p3), 72, %s1692_s14 }
   0xe   : > { %s1641_s22 = smul.u32 (%p29_p3), 288, %s132_s20 }
   0xf   : > { %s1750_s25 = scalar_lea.vmem (%p29_p3), %s2006_s0, %s1602_s21 }
  0x10   : > { %v154_v0 = vld [vmem:[%s1750_s25] sm:$0xff] (%p29_p3)   ;;  %v158_v1 = vld [vmem:[%s1750_s25 + $0x8] sm:$0xff] (%p29_p3)   ;;  %v162_v2 = vld [vmem:[%s1750_s25 + $0x10] sm:$0xff] (%p29_p3)   ;;  %s1755_s26 = scalar_lea.vmem (%p29_p3), [#allocation2], %s1641_s22 }
  0x11   : > { %155 = vst [vmem:[%s1755_s26] sm:$0xff] %v154_v0   ;;  %v166_v3 = vld [vmem:[%s1750_s25 + $0x18] sm:$0xff]   ;;  %v170_v4 = vld [vmem:[%s1750_s25 + $0x20] sm:$0xff]   ;;  %v174_v5 = vld [vmem:[%s1750_s25 + $0x28] sm:$0xff]  }
  0x12   : > { %159 = vst [vmem:[%s1755_s26 + $0x8] sm:$0xff] %v158_v1   ;;  %v178_v6 = vld [vmem:[%s1750_s25 + $0x30] sm:$0xff]   ;;  %v182_v7 = vld [vmem:[%s1750_s25 + $0x38] sm:$0xff]   ;;  %v186_v8 = vld [vmem:[%s1750_s25 + $0x40] sm:$0xff]  }
  0x13   : > { %163 = vst [vmem:[%s1755_s26 + $0x10] sm:$0xff] %v162_v2   ;;  %v190_v9 = vld [vmem:[%s1750_s25 + $0x90] sm:$0xff]   ;;  %v194_v10 = vld [vmem:[%s1750_s25 + $0x98] sm:$0xff]   ;;  %v198_v11 = vld [vmem:[%s1750_s25 + $0xa0] sm:$0xff]  }
  0x14   : > { %167 = vst [vmem:[%s1755_s26 + $0x18] sm:$0xff] %v166_v3   ;;  %v202_v12 = vld [vmem:[%s1750_s25 + $0xa8] sm:$0xff]   ;;  %v206_v13 = vld [vmem:[%s1750_s25 + $0xb0] sm:$0xff]   ;;  %v210_v14 = vld [vmem:[%s1750_s25 + $0xb8] sm:$0xff]  }
  0x15   : > { %171 = vst [vmem:[%s1755_s26 + $0x20] sm:$0xff] %v170_v4   ;;  %v214_v15 = vld [vmem:[%s1750_s25 + $0xc0] sm:$0xff]   ;;  %v218_v16 = vld [vmem:[%s1750_s25 + $0xc8] sm:$0xff]   ;;  %v222_v17 = vld [vmem:[%s1750_s25 + $0xd0] sm:$0xff]  }
  0x16   : > { %175 = vst [vmem:[%s1755_s26 + $0x28] sm:$0xff] %v174_v5   ;;  %v226_v18 = vld [vmem:[%s1750_s25 + $0x120] sm:$0xff]   ;;  %v230_v19 = vld [vmem:[%s1750_s25 + $0x128] sm:$0xff]   ;;  %v234_v20 = vld [vmem:[%s1750_s25 + $0x130] sm:$0xff]  }
  0x17   : > { %179 = vst [vmem:[%s1755_s26 + $0x30] sm:$0xff] %v178_v6   ;;  %v238_v21 = vld [vmem:[%s1750_s25 + $0x138] sm:$0xff]   ;;  %v242_v22 = vld [vmem:[%s1750_s25 + $0x140] sm:$0xff]   ;;  %v246_v23 = vld [vmem:[%s1750_s25 + $0x148] sm:$0xff]  }
  0x18   : > { %183 = vst [vmem:[%s1755_s26 + $0x38] sm:$0xff] %v182_v7   ;;  %v250_v24 = vld [vmem:[%s1750_s25 + $0x150] sm:$0xff]   ;;  %v254_v25 = vld [vmem:[%s1750_s25 + $0x158] sm:$0xff]   ;;  %v258_v26 = vld [vmem:[%s1750_s25 + $0x160] sm:$0xff]  }
  0x19   : > { %187 = vst [vmem:[%s1755_s26 + $0x40] sm:$0xff] %v186_v8   ;;  %v262_v27 = vld [vmem:[%s1750_s25 + $0x1b0] sm:$0xff]   ;;  %v266_v28 = vld [vmem:[%s1750_s25 + $0x1b8] sm:$0xff]   ;;  %v270_v29 = vld [vmem:[%s1750_s25 + $0x1c0] sm:$0xff]  }
  0x1a   : > { %191 = vst [vmem:[%s1755_s26 + $0x48] sm:$0xff] %v190_v9   ;;  %v274_v30 = vld [vmem:[%s1750_s25 + $0x1c8] sm:$0xff]   ;;  %v278_v31 = vld [vmem:[%s1750_s25 + $0x1d0] sm:$0xff]   ;;  %v282_v32 = vld [vmem:[%s1750_s25 + $0x1d8] sm:$0xff]  }
  0x1b   : > { %195 = vst [vmem:[%s1755_s26 + $0x50] sm:$0xff] %v194_v10   ;;  %v286_v33 = vld [vmem:[%s1750_s25 + $0x1e0] sm:$0xff]   ;;  %v290_v34 = vld [vmem:[%s1750_s25 + $0x1e8] sm:$0xff]   ;;  %v294_v35 = vld [vmem:[%s1750_s25 + $0x1f0] sm:$0xff]  }
  0x1c   : > { %199 = vst [vmem:[%s1755_s26 + $0x58] sm:$0xff] %v198_v11  }
  0x1d   : > { %203 = vst [vmem:[%s1755_s26 + $0x60] sm:$0xff] %v202_v12  }
  0x1e   : > { %207 = vst [vmem:[%s1755_s26 + $0x68] sm:$0xff] %v206_v13  }
  0x1f   : > { %211 = vst [vmem:[%s1755_s26 + $0x70] sm:$0xff] %v210_v14  }
  0x20   : > { %215 = vst [vmem:[%s1755_s26 + $0x78] sm:$0xff] %v214_v15  }
  0x21   : > { %219 = vst [vmem:[%s1755_s26 + $0x80] sm:$0xff] %v218_v16  }
  0x22   : > { %223 = vst [vmem:[%s1755_s26 + $0x88] sm:$0xff] %v222_v17  }
  0x23   : > { %227 = vst [vmem:[%s1755_s26 + $0x90] sm:$0xff] %v226_v18  }
  0x24   : > { %231 = vst [vmem:[%s1755_s26 + $0x98] sm:$0xff] %v230_v19  }
  0x25   : > { %235 = vst [vmem:[%s1755_s26 + $0xa0] sm:$0xff] %v234_v20  }
  0x26   : > { %239 = vst [vmem:[%s1755_s26 + $0xa8] sm:$0xff] %v238_v21  }
  0x27   : > { %243 = vst [vmem:[%s1755_s26 + $0xb0] sm:$0xff] %v242_v22  }
  0x28   : > { %247 = vst [vmem:[%s1755_s26 + $0xb8] sm:$0xff] %v246_v23  }
  0x29   : > { %251 = vst [vmem:[%s1755_s26 + $0xc0] sm:$0xff] %v250_v24  }
  0x2a   : > { %255 = vst [vmem:[%s1755_s26 + $0xc8] sm:$0xff] %v254_v25  }
  0x2b   : > { %259 = vst [vmem:[%s1755_s26 + $0xd0] sm:$0xff] %v258_v26  }
  0x2c   : > { %263 = vst [vmem:[%s1755_s26 + $0xd8] sm:$0xff] %v262_v27  }
  0x2d   : > { %267 = vst [vmem:[%s1755_s26 + $0xe0] sm:$0xff] %v266_v28  }
  0x2e   : > { %271 = vst [vmem:[%s1755_s26 + $0xe8] sm:$0xff] %v270_v29  }
  0x2f   : > { %275 = vst [vmem:[%s1755_s26 + $0xf0] sm:$0xff] %v274_v30  }
  0x30   : > { %279 = vst [vmem:[%s1755_s26 + $0xf8] sm:$0xff] %v278_v31  }
  0x31   : > { %283 = vst [vmem:[%s1755_s26 + $0x100] sm:$0xff] %v282_v32  }
  0x32   : > { %287 = vst [vmem:[%s1755_s26 + $0x108] sm:$0xff] %v286_v33  }
  0x33   : > { %291 = vst [vmem:[%s1755_s26 + $0x110] sm:$0xff] %v290_v34  }
  0x34   : > { %295 = vst [vmem:[%s1755_s26 + $0x118] sm:$0xff] %v294_v35  }
  0x35 PF: > { %p1338_p5 = scmp.ge.s32.totalorder %s1692_s14, 1  ;;  %p464_p6 = scmp.lt.s32.totalorder %s1692_s14, 3 }
  0x37   : > { %p465_p7 = pnand %p1338_p5, %p464_p6 }
  0x38   : > { %s471_s4 = sand.u32 (!%p465_p7), 1, %s1684_s12   ;;  %s495_s9 = smul.u32 (!%p465_p7), 18, %s1333_s15 }
  0x39   : > { %468 = sbr.rel (%p465_p7) target bundleno = 355 (0x163), region = 69 }
  0x3a   : > { %s1642_s5 = smul.u32 (!%p465_p7), 288, %s471_s4  ;;  %p496_p8 = scmp.lt.s32.totalorder (!%p465_p7), %s495_s9, 35 }
  0x3c   : > { %s1838_s8 = scalar_lea.vmem (!%p465_p7), [#allocation2], %s1642_s5 }
  0x3e   : > { %v1382_v36 = vld [vmem:[%s2007_s1 + $0x8] sm:$0xf]  ;;  %v1604_v37 = vld [vmem:[%s2007_s1 + $0x8] sm:$0x10]  ;;  %vm608_vm0 = vcmask 1043456   ;;  %vm609_vm1 = vcmask 1044480  }
  0x3f   : > { %v1383_v38 = vor.u32 %v1604_v37, %v1382_v36  ;;  %v1694_v39 = vmov 65535   ;;  %v1603_v43 = vld [vmem:[%s2007_s1] sm:$0xff]  ;;  %v1614_v45 = vld [vmem:[%s1838_s8 + $0x48] sm:$0xff]  ;;  %vm580_vm2 = vcmask 203776   ;;  %v1623_v46 = vld [vmem:[%s1838_s8 + $0x90] sm:$0xff]  ;;  %s2014_s9 = smov (!%p496_p8, %s495_s9), 35 }
  0x40   : > { %v610_v40 = vsel %vm608_vm0, 4294967295, %v1694_v39  ;;  %v1605_v44 = vld [vmem:[%s1838_s8] sm:$0xff]  ;;  %v1632_v47 = vld [vmem:[%s1838_s8 + $0xd8] sm:$0xff]  ;;  %v1606_v48 = vld [vmem:[%s1838_s8 + $0x8] sm:$0xff]  ;;  %s1339_s12 = sshll.u32 %s2014_s9, 2  ;;  %v1695_v28 = vmov 0.0  }
  0x41   : > { %v611_v41 = vsel %vm609_vm1, %v610_v40, 0  ;;  %v1615_v49 = vld [vmem:[%s1838_s8 + $0x50] sm:$0xff]  ;;  %v1624_v50 = vld [vmem:[%s1838_s8 + $0x98] sm:$0xff]  ;;  %v1633_v51 = vld [vmem:[%s1838_s8 + $0xe0] sm:$0xff]  ;;  %s1923_s17 = scalar_lea.vmem %s2009_s3, %s1339_s12  ;;  %vm1252_vm4 = vcmask 125952  }
  0x42   : > { %v613_v42 = vand.u32 %v1383_v38, %v611_v41  ;;  %v1607_v52 = vld [vmem:[%s1838_s8 + $0x10] sm:$0xff]  ;;  %v1616_v53 = vld [vmem:[%s1838_s8 + $0x58] sm:$0xff]  ;;  %v1625_v54 = vld [vmem:[%s1838_s8 + $0xa0] sm:$0xff] }
  0x43   : > { %v1634_v55 = vld [vmem:[%s1838_s8 + $0xe8] sm:$0xff]  ;;  %v1608_v56 = vld [vmem:[%s1838_s8 + $0x18] sm:$0xff]  ;;  %v1617_v57 = vld [vmem:[%s1838_s8 + $0x60] sm:$0xff] }
  0x44   : > { %621 = vmatpush.bf16.msra.mxu0 %v613_v42  ;;  %766 = vmatpush.bf16.msra.mxu1 %v613_v42  ;;  %v1626_v58 = vld [vmem:[%s1838_s8 + $0xa8] sm:$0xff]  ;;  %v1635_v59 = vld [vmem:[%s1838_s8 + $0xf0] sm:$0xff]  ;;  %v1609_v60 = vld [vmem:[%s1838_s8 + $0x20] sm:$0xff] }
  0x45   : > { %929 = vmatpush.bf16.msra.mxu2 %v613_v42  ;;  %1092 = vmatpush.bf16.msra.mxu3 %v613_v42  ;;  %v1618_v61 = vld [vmem:[%s1838_s8 + $0x68] sm:$0xff]  ;;  %v1627_v62 = vld [vmem:[%s1838_s8 + $0xb0] sm:$0xff]  ;;  %v1636_v63 = vld [vmem:[%s1838_s8 + $0xf8] sm:$0xff] }
  0x46   : > { %v1610_v0 = vld [vmem:[%s1838_s8 + $0x28] sm:$0xff]  ;;  %v1619_v1 = vld [vmem:[%s1838_s8 + $0x70] sm:$0xff]  ;;  %v1628_v2 = vld [vmem:[%s1838_s8 + $0xb8] sm:$0xff] }
  0x47   : > { %v1637_v3 = vld [vmem:[%s1838_s8 + $0x100] sm:$0xff]  ;;  %v1611_v4 = vld [vmem:[%s1838_s8 + $0x30] sm:$0xff]  ;;  %v1620_v5 = vld [vmem:[%s1838_s8 + $0x78] sm:$0xff] }
  0x48   : > { %622 = vmatpush.bf16.msra.mxu0 %v1603_v43  ;;  %767 = vmatpush.bf16.msra.mxu1 %v1603_v43  ;;  %v1629_v6 = vld [vmem:[%s1838_s8 + $0xc0] sm:$0xff]  ;;  %v1638_v7 = vld [vmem:[%s1838_s8 + $0x108] sm:$0xff]  ;;  %v1612_v8 = vld [vmem:[%s1838_s8 + $0x38] sm:$0xff] }
  0x49   : > { %930 = vmatpush.bf16.msra.mxu2 %v1603_v43  ;;  %1093 = vmatpush.bf16.msra.mxu3 %v1603_v43  ;;  %v1621_v9 = vld [vmem:[%s1838_s8 + $0x80] sm:$0xff]  ;;  %v1630_v10 = vld [vmem:[%s1838_s8 + $0xc8] sm:$0xff]  ;;  %v1639_v11 = vld [vmem:[%s1838_s8 + $0x110] sm:$0xff] }
  0x4a   : > { %v1613_v12 = vld [vmem:[%s1838_s8 + $0x40] sm:$0xff]  ;;  %v1622_v13 = vld [vmem:[%s1838_s8 + $0x88] sm:$0xff]  ;;  %v1631_v16 = vld [vmem:[%s1838_s8 + $0xd0] sm:$0xff] }
  0x4b   : > { %1384 = vmatmul.msk.bf16.vlgmr.msra.gmra.mxu0 %vm580_vm2, %v1605_v44  ;;  %1447 = vmatmul.msk.bf16.vlgmr.msra.gmra.mxu1 %vm580_vm2, %v1614_v45  ;;  %v1640_v17 = vld [vmem:[%s1838_s8 + $0x118] sm:$0xff]  ;;  %v1917_v22 = vld [vmem:[%s2008_s2] ss:$0 sm:$0xff] }
  0x4c   : > { %1510 = vmatmul.msk.bf16.vlgmr.msra.gmra.mxu2 %vm580_vm2, %v1623_v46  ;;  %1573 = vmatmul.msk.bf16.vlgmr.msra.gmra.mxu3 %vm580_vm2, %v1632_v47 }
  0x5b   : > { %1385 = vmatmul.msk.bf16.gmra.mxu0 %vm580_vm2, %v1606_v48  ;;  %1448 = vmatmul.msk.bf16.gmra.mxu1 %vm580_vm2, %v1615_v49 }
  0x5c   : > { %1511 = vmatmul.msk.bf16.gmra.mxu2 %vm580_vm2, %v1624_v50  ;;  %1574 = vmatmul.msk.bf16.gmra.mxu3 %vm580_vm2, %v1633_v51 }
  0x6b   : > { %1386 = vmatmul.msk.bf16.gmra.mxu0 %vm580_vm2, %v1607_v52  ;;  %1449 = vmatmul.msk.bf16.gmra.mxu1 %vm580_vm2, %v1616_v53 }
  0x6c   : > { %1512 = vmatmul.msk.bf16.gmra.mxu2 %vm580_vm2, %v1625_v54  ;;  %1575 = vmatmul.msk.bf16.gmra.mxu3 %vm580_vm2, %v1634_v55 }
  0x7b   : > { %1387 = vmatmul.msk.bf16.gmra.mxu0 %vm580_vm2, %v1608_v56  ;;  %1450 = vmatmul.msk.bf16.gmra.mxu1 %vm580_vm2, %v1617_v57 }
  0x7c   : > { %1513 = vmatmul.msk.bf16.gmra.mxu2 %vm580_vm2, %v1626_v58  ;;  %1576 = vmatmul.msk.bf16.gmra.mxu3 %vm580_vm2, %v1635_v59 }
  0x8b   : > { %1388 = vmatmul.msk.bf16.gmra.mxu0 %vm580_vm2, %v1609_v60  ;;  %1451 = vmatmul.msk.bf16.gmra.mxu1 %vm580_vm2, %v1618_v61 }
  0x8c   : > { %1514 = vmatmul.msk.bf16.gmra.mxu2 %vm580_vm2, %v1627_v62  ;;  %1577 = vmatmul.msk.bf16.gmra.mxu3 %vm580_vm2, %v1636_v63 }
  0x9b   : > { %1389 = vmatmul.msk.bf16.gmra.mxu0 %vm580_vm2, %v1610_v0  ;;  %1452 = vmatmul.msk.bf16.gmra.mxu1 %vm580_vm2, %v1619_v1 }
  0x9c   : > { %1515 = vmatmul.msk.bf16.gmra.mxu2 %vm580_vm2, %v1628_v2  ;;  %1578 = vmatmul.msk.bf16.gmra.mxu3 %vm580_vm2, %v1637_v3 }
  0xab   : > { %1390 = vmatmul.msk.bf16.gmra.mxu0 %vm580_vm2, %v1611_v4  ;;  %1453 = vmatmul.msk.bf16.gmra.mxu1 %vm580_vm2, %v1620_v5 }
  0xac   : > { %1516 = vmatmul.msk.bf16.gmra.mxu2 %vm580_vm2, %v1629_v6  ;;  %1579 = vmatmul.msk.bf16.gmra.mxu3 %vm580_vm2, %v1638_v7 }
  0xbb   : > { %1391 = vmatmul.msk.bf16.gmra.mxu0 %vm580_vm2, %v1612_v8  ;;  %1454 = vmatmul.msk.bf16.gmra.mxu1 %vm580_vm2, %v1621_v9 }
  0xbc   : > { %1517 = vmatmul.msk.bf16.gmra.mxu2 %vm580_vm2, %v1630_v10  ;;  %1580 = vmatmul.msk.bf16.gmra.mxu3 %vm580_vm2, %v1639_v11 }
  0xc8   : > { %v624_v14 = vpop.f32.mrf.mxu0  ;;  %v769_v15 = vpop.f32.mrf.mxu1 }
  0xc9   : > { %v814_v18 = vmax.f32 %v624_v14, %v769_v15 }
  0xcb   : > { %1392 = vmatmul.msk.bf16.gmra.mxu0 %vm580_vm2, %v1613_v12  ;;  %1455 = vmatmul.msk.bf16.gmra.mxu1 %vm580_vm2, %v1622_v13 }
  0xcc   : > { %1518 = vmatmul.msk.bf16.gmra.mxu2 %vm580_vm2, %v1631_v16  ;;  %1581 = vmatmul.msk.bf16.gmra.mxu3 %vm580_vm2, %v1640_v17 }
  0xcf   : > { %v932_v19 = vpop.f32.mrf.mxu2  ;;  %v1095_v20 = vpop.f32.mrf.mxu3 }
  0xd0   : > { %v977_v21 = vmax.f32 %v814_v18, %v932_v19  ;;  %v626_v23 = vpop.f32.mrf.mxu0  ;;  %v771_v24 = vpop.f32.mrf.mxu1 }
  0xd1   : > { %v815_v27 = vmax.f32 %v626_v23, %v771_v24 }
  0xd2   : > { %v1140_v25 = vmax.f32 %v977_v21, %v1095_v20 }
  0xd4   : > { %v1162_v26 = vadd.f32 %v1917_v22, %v1140_v25 }
  0xd6   : > { %vm1180_vm3 = vcmp.gt.f32.partialorder %v1162_v26, 1.0 }
  0xd7   : > { %v1582_v29 = vsel %vm1180_vm3, 1.0, %v1695_v28  ;;  %v934_v30 = vpop.f32.mrf.mxu2  ;;  %v1097_v31 = vpop.f32.mrf.mxu3 }
  0xd8   : > { %v1234_v32 = vpack.c.bf16 %v1582_v29, %v1582_v29  ;;  %v978_v33 = vmax.f32 %v815_v27, %v934_v30  ;;  %v629_v34 = vpop.f32.mrf.mxu0  ;;  %v774_v35 = vpop.f32.mrf.mxu1 }
  0xd9   : > { %v816_v38 = vmax.f32 %v629_v34, %v774_v35 }
  0xda   : > { %1253 = vst.msk [vmem:[%s1923_s17] sm:$0xf] %vm1252_vm4, %v1234_v32  ;;  %v1141_v36 = vmax.f32 %v978_v33, %v1097_v31 }
  0xdc   : > { %v1163_v37 = vadd.f32 %v1917_v22, %v1141_v36 }
  0xde   : > { %vm1181_vm5 = vcmp.gt.f32.partialorder %v1163_v37, 1.0 }
  0xdf   : > { %v1583_v39 = vsel %vm1181_vm5, 1.0, %v1695_v28  ;;  %v937_v40 = vpop.f32.mrf.mxu2  ;;  %v1100_v41 = vpop.f32.mrf.mxu3 }
  0xe0   : > { %v1235_v42 = vpack.c.bf16 %v1583_v39, %v1583_v39  ;;  %v979_v43 = vmax.f32 %v816_v38, %v937_v40  ;;  %v631_v44 = vpop.f32.mrf.mxu0  ;;  %v776_v45 = vpop.f32.mrf.mxu1 }
  0xe1   : > { %v817_v48 = vmax.f32 %v631_v44, %v776_v45 }
  0xe2   : > { %1254 = vst.msk [vmem:[%s1923_s17 + $0x4] sm:$0xf] %vm1252_vm4, %v1235_v42  ;;  %v1142_v46 = vmax.f32 %v979_v43, %v1100_v41 }
  0xe4   : > { %v1164_v47 = vadd.f32 %v1917_v22, %v1142_v46 }
  0xe6   : > { %vm1182_vm6 = vcmp.gt.f32.partialorder %v1164_v47, 1.0 }
  0xe7   : > { %v1584_v49 = vsel %vm1182_vm6, 1.0, %v1695_v28  ;;  %v939_v50 = vpop.f32.mrf.mxu2  ;;  %v1102_v51 = vpop.f32.mrf.mxu3 }
  0xe8   : > { %v1236_v52 = vpack.c.bf16 %v1584_v49, %v1584_v49  ;;  %v980_v53 = vmax.f32 %v817_v48, %v939_v50  ;;  %v634_v54 = vpop.f32.mrf.mxu0  ;;  %v779_v55 = vpop.f32.mrf.mxu1 }
  0xe9   : > { %v818_v58 = vmax.f32 %v634_v54, %v779_v55 }
  0xea   : > { %1255 = vst.msk [vmem:[%s1923_s17 + $0x8] sm:$0xf] %vm1252_vm4, %v1236_v52  ;;  %v1143_v56 = vmax.f32 %v980_v53, %v1102_v51 }
  0xec   : > { %v1165_v57 = vadd.f32 %v1917_v22, %v1143_v56 }
  0xee   : > { %vm1183_vm7 = vcmp.gt.f32.partialorder %v1165_v57, 1.0 }
  0xef   : > { %v1585_v59 = vsel %vm1183_vm7, 1.0, %v1695_v28  ;;  %v942_v60 = vpop.f32.mrf.mxu2  ;;  %v1105_v61 = vpop.f32.mrf.mxu3 }
  0xf0   : > { %v1237_v62 = vpack.c.bf16 %v1585_v59, %v1585_v59  ;;  %v981_v63 = vmax.f32 %v818_v58, %v942_v60  ;;  %v636_v0 = vpop.f32.mrf.mxu0  ;;  %v781_v1 = vpop.f32.mrf.mxu1 }
  0xf1   : > { %v819_v4 = vmax.f32 %v636_v0, %v781_v1 }
  0xf2   : > { %1256 = vst.msk [vmem:[%s1923_s17 + $0xc] sm:$0xf] %vm1252_vm4, %v1237_v62  ;;  %v1144_v2 = vmax.f32 %v981_v63, %v1105_v61 }
  0xf4   : > { %v1166_v3 = vadd.f32 %v1917_v22, %v1144_v2 }
  0xf6   : > { %vm1184_vm8 = vcmp.gt.f32.partialorder %v1166_v3, 1.0 }
  0xf7   : > { %v1586_v5 = vsel %vm1184_vm8, 1.0, %v1695_v28  ;;  %v944_v6 = vpop.f32.mrf.mxu2  ;;  %v1107_v7 = vpop.f32.mrf.mxu3 }
  0xf8   : > { %v1238_v8 = vpack.c.bf16 %v1586_v5, %v1586_v5  ;;  %v982_v9 = vmax.f32 %v819_v4, %v944_v6  ;;  %v639_v10 = vpop.f32.mrf.mxu0  ;;  %v784_v11 = vpop.f32.mrf.mxu1 }
  0xf9   : > { %v820_v14 = vmax.f32 %v639_v10, %v784_v11 }
  0xfa   : > { %1257 = vst.msk [vmem:[%s1923_s17 + $0x10] sm:$0xf] %vm1252_vm4, %v1238_v8  ;;  %v1145_v12 = vmax.f32 %v982_v9, %v1107_v7 }
  0xfc   : > { %v1167_v13 = vadd.f32 %v1917_v22, %v1145_v12 }
  0xfe   : > { %vm1185_vm9 = vcmp.gt.f32.partialorder %v1167_v13, 1.0 }
  0xff   : > { %v1587_v15 = vsel %vm1185_vm9, 1.0, %v1695_v28  ;;  %v947_v16 = vpop.f32.mrf.mxu2  ;;  %v1110_v17 = vpop.f32.mrf.mxu3 }
 0x100   : > { %v1239_v18 = vpack.c.bf16 %v1587_v15, %v1587_v15  ;;  %v983_v19 = vmax.f32 %v820_v14, %v947_v16  ;;  %v641_v20 = vpop.f32.mrf.mxu0  ;;  %v786_v21 = vpop.f32.mrf.mxu1 }
 0x101   : > { %v821_v25 = vmax.f32 %v641_v20, %v786_v21 }
 0x102   : > { %1258 = vst.msk [vmem:[%s1923_s17 + $0x14] sm:$0xf] %vm1252_vm4, %v1239_v18  ;;  %v1146_v23 = vmax.f32 %v983_v19, %v1110_v17 }
 0x104   : > { %v1168_v24 = vadd.f32 %v1917_v22, %v1146_v23 }
 0x106   : > { %vm1186_vm10 = vcmp.gt.f32.partialorder %v1168_v24, 1.0 }
 0x107   : > { %v1588_v26 = vsel %vm1186_vm10, 1.0, %v1695_v28  ;;  %v949_v27 = vpop.f32.mrf.mxu2  ;;  %v1112_v29 = vpop.f32.mrf.mxu3 }
 0x108   : > { %v1240_v30 = vpack.c.bf16 %v1588_v26, %v1588_v26  ;;  %v984_v31 = vmax.f32 %v821_v25, %v949_v27  ;;  %v644_v32 = vpop.f32.mrf.mxu0  ;;  %v789_v33 = vpop.f32.mrf.mxu1 }
 0x109   : > { %v822_v36 = vmax.f32 %v644_v32, %v789_v33 }
 0x10a   : > { %1259 = vst.msk [vmem:[%s1923_s17 + $0x18] sm:$0xf] %vm1252_vm4, %v1240_v30  ;;  %v1147_v34 = vmax.f32 %v984_v31, %v1112_v29 }
 0x10c   : > { %v1169_v35 = vadd.f32 %v1917_v22, %v1147_v34 }
 0x10e   : > { %vm1187_vm11 = vcmp.gt.f32.partialorder %v1169_v35, 1.0 }
 0x10f   : > { %v1589_v37 = vsel %vm1187_vm11, 1.0, %v1695_v28  ;;  %v952_v38 = vpop.f32.mrf.mxu2  ;;  %v1115_v39 = vpop.f32.mrf.mxu3 }
 0x110   : > { %v1241_v40 = vpack.c.bf16 %v1589_v37, %v1589_v37  ;;  %v985_v41 = vmax.f32 %v822_v36, %v952_v38  ;;  %v646_v42 = vpop.f32.mrf.mxu0  ;;  %v791_v43 = vpop.f32.mrf.mxu1 }
 0x111   : > { %v823_v46 = vmax.f32 %v646_v42, %v791_v43 }
 0x112   : > { %1260 = vst.msk [vmem:[%s1923_s17 + $0x1c] sm:$0xf] %vm1252_vm4, %v1241_v40  ;;  %v1148_v44 = vmax.f32 %v985_v41, %v1115_v39 }
 0x114   : > { %v1170_v45 = vadd.f32 %v1917_v22, %v1148_v44 }
 0x116   : > { %vm1188_vm12 = vcmp.gt.f32.partialorder %v1170_v45, 1.0 }
 0x117   : > { %v1590_v47 = vsel %vm1188_vm12, 1.0, %v1695_v28  ;;  %v954_v48 = vpop.f32.mrf.mxu2  ;;  %v1117_v49 = vpop.f32.mrf.mxu3 }
 0x118   : > { %v1242_v50 = vpack.c.bf16 %v1590_v47, %v1590_v47  ;;  %v986_v51 = vmax.f32 %v823_v46, %v954_v48  ;;  %v649_v52 = vpop.f32.mrf.mxu0  ;;  %v794_v53 = vpop.f32.mrf.mxu1 }
 0x119   : > { %v824_v56 = vmax.f32 %v649_v52, %v794_v53 }
 0x11a   : > { %1261 = vst.msk [vmem:[%s1923_s17 + $0x20] sm:$0xf] %vm1252_vm4, %v1242_v50  ;;  %v1149_v54 = vmax.f32 %v986_v51, %v1117_v49 }
 0x11c   : > { %v1171_v55 = vadd.f32 %v1917_v22, %v1149_v54 }
 0x11e   : > { %vm1189_vm13 = vcmp.gt.f32.partialorder %v1171_v55, 1.0 }
 0x11f   : > { %v1591_v57 = vsel %vm1189_vm13, 1.0, %v1695_v28  ;;  %v957_v58 = vpop.f32.mrf.mxu2  ;;  %v1120_v59 = vpop.f32.mrf.mxu3 }
 0x120   : > { %v1243_v60 = vpack.c.bf16 %v1591_v57, %v1591_v57  ;;  %v987_v61 = vmax.f32 %v824_v56, %v957_v58  ;;  %v651_v62 = vpop.f32.mrf.mxu0  ;;  %v796_v63 = vpop.f32.mrf.mxu1 }
 0x121   : > { %v825_v2 = vmax.f32 %v651_v62, %v796_v63 }
 0x122   : > { %1262 = vst.msk [vmem:[%s1923_s17 + $0x24] sm:$0xf] %vm1252_vm4, %v1243_v60  ;;  %v1150_v0 = vmax.f32 %v987_v61, %v1120_v59 }
 0x124   : > { %v1172_v1 = vadd.f32 %v1917_v22, %v1150_v0 }
 0x126   : > { %vm1190_vm14 = vcmp.gt.f32.partialorder %v1172_v1, 1.0 }
 0x127   : > { %v1592_v3 = vsel %vm1190_vm14, 1.0, %v1695_v28  ;;  %v959_v4 = vpop.f32.mrf.mxu2  ;;  %v1122_v5 = vpop.f32.mrf.mxu3 }
 0x128   : > { %v1244_v6 = vpack.c.bf16 %v1592_v3, %v1592_v3  ;;  %v988_v7 = vmax.f32 %v825_v2, %v959_v4  ;;  %v654_v8 = vpop.f32.mrf.mxu0  ;;  %v799_v9 = vpop.f32.mrf.mxu1 }
 0x129   : > { %v826_v12 = vmax.f32 %v654_v8, %v799_v9 }
 0x12a   : > { %1263 = vst.msk [vmem:[%s1923_s17 + $0x28] sm:$0xf] %vm1252_vm4, %v1244_v6  ;;  %v1151_v10 = vmax.f32 %v988_v7, %v1122_v5 }
 0x12c   : > { %v1173_v11 = vadd.f32 %v1917_v22, %v1151_v10 }
 0x12e   : > { %vm1191_vm15 = vcmp.gt.f32.partialorder %v1173_v11, 1.0 }
 0x12f   : > { %v1593_v13 = vsel %vm1191_vm15, 1.0, %v1695_v28  ;;  %v962_v14 = vpop.f32.mrf.mxu2  ;;  %v1125_v15 = vpop.f32.mrf.mxu3 }
 0x130   : > { %v1245_v16 = vpack.c.bf16 %v1593_v13, %v1593_v13  ;;  %v989_v17 = vmax.f32 %v826_v12, %v962_v14  ;;  %v656_v18 = vpop.f32.mrf.mxu0  ;;  %v801_v19 = vpop.f32.mrf.mxu1 }
 0x131   : > { %v827_v23 = vmax.f32 %v656_v18, %v801_v19 }
 0x132   : > { %1264 = vst.msk [vmem:[%s1923_s17 + $0x2c] sm:$0xf] %vm1252_vm4, %v1245_v16  ;;  %v1152_v20 = vmax.f32 %v989_v17, %v1125_v15 }
 0x134   : > { %v1174_v21 = vadd.f32 %v1917_v22, %v1152_v20 }
 0x136   : > { %vm1192_vm0 = vcmp.gt.f32.partialorder %v1174_v21, 1.0 }
 0x137   : > { %v1594_v24 = vsel %vm1192_vm0, 1.0, %v1695_v28  ;;  %v964_v25 = vpop.f32.mrf.mxu2  ;;  %v1127_v26 = vpop.f32.mrf.mxu3 }
 0x138   : > { %v1246_v27 = vpack.c.bf16 %v1594_v24, %v1594_v24  ;;  %v990_v29 = vmax.f32 %v827_v23, %v964_v25  ;;  %v659_v30 = vpop.f32.mrf.mxu0  ;;  %v804_v31 = vpop.f32.mrf.mxu1 }
 0x139   : > { %v828_v34 = vmax.f32 %v659_v30, %v804_v31 }
 0x13a   : > { %1265 = vst.msk [vmem:[%s1923_s17 + $0x30] sm:$0xf] %vm1252_vm4, %v1246_v27  ;;  %v1153_v32 = vmax.f32 %v990_v29, %v1127_v26 }
 0x13c   : > { %v1175_v33 = vadd.f32 %v1917_v22, %v1153_v32 }
 0x13e   : > { %vm1193_vm1 = vcmp.gt.f32.partialorder %v1175_v33, 1.0 }
 0x13f   : > { %v1595_v35 = vsel %vm1193_vm1, 1.0, %v1695_v28  ;;  %v967_v36 = vpop.f32.mrf.mxu2  ;;  %v1130_v37 = vpop.f32.mrf.mxu3 }
 0x140   : > { %v1247_v38 = vpack.c.bf16 %v1595_v35, %v1595_v35  ;;  %v991_v39 = vmax.f32 %v828_v34, %v967_v36  ;;  %v661_v40 = vpop.f32.mrf.mxu0  ;;  %v806_v41 = vpop.f32.mrf.mxu1 }
 0x141   : > { %v829_v44 = vmax.f32 %v661_v40, %v806_v41 }
 0x142   : > { %1266 = vst.msk [vmem:[%s1923_s17 + $0x34] sm:$0xf] %vm1252_vm4, %v1247_v38  ;;  %v1154_v42 = vmax.f32 %v991_v39, %v1130_v37 }
 0x144   : > { %v1176_v43 = vadd.f32 %v1917_v22, %v1154_v42 }
 0x146   : > { %vm1194_vm2 = vcmp.gt.f32.partialorder %v1176_v43, 1.0 }
 0x147   : > { %v1596_v45 = vsel %vm1194_vm2, 1.0, %v1695_v28  ;;  %v969_v46 = vpop.f32.mrf.mxu2  ;;  %v1132_v47 = vpop.f32.mrf.mxu3 }
 0x148   : > { %v1248_v48 = vpack.c.bf16 %v1596_v45, %v1596_v45  ;;  %v992_v49 = vmax.f32 %v829_v44, %v969_v46  ;;  %v664_v50 = vpop.f32.mrf.mxu0  ;;  %v809_v51 = vpop.f32.mrf.mxu1 }
 0x149   : > { %v830_v54 = vmax.f32 %v664_v50, %v809_v51 }
 0x14a   : > { %1267 = vst.msk [vmem:[%s1923_s17 + $0x38] sm:$0xf] %vm1252_vm4, %v1248_v48  ;;  %v1155_v52 = vmax.f32 %v992_v49, %v1132_v47 }
 0x14c   : > { %v1177_v53 = vadd.f32 %v1917_v22, %v1155_v52 }
 0x14e   : > { %vm1195_vm3 = vcmp.gt.f32.partialorder %v1177_v53, 1.0 }
 0x14f   : > { %v1597_v55 = vsel %vm1195_vm3, 1.0, %v1695_v28  ;;  %v972_v56 = vpop.f32.mrf.mxu2  ;;  %v1135_v57 = vpop.f32.mrf.mxu3 }
 0x150   : > { %v1249_v58 = vpack.c.bf16 %v1597_v55, %v1597_v55  ;;  %v993_v59 = vmax.f32 %v830_v54, %v972_v56  ;;  %v666_v61 = vpop.f32.mrf.mxu0  ;;  %v811_v62 = vpop.f32.mrf.mxu1 }
 0x151   : > { %v831_v0 = vmax.f32 %v666_v61, %v811_v62 }
 0x152   : > { %1268 = vst.msk [vmem:[%s1923_s17 + $0x3c] sm:$0xf] %vm1252_vm4, %v1249_v58  ;;  %v1156_v60 = vmax.f32 %v993_v59, %v1135_v57 }
 0x154   : > { %v1178_v63 = vadd.f32 %v1917_v22, %v1156_v60 }
 0x156   : > { %vm1196_vm5 = vcmp.gt.f32.partialorder %v1178_v63, 1.0 }
 0x157   : > { %v1598_v1 = vsel %vm1196_vm5, 1.0, %v1695_v28  ;;  %v974_v2 = vpop.f32.mrf.mxu2  ;;  %v1137_v5 = vpop.f32.mrf.mxu3 }
 0x158   : > { %v1250_v3 = vpack.c.bf16 %v1598_v1, %v1598_v1  ;;  %v994_v4 = vmax.f32 %v831_v0, %v974_v2 }
 0x15a   : > { %1269 = vst.msk [vmem:[%s1923_s17 + $0x40] sm:$0xf] %vm1252_vm4, %v1250_v3  ;;  %v1157_v6 = vmax.f32 %v994_v4, %v1137_v5 }
 0x15c   : > { %v1179_v7 = vadd.f32 %v1917_v22, %v1157_v6 }
 0x15e   : > { %vm1197_vm6 = vcmp.gt.f32.partialorder %v1179_v7, 1.0 }
 0x15f   : > { %v1599_v8 = vsel %vm1197_vm6, 1.0, %v1695_v28 }
 0x160   : > { %v1251_v9 = vpack.c.bf16 %v1599_v8, %v1599_v8 }
 0x162   : > { %1270 = vst.msk [vmem:[%s1923_s17 + $0x44] sm:$0xf] %vm1252_vm4, %v1251_v9 }
 0x163 PF: > { %p10_p9 = scmp.ge.s32.totalorder %s1733_s16, 4   ;;  %s2010_s12 = smov %s1688_s13 }
 0x164   : > { %s2011_s13 = smov %s1742_s19  ;;  %s2012_s14 = smov %s1733_s16 }
 0x165   :  { %12 = sbr.rel (!%p10_p9) target bundleno = 2 (0x2), region = 111 }

// kernel: net_forward.3
= control target key start
LH: loop header
LB: loop body
LE: loop exit
PB: predicated region body
PF: predicated region fallthrough
CT: control target
= control target key end

     0   :  { %12 = vsyncpa [#allocation3], 0  ;;  %vm187_vm0 = vcmask 1045504   ;;  %s8687_s0 = inlined_call_operand.vmem [shape: bf16[16,4,2,300], index: 0, kind: input, shape index: {}]   ;;  %s8688_s1 = inlined_call_operand.vmem [shape: bf16[300,128], index: 1, kind: input, shape index: {}]   ;;  %s8689_s2 = inlined_call_operand.vmem [shape: f32[1,128], index: 2, kind: input, shape index: {}]   ;;  %s8690_s3 = inlined_call_operand.vmem [shape: bf16[16,128,128], index: 3, kind: input, shape index: {}]   ;;  %s8691_s4 = inlined_call_operand.vmem [shape: f32[1,128], index: 4, kind: input, shape index: {}]   ;;  %s8692_s5 = inlined_call_operand.hbm [shape: f32[2,128], index: 5, kind: output, shape index: {0}]   ;;  %s8693_s6 = inlined_call_operand.hbm [shape: f32[2,128], index: 6, kind: output, shape index: {1}]  }
   0x1   :  { %v6141_v0 = vld [vmem:[%s8688_s1 + $0x38] sm:$0xff]  ;;  %v4889_v1 = vld [vmem:[%s8688_s1 + $0x90] sm:$0xf]  ;;  %v5837_v2 = vld [vmem:[%s8688_s1 + $0x90] sm:$0x30] }
   0x2   :  { %v4890_v3 = vor.u32 %v5837_v2, %v4889_v1  ;;  %v6152_v4 = vld [vmem:[%s8688_s1 + $0x78] sm:$0xff]  ;;  %241 = vmatpush.bf16.msra.mxu3 %v6141_v0  ;;  %v6158_v5 = vld [vmem:[%s8688_s1 + $0x30] sm:$0xff]  ;;  %191 = vmatpush.bf16.msra.mxu0 %v6141_v0  ;;  %v6173_v8 = vld [vmem:[%s8688_s1 + $0x88] sm:$0xff] }
   0x3   :  { %204 = vmatpush.bf16.msra.mxu1 %v6152_v4  ;;  %v6167_v7 = vld [vmem:[%s8688_s1 + $0x70] sm:$0xff]  ;;  %v63_v9 = vld [vmem:[%s8687_s0] sm:$0x7]  ;;  %v6182_v10 = vld [vmem:[%s8688_s1 + $0x28] sm:$0xff] }
   0x4   :  { %v6161_v6 = vsel %vm187_vm0, %v4890_v3, 0  ;;  %65 = vst [vmem:[#allocation1] ss:$9 sm:$0xff] %v63_v9  ;;  %v6189_v11 = vld [vmem:[%s8688_s1 + $0x68] sm:$0xff]  ;;  %v6195_v12 = vld [vmem:[%s8688_s1 + $0x80] sm:$0xff] }
   0x5   :  { %222 = vmatpush.bf16.msra.mxu2 %v6161_v6 }
   0x6   :  { %242 = vmatpush.bf16.msra.mxu3 %v6158_v5  ;;  %192 = vmatpush.bf16.msra.mxu0 %v6158_v5 }
   0x7   :  { %205 = vmatpush.bf16.msra.mxu1 %v6167_v7 }
   0x9   :  { %223 = vmatpush.bf16.msra.mxu2 %v6173_v8 }
   0xa   :  { %13 = vsyncpa [#allocation5], 0  ;;  %243 = vmatpush.bf16.msra.mxu3 %v6182_v10  ;;  %v6201_v13 = vld [vmem:[%s8688_s1 + $0x20] sm:$0xff]  ;;  %193 = vmatpush.bf16.msra.mxu0 %v6182_v10  ;;  %vm184_vm1 = vcmask 359424   ;;  %v6219_v19 = vld [vmem:[%s8688_s1 + $0x18] sm:$0xff]  ;;  %s6100_s14 = smov [#allocation4]  }
   0xb   :  { %206 = vmatpush.bf16.msra.mxu1 %v6189_v11  ;;  %v6208_v14 = vld [vmem:[%s8688_s1 + $0x60] sm:$0xff]  ;;  %v67_v17 = vld [vmem:[#allocation1 + $0x9] sm:$0xff]  ;;  %v68_v18 = vld [vmem:[#allocation1 + $0x12] sm:$0xff]  ;;  %s4799_s15 = sshll.u32 %s6100_s14, 4  ;;  %s4801_s18 = sshll.u32 %s8693_s6, 4  ;;  %s4800_s15 = int_to_ptr.vmem [resolvable:$true] %s4799_s15  ;;  %s4802_s18 = int_to_ptr.hbm [resolvable:$true] %s4801_s18 }
   0xc   :  { %v4892_v15 = vld [vmem:[%s8687_s0 + $0x3] sm:$0x7]  ;;  %v6226_v20 = vld [vmem:[%s8688_s1 + $0x58] sm:$0xff]  ;;  %v6234_v21 = vld [vmem:[%s8688_s1 + $0x10] sm:$0xff]  ;;  %s6101_s19 = smov [#allocation2]   ;;  %s4790_s23 = sshll.u32 %s8692_s5, 4  ;;  %s4791_s23 = int_to_ptr.hbm [resolvable:$true] %s4790_s23 }
   0xd   :  { %224 = vmatpush.bf16.msra.mxu2 %v6195_v12  ;;  %v66_v16 = vld [vmem:[#allocation1] sm:$0xff]  ;;  %v6241_v22 = vld [vmem:[%s8688_s1 + $0x50] sm:$0xff]  ;;  %v6248_v23 = vld [vmem:[%s8688_s1 + $0x8] sm:$0xff]  ;;  %s4788_s20 = sshll.u32 %s6101_s19, 4  ;;  %s4789_s20 = int_to_ptr.vmem [resolvable:$true] %s4788_s20 }
   0xe   :  { %244 = vmatpush.bf16.msra.mxu3 %v6201_v13  ;;  %194 = vmatpush.bf16.msra.mxu0 %v6201_v13  ;;  %233 = vst [vmem:[#allocation1] ss:$9 sm:$0xff] %v4892_v15  ;;  %v6255_v24 = vld [vmem:[%s8688_s1 + $0x48] sm:$0xff]  ;;  %v6265_v29 = vld [vmem:[%s8688_s1] sm:$0xff]  ;;  %v4903_v46 = vld [vmem:[%s8687_s0 + $0x12] sm:$0x7] }
   0xf   :  { %207 = vmatpush.bf16.msra.mxu1 %v6208_v14  ;;  %v4894_v28 = vld [vmem:[%s8687_s0 + $0x6] sm:$0x7]  ;;  %v4896_v34 = vld [vmem:[%s8687_s0 + $0x9] sm:$0x7]  ;;  %v4899_v38 = vld [vmem:[%s8687_s0 + $0xc] sm:$0x7] }
  0x10   :  { %4891 = vmatmul.msk.bf16.vlgmr.msra.gmra.mxu2 %vm184_vm1, %v68_v18  ;;  %v6272_v30 = vld [vmem:[%s8688_s1 + $0x40] sm:$0xff]  ;;  %v4901_v42 = vld [vmem:[%s8687_s0 + $0xf] sm:$0x7]  ;;  %v4905_v50 = vld [vmem:[%s8687_s0 + $0x15] sm:$0x7] }
  0x11   :  { %254 = vmatpush.bf16.msrb.mxu2 %v6152_v4  ;;  %v5845_v55 = vld [vmem:[%s8690_s3 + $0x38] sm:$0xff]  ;;  %v5844_v59 = vld [vmem:[%s8690_s3 + $0x30] sm:$0xff]  ;;  %v5843_v60 = vld [vmem:[%s8690_s3 + $0x28] sm:$0xff] }
  0x12   :  { %245 = vmatpush.bf16.msra.mxu3 %v6219_v19  ;;  %195 = vmatpush.bf16.msra.mxu0 %v6219_v19  ;;  %v5842_v1 = vld [vmem:[%s8690_s3 + $0x20] sm:$0xff]  ;;  %v5841_v9 = vld [vmem:[%s8690_s3 + $0x18] sm:$0xff]  ;;  %v5840_v15 = vld [vmem:[%s8690_s3 + $0x10] sm:$0xff] }
  0x13   :  { %208 = vmatpush.bf16.msra.mxu1 %v6226_v20  ;;  %v5839_v18 = vld [vmem:[%s8690_s3 + $0x8] sm:$0xff] }
  0x15   :  { %255 = vmatpush.bf16.msrb.mxu2 %v6167_v7  ;;  %v234_v25 = vld [vmem:[#allocation1] sm:$0xff]  ;;  %v235_v26 = vld [vmem:[#allocation1 + $0x9] sm:$0xff]  ;;  %v236_v27 = vld [vmem:[#allocation1 + $0x12] sm:$0xff] }
  0x16   :  { %246 = vmatpush.bf16.msra.mxu3 %v6234_v21  ;;  %196 = vmatpush.bf16.msra.mxu0 %v6234_v21  ;;  %284 = vst [vmem:[#allocation1] ss:$9 sm:$0xff] %v4894_v28 }
  0x17   :  { %209 = vmatpush.bf16.msra.mxu1 %v6241_v22 }
  0x19   :  { %256 = vmatpush.bf16.msrb.mxu2 %v6189_v11 }
  0x1a   :  { %247 = vmatpush.bf16.msra.mxu3 %v6248_v23  ;;  %197 = vmatpush.bf16.msra.mxu0 %v6248_v23 }
  0x1b   :  { %210 = vmatpush.bf16.msra.mxu1 %v6255_v24 }
  0x1d   :  { %257 = vmatpush.bf16.msrb.mxu2 %v6208_v14  ;;  %v287_v31 = vld [vmem:[#allocation1 + $0x12] sm:$0xff]  ;;  %v285_v32 = vld [vmem:[#allocation1] sm:$0xff]  ;;  %v286_v33 = vld [vmem:[#allocation1 + $0x9] sm:$0xff] }
  0x1e   :  { %248 = vmatpush.bf16.msra.mxu3 %v6265_v29  ;;  %198 = vmatpush.bf16.msra.mxu0 %v6265_v29  ;;  %335 = vst [vmem:[#allocation1] ss:$9 sm:$0xff] %v4896_v34 }
  0x1f   :  { %211 = vmatpush.bf16.msra.mxu1 %v6272_v30 }
  0x21   :  { %258 = vmatpush.bf16.msrb.mxu2 %v6226_v20  ;;  %249 = vmatmul.bf16.vlgmr.msra.gmra.mxu3 %v234_v25  ;;  %v5838_v25 = vld [vmem:[%s8690_s3] sm:$0xff] }
  0x22   :  { %272 = vmatpush.bf16.msrb.mxu3 %v6161_v6  ;;  %343 = vmatpush.bf16.msrb.mxu0 %v6141_v0 }
  0x23   :  { %292 = vmatpush.bf16.msrb.mxu1 %v6141_v0  ;;  %199 = vmatmul.bf16.vlgmr.msra.gmra.mxu0 %v66_v16 }
  0x24   :  { %212 = vmatmul.bf16.vlgmr.msra.gmra.mxu1 %v67_v17 }
  0x25   :  { %259 = vmatpush.bf16.msrb.mxu2 %v6241_v22  ;;  %v337_v35 = vld [vmem:[#allocation1 + $0x9] sm:$0xff]  ;;  %v338_v36 = vld [vmem:[#allocation1 + $0x12] sm:$0xff]  ;;  %v336_v37 = vld [vmem:[#allocation1] sm:$0xff] }
  0x26   :  { %273 = vmatpush.bf16.msrb.mxu3 %v6173_v8  ;;  %344 = vmatpush.bf16.msrb.mxu0 %v6158_v5  ;;  %411 = vst [vmem:[#allocation1] ss:$9 sm:$0xff] %v4899_v38 }
  0x27   :  { %293 = vmatpush.bf16.msrb.mxu1 %v6158_v5 }
  0x29   :  { %260 = vmatpush.bf16.msrb.mxu2 %v6255_v24 }
  0x2a   :  { %274 = vmatpush.bf16.msrb.mxu3 %v6195_v12  ;;  %345 = vmatpush.bf16.msrb.mxu0 %v6182_v10 }
  0x2b   :  { %294 = vmatpush.bf16.msrb.mxu1 %v6182_v10 }
  0x2d   :  { %261 = vmatpush.bf16.msrb.mxu2 %v6272_v30  ;;  %v413_v39 = vld [vmem:[#allocation1 + $0x9] sm:$0xff]  ;;  %v412_v40 = vld [vmem:[#allocation1] sm:$0xff]  ;;  %v414_v41 = vld [vmem:[#allocation1 + $0x12] sm:$0xff] }
  0x2e   :  { %305 = vmatpush.bf16.msra.mxu3 %v6152_v4  ;;  %346 = vmatpush.bf16.msrb.mxu0 %v6201_v13  ;;  %461 = vst [vmem:[#allocation1] ss:$9 sm:$0xff] %v4901_v42 }
  0x2f   :  { %295 = vmatpush.bf16.msrb.mxu1 %v6201_v13 }
  0x30   :  { %262 = vmatmul.bf16.vlgmr.msrb.gmra.mxu2 %v235_v26 }
  0x31   :  { %323 = vmatpush.bf16.msra.mxu2 %v6161_v6  ;;  %4893 = vmatmul.msk.bf16.vlgmr.msrb.gmra.mxu3 %vm184_vm1, %v236_v27 }
  0x32   :  { %306 = vmatpush.bf16.msra.mxu3 %v6167_v7  ;;  %347 = vmatpush.bf16.msrb.mxu0 %v6219_v19 }
  0x33   :  { %296 = vmatpush.bf16.msrb.mxu1 %v6219_v19 }
  0x35   :  { %324 = vmatpush.bf16.msra.mxu2 %v6173_v8  ;;  %v462_v43 = vld [vmem:[#allocation1] sm:$0xff]  ;;  %v464_v44 = vld [vmem:[#allocation1 + $0x12] sm:$0xff]  ;;  %v463_v45 = vld [vmem:[#allocation1 + $0x9] sm:$0xff] }
  0x36   :  { %307 = vmatpush.bf16.msra.mxu3 %v6189_v11  ;;  %348 = vmatpush.bf16.msrb.mxu0 %v6234_v21  ;;  %512 = vst [vmem:[#allocation1] ss:$9 sm:$0xff] %v4903_v46 }
  0x37   :  { %297 = vmatpush.bf16.msrb.mxu1 %v6234_v21 }
  0x39   :  { %325 = vmatpush.bf16.msra.mxu2 %v6195_v12 }
  0x3a   :  { %308 = vmatpush.bf16.msra.mxu3 %v6208_v14  ;;  %349 = vmatpush.bf16.msrb.mxu0 %v6248_v23 }
  0x3b   :  { %298 = vmatpush.bf16.msrb.mxu1 %v6248_v23 }
  0x3d   :  { %356 = vmatpush.bf16.msrb.mxu2 %v6152_v4  ;;  %v514_v47 = vld [vmem:[#allocation1 + $0x9] sm:$0xff]  ;;  %v515_v48 = vld [vmem:[#allocation1 + $0x12] sm:$0xff]  ;;  %v513_v49 = vld [vmem:[#allocation1] sm:$0xff] }
  0x3e   :  { %309 = vmatpush.bf16.msra.mxu3 %v6226_v20  ;;  %350 = vmatpush.bf16.msrb.mxu0 %v6265_v29  ;;  %563 = vst [vmem:[#allocation1] ss:$9 sm:$0xff] %v4905_v50  ;;  %v6489_v50 = vld [vmem:[%s8689_s2] ss:$0 sm:$0xff] }
  0x3f   :  { %299 = vmatpush.bf16.msrb.mxu1 %v6265_v29 }
  0x40   :  { %4895 = vmatmul.msk.bf16.vlgmr.msra.gmra.mxu2 %vm184_vm1, %v287_v31 }
  0x41   :  { %357 = vmatpush.bf16.msrb.mxu2 %v6167_v7  ;;  %351 = vmatmul.bf16.vlgmr.msrb.gmra.mxu0 %v336_v37 }
  0x42   :  { %310 = vmatpush.bf16.msra.mxu3 %v6241_v22  ;;  %432 = vmatpush.bf16.msra.mxu0 %v6152_v4 }
  0x43   :  { %374 = vmatpush.bf16.msra.mxu1 %v6161_v6 }
  0x44   :  { %300 = vmatmul.bf16.vlgmr.msrb.gmra.mxu1 %v285_v32 }
  0x45   :  { %358 = vmatpush.bf16.msrb.mxu2 %v6189_v11  ;;  %v564_v51 = vld [vmem:[#allocation1] sm:$0xff]  ;;  %v566_v52 = vld [vmem:[#allocation1 + $0x12] sm:$0xff]  ;;  %v565_v53 = vld [vmem:[#allocation1 + $0x9] sm:$0xff] }
  0x46   :  { %311 = vmatpush.bf16.msra.mxu3 %v6255_v24  ;;  %433 = vmatpush.bf16.msra.mxu0 %v6167_v7 }
  0x47   :  { %375 = vmatpush.bf16.msra.mxu1 %v6173_v8 }
  0x49   :  { %359 = vmatpush.bf16.msrb.mxu2 %v6208_v14 }
  0x4a   :  { %312 = vmatpush.bf16.msra.mxu3 %v6272_v30  ;;  %434 = vmatpush.bf16.msra.mxu0 %v6189_v11 }
  0x4b   :  { %376 = vmatpush.bf16.msra.mxu1 %v6195_v12 }
  0x4d   :  { %360 = vmatpush.bf16.msrb.mxu2 %v6226_v20  ;;  %313 = vmatmul.bf16.vlgmr.msra.gmra.mxu3 %v286_v33 }
  0x4e   :  { %419 = vmatpush.bf16.msrb.mxu3 %v6141_v0  ;;  %435 = vmatpush.bf16.msra.mxu0 %v6208_v14 }
  0x4f   :  { %450 = vmatpush.bf16.msrb.mxu1 %v6161_v6 }
  0x51   :  { %361 = vmatpush.bf16.msrb.mxu2 %v6241_v22 }
  0x52   :  { %420 = vmatpush.bf16.msrb.mxu3 %v6158_v5  ;;  %436 = vmatpush.bf16.msra.mxu0 %v6226_v20 }
  0x53   :  { %451 = vmatpush.bf16.msrb.mxu1 %v6173_v8 }
  0x54   :  { %4897 = vmatmul.msk.bf16.vlgmr.msra.gmra.mxu1 %vm184_vm1, %v338_v36 }
  0x55   :  { %362 = vmatpush.bf16.msrb.mxu2 %v6255_v24 }
  0x56   :  { %421 = vmatpush.bf16.msrb.mxu3 %v6182_v10  ;;  %437 = vmatpush.bf16.msra.mxu0 %v6241_v22 }
  0x57   :  { %452 = vmatpush.bf16.msrb.mxu1 %v6195_v12 }
  0x59   :  { %363 = vmatpush.bf16.msrb.mxu2 %v6272_v30 }
  0x5a   :  { %422 = vmatpush.bf16.msrb.mxu3 %v6201_v13  ;;  %438 = vmatpush.bf16.msra.mxu0 %v6255_v24 }
  0x5b   :  { %482 = vmatpush.bf16.msra.mxu1 %v6152_v4 }
  0x5c   :  { %364 = vmatmul.bf16.vlgmr.msrb.gmra.mxu2 %v337_v35 }
  0x5d   :  { %469 = vmatpush.bf16.msra.mxu2 %v6141_v0 }
  0x5e   :  { %423 = vmatpush.bf16.msrb.mxu3 %v6219_v19  ;;  %439 = vmatpush.bf16.msra.mxu0 %v6272_v30 }
  0x5f   :  { %483 = vmatpush.bf16.msra.mxu1 %v6167_v7 }
  0x61   :  { %470 = vmatpush.bf16.msra.mxu2 %v6158_v5  ;;  %440 = vmatmul.bf16.vlgmr.msra.gmra.mxu0 %v413_v39 }
  0x62   :  { %424 = vmatpush.bf16.msrb.mxu3 %v6234_v21  ;;  %520 = vmatpush.bf16.msrb.mxu0 %v6141_v0 }
  0x63   :  { %484 = vmatpush.bf16.msra.mxu1 %v6189_v11 }
  0x64   :  { %4900 = vmatmul.msk.bf16.vlgmr.msrb.gmra.mxu1 %vm184_vm1, %v414_v41 }
  0x65   :  { %471 = vmatpush.bf16.msra.mxu2 %v6182_v10 }
  0x66   :  { %425 = vmatpush.bf16.msrb.mxu3 %v6248_v23  ;;  %521 = vmatpush.bf16.msrb.mxu0 %v6158_v5 }
  0x67   :  { %485 = vmatpush.bf16.msra.mxu1 %v6208_v14 }
  0x69   :  { %472 = vmatpush.bf16.msra.mxu2 %v6201_v13 }
  0x6a   :  { %426 = vmatpush.bf16.msrb.mxu3 %v6265_v29  ;;  %522 = vmatpush.bf16.msrb.mxu0 %v6182_v10 }
  0x6b   :  { %486 = vmatpush.bf16.msra.mxu1 %v6226_v20 }
  0x6d   :  { %473 = vmatpush.bf16.msra.mxu2 %v6219_v19  ;;  %427 = vmatmul.bf16.vlgmr.msrb.gmra.mxu3 %v412_v40 }
  0x6e   :  { %500 = vmatpush.bf16.msra.mxu3 %v6161_v6  ;;  %523 = vmatpush.bf16.msrb.mxu0 %v6201_v13 }
  0x6f   :  { %487 = vmatpush.bf16.msra.mxu1 %v6241_v22 }
  0x71   :  { %474 = vmatpush.bf16.msra.mxu2 %v6234_v21 }
  0x72   :  { %501 = vmatpush.bf16.msra.mxu3 %v6173_v8  ;;  %524 = vmatpush.bf16.msrb.mxu0 %v6219_v19 }
  0x73   :  { %488 = vmatpush.bf16.msra.mxu1 %v6255_v24 }
  0x75   :  { %475 = vmatpush.bf16.msra.mxu2 %v6248_v23 }
  0x76   :  { %502 = vmatpush.bf16.msra.mxu3 %v6195_v12  ;;  %525 = vmatpush.bf16.msrb.mxu0 %v6234_v21 }
  0x77   :  { %489 = vmatpush.bf16.msra.mxu1 %v6272_v30 }
  0x79   :  { %476 = vmatpush.bf16.msra.mxu2 %v6265_v29 }
  0x7a   :  { %533 = vmatpush.bf16.msrb.mxu3 %v6152_v4  ;;  %490 = vmatmul.bf16.vlgmr.msra.gmra.mxu1 %v463_v45 }
  0x7b   :  { %571 = vmatpush.bf16.msrb.mxu1 %v6141_v0  ;;  %526 = vmatpush.bf16.msrb.mxu0 %v6248_v23 }
  0x7c   :  { %477 = vmatmul.bf16.vlgmr.msra.gmra.mxu2 %v462_v43 }
  0x7d   :  { %551 = vmatpush.bf16.msrb.mxu2 %v6161_v6  ;;  %4902 = vmatmul.msk.bf16.vlgmr.msra.gmra.mxu3 %vm184_vm1, %v464_v44 }
  0x7e   :  { %534 = vmatpush.bf16.msrb.mxu3 %v6167_v7 }
  0x7f   :  { %572 = vmatpush.bf16.msrb.mxu1 %v6158_v5  ;;  %527 = vmatpush.bf16.msrb.mxu0 %v6265_v29 }
  0x81   :  { %552 = vmatpush.bf16.msrb.mxu2 %v6173_v8 }
  0x82   :  { %535 = vmatpush.bf16.msrb.mxu3 %v6189_v11  ;;  %528 = vmatmul.bf16.vlgmr.msrb.gmra.mxu0 %v513_v49 }
  0x83   :  { %573 = vmatpush.bf16.msrb.mxu1 %v6182_v10  ;;  %602 = vmatpush.bf16.msra.mxu0 %v6161_v6 }
  0x85   :  { %553 = vmatpush.bf16.msrb.mxu2 %v6195_v12 }
  0x86   :  { %536 = vmatpush.bf16.msrb.mxu3 %v6208_v14 }
  0x87   :  { %574 = vmatpush.bf16.msrb.mxu1 %v6201_v13  ;;  %603 = vmatpush.bf16.msra.mxu0 %v6173_v8 }
  0x89   :  { %584 = vmatpush.bf16.msra.mxu2 %v6152_v4 }
  0x8a   :  { %537 = vmatpush.bf16.msrb.mxu3 %v6226_v20 }
  0x8b   :  { %575 = vmatpush.bf16.msrb.mxu1 %v6219_v19  ;;  %604 = vmatpush.bf16.msra.mxu0 %v6195_v12 }
  0x8c   :  { %4904 = vmatmul.msk.bf16.vlgmr.msrb.gmra.mxu2 %vm184_vm1, %v515_v48 }
  0x8d   :  { %585 = vmatpush.bf16.msra.mxu2 %v6167_v7 }
  0x8e   :  { %538 = vmatpush.bf16.msrb.mxu3 %v6241_v22 }
  0x8f   :  { %576 = vmatpush.bf16.msrb.mxu1 %v6234_v21  ;;  %742 = vmatpush.bf16.msrb.mxu0 %v5845_v55  ;;  %v6099_v55 = vmov 1.0|1.0  }
  0x91   :  { %586 = vmatpush.bf16.msra.mxu2 %v6189_v11 }
  0x92   :  { %539 = vmatpush.bf16.msrb.mxu3 %v6255_v24  ;;  %4906 = vmatmul.msk.bf16.vlgmr.msra.gmra.mxu0 %vm184_vm1, %v566_v52 }
  0x93   :  { %577 = vmatpush.bf16.msrb.mxu1 %v6248_v23  ;;  %v6422_v54 = vpop.f32.mrf.mxu2  ;;  %743 = vmatpush.bf16.msrb.mxu0 %v5844_v59 }
  0x95   :  { %587 = vmatpush.bf16.msra.mxu2 %v6208_v14 }
  0x96   :  { %540 = vmatpush.bf16.msrb.mxu3 %v6272_v30 }
  0x97   :  { %578 = vmatpush.bf16.msrb.mxu1 %v6265_v29  ;;  %744 = vmatpush.bf16.msrb.mxu0 %v5843_v60 }
  0x99   :  { %588 = vmatpush.bf16.msra.mxu2 %v6226_v20  ;;  %541 = vmatmul.bf16.vlgmr.msrb.gmra.mxu3 %v514_v47 }
  0x9a   :  { %579 = vmatmul.bf16.vlgmr.msrb.gmra.mxu1 %v564_v51 }
  0x9b   :  { %766 = vmatpush.bf16.msra.mxu1 %v6141_v0  ;;  %v228_v56 = vpop.f32.mrf.mxu2  ;;  %745 = vmatpush.bf16.msrb.mxu0 %v5842_v1 }
  0x9d   :  { %589 = vmatpush.bf16.msra.mxu2 %v6241_v22 }
  0x9f   :  { %767 = vmatpush.bf16.msra.mxu1 %v6158_v5  ;;  %746 = vmatpush.bf16.msrb.mxu0 %v5841_v9  ;;  %v5849_v9 = vld [vmem:[%s8690_s3 + $0x58] sm:$0xff] }
  0xa0   :  { %v200_v57 = vpop.f32.mrf.mxu0 }
  0xa1   :  { %590 = vmatpush.bf16.msra.mxu2 %v6255_v24  ;;  %v213_v58 = vpop.f32.mrf.mxu1 }
  0xa2   :  { %v214_v38 = vadd.f32 %v213_v58, %v200_v57  ;;  %v5853_v57 = vld [vmem:[%s8690_s3 + $0x78] sm:$0xff]  ;;  %v5852_v58 = vld [vmem:[%s8690_s3 + $0x70] sm:$0xff] }
  0xa3   :  { %768 = vmatpush.bf16.msra.mxu1 %v6182_v10  ;;  %747 = vmatpush.bf16.msrb.mxu0 %v5840_v15  ;;  %v5848_v15 = vld [vmem:[%s8690_s3 + $0x50] sm:$0xff] }
  0xa4   :  { %v250_v61 = vpop.f32.mrf.mxu3  ;;  %v227_v42 = vadd.f32 %v6422_v54, %v214_v38  ;;  %681 = vmatpush.bf16.msra.mxu3 %v5853_v57 }
  0xa5   :  { %591 = vmatpush.bf16.msra.mxu2 %v6272_v30 }
  0xa7   :  { %769 = vmatpush.bf16.msra.mxu1 %v6201_v13  ;;  %748 = vmatpush.bf16.msrb.mxu0 %v5839_v18 }
  0xa8   :  { %592 = vmatmul.bf16.vlgmr.msra.gmra.mxu2 %v565_v53  ;;  %v202_v63 = vpop.f32.mrf.mxu0  ;;  %682 = vmatpush.bf16.msra.mxu3 %v5852_v58 }
  0xa9   :  { %779 = vmatpush.bf16.msrb.mxu2 %v6152_v4  ;;  %v215_v62 = vpop.f32.mrf.mxu1  ;;  %v5850_v63 = vld [vmem:[%s8690_s3 + $0x60] sm:$0xff] }
  0xaa   :  { %v5851_v62 = vld [vmem:[%s8690_s3 + $0x68] sm:$0xff] }
  0xab   :  { %770 = vmatpush.bf16.msra.mxu1 %v6219_v19  ;;  %749 = vmatpush.bf16.msrb.mxu0 %v5838_v25  ;;  %v5847_v25 = vld [vmem:[%s8690_s3 + $0x48] sm:$0xff] }
  0xac   :  { %v252_v2 = vpop.f32.mrf.mxu3  ;;  %683 = vmatpush.bf16.msra.mxu3 %v5851_v62 }
  0xad   :  { %780 = vmatpush.bf16.msrb.mxu2 %v6167_v7 }
  0xaf   :  { %771 = vmatpush.bf16.msra.mxu1 %v6234_v21  ;;  %816 = vmatpush.bf16.msra.mxu0 %v6141_v0 }
  0xb0   :  { %684 = vmatpush.bf16.msra.mxu3 %v5850_v63 }
  0xb1   :  { %781 = vmatpush.bf16.msrb.mxu2 %v6189_v11 }
  0xb3   :  { %772 = vmatpush.bf16.msra.mxu1 %v6248_v23  ;;  %v263_v3 = vpop.f32.mrf.mxu2  ;;  %817 = vmatpush.bf16.msra.mxu0 %v6158_v5 }
  0xb4   :  { %v276_v16 = vpop.f32.mrf.mxu3  ;;  %v264_v36 = vadd.f32 %v263_v3, %v250_v61  ;;  %685 = vmatpush.bf16.msra.mxu3 %v5849_v9 }
  0xb5   :  { %782 = vmatpush.bf16.msrb.mxu2 %v6208_v14 }
  0xb6   :  { %v277_v40 = vadd.f32 %v276_v16, %v264_v36 }
  0xb7   :  { %773 = vmatpush.bf16.msra.mxu1 %v6265_v29  ;;  %818 = vmatpush.bf16.msra.mxu0 %v6182_v10 }
  0xb8   :  { %v280_v45 = vmax.f32 %v227_v42, %v277_v40  ;;  %686 = vmatpush.bf16.msra.mxu3 %v5848_v15  ;;  %v4998_v15 = vld [vmem:[%s8687_s0 + $0x21] sm:$0x7] }
  0xb9   :  { %783 = vmatpush.bf16.msrb.mxu2 %v6226_v20 }
  0xbb   :  { %829 = vmatpush.bf16.msrb.mxu1 %v6152_v4  ;;  %v265_v17 = vpop.f32.mrf.mxu2  ;;  %819 = vmatpush.bf16.msra.mxu0 %v6201_v13 }
  0xbc   :  { %v278_v26 = vpop.f32.mrf.mxu3  ;;  %687 = vmatpush.bf16.msra.mxu3 %v5847_v25  ;;  %v5857_v25 = vld [vmem:[%s8690_s3 + $0x98] sm:$0xff] }
  0xbd   :  { %784 = vmatpush.bf16.msrb.mxu2 %v6241_v22 }
  0xbe   :  { %v352_v28 = vpop.f32.mrf.mxu0 }
  0xbf   :  { %830 = vmatpush.bf16.msrb.mxu1 %v6167_v7  ;;  %820 = vmatpush.bf16.msra.mxu0 %v6219_v19 }
  0xc1   :  { %785 = vmatpush.bf16.msrb.mxu2 %v6255_v24  ;;  %v301_v27 = vpop.f32.mrf.mxu1 }
  0xc3   :  { %831 = vmatpush.bf16.msrb.mxu1 %v6189_v11  ;;  %v327_v31 = vpop.f32.mrf.mxu2  ;;  %821 = vmatpush.bf16.msra.mxu0 %v6234_v21 }
  0xc5   :  { %786 = vmatpush.bf16.msrb.mxu2 %v6272_v30 }
  0xc6   :  { %v354_v33 = vpop.f32.mrf.mxu0 }
  0xc7   :  { %832 = vmatpush.bf16.msrb.mxu1 %v6208_v14  ;;  %822 = vmatpush.bf16.msra.mxu0 %v6248_v23 }
  0xc9   :  { %867 = vmatpush.bf16.msra.mxu2 %v6141_v0  ;;  %v303_v32 = vpop.f32.mrf.mxu1 }
  0xca   :  { %v4992_v32 = vld [vmem:[%s8687_s0 + $0x18] sm:$0x7] }
  0xcb   :  { %833 = vmatpush.bf16.msrb.mxu1 %v6226_v20  ;;  %v329_v34 = vpop.f32.mrf.mxu2  ;;  %823 = vmatpush.bf16.msra.mxu0 %v6265_v29  ;;  %758 = vst [vmem:[#allocation1] ss:$9 sm:$0xff] %v4992_v32  ;;  %v5855_v32 = vld [vmem:[%s8690_s3 + $0x88] sm:$0xff] }
  0xcd   :  { %868 = vmatpush.bf16.msra.mxu2 %v6158_v5 }
  0xcf   :  { %834 = vmatpush.bf16.msrb.mxu1 %v6241_v22 }
  0xd0   :  { %v314_v35 = vpop.f32.mrf.mxu3 }
  0xd1   :  { %869 = vmatpush.bf16.msra.mxu2 %v6182_v10  ;;  %v378_v37 = vpop.f32.mrf.mxu1  ;;  %v315_v39 = vadd.f32 %v314_v35, %v301_v27  ;;  %v5846_v27 = vld [vmem:[%s8690_s3 + $0x40] sm:$0xff] }
  0xd2   :  { %688 = vmatpush.bf16.msra.mxu3 %v5846_v27  ;;  %v759_v36 = vld [vmem:[#allocation1] sm:$0xff]  ;;  %v6527_v38 = vld [vmem:[#allocation1 + $0x12] sm:$0xff] }
  0xd3   :  { %835 = vmatpush.bf16.msrb.mxu1 %v6255_v24  ;;  %v328_v43 = vadd.f32 %v327_v31, %v315_v39 }
  0xd4   :  { %774 = vmatmul.bf16.vlgmr.msra.gmra.mxu1 %v759_v36 }
  0xd5   :  { %870 = vmatpush.bf16.msra.mxu2 %v6201_v13  ;;  %v331_v48 = vmax.f32 %v280_v45, %v328_v43 }
  0xd6   :  { %797 = vmatpush.bf16.msrb.mxu3 %v6161_v6 }
  0xd7   :  { %836 = vmatpush.bf16.msrb.mxu1 %v6272_v30 }
  0xd8   :  { %v316_v41 = vpop.f32.mrf.mxu3 }
  0xd9   :  { %871 = vmatpush.bf16.msra.mxu2 %v6219_v19  ;;  %v380_v47 = vpop.f32.mrf.mxu1  ;;  %v4994_v41 = vld [vmem:[%s8687_s0 + $0x1b] sm:$0x7] }
  0xda   :  { %798 = vmatpush.bf16.msrb.mxu3 %v6173_v8 }
  0xdb   :  { %918 = vmatpush.bf16.msra.mxu1 %v6141_v0 }
  0xdd   :  { %872 = vmatpush.bf16.msra.mxu2 %v6234_v21 }
  0xde   :  { %v441_v56 = vpop.f32.mrf.mxu0  ;;  %799 = vmatpush.bf16.msrb.mxu3 %v6195_v12 }
  0xdf   :  { %v365_v44 = vpop.f32.mrf.mxu2  ;;  %919 = vmatpush.bf16.msra.mxu1 %v6158_v5 }
  0xe0   :  { %v366_v46 = vadd.f32 %v365_v44, %v352_v28 }
  0xe1   :  { %873 = vmatpush.bf16.msra.mxu2 %v6248_v23  ;;  %v454_v54 = vpop.f32.mrf.mxu1 }
  0xe2   :  { %v379_v49 = vadd.f32 %v378_v37, %v366_v46  ;;  %v760_v37 = vld [vmem:[#allocation1 + $0x9] sm:$0xff]  ;;  %v4996_v46 = vld [vmem:[%s8687_s0 + $0x1e] sm:$0x7] }
  0xe3   :  { %787 = vmatmul.bf16.vlgmr.msrb.gmra.mxu2 %v760_v37  ;;  %808 = vst [vmem:[#allocation1] ss:$9 sm:$0xff] %v4994_v41  ;;  %920 = vmatpush.bf16.msra.mxu1 %v6182_v10  ;;  %v6664_v41 = vld [vmem:[%s8688_s1 + $0x30] sm:$0xff] }
  0xe4   :  { %v382_v51 = vmax.f32 %v331_v48, %v379_v49 }
  0xe5   :  { %874 = vmatpush.bf16.msra.mxu2 %v6265_v29 }
  0xe6   :  { %v387_v52 = vadd.f32 %v6489_v50, %v382_v51  ;;  %v443_v61 = vpop.f32.mrf.mxu0 }
  0xe7   :  { %v367_v53 = vpop.f32.mrf.mxu2  ;;  %921 = vmatpush.bf16.msra.mxu1 %v6201_v13 }
  0xe8   :  { %vm388_vm2 = vcmp.gt.f32.partialorder %v387_v52, 1.0 }
  0xe9   :  { %vm4990_vm3 = vmpackc.low %vm388_vm2, %vm388_vm2  ;;  %v456_v59 = vpop.f32.mrf.mxu1  ;;  %931 = vmatpush.bf16.msrb.mxu2 %v6152_v4 }
  0xea   :  { %4991 = vmatmul.msk.bf16.vlgmr.msrb.gmra.mxu0 %vm4990_vm3, %v6099_v55  ;;  %v809_v52 = vld [vmem:[#allocation1] sm:$0xff]  ;;  %v6539_v53 = vld [vmem:[#allocation1 + $0x12] sm:$0xff]  ;;  %v810_v57 = vld [vmem:[#allocation1 + $0x9] sm:$0xff] }
  0xeb   :  { %898 = vmatpush.bf16.msrb.mxu0 %v6161_v6  ;;  %859 = vst [vmem:[#allocation1] ss:$9 sm:$0xff] %v4996_v46  ;;  %837 = vmatmul.bf16.vlgmr.msrb.gmra.mxu1 %v810_v57 }
  0xec   :  { %922 = vmatpush.bf16.msra.mxu1 %v6219_v19 }
  0xed   :  { %932 = vmatpush.bf16.msrb.mxu2 %v6167_v7 }
  0xef   :  { %899 = vmatpush.bf16.msrb.mxu0 %v6173_v8 }
  0xf0   :  { %v428_v60 = vpop.f32.mrf.mxu3  ;;  %923 = vmatpush.bf16.msra.mxu1 %v6234_v21 }
  0xf1   :  { %v442_v42 = vadd.f32 %v441_v56, %v428_v60  ;;  %933 = vmatpush.bf16.msrb.mxu2 %v6189_v11 }
  0xf2   :  { %v860_v63 = vld [vmem:[#allocation1] sm:$0xff]  ;;  %v862_v9 = vld [vmem:[#allocation1 + $0x12] sm:$0xff] }
  0xf3   :  { %900 = vmatpush.bf16.msrb.mxu0 %v6195_v12  ;;  %v455_v47 = vadd.f32 %v454_v54, %v442_v42  ;;  %875 = vmatmul.bf16.vlgmr.msra.gmra.mxu2 %v860_v63  ;;  %v6717_v63 = vld [vmem:[%s8688_s1 + $0x8] sm:$0xff] }
  0xf4   :  { %924 = vmatpush.bf16.msra.mxu1 %v6248_v23 }
  0xf5   :  { %934 = vmatpush.bf16.msrb.mxu2 %v6208_v14 }
  0xf7   :  { %v491_v2 = vpop.f32.mrf.mxu1 }
  0xf8   :  { %v430_v1 = vpop.f32.mrf.mxu3  ;;  %925 = vmatpush.bf16.msra.mxu1 %v6265_v29 }
  0xf9   :  { %935 = vmatpush.bf16.msrb.mxu2 %v6226_v20 }
  0xfa   :  { %824 = vmatmul.bf16.vlgmr.msra.gmra.mxu0 %v809_v52  ;;  %v5053_v52 = vld [vmem:[%s8687_s0 + $0x27] sm:$0x7] }
  0xfb   :  { %949 = vmatpush.bf16.msra.mxu0 %v6161_v6 }
  0xfc   :  { %1066 = vmatpush.bf16.msrb.mxu1 %v6152_v4 }
  0xfd   :  { %936 = vmatpush.bf16.msrb.mxu2 %v6241_v22 }
  0xff   :  { %v478_v3 = vpop.f32.mrf.mxu2  ;;  %v493_v17 = vpop.f32.mrf.mxu1  ;;  %950 = vmatpush.bf16.msra.mxu0 %v6173_v8 }
 0x100   :  { %v504_v16 = vpop.f32.mrf.mxu3  ;;  %v529_v26 = vpop.f32.mrf.mxu0  ;;  %v492_v43 = vadd.f32 %v491_v2, %v478_v3  ;;  %v6551_v3 = vld [vmem:[#allocation1 + $0x9] sm:$0xff]  ;;  %1067 = vmatpush.bf16.msrb.mxu1 %v6167_v7 }
 0x101   :  { %910 = vst [vmem:[#allocation1] ss:$9 sm:$0xff] %v4998_v15  ;;  %937 = vmatpush.bf16.msrb.mxu2 %v6255_v24 }
 0x102   :  { %v505_v48 = vadd.f32 %v504_v16, %v492_v43  ;;  %v5051_v43 = vld [vmem:[%s8687_s0 + $0x24] sm:$0x7] }
 0x103   :  { %951 = vmatpush.bf16.msra.mxu0 %v6195_v12 }
 0x104   :  { %v508_v59 = vmax.f32 %v455_v47, %v505_v48  ;;  %1068 = vmatpush.bf16.msrb.mxu1 %v6189_v11  ;;  %v6679_v47 = vld [vmem:[%s8688_s1 + $0x20] sm:$0xff] }
 0x105   :  { %938 = vmatpush.bf16.msrb.mxu2 %v6272_v30 }
 0x107   :  { %v480_v18 = vpop.f32.mrf.mxu2 }
 0x108   :  { %v506_v28 = vpop.f32.mrf.mxu3  ;;  %v531_v33 = vpop.f32.mrf.mxu0  ;;  %v912_v16 = vld [vmem:[#allocation1 + $0x9] sm:$0xff]  ;;  %v911_v17 = vld [vmem:[#allocation1] sm:$0xff]  ;;  %v913_v18 = vld [vmem:[#allocation1 + $0x12] sm:$0xff]  ;;  %1069 = vmatpush.bf16.msrb.mxu1 %v6208_v14 }
 0x109   :  { %1084 = vmatpush.bf16.msra.mxu2 %v6161_v6  ;;  %926 = vmatmul.bf16.vlgmr.msra.gmra.mxu1 %v911_v17  ;;  %v5856_v28 = vld [vmem:[%s8690_s3 + $0x90] sm:$0xff]  ;;  %1045 = vst [vmem:[#allocation1] ss:$9 sm:$0xff] %v5051_v43  ;;  %v5055_v17 = vld [vmem:[%s8687_s0 + $0x2a] sm:$0x7] }
 0x10a   :  { %4997 = vmatmul.msk.bf16.vlgmr.msrb.gmra.mxu0 %vm184_vm1, %v862_v9  ;;  %939 = vmatmul.bf16.vlgmr.msrb.gmra.mxu2 %v912_v16 }
 0x10b   :  { %1053 = vmatpush.bf16.msrb.mxu0 %v6141_v0 }
 0x10c   :  { %1070 = vmatpush.bf16.msrb.mxu1 %v6226_v20 }
 0x10d   :  { %1085 = vmatpush.bf16.msra.mxu2 %v6173_v8 }
 0x10f   :  { %v555_v31 = vpop.f32.mrf.mxu2  ;;  %1054 = vmatpush.bf16.msrb.mxu0 %v6158_v5 }
 0x110   :  { %v606_v40 = vpop.f32.mrf.mxu0  ;;  %1071 = vmatpush.bf16.msrb.mxu1 %v6241_v22  ;;  %v1048_v48 = vld [vmem:[#allocation1 + $0x12] sm:$0xff] }
 0x111   :  { %1086 = vmatpush.bf16.msra.mxu2 %v6195_v12 }
 0x113   :  { %1055 = vmatpush.bf16.msrb.mxu0 %v6182_v10 }
 0x114   :  { %1072 = vmatpush.bf16.msrb.mxu1 %v6255_v24 }
 0x115   :  { %1116 = vmatpush.bf16.msrb.mxu2 %v6152_v4 }
 0x117   :  { %v557_v34 = vpop.f32.mrf.mxu2  ;;  %v580_v35 = vpop.f32.mrf.mxu1  ;;  %1056 = vmatpush.bf16.msrb.mxu0 %v6201_v13 }
 0x118   :  { %v608_v51 = vpop.f32.mrf.mxu0  ;;  %1073 = vmatpush.bf16.msrb.mxu1 %v6272_v30  ;;  %v5854_v34 = vld [vmem:[%s8690_s3 + $0x80] sm:$0xff] }
 0x119   :  { %1117 = vmatpush.bf16.msrb.mxu2 %v6167_v7  ;;  %v1047_v51 = vld [vmem:[#allocation1 + $0x9] sm:$0xff] }
 0x11a   :  { %4999 = vmatmul.msk.bf16.vlgmr.msra.gmra.mxu0 %vm184_vm1, %v913_v18  ;;  %5052 = vmatmul.msk.bf16.vlgmr.msra.gmra.mxu2 %vm184_vm1, %v1048_v48  ;;  %v6745_v18 = vld [vmem:[%s8688_s1 + $0x58] sm:$0xff] }
 0x11b   :  { %1057 = vmatpush.bf16.msrb.mxu0 %v6219_v19  ;;  %1074 = vmatmul.bf16.vlgmr.msrb.gmra.mxu1 %v1047_v51 }
 0x11c   :  { %v542_v39 = vpop.f32.mrf.mxu3  ;;  %1154 = vmatpush.bf16.msra.mxu1 %v6141_v0 }
 0x11d   :  { %v543_v44 = vadd.f32 %v542_v39, %v529_v26  ;;  %1118 = vmatpush.bf16.msrb.mxu2 %v6189_v11 }
 0x11f   :  { %v582_v45 = vpop.f32.mrf.mxu1  ;;  %v556_v56 = vadd.f32 %v555_v31, %v543_v44  ;;  %1058 = vmatpush.bf16.msrb.mxu0 %v6234_v21 }
 0x120   :  { %1155 = vmatpush.bf16.msra.mxu1 %v6158_v5  ;;  %v6673_v45 = vld [vmem:[%s8688_s1 + $0x28] sm:$0xff] }
 0x121   :  { %v559_v54 = vmax.f32 %v508_v59, %v556_v56  ;;  %1119 = vmatpush.bf16.msrb.mxu2 %v6208_v14  ;;  %v6695_v56 = vld [vmem:[%s8688_s1 + $0x78] sm:$0xff] }
 0x123   :  { %1059 = vmatpush.bf16.msrb.mxu0 %v6248_v23 }
 0x124   :  { %v544_v49 = vpop.f32.mrf.mxu3  ;;  %1156 = vmatpush.bf16.msra.mxu1 %v6182_v10 }
 0x125   :  { %1120 = vmatpush.bf16.msrb.mxu2 %v6226_v20  ;;  %v1046_v49 = vld [vmem:[#allocation1] sm:$0xff] }
 0x126   :  { %1095 = vst [vmem:[#allocation1] ss:$9 sm:$0xff] %v5053_v52 }
 0x127   :  { %1060 = vmatpush.bf16.msrb.mxu0 %v6265_v29 }
 0x128   :  { %1157 = vmatpush.bf16.msra.mxu1 %v6201_v13  ;;  %v5860_v13 = vld [vmem:[%s8690_s3 + $0xb0] sm:$0xff] }
 0x129   :  { %1121 = vmatpush.bf16.msrb.mxu2 %v6241_v22 }
 0x12a   :  { %1061 = vmatmul.bf16.vlgmr.msrb.gmra.mxu0 %v1046_v49  ;;  %v5867_v49 = vld [vmem:[%s8690_s3 + $0xe8] sm:$0xff] }
 0x12b   :  { %v593_v58 = vpop.f32.mrf.mxu2  ;;  %1134 = vmatpush.bf16.msra.mxu0 %v6161_v6 }
 0x12c   :  { %v594_v60 = vadd.f32 %v593_v58, %v580_v35  ;;  %1158 = vmatpush.bf16.msra.mxu1 %v6219_v19 }
 0x12d   :  { %1122 = vmatpush.bf16.msrb.mxu2 %v6255_v24  ;;  %v1097_v9 = vld [vmem:[#allocation1 + $0x9] sm:$0xff]  ;;  %v1096_v15 = vld [vmem:[#allocation1] sm:$0xff]  ;;  %v1098_v16 = vld [vmem:[#allocation1 + $0x12] sm:$0xff] }
 0x12e   :  { %v607_v61 = vadd.f32 %v606_v40, %v594_v60  ;;  %1146 = vst [vmem:[#allocation1] ss:$9 sm:$0xff] %v5055_v17  ;;  %v5863_v17 = vld [vmem:[%s8690_s3 + $0xc8] sm:$0xff] }
 0x12f   :  { %1135 = vmatpush.bf16.msra.mxu0 %v6173_v8 }
 0x130   :  { %v610_v62 = vmax.f32 %v559_v54, %v607_v61  ;;  %1159 = vmatpush.bf16.msra.mxu1 %v6234_v21  ;;  %v5859_v21 = vld [vmem:[%s8690_s3 + $0xa8] sm:$0xff]  ;;  %v6703_v54 = vld [vmem:[%s8688_s1 + $0x10] sm:$0xff] }
 0x131   :  { %1123 = vmatpush.bf16.msrb.mxu2 %v6272_v30 }
 0x132   :  { %v611_v1 = vadd.f32 %v6489_v50, %v610_v62  ;;  %v6709_v62 = vld [vmem:[%s8688_s1 + $0x70] sm:$0xff] }
 0x133   :  { %v595_v2 = vpop.f32.mrf.mxu2  ;;  %1136 = vmatpush.bf16.msra.mxu0 %v6195_v12 }
 0x134   :  { %vm612_vm4 = vcmp.gt.f32.partialorder %v611_v1, 1.0  ;;  %1160 = vmatpush.bf16.msra.mxu1 %v6248_v23  ;;  %v6723_v1 = vld [vmem:[%s8688_s1 + $0x68] sm:$0xff]  ;;  %1124 = vmatmul.bf16.vlgmr.msrb.gmra.mxu2 %v1097_v9  ;;  %v5864_v9 = vld [vmem:[%s8690_s3 + $0xd0] sm:$0xff] }
 0x135   :  { %vm4956_vm5 = vmpackc.low %vm612_vm4, %vm612_vm4 }
 0x136   :  { %4957 = vmatmul.msk.bf16.vlgmr.msra.gmra.mxu3 %vm4956_vm5, %v6099_v55 }
 0x137   :  { %847 = vmatpush.bf16.msra.mxu3 %v6161_v6  ;;  %1167 = vmatpush.bf16.msrb.mxu0 %v6695_v56 }
 0x138   :  { %1161 = vmatpush.bf16.msra.mxu1 %v6265_v29 }
 0x13a   :  { %5054 = vmatmul.msk.bf16.vlgmr.msra.gmra.mxu0 %vm184_vm1, %v1098_v16 }
 0x13b   :  { %848 = vmatpush.bf16.msra.mxu3 %v6173_v8  ;;  %1168 = vmatpush.bf16.msrb.mxu0 %v6709_v62 }
 0x13c   :  { %1218 = vmatpush.bf16.msrb.mxu1 %v6695_v56 }
 0x13f   :  { %849 = vmatpush.bf16.msra.mxu3 %v6195_v12  ;;  %v5861_v12 = vld [vmem:[%s8690_s3 + $0xb8] sm:$0xff]  ;;  %1169 = vmatpush.bf16.msrb.mxu0 %v6723_v1 }
 0x140   :  { %1219 = vmatpush.bf16.msrb.mxu1 %v6709_v62 }
 0x144   :  { %1220 = vmatpush.bf16.msrb.mxu1 %v6723_v1 }
 0x146   :  { %4993 = vmatmul.msk.bf16.vlgmr.msrb.gmra.mxu3 %vm184_vm1, %v6527_v38  ;;  %v6658_v38 = vld [vmem:[%s8688_s1 + $0x38] sm:$0xff] }
 0x147   :  { %880 = vmatpush.bf16.msrb.mxu3 %v6152_v4  ;;  %1205 = vmatpush.bf16.msra.mxu2 %v6658_v38 }
 0x14b   :  { %881 = vmatpush.bf16.msrb.mxu3 %v6167_v7  ;;  %1206 = vmatpush.bf16.msra.mxu2 %v6664_v41 }
 0x14f   :  { %882 = vmatpush.bf16.msrb.mxu3 %v6189_v11  ;;  %1207 = vmatpush.bf16.msra.mxu2 %v6673_v45 }
 0x151   :  { %v775_v5 = vpop.f32.mrf.mxu1 }
 0x153   :  { %883 = vmatpush.bf16.msrb.mxu3 %v6208_v14  ;;  %1208 = vmatpush.bf16.msra.mxu2 %v6679_v47 }
 0x156   :  { %4995 = vmatmul.msk.bf16.vlgmr.msra.gmra.mxu3 %vm184_vm1, %v6539_v53  ;;  %v6689_v53 = vld [vmem:[%s8688_s1 + $0x18] sm:$0xff] }
 0x157   :  { %884 = vmatpush.bf16.msrb.mxu3 %v6226_v20  ;;  %1209 = vmatpush.bf16.msra.mxu2 %v6689_v53 }
 0x159   :  { %v777_v10 = vpop.f32.mrf.mxu1 }
 0x15a   :  { %v6756_v10 = vld [vmem:[%s8688_s1 + $0x50] sm:$0xff] }
 0x15b   :  { %885 = vmatpush.bf16.msrb.mxu3 %v6241_v22  ;;  %v5858_v22 = vld [vmem:[%s8690_s3 + $0xa0] sm:$0xff]  ;;  %1210 = vmatpush.bf16.msra.mxu2 %v6703_v54 }
 0x15f   :  { %886 = vmatpush.bf16.msrb.mxu3 %v6255_v24  ;;  %1211 = vmatpush.bf16.msra.mxu2 %v6717_v63 }
 0x163   :  { %887 = vmatpush.bf16.msrb.mxu3 %v6272_v30 }
 0x166   :  { %888 = vmatmul.bf16.vlgmr.msrb.gmra.mxu3 %v6551_v3  ;;  %v788_v7 = vpop.f32.mrf.mxu2  ;;  %v6732_v3 = vld [vmem:[%s8688_s1 + $0x60] sm:$0xff] }
 0x167   :  { %v6616_v0 = vpop.f32.mrf.mxu0  ;;  %v789_v8 = vadd.f32 %v788_v7, %v775_v5  ;;  %1028 = vmatpush.bf16.msra.mxu3 %v5861_v12  ;;  %1170 = vmatpush.bf16.msrb.mxu0 %v6732_v3  ;;  %v1147_v12 = vld [vmem:[#allocation1] sm:$0xff] }
 0x168   :  { %v838_v19 = vpop.f32.mrf.mxu1  ;;  %1221 = vmatpush.bf16.msrb.mxu1 %v6732_v3 }
 0x169   :  { %1162 = vmatmul.bf16.vlgmr.msra.gmra.mxu1 %v1147_v12 }
 0x16b   :  { %1029 = vmatpush.bf16.msra.mxu3 %v5860_v13  ;;  %1171 = vmatpush.bf16.msrb.mxu0 %v6745_v18 }
 0x16c   :  { %1222 = vmatpush.bf16.msrb.mxu1 %v6745_v18 }
 0x16e   :  { %v790_v14 = vpop.f32.mrf.mxu2 }
 0x16f   :  { %v753_v4 = vpop.f32.mrf.mxu0  ;;  %1030 = vmatpush.bf16.msra.mxu3 %v5859_v21  ;;  %1172 = vmatpush.bf16.msrb.mxu0 %v6756_v10  ;;  %v6764_v14 = vld [vmem:[%s8688_s1 + $0x48] sm:$0xff] }
 0x170   :  { %v840_v24 = vpop.f32.mrf.mxu1  ;;  %1223 = vmatpush.bf16.msrb.mxu1 %v6756_v10 }
 0x171   :  { %v6776_v24 = vld [vmem:[%s8688_s1 + $0x40] sm:$0xff] }
 0x173   :  { %1031 = vmatpush.bf16.msra.mxu3 %v5858_v22  ;;  %1173 = vmatpush.bf16.msrb.mxu0 %v6764_v14  ;;  %v1148_v22 = vld [vmem:[#allocation1 + $0x9] sm:$0xff] }
 0x174   :  { %1224 = vmatpush.bf16.msrb.mxu1 %v6764_v14 }
 0x176   :  { %v6633_v23 = vpop.f32.mrf.mxu2 }
 0x177   :  { %v825_v11 = vpop.f32.mrf.mxu0  ;;  %1032 = vmatpush.bf16.msra.mxu3 %v5857_v25  ;;  %1174 = vmatpush.bf16.msrb.mxu0 %v6776_v24  ;;  %v6794_v25 = vld [vmem:[%s8688_s1 + $0x88] sm:$0xff] }
 0x178   :  { %v839_v57 = vadd.f32 %v838_v19, %v825_v11  ;;  %1225 = vmatpush.bf16.msrb.mxu1 %v6776_v24 }
 0x17a   :  { %1175 = vmatmul.bf16.vlgmr.msrb.gmra.mxu0 %v1148_v22 }
 0x17b   :  { %1033 = vmatpush.bf16.msra.mxu3 %v5856_v28 }
 0x17c   :  { %1371 = vmatpush.bf16.msra.mxu1 %v6161_v6 }
 0x17e   :  { %v878_v27 = vpop.f32.mrf.mxu2 }
 0x17f   :  { %v827_v20 = vpop.f32.mrf.mxu0  ;;  %1034 = vmatpush.bf16.msra.mxu3 %v5855_v32 }
 0x180   :  { %v1149_v20 = vld [vmem:[#allocation1 + $0x12] sm:$0xff]  ;;  %1372 = vmatpush.bf16.msra.mxu1 %v6794_v25 }
 0x183   :  { %1035 = vmatpush.bf16.msra.mxu3 %v5854_v34 }
 0x186   :  { %v6651_v35 = vpop.f32.mrf.mxu1 }
 0x187   :  { %v6635_v30 = vpop.f32.mrf.mxu0  ;;  %1103 = vmatpush.bf16.msrb.mxu3 %v6658_v38 }
 0x18b   :  { %1104 = vmatpush.bf16.msrb.mxu3 %v6664_v41 }
 0x18d   :  { %v940_v36 = vpop.f32.mrf.mxu2 }
 0x18e   :  { %v929_v40 = vpop.f32.mrf.mxu1 }
 0x18f   :  { %v904_v31 = vpop.f32.mrf.mxu0  ;;  %1105 = vmatpush.bf16.msrb.mxu3 %v6673_v45 }
 0x190   :  { %v6802_v31 = vld [vmem:[%s8688_s1 + $0x80] sm:$0xff] }
 0x191   :  { %1373 = vmatpush.bf16.msra.mxu1 %v6802_v31 }
 0x193   :  { %1106 = vmatpush.bf16.msrb.mxu3 %v6679_v47 }
 0x195   :  { %v942_v42 = vpop.f32.mrf.mxu2 }
 0x196   :  { %v5869_v42 = vld [vmem:[%s8690_s3 + $0xf8] sm:$0xff] }
 0x197   :  { %v6653_v37 = vpop.f32.mrf.mxu0  ;;  %1107 = vmatpush.bf16.msrb.mxu3 %v6689_v53  ;;  %1315 = vmatpush.bf16.msra.mxu0 %v5869_v42 }
 0x19b   :  { %1108 = vmatpush.bf16.msrb.mxu3 %v6703_v54 }
 0x19d   :  { %v1088_v34 = vpop.f32.mrf.mxu2 }
 0x19f   :  { %v955_v44 = vpop.f32.mrf.mxu0  ;;  %1109 = vmatpush.bf16.msrb.mxu3 %v6717_v63 }
 0x1a3   :  { %1110 = vmatpush.bf16.msrb.mxu3 %v6265_v29  ;;  %v941_v29 = vadd.f32 %v940_v36, %v6651_v35  ;;  %v1075_v35 = vpop.f32.mrf.mxu1 }
 0x1a5   :  { %v954_v7 = vadd.f32 %v6653_v37, %v941_v29  ;;  %v1090_v40 = vpop.f32.mrf.mxu2 }
 0x1ab   :  { %v1077_v43 = vpop.f32.mrf.mxu1 }
 0x1b7   :  { %v1125_v48 = vpop.f32.mrf.mxu2 }
 0x1b9   :  { %v6640_v26 = vpop.f32.mrf.mxu3 }
 0x1c1   :  { %v692_v33 = vpop.f32.mrf.mxu3 }
 0x1c2   :  { %v1062_v33 = vpop.f32.mrf.mxu0 }
 0x1c3   :  { %v1076_v36 = vadd.f32 %v1075_v35, %v1062_v33 }
 0x1c9   :  { %v801_v39 = vpop.f32.mrf.mxu3 }
 0x1ca   :  { %v802_v59 = vadd.f32 %v801_v39, %v789_v8  ;;  %v1064_v37 = vpop.f32.mrf.mxu0  ;;  %v6843_v39 = vadd.f32 %v1088_v34, %v1076_v36  ;;  %v5114_v36 = vld [vmem:[%s8687_s0 + $0x36] sm:$0x7] }
 0x1d1   :  { %v803_v46 = vpop.f32.mrf.mxu3 }
 0x1d2   :  { %v1138_v44 = vpop.f32.mrf.mxu0  ;;  %v5868_v46 = vld [vmem:[%s8690_s3 + $0xf0] sm:$0xff] }
 0x1d3   :  { %1316 = vmatpush.bf16.msra.mxu0 %v5868_v46 }
 0x1d7   :  { %1317 = vmatpush.bf16.msra.mxu0 %v5867_v49  ;;  %v5116_v49 = vld [vmem:[%s8687_s0 + $0x39] sm:$0x7] }
 0x1d9   :  { %v851_v58 = vpop.f32.mrf.mxu3 }
 0x1da   :  { %v852_v60 = vadd.f32 %v851_v58, %v839_v57  ;;  %v1140_v51 = vpop.f32.mrf.mxu0  ;;  %v5866_v57 = vld [vmem:[%s8690_s3 + $0xe0] sm:$0xff]  ;;  %v1127_v58 = vpop.f32.mrf.mxu2 }
 0x1db   :  { %1318 = vmatpush.bf16.msra.mxu0 %v5866_v57 }
 0x1dc   :  { %v855_v61 = vmax.f32 %v802_v59, %v852_v60  ;;  %v5865_v59 = vld [vmem:[%s8690_s3 + $0xd8] sm:$0xff] }
 0x1df   :  { %1319 = vmatpush.bf16.msra.mxu0 %v5865_v59 }
 0x1e1   :  { %v853_v2 = vpop.f32.mrf.mxu3 }
 0x1e2   :  { %v752_v2 = vadd.f32 %v6616_v0, %v6640_v26  ;;  %v5862_v0 = vld [vmem:[%s8690_s3 + $0xc0] sm:$0xff] }
 0x1e3   :  { %1320 = vmatpush.bf16.msra.mxu0 %v5864_v9 }
 0x1e6   :  { %v6854_v52 = vpop.f32.mrf.mxu1 }
 0x1e7   :  { %1321 = vmatpush.bf16.msra.mxu0 %v5863_v17 }
 0x1e9   :  { %v889_v4 = vpop.f32.mrf.mxu3 }
 0x1ea   :  { %v890_v5 = vadd.f32 %v889_v4, %v6633_v23  ;;  %v5057_v23 = vld [vmem:[%s8687_s0 + $0x2d] sm:$0x7] }
 0x1eb   :  { %1197 = vst [vmem:[#allocation1] ss:$9 sm:$0xff] %v5057_v23  ;;  %1322 = vmatpush.bf16.msra.mxu0 %v5862_v0 }
 0x1ec   :  { %v903_v8 = vadd.f32 %v6635_v30, %v890_v5  ;;  %v6782_v30 = vld [vmem:[%s8688_s1] sm:$0xff] }
 0x1ed   :  { %1212 = vmatpush.bf16.msra.mxu2 %v6782_v30 }
 0x1ee   :  { %v906_v11 = vmax.f32 %v855_v61, %v903_v8  ;;  %v1165_v60 = vpop.f32.mrf.mxu1 }
 0x1ef   :  { %1390 = vmatpush.bf16.msrb.mxu0 %v6658_v38 }
 0x1f0   :  { %v957_v13 = vmax.f32 %v906_v11, %v954_v7  ;;  %v5110_v7 = vld [vmem:[%s8687_s0 + $0x30] sm:$0x7] }
 0x1f1   :  { %v891_v19 = vpop.f32.mrf.mxu3  ;;  %1353 = vmatpush.bf16.msrb.mxu2 %v6695_v56 }
 0x1f2   :  { %v958_v21 = vadd.f32 %v6489_v50, %v957_v13  ;;  %v1198_v27 = vld [vmem:[#allocation1] sm:$0xff]  ;;  %v1199_v28 = vld [vmem:[#allocation1 + $0x9] sm:$0xff]  ;;  %v1200_v32 = vld [vmem:[#allocation1 + $0x12] sm:$0xff] }
 0x1f3   :  { %1213 = vmatmul.bf16.vlgmr.msra.gmra.mxu2 %v1198_v27  ;;  %1226 = vmatmul.bf16.vlgmr.msrb.gmra.mxu1 %v1199_v28  ;;  %1332 = vst [vmem:[#allocation1] ss:$9 sm:$0xff] %v5110_v7  ;;  %v5112_v28 = vld [vmem:[%s8687_s0 + $0x33] sm:$0x7] }
 0x1f4   :  { %vm959_vm6 = vcmp.gt.f32.partialorder %v958_v21, 1.0  ;;  %1403 = vmatpush.bf16.msrb.mxu1 %v6695_v56  ;;  %1391 = vmatpush.bf16.msrb.mxu0 %v6664_v41 }
 0x1f5   :  { %vm5049_vm7 = vmpackc.low %vm959_vm6, %vm959_vm6  ;;  %1354 = vmatpush.bf16.msrb.mxu2 %v6709_v62 }
 0x1f6   :  { %5050 = vmatmul.msk.bf16.vlgmr.msra.gmra.mxu3 %vm5049_vm7, %v6099_v55 }
 0x1f7   :  { %1185 = vmatpush.bf16.msra.mxu3 %v6161_v6  ;;  %v1176_v61 = vpop.f32.mrf.mxu0 }
 0x1f8   :  { %1404 = vmatpush.bf16.msrb.mxu1 %v6709_v62  ;;  %1392 = vmatpush.bf16.msrb.mxu0 %v6673_v45 }
 0x1f9   :  { %1355 = vmatpush.bf16.msrb.mxu2 %v6723_v1 }
 0x1fa   :  { %v1333_v13 = vld [vmem:[#allocation1] sm:$0xff]  ;;  %v1334_v23 = vld [vmem:[#allocation1 + $0x9] sm:$0xff]  ;;  %v1335_v27 = vld [vmem:[#allocation1 + $0x12] sm:$0xff] }
 0x1fb   :  { %1186 = vmatpush.bf16.msra.mxu3 %v6794_v25  ;;  %1382 = vst [vmem:[#allocation1] ss:$9 sm:$0xff] %v5112_v28  ;;  %v5872_v28 = vld [vmem:[%s8690_s3 + $0x110] sm:$0xff] }
 0x1fc   :  { %1405 = vmatpush.bf16.msrb.mxu1 %v6723_v1  ;;  %1393 = vmatpush.bf16.msrb.mxu0 %v6679_v47 }
 0x1fd   :  { %1356 = vmatpush.bf16.msrb.mxu2 %v6732_v3 }
 0x1ff   :  { %1187 = vmatpush.bf16.msra.mxu3 %v6802_v31  ;;  %v1178_v4 = vpop.f32.mrf.mxu0 }
 0x200   :  { %1406 = vmatpush.bf16.msrb.mxu1 %v6732_v3  ;;  %1394 = vmatpush.bf16.msrb.mxu0 %v6689_v53 }
 0x201   :  { %1357 = vmatpush.bf16.msrb.mxu2 %v6745_v18 }
 0x202   :  { %v1385_v33 = vld [vmem:[#allocation1 + $0x12] sm:$0xff]  ;;  %v1383_v34 = vld [vmem:[#allocation1] sm:$0xff]  ;;  %v1384_v35 = vld [vmem:[#allocation1 + $0x9] sm:$0xff] }
 0x203   :  { %5111 = vmatmul.msk.bf16.vlgmr.msra.gmra.mxu1 %vm184_vm1, %v1335_v27  ;;  %1433 = vst [vmem:[#allocation1] ss:$9 sm:$0xff] %v5114_v36 }
 0x204   :  { %1407 = vmatpush.bf16.msrb.mxu1 %v6745_v18  ;;  %1395 = vmatpush.bf16.msrb.mxu0 %v6703_v54 }
 0x205   :  { %1358 = vmatpush.bf16.msrb.mxu2 %v6756_v10 }
 0x206   :  { %1111 = vmatmul.bf16.vlgmr.msrb.gmra.mxu3 %v1096_v15 }
 0x207   :  { %1236 = vmatpush.bf16.msrb.mxu3 %v6161_v6 }
 0x208   :  { %1408 = vmatpush.bf16.msrb.mxu1 %v6756_v10  ;;  %1396 = vmatpush.bf16.msrb.mxu0 %v6717_v63 }
 0x209   :  { %1359 = vmatpush.bf16.msrb.mxu2 %v6764_v14 }
 0x20a   :  { %v1434_v40 = vld [vmem:[#allocation1] sm:$0xff]  ;;  %v1436_v46 = vld [vmem:[#allocation1 + $0x12] sm:$0xff] }
 0x20b   :  { %1237 = vmatpush.bf16.msrb.mxu3 %v6794_v25 }
 0x20c   :  { %1409 = vmatpush.bf16.msrb.mxu1 %v6764_v14  ;;  %1397 = vmatpush.bf16.msrb.mxu0 %v6782_v30 }
 0x20d   :  { %1360 = vmatpush.bf16.msrb.mxu2 %v6776_v24 }
 0x20f   :  { %1238 = vmatpush.bf16.msrb.mxu3 %v6802_v31 }
 0x210   :  { %1410 = vmatpush.bf16.msrb.mxu1 %v6776_v24  ;;  %1361 = vmatmul.bf16.vlgmr.msrb.gmra.mxu2 %v1334_v23 }
 0x211   :  { %1441 = vmatpush.bf16.msra.mxu2 %v6658_v38 }
 0x213   :  { %1411 = vmatmul.bf16.vlgmr.msrb.gmra.mxu1 %v1384_v35 }
 0x214   :  { %1492 = vmatpush.bf16.msra.mxu1 %v6658_v38 }
 0x215   :  { %1442 = vmatpush.bf16.msra.mxu2 %v6664_v41 }
 0x216   :  { %5056 = vmatmul.msk.bf16.vlgmr.msra.gmra.mxu3 %vm184_vm1, %v1149_v20 }
 0x217   :  { %1340 = vmatpush.bf16.msra.mxu3 %v6658_v38 }
 0x218   :  { %1493 = vmatpush.bf16.msra.mxu1 %v6664_v41 }
 0x219   :  { %1443 = vmatpush.bf16.msra.mxu2 %v6673_v45 }
 0x21b   :  { %1341 = vmatpush.bf16.msra.mxu3 %v6664_v41 }
 0x21c   :  { %1494 = vmatpush.bf16.msra.mxu1 %v6673_v45 }
 0x21d   :  { %1444 = vmatpush.bf16.msra.mxu2 %v6679_v47 }
 0x21f   :  { %1342 = vmatpush.bf16.msra.mxu3 %v6673_v45 }
 0x220   :  { %1495 = vmatpush.bf16.msra.mxu1 %v6679_v47 }
 0x221   :  { %1445 = vmatpush.bf16.msra.mxu2 %v6689_v53 }
 0x223   :  { %1343 = vmatpush.bf16.msra.mxu3 %v6679_v47 }
 0x224   :  { %1496 = vmatpush.bf16.msra.mxu1 %v6689_v53 }
 0x225   :  { %1446 = vmatpush.bf16.msra.mxu2 %v6703_v54 }
 0x226   :  { %5058 = vmatmul.msk.bf16.vlgmr.msrb.gmra.mxu3 %vm184_vm1, %v1200_v32 }
 0x227   :  { %1344 = vmatpush.bf16.msra.mxu3 %v6689_v53 }
 0x228   :  { %1497 = vmatpush.bf16.msra.mxu1 %v6703_v54 }
 0x229   :  { %1447 = vmatpush.bf16.msra.mxu2 %v6717_v63 }
 0x22b   :  { %1345 = vmatpush.bf16.msra.mxu3 %v6703_v54 }
 0x22c   :  { %1498 = vmatpush.bf16.msra.mxu1 %v6717_v63 }
 0x22d   :  { %1448 = vmatpush.bf16.msra.mxu2 %v6782_v30 }
 0x22f   :  { %1346 = vmatpush.bf16.msra.mxu3 %v6717_v63 }
 0x230   :  { %1449 = vmatmul.bf16.vlgmr.msra.gmra.mxu2 %v1434_v40  ;;  %1499 = vmatpush.bf16.msra.mxu1 %v6782_v30 }
 0x231   :  { %1505 = vmatpush.bf16.msrb.mxu2 %v6695_v56 }
 0x233   :  { %1347 = vmatpush.bf16.msra.mxu3 %v6782_v30 }
 0x234   :  { %1640 = vmatpush.bf16.msrb.mxu1 %v6695_v56 }
 0x235   :  { %1506 = vmatpush.bf16.msrb.mxu2 %v6709_v62 }
 0x236   :  { %1348 = vmatmul.bf16.vlgmr.msra.gmra.mxu3 %v1333_v13 }
 0x237   :  { %1421 = vmatpush.bf16.msrb.mxu3 %v6161_v6 }
 0x238   :  { %1641 = vmatpush.bf16.msrb.mxu1 %v6709_v62 }
 0x239   :  { %1507 = vmatpush.bf16.msrb.mxu2 %v6723_v1 }
 0x23b   :  { %1422 = vmatpush.bf16.msrb.mxu3 %v6794_v25 }
 0x23c   :  { %1642 = vmatpush.bf16.msrb.mxu1 %v6723_v1 }
 0x23d   :  { %1508 = vmatpush.bf16.msrb.mxu2 %v6732_v3 }
 0x23f   :  { %1423 = vmatpush.bf16.msrb.mxu3 %v6802_v31 }
 0x240   :  { %1643 = vmatpush.bf16.msrb.mxu1 %v6732_v3 }
 0x241   :  { %1509 = vmatpush.bf16.msrb.mxu2 %v6745_v18 }
 0x243   :  { %1454 = vmatpush.bf16.msra.mxu3 %v6695_v56 }
 0x244   :  { %1644 = vmatpush.bf16.msrb.mxu1 %v6745_v18 }
 0x245   :  { %1510 = vmatpush.bf16.msrb.mxu2 %v6756_v10 }
 0x246   :  { %5113 = vmatmul.msk.bf16.vlgmr.msrb.gmra.mxu3 %vm184_vm1, %v1385_v33 }
 0x247   :  { %1455 = vmatpush.bf16.msra.mxu3 %v6709_v62 }
 0x248   :  { %1645 = vmatpush.bf16.msrb.mxu1 %v6756_v10 }
 0x249   :  { %1511 = vmatpush.bf16.msrb.mxu2 %v6764_v14 }
 0x24b   :  { %1456 = vmatpush.bf16.msra.mxu3 %v6723_v1 }
 0x24c   :  { %1646 = vmatpush.bf16.msrb.mxu1 %v6764_v14 }
 0x24d   :  { %1512 = vmatpush.bf16.msrb.mxu2 %v6776_v24 }
 0x24f   :  { %1457 = vmatpush.bf16.msra.mxu3 %v6732_v3 }
 0x250   :  { %1647 = vmatpush.bf16.msrb.mxu1 %v6776_v24 }
 0x251   :  { %1658 = vmatpush.bf16.msra.mxu2 %v6161_v6 }
 0x253   :  { %1458 = vmatpush.bf16.msra.mxu3 %v6745_v18 }
 0x255   :  { %1659 = vmatpush.bf16.msra.mxu2 %v6794_v25 }
 0x257   :  { %1459 = vmatpush.bf16.msra.mxu3 %v6756_v10 }
 0x259   :  { %1660 = vmatpush.bf16.msra.mxu2 %v6802_v31 }
 0x25b   :  { %1460 = vmatpush.bf16.msra.mxu3 %v6764_v14 }
 0x25f   :  { %1461 = vmatpush.bf16.msra.mxu3 %v6776_v24 }
 0x270   :  { %v1227_v29 = vpop.f32.mrf.mxu1 }
 0x276   :  { %v1214_v5 = vpop.f32.mrf.mxu2 }
 0x277   :  { %v1228_v43 = vadd.f32 %v1227_v29, %v1214_v5  ;;  %v5877_v5 = vld [vmem:[%s8690_s3 + $0x138] sm:$0xff] }
 0x278   :  { %v1229_v8 = vpop.f32.mrf.mxu1  ;;  %1602 = vmatpush.bf16.msrb.mxu3 %v5877_v5 }
 0x279   :  { %v1037_v15 = vpop.f32.mrf.mxu3  ;;  %v5876_v8 = vld [vmem:[%s8690_s3 + $0x130] sm:$0xff] }
 0x27a   :  { %v6867_v16 = vadd.f32 %v1037_v15, %v752_v2 }
 0x27c   :  { %1603 = vmatpush.bf16.msrb.mxu3 %v5876_v8 }
 0x27e   :  { %v1216_v11 = vpop.f32.mrf.mxu2 }
 0x280   :  { %v1375_v9 = vpop.f32.mrf.mxu1 }
 0x281   :  { %v1039_v26 = vpop.f32.mrf.mxu3 }
 0x288   :  { %v1377_v4 = vpop.f32.mrf.mxu1 }
 0x289   :  { %v1112_v12 = vpop.f32.mrf.mxu3 }
 0x28a   :  { %v1126_v19 = vadd.f32 %v1125_v48, %v1112_v12  ;;  %v5875_v12 = vld [vmem:[%s8690_s3 + $0x128] sm:$0xff] }
 0x28b   :  { %1604 = vmatpush.bf16.msrb.mxu3 %v5875_v12 }
 0x28c   :  { %v1139_v20 = vadd.f32 %v1138_v44, %v1126_v19  ;;  %v1435_v44 = vld [vmem:[#allocation1 + $0x9] sm:$0xff] }
 0x28d   :  { %1462 = vmatmul.bf16.vlgmr.msra.gmra.mxu3 %v1435_v44  ;;  %1484 = vst [vmem:[#allocation1] ss:$9 sm:$0xff] %v5116_v49  ;;  %v5169_v44 = vld [vmem:[%s8687_s0 + $0x3c] sm:$0x7] }
 0x28e   :  { %v1142_v21 = vmax.f32 %v6843_v39, %v1139_v20  ;;  %v1177_v39 = vadd.f32 %v1176_v61, %v6854_v52  ;;  %v5874_v20 = vld [vmem:[%s8690_s3 + $0x120] sm:$0xff] }
 0x28f   :  { %1605 = vmatpush.bf16.msrb.mxu3 %v5874_v20  ;;  %v5175_v20 = vld [vmem:[%s8687_s0 + $0x45] sm:$0x7] }
 0x290   :  { %v1412_v11 = vpop.f32.mrf.mxu1 }
 0x291   :  { %v1114_v22 = vpop.f32.mrf.mxu3 }
 0x292   :  { %v5873_v22 = vld [vmem:[%s8690_s3 + $0x118] sm:$0xff] }
 0x293   :  { %v1362_v17 = vpop.f32.mrf.mxu2  ;;  %1606 = vmatpush.bf16.msrb.mxu3 %v5873_v22 }
 0x294   :  { %v1486_v60 = vld [vmem:[#allocation1 + $0x9] sm:$0xff]  ;;  %v1485_v61 = vld [vmem:[#allocation1] sm:$0xff] }
 0x295   :  { %1513 = vmatmul.bf16.vlgmr.msrb.gmra.mxu2 %v1486_v60  ;;  %1500 = vmatmul.bf16.vlgmr.msra.gmra.mxu1 %v1485_v61 }
 0x296   :  { %1690 = vmatpush.bf16.msrb.mxu2 %v6695_v56  ;;  %1728 = vmatpush.bf16.msra.mxu1 %v6658_v38 }
 0x297   :  { %1607 = vmatpush.bf16.msrb.mxu3 %v5872_v28 }
 0x299   :  { %v1189_v32 = vpop.f32.mrf.mxu3 }
 0x29a   :  { %v1190_v42 = vadd.f32 %v1189_v32, %v1177_v39  ;;  %1691 = vmatpush.bf16.msrb.mxu2 %v6709_v62  ;;  %1729 = vmatpush.bf16.msra.mxu1 %v6664_v41  ;;  %v5870_v39 = vld [vmem:[%s8690_s3 + $0x100] sm:$0xff] }
 0x29b   :  { %v1364_v26 = vpop.f32.mrf.mxu2 }
 0x29c   :  { %v1193_v51 = vmax.f32 %v1142_v21, %v1190_v42  ;;  %v1414_v21 = vpop.f32.mrf.mxu1 }
 0x29e   :  { %1692 = vmatpush.bf16.msrb.mxu2 %v6723_v1  ;;  %1730 = vmatpush.bf16.msra.mxu1 %v6673_v45 }
 0x2a1   :  { %v1191_v37 = vpop.f32.mrf.mxu3 }
 0x2a2   :  { %1693 = vmatpush.bf16.msrb.mxu2 %v6732_v3  ;;  %1731 = vmatpush.bf16.msra.mxu1 %v6679_v47 }
 0x2a6   :  { %1694 = vmatpush.bf16.msrb.mxu2 %v6745_v18  ;;  %1732 = vmatpush.bf16.msra.mxu1 %v6689_v53 }
 0x2a9   :  { %v1240_v48 = vpop.f32.mrf.mxu3 }
 0x2aa   :  { %v1241_v52 = vadd.f32 %v1240_v48, %v1228_v43  ;;  %1695 = vmatpush.bf16.msrb.mxu2 %v6756_v10  ;;  %1733 = vmatpush.bf16.msra.mxu1 %v6703_v54 }
 0x2ac   :  { %v1244_v57 = vmax.f32 %v1193_v51, %v1241_v52  ;;  %v5171_v52 = vld [vmem:[%s8687_s0 + $0x3f] sm:$0x7] }
 0x2ae   :  { %v1245_v58 = vadd.f32 %v6489_v50, %v1244_v57  ;;  %1696 = vmatpush.bf16.msrb.mxu2 %v6764_v14  ;;  %v1487_v50 = vld [vmem:[#allocation1 + $0x12] sm:$0xff]  ;;  %1734 = vmatpush.bf16.msra.mxu1 %v6717_v63 }
 0x2af   :  { %1619 = vst [vmem:[#allocation1] ss:$9 sm:$0xff] %v5169_v44 }
 0x2b0   :  { %vm1246_vm8 = vcmp.gt.f32.partialorder %v1245_v58, 1.0 }
 0x2b1   :  { %vm5108_vm9 = vmpackc.low %vm1246_vm8, %vm1246_vm8  ;;  %v1242_v59 = vpop.f32.mrf.mxu3 }
 0x2b2   :  { %5109 = vmatmul.msk.bf16.vlgmr.msra.gmra.mxu0 %vm5108_vm9, %v6099_v55  ;;  %1697 = vmatpush.bf16.msrb.mxu2 %v6776_v24 }
 0x2b3   :  { %1472 = vmatpush.bf16.msra.mxu0 %v6161_v6  ;;  %1735 = vmatpush.bf16.msra.mxu1 %v6782_v30  ;;  %v1450_v19 = vpop.f32.mrf.mxu2 }
 0x2b6   :  { %v1622_v48 = vld [vmem:[#allocation1 + $0x12] sm:$0xff]  ;;  %v1620_v49 = vld [vmem:[#allocation1] sm:$0xff]  ;;  %v1621_v51 = vld [vmem:[#allocation1 + $0x9] sm:$0xff] }
 0x2b7   :  { %1473 = vmatpush.bf16.msra.mxu0 %v6794_v25  ;;  %5170 = vmatmul.msk.bf16.vlgmr.msra.gmra.mxu2 %vm184_vm1, %v1622_v48  ;;  %1669 = vst [vmem:[#allocation1] ss:$9 sm:$0xff] %v5171_v52 }
 0x2b8   :  { %1779 = vmatpush.bf16.msra.mxu2 %v6658_v38  ;;  %1648 = vmatmul.bf16.vlgmr.msrb.gmra.mxu1 %v1621_v51  ;;  %v5882_v51 = vld [vmem:[%s8690_s3 + $0x160] sm:$0xff] }
 0x2b9   :  { %v1349_v2 = vpop.f32.mrf.mxu3  ;;  %1792 = vmatpush.bf16.msrb.mxu1 %v6695_v56 }
 0x2ba   :  { %v1363_v29 = vadd.f32 %v1362_v17, %v1349_v2 }
 0x2bb   :  { %1474 = vmatpush.bf16.msra.mxu0 %v6802_v31  ;;  %v1452_v27 = vpop.f32.mrf.mxu2 }
 0x2bc   :  { %v6974_v0 = vadd.f32 %v1375_v9, %v1363_v29  ;;  %1780 = vmatpush.bf16.msra.mxu2 %v6664_v41  ;;  %v5173_v9 = vld [vmem:[%s8687_s0 + $0x42] sm:$0x7] }
 0x2bd   :  { %1793 = vmatpush.bf16.msrb.mxu1 %v6709_v62 }
 0x2be   :  { %v1671_v60 = vld [vmem:[#allocation1 + $0x9] sm:$0xff]  ;;  %v1672_v2 = vld [vmem:[#allocation1 + $0x12] sm:$0xff] }
 0x2c0   :  { %1781 = vmatpush.bf16.msra.mxu2 %v6673_v45 }
 0x2c1   :  { %v1351_v15 = vpop.f32.mrf.mxu3  ;;  %1794 = vmatpush.bf16.msrb.mxu1 %v6723_v1 }
 0x2c2   :  { %1398 = vmatmul.bf16.vlgmr.msrb.gmra.mxu0 %v1383_v34  ;;  %v5871_v34 = vld [vmem:[%s8690_s3 + $0x108] sm:$0xff] }
 0x2c3   :  { %1523 = vmatpush.bf16.msrb.mxu0 %v6161_v6  ;;  %1608 = vmatpush.bf16.msrb.mxu3 %v5871_v34 }
 0x2c4   :  { %1782 = vmatpush.bf16.msra.mxu2 %v6679_v47 }
 0x2c5   :  { %1795 = vmatpush.bf16.msrb.mxu1 %v6732_v3 }
 0x2c7   :  { %1524 = vmatpush.bf16.msrb.mxu0 %v6794_v25  ;;  %1609 = vmatpush.bf16.msrb.mxu3 %v5870_v39 }
 0x2c8   :  { %1698 = vmatmul.bf16.vlgmr.msrb.gmra.mxu2 %v1671_v60  ;;  %v5880_v60 = vld [vmem:[%s8690_s3 + $0x150] sm:$0xff] }
 0x2c9   :  { %v6976_v7 = vpop.f32.mrf.mxu3  ;;  %1783 = vmatpush.bf16.msra.mxu2 %v6689_v53  ;;  %1796 = vmatpush.bf16.msrb.mxu1 %v6745_v18 }
 0x2cb   :  { %1525 = vmatpush.bf16.msrb.mxu0 %v6802_v31  ;;  %1677 = vmatpush.bf16.msra.mxu3 %v6658_v38 }
 0x2cd   :  { %1784 = vmatpush.bf16.msra.mxu2 %v6703_v54  ;;  %1797 = vmatpush.bf16.msrb.mxu1 %v6756_v10 }
 0x2cf   :  { %1678 = vmatpush.bf16.msra.mxu3 %v6664_v41 }
 0x2d1   :  { %v1427_v13 = vpop.f32.mrf.mxu3  ;;  %1785 = vmatpush.bf16.msra.mxu2 %v6717_v63  ;;  %1798 = vmatpush.bf16.msrb.mxu1 %v6764_v14 }
 0x2d2   :  { %5115 = vmatmul.msk.bf16.vlgmr.msra.gmra.mxu0 %vm184_vm1, %v1436_v46 }
 0x2d3   :  { %1627 = vmatpush.bf16.msra.mxu0 %v6658_v38  ;;  %1679 = vmatpush.bf16.msra.mxu3 %v6673_v45 }
 0x2d5   :  { %1786 = vmatpush.bf16.msra.mxu2 %v6782_v30  ;;  %1799 = vmatpush.bf16.msrb.mxu1 %v6776_v24 }
 0x2d7   :  { %1628 = vmatpush.bf16.msra.mxu0 %v6664_v41  ;;  %1680 = vmatpush.bf16.msra.mxu3 %v6679_v47 }
 0x2d9   :  { %1927 = vmatpush.bf16.msrb.mxu2 %v6695_v56 }
 0x2db   :  { %1629 = vmatpush.bf16.msra.mxu0 %v6673_v45  ;;  %1681 = vmatpush.bf16.msra.mxu3 %v6689_v53 }
 0x2dd   :  { %1928 = vmatpush.bf16.msrb.mxu2 %v6709_v62 }
 0x2df   :  { %1630 = vmatpush.bf16.msra.mxu0 %v6679_v47  ;;  %1682 = vmatpush.bf16.msra.mxu3 %v6703_v54 }
 0x2e1   :  { %1929 = vmatpush.bf16.msrb.mxu2 %v6723_v1 }
 0x2e2   :  { %5117 = vmatmul.msk.bf16.vlgmr.msrb.gmra.mxu0 %vm184_vm1, %v1487_v50  ;;  %v1670_v50 = vld [vmem:[#allocation1] sm:$0xff] }
 0x2e3   :  { %1631 = vmatpush.bf16.msra.mxu0 %v6689_v53  ;;  %1683 = vmatpush.bf16.msra.mxu3 %v6717_v63  ;;  %1720 = vst [vmem:[#allocation1] ss:$9 sm:$0xff] %v5173_v9 }
 0x2e5   :  { %1930 = vmatpush.bf16.msrb.mxu2 %v6732_v3 }
 0x2e7   :  { %1632 = vmatpush.bf16.msra.mxu0 %v6703_v54  ;;  %1684 = vmatpush.bf16.msra.mxu3 %v6782_v30 }
 0x2e9   :  { %1931 = vmatpush.bf16.msrb.mxu2 %v6745_v18 }
 0x2ea   :  { %v1723_v12 = vld [vmem:[#allocation1 + $0x12] sm:$0xff] }
 0x2eb   :  { %1633 = vmatpush.bf16.msra.mxu0 %v6717_v63 }
 0x2ed   :  { %1932 = vmatpush.bf16.msrb.mxu2 %v6756_v10 }
 0x2ef   :  { %1634 = vmatpush.bf16.msra.mxu0 %v6782_v30 }
 0x2f1   :  { %1933 = vmatpush.bf16.msrb.mxu2 %v6764_v14 }
 0x2f2   :  { %1635 = vmatmul.bf16.vlgmr.msra.gmra.mxu0 %v1620_v49 }
 0x2f3   :  { %1708 = vmatpush.bf16.msrb.mxu0 %v6161_v6 }
 0x2f5   :  { %1934 = vmatpush.bf16.msrb.mxu2 %v6776_v24 }
 0x2f7   :  { %1709 = vmatpush.bf16.msrb.mxu0 %v6794_v25 }
 0x2fb   :  { %1710 = vmatpush.bf16.msrb.mxu0 %v6802_v31 }
 0x2ff   :  { %1741 = vmatpush.bf16.msra.mxu0 %v6695_v56 }
 0x302   :  { %5172 = vmatmul.msk.bf16.vlgmr.msrb.gmra.mxu0 %vm184_vm1, %v1672_v2  ;;  %v5879_v2 = vld [vmem:[%s8690_s3 + $0x148] sm:$0xff] }
 0x303   :  { %1742 = vmatpush.bf16.msra.mxu0 %v6709_v62 }
 0x307   :  { %1743 = vmatpush.bf16.msra.mxu0 %v6723_v1 }
 0x30b   :  { %1744 = vmatpush.bf16.msra.mxu0 %v6732_v3 }
 0x30f   :  { %1745 = vmatpush.bf16.msra.mxu0 %v6745_v18 }
 0x310   :  { %v1463_v23 = vpop.f32.mrf.mxu3 }
 0x311   :  { %v1464_v61 = vadd.f32 %v1463_v23, %v1450_v19  ;;  %v1722_v19 = vld [vmem:[#allocation1 + $0x9] sm:$0xff] }
 0x312   :  { %v1501_v35 = vpop.f32.mrf.mxu1 }
 0x313   :  { %1746 = vmatpush.bf16.msra.mxu0 %v6756_v10 }
 0x317   :  { %1747 = vmatpush.bf16.msra.mxu0 %v6764_v14 }
 0x318   :  { %v1465_v36 = vpop.f32.mrf.mxu3  ;;  %v1514_v37 = vpop.f32.mrf.mxu2 }
 0x319   :  { %v1515_v29 = vadd.f32 %v1514_v37, %v1501_v35 }
 0x31a   :  { %v1503_v42 = vpop.f32.mrf.mxu1 }
 0x31b   :  { %1748 = vmatpush.bf16.msra.mxu0 %v6776_v24 }
 0x31e   :  { %1749 = vmatmul.bf16.vlgmr.msra.gmra.mxu0 %v1722_v19 }
 0x32f   :  { %v1324_v32 = vpop.f32.mrf.mxu0 }
 0x330   :  { %v6994_v33 = vadd.f32 %v1324_v32, %v6867_v16  ;;  %v1516_v16 = vpop.f32.mrf.mxu2 }
 0x335   :  { %v1649_v34 = vpop.f32.mrf.mxu1 }
 0x337   :  { %v1326_v40 = vpop.f32.mrf.mxu0 }
 0x338   :  { %v5885_v40 = vld [vmem:[%s8690_s3 + $0x178] sm:$0xff] }
 0x339   :  { %1889 = vmatpush.bf16.msrb.mxu0 %v5885_v40 }
 0x33a   :  { %v1662_v32 = vpop.f32.mrf.mxu2 }
 0x33d   :  { %v1651_v42 = vpop.f32.mrf.mxu1 }
 0x33f   :  { %v1399_v43 = vpop.f32.mrf.mxu0 }
 0x340   :  { %v1413_v58 = vadd.f32 %v1412_v11, %v1399_v43  ;;  %v1721_v11 = vld [vmem:[#allocation1] sm:$0xff]  ;;  %v5884_v43 = vld [vmem:[%s8690_s3 + $0x170] sm:$0xff] }
 0x341   :  { %1736 = vmatmul.bf16.vlgmr.msra.gmra.mxu1 %v1721_v11  ;;  %1771 = vst [vmem:[#allocation1] ss:$9 sm:$0xff] %v5175_v20  ;;  %1890 = vmatpush.bf16.msrb.mxu0 %v5884_v43 }
 0x342   :  { %v1426_v15 = vadd.f32 %v6976_v7, %v1413_v58  ;;  %1945 = vmatpush.bf16.msra.mxu1 %v6161_v6  ;;  %v1664_v39 = vpop.f32.mrf.mxu2 }
 0x344   :  { %v1429_v4 = vmax.f32 %v6974_v0, %v1426_v15  ;;  %v7046_v0 = vld [vmem:[%s8689_s2] ss:$0 sm:$0xff] }
 0x346   :  { %1946 = vmatpush.bf16.msra.mxu1 %v6794_v25 }
 0x347   :  { %v1401_v46 = vpop.f32.mrf.mxu0 }
 0x348   :  { %v1772_v22 = vld [vmem:[#allocation1] sm:$0xff]  ;;  %v1773_v23 = vld [vmem:[#allocation1 + $0x9] sm:$0xff]  ;;  %v1774_v27 = vld [vmem:[#allocation1 + $0x12] sm:$0xff] }
 0x349   :  { %1787 = vmatmul.bf16.vlgmr.msra.gmra.mxu2 %v1772_v22  ;;  %v5883_v46 = vld [vmem:[%s8690_s3 + $0x168] sm:$0xff] }
 0x34a   :  { %1947 = vmatpush.bf16.msra.mxu1 %v6802_v31  ;;  %2015 = vmatpush.bf16.msra.mxu2 %v6658_v38 }
 0x34b   :  { %v1699_v44 = vpop.f32.mrf.mxu2  ;;  %1891 = vmatpush.bf16.msrb.mxu0 %v5883_v46 }
 0x34e   :  { %2016 = vmatpush.bf16.msra.mxu2 %v6664_v41 }
 0x34f   :  { %v1476_v57 = vpop.f32.mrf.mxu0  ;;  %1892 = vmatpush.bf16.msrb.mxu0 %v5882_v51  ;;  %v7287_v51 = vld [vmem:[%s8688_s1 + $0x48] sm:$0xff] }
 0x350   :  { %v1477_v17 = vadd.f32 %v1476_v57, %v1464_v61  ;;  %v5881_v57 = vld [vmem:[%s8690_s3 + $0x158] sm:$0xff] }
 0x351   :  { %1800 = vmatmul.bf16.vlgmr.msrb.gmra.mxu1 %v1773_v23 }
 0x352   :  { %v1480_v26 = vmax.f32 %v1429_v4, %v1477_v17  ;;  %1977 = vmatpush.bf16.msrb.mxu1 %v6695_v56  ;;  %2017 = vmatpush.bf16.msra.mxu2 %v6673_v45 }
 0x353   :  { %v1701_v52 = vpop.f32.mrf.mxu2  ;;  %1893 = vmatpush.bf16.msrb.mxu0 %v5881_v57  ;;  %v7300_v57 = vld [vmem:[%s8688_s1 + $0x40] sm:$0xff] }
 0x354   :  { %v7294_v52 = vld [vmem:[%s8688_s1 + $0x80] sm:$0xff] }
 0x356   :  { %1978 = vmatpush.bf16.msrb.mxu1 %v6709_v62  ;;  %2018 = vmatpush.bf16.msra.mxu2 %v6679_v47 }
 0x357   :  { %v1478_v59 = vpop.f32.mrf.mxu0  ;;  %1894 = vmatpush.bf16.msrb.mxu0 %v5880_v60 }
 0x35a   :  { %1979 = vmatpush.bf16.msrb.mxu1 %v6723_v1  ;;  %2019 = vmatpush.bf16.msra.mxu2 %v6689_v53 }
 0x35b   :  { %1895 = vmatpush.bf16.msrb.mxu0 %v5879_v2 }
 0x35e   :  { %1980 = vmatpush.bf16.msrb.mxu1 %v6732_v3  ;;  %2020 = vmatpush.bf16.msra.mxu2 %v6703_v54 }
 0x35f   :  { %v1527_v5 = vpop.f32.mrf.mxu0 }
 0x360   :  { %v1528_v8 = vadd.f32 %v1527_v5, %v1515_v29  ;;  %v5878_v29 = vld [vmem:[%s8690_s3 + $0x140] sm:$0xff] }
 0x361   :  { %1896 = vmatpush.bf16.msrb.mxu0 %v5878_v29  ;;  %v5893_v29 = vld [vmem:[%s8690_s3 + $0x1b8] sm:$0xff] }
 0x362   :  { %v1531_v7 = vmax.f32 %v1480_v26, %v1528_v8  ;;  %1981 = vmatpush.bf16.msrb.mxu1 %v6745_v18  ;;  %2021 = vmatpush.bf16.msra.mxu2 %v6717_v63 }
 0x364   :  { %v1532_v13 = vadd.f32 %v7046_v0, %v1531_v7 }
 0x365   :  { %1964 = vmatpush.bf16.msra.mxu0 %v6658_v38 }
 0x366   :  { %vm1533_vm10 = vcmp.gt.f32.partialorder %v1532_v13, 1.0  ;;  %1982 = vmatpush.bf16.msrb.mxu1 %v6756_v10  ;;  %2022 = vmatpush.bf16.msra.mxu2 %v6782_v30 }
 0x367   :  { %vm5167_vm11 = vmpackc.low %vm1533_vm10, %vm1533_vm10  ;;  %v1529_v21 = vpop.f32.mrf.mxu0 }
 0x368   :  { %5168 = vmatmul.msk.bf16.vlgmr.msrb.gmra.mxu3 %vm5167_vm11, %v6099_v55 }
 0x369   :  { %1759 = vmatpush.bf16.msrb.mxu3 %v6161_v6  ;;  %1965 = vmatpush.bf16.msra.mxu0 %v6664_v41 }
 0x36a   :  { %1983 = vmatpush.bf16.msrb.mxu1 %v6764_v14 }
 0x36d   :  { %1760 = vmatpush.bf16.msrb.mxu3 %v6794_v25  ;;  %1966 = vmatpush.bf16.msra.mxu0 %v6673_v45 }
 0x36e   :  { %1984 = vmatpush.bf16.msrb.mxu1 %v6776_v24 }
 0x36f   :  { %v1636_v28 = vpop.f32.mrf.mxu0 }
 0x370   :  { %v1650_v35 = vadd.f32 %v1649_v34, %v1636_v28 }
 0x371   :  { %1761 = vmatpush.bf16.msrb.mxu3 %v6802_v31  ;;  %1967 = vmatpush.bf16.msra.mxu0 %v6679_v47 }
 0x372   :  { %v7103_v37 = vadd.f32 %v1662_v32, %v1650_v35 }
 0x375   :  { %1968 = vmatpush.bf16.msra.mxu0 %v6689_v53 }
 0x377   :  { %v1638_v36 = vpop.f32.mrf.mxu0 }
 0x378   :  { %1685 = vmatmul.bf16.vlgmr.msra.gmra.mxu3 %v1670_v50 }
 0x379   :  { %1810 = vmatpush.bf16.msra.mxu3 %v6161_v6  ;;  %1969 = vmatpush.bf16.msra.mxu0 %v6703_v54 }
 0x37d   :  { %1811 = vmatpush.bf16.msra.mxu3 %v6794_v25  ;;  %1970 = vmatpush.bf16.msra.mxu0 %v6717_v63 }
 0x37f   :  { %v1712_v16 = vpop.f32.mrf.mxu0 }
 0x381   :  { %1812 = vmatpush.bf16.msra.mxu3 %v6802_v31  ;;  %1971 = vmatpush.bf16.msra.mxu0 %v6782_v30 }
 0x387   :  { %v1714_v48 = vpop.f32.mrf.mxu0 }
 0x388   :  { %5174 = vmatmul.msk.bf16.vlgmr.msrb.gmra.mxu3 %vm184_vm1, %v1723_v12  ;;  %v7258_v48 = vld [vmem:[%s8688_s1 + $0x60] sm:$0xff] }
 0x389   :  { %1914 = vmatpush.bf16.msrb.mxu3 %v6658_v38 }
 0x38d   :  { %1915 = vmatpush.bf16.msrb.mxu3 %v6664_v41  ;;  %v5230_v41 = vld [vmem:[%s8687_s0 + $0x4b] sm:$0x7] }
 0x391   :  { %1916 = vmatpush.bf16.msrb.mxu3 %v6673_v45  ;;  %v7160_v45 = vld [vmem:[%s8688_s1 + $0x38] sm:$0xff] }
 0x395   :  { %1917 = vmatpush.bf16.msrb.mxu3 %v6679_v47  ;;  %v7169_v47 = vld [vmem:[%s8688_s1 + $0x30] sm:$0xff] }
 0x398   :  { %5176 = vmatmul.msk.bf16.vlgmr.msra.gmra.mxu3 %vm184_vm1, %v1774_v27 }
 0x399   :  { %1918 = vmatpush.bf16.msrb.mxu3 %v6689_v53 }
 0x39b   :  { %v7122_v59 = vpop.f32.mrf.mxu0 }
 0x39d   :  { %1919 = vmatpush.bf16.msrb.mxu3 %v6703_v54  ;;  %v5232_v54 = vld [vmem:[%s8687_s0 + $0x4e] sm:$0x7] }
 0x3a1   :  { %1920 = vmatpush.bf16.msrb.mxu3 %v6717_v63  ;;  %v7193_v63 = vld [vmem:[%s8688_s1 + $0x20] sm:$0xff] }
 0x3a3   :  { %v1752_v15 = vpop.f32.mrf.mxu0 }
 0x3a5   :  { %1921 = vmatpush.bf16.msrb.mxu3 %v6782_v30 }
 0x3a9   :  { %1995 = vmatpush.bf16.msra.mxu3 %v6161_v6 }
 0x3ad   :  { %1996 = vmatpush.bf16.msra.mxu3 %v6794_v25 }
 0x3b1   :  { %1997 = vmatpush.bf16.msra.mxu3 %v6802_v31 }
 0x3be   :  { %v7114_v49 = vpop.f32.mrf.mxu1 }
 0x3bf   :  { %v1751_v23 = vadd.f32 %v7122_v59, %v7114_v49  ;;  %v7281_v49 = vld [vmem:[%s8688_s1 + $0x88] sm:$0xff]  ;;  %v7324_v59 = vld [vmem:[%s8688_s1] sm:$0xff] }
 0x3c6   :  { %v1739_v58 = vpop.f32.mrf.mxu1 }
 0x3cc   :  { %v7135_v17 = vpop.f32.mrf.mxu2 }
 0x3ce   :  { %v7133_v9 = vpop.f32.mrf.mxu1 }
 0x3cf   :  { %v1802_v32 = vadd.f32 %v7133_v9, %v7135_v17 }
 0x3d4   :  { %v1790_v26 = vpop.f32.mrf.mxu2 }
 0x3d5   :  { %v5892_v26 = vld [vmem:[%s8690_s3 + $0x1b0] sm:$0xff] }
 0x3d6   :  { %v1803_v5 = vpop.f32.mrf.mxu1 }
 0x3eb   :  { %v1611_v61 = vpop.f32.mrf.mxu3 }
 0x3ec   :  { %v7128_v50 = vadd.f32 %v1611_v61, %v6994_v33  ;;  %v5228_v33 = vld [vmem:[%s8687_s0 + $0x48] sm:$0x7] }
 0x3ed   :  { %1906 = vst [vmem:[#allocation1] ss:$9 sm:$0xff] %v5228_v33 }
 0x3f3   :  { %v1613_v4 = vpop.f32.mrf.mxu3 }
 0x3f4   :  { %v1907_v11 = vld [vmem:[#allocation1] sm:$0xff]  ;;  %v1908_v19 = vld [vmem:[#allocation1 + $0x9] sm:$0xff]  ;;  %v1909_v20 = vld [vmem:[#allocation1 + $0x12] sm:$0xff] }
 0x3f5   :  { %1922 = vmatmul.bf16.vlgmr.msrb.gmra.mxu3 %v1907_v11  ;;  %1935 = vmatmul.bf16.vlgmr.msrb.gmra.mxu2 %v1908_v19  ;;  %1956 = vst [vmem:[#allocation1] ss:$9 sm:$0xff] %v5230_v41  ;;  %v5891_v11 = vld [vmem:[%s8690_s3 + $0x1a8] sm:$0xff]  ;;  %v5889_v19 = vld [vmem:[%s8690_s3 + $0x198] sm:$0xff] }
 0x3f6   :  { %2028 = vmatpush.bf16.msrb.mxu3 %v6695_v56  ;;  %5229 = vmatmul.msk.bf16.vlgmr.msra.gmra.mxu1 %vm184_vm1, %v1909_v20 }
 0x3f7   :  { %2079 = vmatpush.bf16.msrb.mxu2 %v6695_v56  ;;  %2066 = vmatpush.bf16.msra.mxu1 %v7160_v45 }
 0x3fa   :  { %2029 = vmatpush.bf16.msrb.mxu3 %v6709_v62 }
 0x3fb   :  { %v1686_v8 = vpop.f32.mrf.mxu3  ;;  %2080 = vmatpush.bf16.msrb.mxu2 %v6709_v62  ;;  %2067 = vmatpush.bf16.msra.mxu1 %v7169_v47  ;;  %v7184_v62 = vld [vmem:[%s8688_s1 + $0x28] sm:$0xff] }
 0x3fc   :  { %v1700_v7 = vadd.f32 %v1699_v44, %v1686_v8  ;;  %v1959_v56 = vld [vmem:[#allocation1 + $0x12] sm:$0xff]  ;;  %v7172_v21 = vld [vmem:[#allocation1] sm:$0xff]  ;;  %v1958_v22 = vld [vmem:[#allocation1 + $0x9] sm:$0xff] }
 0x3fd   :  { %2007 = vst [vmem:[#allocation1] ss:$9 sm:$0xff] %v5232_v54 }
 0x3fe   :  { %v1713_v12 = vadd.f32 %v1712_v16, %v1700_v7  ;;  %2030 = vmatpush.bf16.msrb.mxu3 %v6723_v1 }
 0x3ff   :  { %2081 = vmatpush.bf16.msrb.mxu2 %v6723_v1  ;;  %2068 = vmatpush.bf16.msra.mxu1 %v7184_v62 }
 0x400   :  { %v1716_v13 = vmax.f32 %v7103_v37, %v1713_v12  ;;  %v5234_v37 = vld [vmem:[%s8687_s0 + $0x51] sm:$0x7] }
 0x402   :  { %2031 = vmatpush.bf16.msrb.mxu3 %v6732_v3 }
 0x403   :  { %v1688_v38 = vpop.f32.mrf.mxu3  ;;  %2082 = vmatpush.bf16.msrb.mxu2 %v6732_v3  ;;  %2069 = vmatpush.bf16.msra.mxu1 %v7193_v63  ;;  %v7203_v3 = vld [vmem:[%s8688_s1 + $0x18] sm:$0xff] }
 0x404   :  { %v2008_v27 = vld [vmem:[#allocation1] sm:$0xff]  ;;  %v2009_v34 = vld [vmem:[#allocation1 + $0x9] sm:$0xff]  ;;  %v2010_v35 = vld [vmem:[#allocation1 + $0x12] sm:$0xff] }
 0x405   :  { %5231 = vmatmul.msk.bf16.vlgmr.msra.gmra.mxu3 %vm184_vm1, %v1959_v56  ;;  %2023 = vmatmul.bf16.vlgmr.msra.gmra.mxu2 %v2008_v27  ;;  %2058 = vst [vmem:[#allocation1] ss:$9 sm:$0xff] %v5234_v37  ;;  %v5886_v27 = vld [vmem:[%s8690_s3 + $0x180] sm:$0xff] }
 0x406   :  { %2032 = vmatpush.bf16.msrb.mxu3 %v6745_v18  ;;  %1985 = vmatmul.bf16.vlgmr.msrb.gmra.mxu1 %v1958_v22  ;;  %v5887_v22 = vld [vmem:[%s8690_s3 + $0x188] sm:$0xff] }
 0x407   :  { %2083 = vmatpush.bf16.msrb.mxu2 %v6745_v18  ;;  %2070 = vmatpush.bf16.msra.mxu1 %v7203_v3  ;;  %v7213_v18 = vld [vmem:[%s8688_s1 + $0x10] sm:$0xff] }
 0x40a   :  { %2033 = vmatpush.bf16.msrb.mxu3 %v6756_v10 }
 0x40b   :  { %v1763_v53 = vpop.f32.mrf.mxu3  ;;  %2084 = vmatpush.bf16.msrb.mxu2 %v6756_v10  ;;  %2071 = vmatpush.bf16.msra.mxu1 %v7213_v18  ;;  %v7223_v10 = vld [vmem:[%s8688_s1 + $0x8] sm:$0xff] }
 0x40c   :  { %v1764_v28 = vadd.f32 %v1763_v53, %v1751_v23  ;;  %v2060_v44 = vld [vmem:[#allocation1 + $0x9] sm:$0xff]  ;;  %v2059_v46 = vld [vmem:[#allocation1] sm:$0xff]  ;;  %v2061_v58 = vld [vmem:[#allocation1 + $0x12] sm:$0xff] }
 0x40d   :  { %v5888_v53 = vld [vmem:[%s8690_s3 + $0x190] sm:$0xff] }
 0x40e   :  { %2034 = vmatpush.bf16.msrb.mxu3 %v6764_v14  ;;  %v1767_v39 = vmax.f32 %v1716_v13, %v1764_v28  ;;  %v5890_v13 = vld [vmem:[%s8690_s3 + $0x1a0] sm:$0xff] }
 0x40f   :  { %2085 = vmatpush.bf16.msrb.mxu2 %v6764_v14  ;;  %2072 = vmatpush.bf16.msra.mxu1 %v7223_v10  ;;  %v7232_v14 = vld [vmem:[%s8688_s1 + $0x78] sm:$0xff] }
 0x412   :  { %2035 = vmatpush.bf16.msrb.mxu3 %v6776_v24 }
 0x413   :  { %v1765_v1 = vpop.f32.mrf.mxu3  ;;  %2086 = vmatpush.bf16.msrb.mxu2 %v6776_v24  ;;  %2073 = vmatpush.bf16.msra.mxu1 %v6782_v30  ;;  %v7241_v24 = vld [vmem:[%s8688_s1 + $0x70] sm:$0xff]  ;;  %v7249_v30 = vld [vmem:[%s8688_s1 + $0x68] sm:$0xff] }
 0x415   :  { %2036 = vmatmul.bf16.vlgmr.msrb.gmra.mxu3 %v2009_v34 }
 0x416   :  { %2087 = vmatmul.bf16.vlgmr.msrb.gmra.mxu2 %v2060_v44  ;;  %2074 = vmatmul.bf16.vlgmr.msra.gmra.mxu1 %v2059_v46 }
 0x417   :  { %2214 = vmatpush.bf16.msrb.mxu1 %v7232_v14  ;;  %2232 = vmatpush.bf16.msra.mxu2 %v6161_v6 }
 0x418   :  { %2176 = vmatpush.bf16.msra.mxu3 %v5893_v29 }
 0x41b   :  { %v1814_v36 = vpop.f32.mrf.mxu3  ;;  %2215 = vmatpush.bf16.msrb.mxu1 %v7241_v24  ;;  %2233 = vmatpush.bf16.msra.mxu2 %v6794_v25 }
 0x41c   :  { %v1815_v40 = vadd.f32 %v1814_v36, %v1802_v32  ;;  %2177 = vmatpush.bf16.msra.mxu3 %v5892_v26 }
 0x41e   :  { %v1818_v42 = vmax.f32 %v1767_v39, %v1815_v40 }
 0x41f   :  { %2216 = vmatpush.bf16.msrb.mxu1 %v7249_v30  ;;  %2234 = vmatpush.bf16.msra.mxu2 %v6802_v31 }
 0x420   :  { %v1819_v16 = vadd.f32 %v7046_v0, %v1818_v42  ;;  %2178 = vmatpush.bf16.msra.mxu3 %v5891_v11  ;;  %v5289_v42 = vld [vmem:[%s8687_s0 + $0x57] sm:$0x7] }
 0x422   :  { %vm1820_vm12 = vcmp.gt.f32.partialorder %v1819_v16, 1.0 }
 0x423   :  { %vm5226_vm13 = vmpackc.low %vm1820_vm12, %vm1820_vm12  ;;  %v1816_v43 = vpop.f32.mrf.mxu3  ;;  %2264 = vmatpush.bf16.msrb.mxu2 %v7232_v14  ;;  %2217 = vmatpush.bf16.msrb.mxu1 %v7258_v48 }
 0x424   :  { %5227 = vmatmul.msk.bf16.vlgmr.msrb.gmra.mxu0 %vm5226_vm13, %v6099_v55  ;;  %2179 = vmatpush.bf16.msra.mxu3 %v5890_v13  ;;  %v5293_v13 = vld [vmem:[%s8687_s0 + $0x5d] sm:$0x7] }
 0x425   :  { %2046 = vmatpush.bf16.msrb.mxu0 %v6161_v6 }
 0x427   :  { %2265 = vmatpush.bf16.msrb.mxu2 %v7241_v24 }
 0x428   :  { %2180 = vmatpush.bf16.msra.mxu3 %v5889_v19 }
 0x429   :  { %2047 = vmatpush.bf16.msrb.mxu0 %v6794_v25  ;;  %v7265_v25 = vld [vmem:[%s8688_s1 + $0x58] sm:$0xff] }
 0x42a   :  { %2218 = vmatpush.bf16.msrb.mxu1 %v7265_v25 }
 0x42b   :  { %2266 = vmatpush.bf16.msrb.mxu2 %v7249_v30 }
 0x42c   :  { %2181 = vmatpush.bf16.msra.mxu3 %v5888_v53 }
 0x42d   :  { %2048 = vmatpush.bf16.msrb.mxu0 %v6802_v31  ;;  %v7274_v31 = vld [vmem:[%s8688_s1 + $0x50] sm:$0xff] }
 0x42e   :  { %2219 = vmatpush.bf16.msrb.mxu1 %v7274_v31 }
 0x42f   :  { %2267 = vmatpush.bf16.msrb.mxu2 %v7258_v48 }
 0x430   :  { %2182 = vmatpush.bf16.msra.mxu3 %v5887_v22 }
 0x432   :  { %2220 = vmatpush.bf16.msrb.mxu1 %v7287_v51 }
 0x433   :  { %2268 = vmatpush.bf16.msrb.mxu2 %v7265_v25 }
 0x434   :  { %1972 = vmatmul.bf16.vlgmr.msra.gmra.mxu0 %v7172_v21  ;;  %2183 = vmatpush.bf16.msra.mxu3 %v5886_v27 }
 0x435   :  { %2097 = vmatpush.bf16.msra.mxu0 %v6161_v6 }
 0x436   :  { %2221 = vmatpush.bf16.msrb.mxu1 %v7300_v57 }
 0x437   :  { %2269 = vmatpush.bf16.msrb.mxu2 %v7274_v31 }
 0x438   :  { %2251 = vmatpush.bf16.msrb.mxu3 %v7160_v45 }
 0x439   :  { %2098 = vmatpush.bf16.msra.mxu0 %v7281_v49 }
 0x43a   :  { %2302 = vmatpush.bf16.msra.mxu1 %v7160_v45 }
 0x43b   :  { %2270 = vmatpush.bf16.msrb.mxu2 %v7287_v51 }
 0x43c   :  { %2252 = vmatpush.bf16.msrb.mxu3 %v7169_v47 }
 0x43d   :  { %2099 = vmatpush.bf16.msra.mxu0 %v7294_v52 }
 0x43e   :  { %2303 = vmatpush.bf16.msra.mxu1 %v7169_v47 }
 0x43f   :  { %2271 = vmatpush.bf16.msrb.mxu2 %v7300_v57 }
 0x440   :  { %2253 = vmatpush.bf16.msrb.mxu3 %v7184_v62 }
 0x442   :  { %2304 = vmatpush.bf16.msra.mxu1 %v7184_v62 }
 0x444   :  { %5233 = vmatmul.msk.bf16.vlgmr.msrb.gmra.mxu0 %vm184_vm1, %v2010_v35  ;;  %v5287_v35 = vld [vmem:[%s8687_s0 + $0x54] sm:$0x7]  ;;  %2254 = vmatpush.bf16.msrb.mxu3 %v7193_v63 }
 0x445   :  { %2201 = vmatpush.bf16.msrb.mxu0 %v7160_v45  ;;  %2193 = vst [vmem:[#allocation1] ss:$9 sm:$0xff] %v5287_v35 }
 0x446   :  { %2305 = vmatpush.bf16.msra.mxu1 %v7193_v63 }
 0x448   :  { %2255 = vmatpush.bf16.msrb.mxu3 %v7203_v3 }
 0x449   :  { %2202 = vmatpush.bf16.msrb.mxu0 %v7169_v47 }
 0x44a   :  { %2306 = vmatpush.bf16.msra.mxu1 %v7203_v3 }
 0x44c   :  { %v2196_v37 = vld [vmem:[#allocation1 + $0x12] sm:$0xff]  ;;  %v2194_v39 = vld [vmem:[#allocation1] sm:$0xff]  ;;  %v2195_v40 = vld [vmem:[#allocation1 + $0x9] sm:$0xff]  ;;  %2256 = vmatpush.bf16.msrb.mxu3 %v7213_v18 }
 0x44d   :  { %2203 = vmatpush.bf16.msrb.mxu0 %v7184_v62  ;;  %5288 = vmatmul.msk.bf16.vlgmr.msra.gmra.mxu2 %vm184_vm1, %v2196_v37  ;;  %2243 = vst [vmem:[#allocation1] ss:$9 sm:$0xff] %v5289_v42 }
 0x44e   :  { %2307 = vmatpush.bf16.msra.mxu1 %v7213_v18  ;;  %2353 = vmatpush.bf16.msra.mxu2 %v7160_v45 }
 0x44f   :  { %2222 = vmatmul.bf16.vlgmr.msrb.gmra.mxu1 %v2195_v40  ;;  %v5898_v40 = vld [vmem:[%s8690_s3 + $0x1e0] sm:$0xff] }
 0x450   :  { %2257 = vmatpush.bf16.msrb.mxu3 %v7223_v10 }
 0x451   :  { %2204 = vmatpush.bf16.msrb.mxu0 %v7193_v63 }
 0x452   :  { %2308 = vmatpush.bf16.msra.mxu1 %v7223_v10  ;;  %2354 = vmatpush.bf16.msra.mxu2 %v7169_v47 }
 0x454   :  { %5235 = vmatmul.msk.bf16.vlgmr.msra.gmra.mxu0 %vm184_vm1, %v2061_v58  ;;  %2258 = vmatpush.bf16.msrb.mxu3 %v7324_v59  ;;  %v2245_v46 = vld [vmem:[#allocation1 + $0x9] sm:$0xff] }
 0x455   :  { %2205 = vmatpush.bf16.msrb.mxu0 %v7203_v3 }
 0x456   :  { %2309 = vmatpush.bf16.msra.mxu1 %v7324_v59  ;;  %2355 = vmatpush.bf16.msra.mxu2 %v7184_v62 }
 0x459   :  { %2206 = vmatpush.bf16.msrb.mxu0 %v7213_v18 }
 0x45a   :  { %2366 = vmatpush.bf16.msrb.mxu1 %v7232_v14  ;;  %2356 = vmatpush.bf16.msra.mxu2 %v7193_v63 }
 0x45d   :  { %2207 = vmatpush.bf16.msrb.mxu0 %v7223_v10  ;;  %2272 = vmatmul.bf16.vlgmr.msrb.gmra.mxu2 %v2245_v46  ;;  %v5896_v46 = vld [vmem:[%s8690_s3 + $0x1d0] sm:$0xff] }
 0x45e   :  { %2367 = vmatpush.bf16.msrb.mxu1 %v7241_v24  ;;  %2357 = vmatpush.bf16.msra.mxu2 %v7203_v3 }
 0x461   :  { %2208 = vmatpush.bf16.msrb.mxu0 %v7324_v59 }
 0x462   :  { %2368 = vmatpush.bf16.msrb.mxu1 %v7249_v30  ;;  %2358 = vmatpush.bf16.msra.mxu2 %v7213_v18 }
 0x464   :  { %2209 = vmatmul.bf16.vlgmr.msrb.gmra.mxu0 %v2194_v39 }
 0x465   :  { %2282 = vmatpush.bf16.msra.mxu0 %v6161_v6 }
 0x466   :  { %2369 = vmatpush.bf16.msrb.mxu1 %v7258_v48  ;;  %2359 = vmatpush.bf16.msra.mxu2 %v7223_v10 }
 0x469   :  { %2283 = vmatpush.bf16.msra.mxu0 %v7281_v49 }
 0x46a   :  { %2370 = vmatpush.bf16.msrb.mxu1 %v7265_v25  ;;  %2360 = vmatpush.bf16.msra.mxu2 %v7324_v59 }
 0x46d   :  { %2284 = vmatpush.bf16.msra.mxu0 %v7294_v52 }
 0x46e   :  { %2371 = vmatpush.bf16.msrb.mxu1 %v7274_v31  ;;  %2501 = vmatpush.bf16.msrb.mxu2 %v7232_v14 }
 0x471   :  { %2315 = vmatpush.bf16.msrb.mxu0 %v7232_v14 }
 0x472   :  { %2372 = vmatpush.bf16.msrb.mxu1 %v7287_v51  ;;  %2502 = vmatpush.bf16.msrb.mxu2 %v7241_v24 }
 0x473   :  { %v1949_v61 = vpop.f32.mrf.mxu1 }
 0x475   :  { %2316 = vmatpush.bf16.msrb.mxu0 %v7241_v24 }
 0x476   :  { %2373 = vmatpush.bf16.msrb.mxu1 %v7300_v57  ;;  %2503 = vmatpush.bf16.msrb.mxu2 %v7249_v30 }
 0x478   :  { %v1923_v60 = vpop.f32.mrf.mxu3  ;;  %v1936_v9 = vpop.f32.mrf.mxu2 }
 0x479   :  { %v1937_v15 = vadd.f32 %v1936_v9, %v1923_v60  ;;  %2317 = vmatpush.bf16.msrb.mxu0 %v7249_v30  ;;  %v2244_v60 = vld [vmem:[#allocation1] sm:$0xff] }
 0x47a   :  { %2504 = vmatpush.bf16.msrb.mxu2 %v7258_v48 }
 0x47b   :  { %v1951_v17 = vpop.f32.mrf.mxu1  ;;  %v7335_v4 = vadd.f32 %v1949_v61, %v1937_v15  ;;  %v2246_v61 = vld [vmem:[#allocation1 + $0x12] sm:$0xff] }
 0x47c   :  { %5290 = vmatmul.msk.bf16.vlgmr.msra.gmra.mxu0 %vm184_vm1, %v2246_v61  ;;  %v5895_v61 = vld [vmem:[%s8690_s3 + $0x1c8] sm:$0xff] }
 0x47d   :  { %2318 = vmatpush.bf16.msrb.mxu0 %v7258_v48 }
 0x47e   :  { %2505 = vmatpush.bf16.msrb.mxu2 %v7265_v25 }
 0x480   :  { %v1925_v2 = vpop.f32.mrf.mxu3  ;;  %v1938_v33 = vpop.f32.mrf.mxu2 }
 0x481   :  { %v5291_v2 = vld [vmem:[%s8687_s0 + $0x5a] sm:$0x7]  ;;  %2319 = vmatpush.bf16.msrb.mxu0 %v7265_v25 }
 0x482   :  { %2294 = vst [vmem:[#allocation1] ss:$9 sm:$0xff] %v5291_v2  ;;  %2506 = vmatpush.bf16.msrb.mxu2 %v7274_v31 }
 0x483   :  { %v1986_v8 = vpop.f32.mrf.mxu1 }
 0x485   :  { %2320 = vmatpush.bf16.msrb.mxu0 %v7274_v31 }
 0x486   :  { %2507 = vmatpush.bf16.msrb.mxu2 %v7287_v51 }
 0x488   :  { %v7337_v5 = vpop.f32.mrf.mxu3  ;;  %v2024_v12 = vpop.f32.mrf.mxu2 }
 0x489   :  { %v2295_v11 = vld [vmem:[#allocation1] sm:$0xff]  ;;  %2321 = vmatpush.bf16.msrb.mxu0 %v7287_v51 }
 0x48a   :  { %2310 = vmatmul.bf16.vlgmr.msra.gmra.mxu1 %v2295_v11  ;;  %2508 = vmatpush.bf16.msrb.mxu2 %v7300_v57 }
 0x48b   :  { %v1988_v38 = vpop.f32.mrf.mxu1  ;;  %2519 = vmatpush.bf16.msra.mxu1 %v6161_v6 }
 0x48d   :  { %2322 = vmatpush.bf16.msrb.mxu0 %v7300_v57 }
 0x48f   :  { %2520 = vmatpush.bf16.msra.mxu1 %v7281_v49 }
 0x490   :  { %v2001_v7 = vpop.f32.mrf.mxu3  ;;  %v2026_v41 = vpop.f32.mrf.mxu2 }
 0x491   :  { %v2297_v7 = vld [vmem:[#allocation1 + $0x12] sm:$0xff] }
 0x493   :  { %v2075_v54 = vpop.f32.mrf.mxu1  ;;  %2521 = vmatpush.bf16.msra.mxu1 %v7294_v52 }
 0x498   :  { %v2037_v20 = vpop.f32.mrf.mxu3 }
 0x499   :  { %v2088_v23 = vpop.f32.mrf.mxu2  ;;  %v2038_v58 = vadd.f32 %v2037_v20, %v2024_v12 }
 0x49a   :  { %v2089_v17 = vadd.f32 %v2088_v23, %v2075_v54 }
 0x49b   :  { %v2077_v32 = vpop.f32.mrf.mxu1 }
 0x4a0   :  { %v2039_v1 = vpop.f32.mrf.mxu3 }
 0x4a1   :  { %v1898_v56 = vpop.f32.mrf.mxu0 }
 0x4a2   :  { %v7355_v21 = vadd.f32 %v1898_v56, %v7128_v50  ;;  %v2090_v50 = vpop.f32.mrf.mxu2 }
 0x4a9   :  { %v1900_v28 = vpop.f32.mrf.mxu0 }
 0x4aa   :  { %v5901_v28 = vld [vmem:[%s8690_s3 + $0x1f8] sm:$0xff] }
 0x4ab   :  { %2463 = vmatpush.bf16.msra.mxu0 %v5901_v28 }
 0x4b1   :  { %v1973_v34 = vpop.f32.mrf.mxu0 }
 0x4b2   :  { %v1987_v43 = vadd.f32 %v1986_v8, %v1973_v34  ;;  %v5900_v34 = vld [vmem:[%s8690_s3 + $0x1f0] sm:$0xff] }
 0x4b3   :  { %2464 = vmatpush.bf16.msra.mxu0 %v5900_v34 }
 0x4b4   :  { %v2000_v9 = vadd.f32 %v7337_v5, %v1987_v43 }
 0x4b6   :  { %v2003_v29 = vmax.f32 %v7335_v4, %v2000_v9  ;;  %v2296_v4 = vld [vmem:[#allocation1 + $0x9] sm:$0xff] }
 0x4b7   :  { %2345 = vst [vmem:[#allocation1] ss:$9 sm:$0xff] %v5293_v13  ;;  %2323 = vmatmul.bf16.vlgmr.msrb.gmra.mxu0 %v2296_v4 }
 0x4b9   :  { %v1975_v36 = vpop.f32.mrf.mxu0 }
 0x4ba   :  { %v5899_v36 = vld [vmem:[%s8690_s3 + $0x1e8] sm:$0xff] }
 0x4bb   :  { %2465 = vmatpush.bf16.msra.mxu0 %v5899_v36 }
 0x4be   :  { %v2346_v19 = vld [vmem:[#allocation1] sm:$0xff]  ;;  %v2347_v20 = vld [vmem:[#allocation1 + $0x9] sm:$0xff]  ;;  %v2348_v41 = vld [vmem:[#allocation1 + $0x12] sm:$0xff] }
 0x4bf   :  { %2361 = vmatmul.bf16.vlgmr.msra.gmra.mxu2 %v2346_v19  ;;  %2374 = vmatmul.bf16.vlgmr.msrb.gmra.mxu1 %v2347_v20  ;;  %v5348_v19 = vld [vmem:[%s8687_s0 + $0x63] sm:$0x7] }
 0x4c0   :  { %2551 = vmatpush.bf16.msrb.mxu1 %v7232_v14  ;;  %2589 = vmatpush.bf16.msra.mxu2 %v7160_v45 }
 0x4c1   :  { %v2050_v16 = vpop.f32.mrf.mxu0  ;;  %2466 = vmatpush.bf16.msra.mxu0 %v5898_v40 }
 0x4c2   :  { %v2051_v15 = vadd.f32 %v2050_v16, %v2038_v58  ;;  %v5897_v16 = vld [vmem:[%s8690_s3 + $0x1d8] sm:$0xff] }
 0x4c4   :  { %v2054_v26 = vmax.f32 %v2003_v29, %v2051_v15  ;;  %2552 = vmatpush.bf16.msrb.mxu1 %v7241_v24  ;;  %2590 = vmatpush.bf16.msra.mxu2 %v7169_v47 }
 0x4c5   :  { %2467 = vmatpush.bf16.msra.mxu0 %v5897_v16 }
 0x4c8   :  { %2553 = vmatpush.bf16.msrb.mxu1 %v7249_v30  ;;  %2591 = vmatpush.bf16.msra.mxu2 %v7184_v62 }
 0x4c9   :  { %v2052_v44 = vpop.f32.mrf.mxu0  ;;  %2468 = vmatpush.bf16.msra.mxu0 %v5896_v46 }
 0x4cc   :  { %2554 = vmatpush.bf16.msrb.mxu1 %v7258_v48  ;;  %2592 = vmatpush.bf16.msra.mxu2 %v7193_v63  ;;  %v2223_v22 = vpop.f32.mrf.mxu1 }
 0x4cd   :  { %2469 = vmatpush.bf16.msra.mxu0 %v5895_v61 }
 0x4d0   :  { %2555 = vmatpush.bf16.msrb.mxu1 %v7265_v25  ;;  %2593 = vmatpush.bf16.msra.mxu2 %v7203_v3  ;;  %v2236_v56 = vpop.f32.mrf.mxu2 }
 0x4d1   :  { %v2101_v33 = vpop.f32.mrf.mxu0 }
 0x4d2   :  { %v2102_v8 = vadd.f32 %v2101_v33, %v2089_v17  ;;  %v5894_v17 = vld [vmem:[%s8690_s3 + $0x1c0] sm:$0xff] }
 0x4d3   :  { %v5346_v33 = vld [vmem:[%s8687_s0 + $0x60] sm:$0x7]  ;;  %2470 = vmatpush.bf16.msra.mxu0 %v5894_v17 }
 0x4d4   :  { %v2105_v5 = vmax.f32 %v2054_v26, %v2102_v8  ;;  %2556 = vmatpush.bf16.msrb.mxu1 %v7274_v31  ;;  %2594 = vmatpush.bf16.msra.mxu2 %v7213_v18  ;;  %v2225_v32 = vpop.f32.mrf.mxu1  ;;  %2480 = vst [vmem:[#allocation1] ss:$9 sm:$0xff] %v5346_v33 }
 0x4d6   :  { %v2106_v12 = vadd.f32 %v7046_v0, %v2105_v5 }
 0x4d7   :  { %2538 = vmatpush.bf16.msrb.mxu0 %v7160_v45 }
 0x4d8   :  { %vm2107_vm14 = vcmp.gt.f32.partialorder %v2106_v12, 1.0  ;;  %2557 = vmatpush.bf16.msrb.mxu1 %v7287_v51  ;;  %2595 = vmatpush.bf16.msra.mxu2 %v7223_v10  ;;  %v2238_v27 = vpop.f32.mrf.mxu2 }
 0x4d9   :  { %vm5285_vm15 = vmpackc.low %vm2107_vm14, %vm2107_vm14  ;;  %v2103_v38 = vpop.f32.mrf.mxu0 }
 0x4da   :  { %5286 = vmatmul.msk.bf16.vlgmr.msra.gmra.mxu3 %vm5285_vm15, %v6099_v55 }
 0x4db   :  { %2333 = vmatpush.bf16.msra.mxu3 %v6161_v6  ;;  %2539 = vmatpush.bf16.msrb.mxu0 %v7169_v47  ;;  %v2481_v11 = vld [vmem:[#allocation1] sm:$0xff]  ;;  %v2482_v13 = vld [vmem:[#allocation1 + $0x9] sm:$0xff]  ;;  %v2483_v38 = vld [vmem:[#allocation1 + $0x12] sm:$0xff] }
 0x4dc   :  { %2558 = vmatpush.bf16.msrb.mxu1 %v7300_v57  ;;  %2596 = vmatpush.bf16.msra.mxu2 %v7324_v59  ;;  %2530 = vst [vmem:[#allocation1] ss:$9 sm:$0xff] %v5348_v19  ;;  %v5904_v19 = vld [vmem:[%s8690_s3 + $0x210] sm:$0xff] }
 0x4dd   :  { %2509 = vmatmul.bf16.vlgmr.msrb.gmra.mxu2 %v2482_v13  ;;  %5347 = vmatmul.msk.bf16.vlgmr.msra.gmra.mxu1 %vm184_vm1, %v2483_v38 }
 0x4df   :  { %2334 = vmatpush.bf16.msra.mxu3 %v7281_v49  ;;  %2540 = vmatpush.bf16.msrb.mxu0 %v7184_v62 }
 0x4e0   :  { %v2273_v35 = vpop.f32.mrf.mxu2  ;;  %2653 = vmatpush.bf16.msrb.mxu2 %v7232_v14  ;;  %2640 = vmatpush.bf16.msra.mxu1 %v7160_v45 }
 0x4e1   :  { %v2210_v53 = vpop.f32.mrf.mxu0 }
 0x4e2   :  { %v2224_v54 = vadd.f32 %v2223_v22, %v2210_v53  ;;  %v5350_v22 = vld [vmem:[%s8687_s0 + $0x66] sm:$0x7] }
 0x4e3   :  { %2335 = vmatpush.bf16.msra.mxu3 %v7294_v52  ;;  %2541 = vmatpush.bf16.msrb.mxu0 %v7193_v63  ;;  %v2531_v53 = vld [vmem:[#allocation1] sm:$0xff] }
 0x4e4   :  { %v7459_v23 = vadd.f32 %v2236_v56, %v2224_v54  ;;  %2654 = vmatpush.bf16.msrb.mxu2 %v7241_v24  ;;  %2641 = vmatpush.bf16.msra.mxu1 %v7169_v47  ;;  %v2532_v56 = vld [vmem:[#allocation1 + $0x9] sm:$0xff] }
 0x4e7   :  { %2542 = vmatpush.bf16.msrb.mxu0 %v7203_v3 }
 0x4e8   :  { %v2275_v42 = vpop.f32.mrf.mxu2  ;;  %2655 = vmatpush.bf16.msrb.mxu2 %v7249_v30  ;;  %2642 = vmatpush.bf16.msra.mxu1 %v7184_v62 }
 0x4e9   :  { %v2212_v1 = vpop.f32.mrf.mxu0 }
 0x4ea   :  { %2259 = vmatmul.bf16.vlgmr.msrb.gmra.mxu3 %v2244_v60 }
 0x4eb   :  { %2384 = vmatpush.bf16.msrb.mxu3 %v6161_v6  ;;  %2543 = vmatpush.bf16.msrb.mxu0 %v7213_v18 }
 0x4ec   :  { %2656 = vmatpush.bf16.msrb.mxu2 %v7258_v48  ;;  %2643 = vmatpush.bf16.msra.mxu1 %v7193_v63 }
 0x4ed   :  { %2559 = vmatmul.bf16.vlgmr.msrb.gmra.mxu1 %v2532_v56 }
 0x4ef   :  { %2385 = vmatpush.bf16.msrb.mxu3 %v7281_v49  ;;  %2544 = vmatpush.bf16.msrb.mxu0 %v7223_v10 }
 0x4f0   :  { %2657 = vmatpush.bf16.msrb.mxu2 %v7265_v25  ;;  %2644 = vmatpush.bf16.msra.mxu1 %v7203_v3 }
 0x4f3   :  { %2386 = vmatpush.bf16.msrb.mxu3 %v7294_v52  ;;  %2545 = vmatpush.bf16.msrb.mxu0 %v7324_v59 }
 0x4f4   :  { %2658 = vmatpush.bf16.msrb.mxu2 %v7274_v31  ;;  %2645 = vmatpush.bf16.msra.mxu1 %v7213_v18 }
 0x4f8   :  { %2659 = vmatpush.bf16.msrb.mxu2 %v7287_v51  ;;  %2646 = vmatpush.bf16.msra.mxu1 %v7223_v10 }
 0x4f9   :  { %v2286_v50 = vpop.f32.mrf.mxu0 }
 0x4fa   :  { %5292 = vmatmul.msk.bf16.vlgmr.msra.gmra.mxu3 %vm184_vm1, %v2297_v7 }
 0x4fb   :  { %2488 = vmatpush.bf16.msra.mxu3 %v7160_v45 }
 0x4fc   :  { %2660 = vmatpush.bf16.msrb.mxu2 %v7300_v57  ;;  %2647 = vmatpush.bf16.msra.mxu1 %v7324_v59 }
 0x4ff   :  { %2489 = vmatpush.bf16.msra.mxu3 %v7169_v47 }
 0x500   :  { %2788 = vmatpush.bf16.msrb.mxu1 %v7232_v14 }
 0x501   :  { %v2288_v37 = vpop.f32.mrf.mxu0 }
 0x503   :  { %2490 = vmatpush.bf16.msra.mxu3 %v7184_v62 }
 0x504   :  { %2789 = vmatpush.bf16.msrb.mxu1 %v7241_v24 }
 0x507   :  { %2491 = vmatpush.bf16.msra.mxu3 %v7193_v63  ;;  %v7470_v39 = vpop.f32.mrf.mxu1 }
 0x508   :  { %2790 = vmatpush.bf16.msrb.mxu1 %v7249_v30 }
 0x50a   :  { %5294 = vmatmul.msk.bf16.vlgmr.msrb.gmra.mxu3 %vm184_vm1, %v2348_v41  ;;  %v2533_v41 = vld [vmem:[#allocation1 + $0x12] sm:$0xff] }
 0x50b   :  { %2492 = vmatpush.bf16.msra.mxu3 %v7203_v3  ;;  %2581 = vst [vmem:[#allocation1] ss:$9 sm:$0xff] %v5350_v22 }
 0x50c   :  { %2791 = vmatpush.bf16.msrb.mxu1 %v7258_v48 }
 0x50f   :  { %2493 = vmatpush.bf16.msra.mxu3 %v7213_v18  ;;  %v2313_v43 = vpop.f32.mrf.mxu1 }
 0x510   :  { %2792 = vmatpush.bf16.msrb.mxu1 %v7265_v25 }
 0x512   :  { %v2583_v32 = vld [vmem:[#allocation1 + $0x9] sm:$0xff] }
 0x513   :  { %2494 = vmatpush.bf16.msra.mxu3 %v7223_v10 }
 0x514   :  { %2793 = vmatpush.bf16.msrb.mxu1 %v7274_v31 }
 0x517   :  { %2495 = vmatpush.bf16.msra.mxu3 %v7324_v59 }
 0x518   :  { %2794 = vmatpush.bf16.msrb.mxu1 %v7287_v51 }
 0x51a   :  { %2496 = vmatmul.bf16.vlgmr.msra.gmra.mxu3 %v2481_v11 }
 0x51b   :  { %2569 = vmatpush.bf16.msrb.mxu3 %v6161_v6 }
 0x51c   :  { %2795 = vmatpush.bf16.msrb.mxu1 %v7300_v57 }
 0x51f   :  { %2570 = vmatpush.bf16.msrb.mxu3 %v7281_v49 }
 0x523   :  { %2571 = vmatpush.bf16.msrb.mxu3 %v7294_v52 }
 0x527   :  { %2602 = vmatpush.bf16.msra.mxu3 %v7232_v14 }
 0x52a   :  { %5349 = vmatmul.msk.bf16.vlgmr.msrb.gmra.mxu3 %vm184_vm1, %v2533_v41 }
 0x52b   :  { %2603 = vmatpush.bf16.msra.mxu3 %v7241_v24 }
 0x52f   :  { %2604 = vmatpush.bf16.msra.mxu3 %v7249_v30 }
 0x533   :  { %2605 = vmatpush.bf16.msra.mxu3 %v7258_v48 }
 0x534   :  { %v2324_v44 = vpop.f32.mrf.mxu0 }
 0x535   :  { %v2325_v1 = vadd.f32 %v2324_v44, %v7470_v39 }
 0x537   :  { %2606 = vmatpush.bf16.msra.mxu3 %v7265_v25 }
 0x53b   :  { %2607 = vmatpush.bf16.msra.mxu3 %v7274_v31 }
 0x53c   :  { %v2375_v2 = vpop.f32.mrf.mxu1  ;;  %v2326_v9 = vpop.f32.mrf.mxu0 }
 0x53f   :  { %2608 = vmatpush.bf16.msra.mxu3 %v7287_v51 }
 0x542   :  { %v2362_v15 = vpop.f32.mrf.mxu2 }
 0x543   :  { %v2376_v28 = vadd.f32 %v2375_v2, %v2362_v15  ;;  %2609 = vmatpush.bf16.msra.mxu3 %v7300_v57  ;;  %v5909_v15 = vld [vmem:[%s8690_s3 + $0x238] sm:$0xff] }
 0x546   :  { %2610 = vmatmul.bf16.vlgmr.msra.gmra.mxu3 %v2583_v32  ;;  %v5405_v32 = vld [vmem:[%s8687_s0 + $0x6c] sm:$0x7] }
 0x547   :  { %2750 = vmatpush.bf16.msrb.mxu3 %v5909_v15 }
 0x54a   :  { %v2364_v26 = vpop.f32.mrf.mxu2 }
 0x55d   :  { %v2185_v58 = vpop.f32.mrf.mxu3 }
 0x55e   :  { %v7482_v60 = vadd.f32 %v2185_v58, %v7355_v21  ;;  %v2377_v21 = vpop.f32.mrf.mxu1 }
 0x55f   :  { %v5908_v21 = vld [vmem:[%s8690_s3 + $0x230] sm:$0xff] }
 0x560   :  { %v2510_v61 = vpop.f32.mrf.mxu2  ;;  %2751 = vmatpush.bf16.msrb.mxu3 %v5908_v21 }
 0x565   :  { %v2187_v29 = vpop.f32.mrf.mxu3 }
 0x566   :  { %v2523_v46 = vpop.f32.mrf.mxu1 }
 0x568   :  { %v2512_v29 = vpop.f32.mrf.mxu2 }
 0x56d   :  { %v2260_v8 = vpop.f32.mrf.mxu3 }
 0x56e   :  { %v2274_v5 = vadd.f32 %v2273_v35, %v2260_v8  ;;  %v5352_v35 = vld [vmem:[%s8687_s0 + $0x69] sm:$0x7]  ;;  %v2525_v9 = vpop.f32.mrf.mxu1 }
 0x56f   :  { %v5907_v8 = vld [vmem:[%s8690_s3 + $0x228] sm:$0xff] }
 0x570   :  { %v2287_v7 = vadd.f32 %v2286_v50, %v2274_v5  ;;  %v2584_v50 = vld [vmem:[#allocation1 + $0x12] sm:$0xff]  ;;  %2752 = vmatpush.bf16.msrb.mxu3 %v5907_v8  ;;  %v7765_v8 = vld [vmem:[%s8688_s1 + $0x80] sm:$0xff] }
 0x572   :  { %v2290_v12 = vmax.f32 %v7459_v23, %v2287_v7  ;;  %v2582_v23 = vld [vmem:[#allocation1] sm:$0xff] }
 0x573   :  { %2597 = vmatmul.bf16.vlgmr.msra.gmra.mxu2 %v2582_v23  ;;  %2632 = vst [vmem:[#allocation1] ss:$9 sm:$0xff] %v5352_v35  ;;  %v5906_v7 = vld [vmem:[%s8690_s3 + $0x220] sm:$0xff] }
 0x574   :  { %2806 = vmatpush.bf16.msra.mxu2 %v6161_v6  ;;  %2753 = vmatpush.bf16.msrb.mxu3 %v5906_v7 }
 0x575   :  { %v2262_v4 = vpop.f32.mrf.mxu3 }
 0x576   :  { %v2560_v26 = vpop.f32.mrf.mxu1  ;;  %v5905_v4 = vld [vmem:[%s8690_s3 + $0x218] sm:$0xff] }
 0x578   :  { %2807 = vmatpush.bf16.msra.mxu2 %v7281_v49  ;;  %2754 = vmatpush.bf16.msrb.mxu3 %v5905_v4 }
 0x57a   :  { %v2634_v16 = vld [vmem:[#allocation1 + $0x9] sm:$0xff]  ;;  %v2633_v43 = vld [vmem:[#allocation1] sm:$0xff] }
 0x57b   :  { %2648 = vmatmul.bf16.vlgmr.msra.gmra.mxu1 %v2633_v43 }
 0x57c   :  { %2808 = vmatpush.bf16.msra.mxu2 %v7294_v52  ;;  %2876 = vmatpush.bf16.msra.mxu1 %v7160_v45 }
 0x57d   :  { %v2337_v20 = vpop.f32.mrf.mxu3  ;;  %2755 = vmatpush.bf16.msrb.mxu3 %v5904_v19 }
 0x57e   :  { %v2338_v27 = vadd.f32 %v2337_v20, %v2325_v1  ;;  %v5902_v1 = vld [vmem:[%s8690_s3 + $0x200] sm:$0xff] }
 0x580   :  { %v2341_v36 = vmax.f32 %v2290_v12, %v2338_v27  ;;  %2877 = vmatpush.bf16.msra.mxu1 %v7169_v47  ;;  %v2562_v12 = vpop.f32.mrf.mxu1 }
 0x583   :  { %2661 = vmatmul.bf16.vlgmr.msrb.gmra.mxu2 %v2634_v16 }
 0x584   :  { %2838 = vmatpush.bf16.msrb.mxu2 %v7232_v14  ;;  %2878 = vmatpush.bf16.msra.mxu1 %v7184_v62 }
 0x585   :  { %v2339_v54 = vpop.f32.mrf.mxu3 }
 0x588   :  { %2839 = vmatpush.bf16.msrb.mxu2 %v7241_v24  ;;  %2879 = vmatpush.bf16.msra.mxu1 %v7193_v63 }
 0x58c   :  { %2840 = vmatpush.bf16.msrb.mxu2 %v7249_v30  ;;  %2880 = vmatpush.bf16.msra.mxu1 %v7203_v3 }
 0x58d   :  { %v2388_v34 = vpop.f32.mrf.mxu3 }
 0x58e   :  { %v2389_v37 = vadd.f32 %v2388_v34, %v2376_v28 }
 0x590   :  { %v2392_v39 = vmax.f32 %v2341_v36, %v2389_v37  ;;  %2841 = vmatpush.bf16.msrb.mxu2 %v7258_v48  ;;  %2881 = vmatpush.bf16.msra.mxu1 %v7213_v18  ;;  %v5407_v37 = vld [vmem:[%s8687_s0 + $0x6f] sm:$0x7] }
 0x592   :  { %v2393_v40 = vadd.f32 %v7046_v0, %v2392_v39  ;;  %v2635_v0 = vld [vmem:[#allocation1 + $0x12] sm:$0xff] }
 0x593   :  { %2767 = vst [vmem:[#allocation1] ss:$9 sm:$0xff] %v5405_v32 }
 0x594   :  { %vm2394_vm0 = vcmp.gt.f32.partialorder %v2393_v40, 1.0  ;;  %2842 = vmatpush.bf16.msrb.mxu2 %v7265_v25  ;;  %2882 = vmatpush.bf16.msra.mxu1 %v7223_v10 }
 0x595   :  { %vm5344_vm2 = vmpackc.low %vm2394_vm0, %vm2394_vm0  ;;  %v2390_v42 = vpop.f32.mrf.mxu3 }
 0x596   :  { %5345 = vmatmul.msk.bf16.vlgmr.msra.gmra.mxu0 %vm5344_vm2, %v6099_v55 }
 0x597   :  { %2620 = vmatpush.bf16.msra.mxu0 %v6161_v6 }
 0x598   :  { %2843 = vmatpush.bf16.msrb.mxu2 %v7274_v31  ;;  %2883 = vmatpush.bf16.msra.mxu1 %v7324_v59 }
 0x59a   :  { %v2770_v34 = vld [vmem:[#allocation1 + $0x12] sm:$0xff]  ;;  %v2768_v35 = vld [vmem:[#allocation1] sm:$0xff]  ;;  %v2769_v36 = vld [vmem:[#allocation1 + $0x9] sm:$0xff] }
 0x59b   :  { %2621 = vmatpush.bf16.msra.mxu0 %v7281_v49  ;;  %5406 = vmatmul.msk.bf16.vlgmr.msra.gmra.mxu2 %vm184_vm1, %v2770_v34  ;;  %2817 = vst [vmem:[#allocation1] ss:$9 sm:$0xff] %v5407_v37 }
 0x59c   :  { %2844 = vmatpush.bf16.msrb.mxu2 %v7287_v51  ;;  %2796 = vmatmul.bf16.vlgmr.msrb.gmra.mxu1 %v2769_v36  ;;  %v5911_v36 = vld [vmem:[%s8690_s3 + $0x248] sm:$0xff] }
 0x59d   :  { %v2497_v44 = vpop.f32.mrf.mxu3  ;;  %2940 = vmatpush.bf16.msrb.mxu1 %v7232_v14 }
 0x59e   :  { %v2511_v2 = vadd.f32 %v2510_v61, %v2497_v44 }
 0x59f   :  { %2622 = vmatpush.bf16.msra.mxu0 %v7294_v52 }
 0x5a0   :  { %2845 = vmatpush.bf16.msrb.mxu2 %v7300_v57  ;;  %v7589_v17 = vadd.f32 %v2523_v46, %v2511_v2 }
 0x5a1   :  { %2941 = vmatpush.bf16.msrb.mxu1 %v7241_v24 }
 0x5a2   :  { %v2818_v16 = vld [vmem:[#allocation1] sm:$0xff]  ;;  %v2820_v43 = vld [vmem:[#allocation1 + $0x12] sm:$0xff] }
 0x5a4   :  { %2927 = vmatpush.bf16.msra.mxu2 %v7160_v45 }
 0x5a5   :  { %v2499_v58 = vpop.f32.mrf.mxu3  ;;  %2942 = vmatpush.bf16.msrb.mxu1 %v7249_v30 }
 0x5a6   :  { %2546 = vmatmul.bf16.vlgmr.msrb.gmra.mxu0 %v2531_v53  ;;  %v5903_v53 = vld [vmem:[%s8690_s3 + $0x208] sm:$0xff] }
 0x5a7   :  { %2671 = vmatpush.bf16.msrb.mxu0 %v6161_v6  ;;  %2756 = vmatpush.bf16.msrb.mxu3 %v5903_v53  ;;  %v5916_v53 = vld [vmem:[%s8690_s3 + $0x270] sm:$0xff] }
 0x5a8   :  { %2928 = vmatpush.bf16.msra.mxu2 %v7169_v47 }
 0x5a9   :  { %2943 = vmatpush.bf16.msrb.mxu1 %v7258_v48 }
 0x5ab   :  { %2672 = vmatpush.bf16.msrb.mxu0 %v7281_v49  ;;  %2757 = vmatpush.bf16.msrb.mxu3 %v5902_v1 }
 0x5ac   :  { %2929 = vmatpush.bf16.msra.mxu2 %v7184_v62 }
 0x5ad   :  { %v7591_v33 = vpop.f32.mrf.mxu3  ;;  %2944 = vmatpush.bf16.msrb.mxu1 %v7265_v25 }
 0x5af   :  { %2673 = vmatpush.bf16.msrb.mxu0 %v7294_v52  ;;  %2825 = vmatpush.bf16.msra.mxu3 %v7160_v45 }
 0x5b0   :  { %2930 = vmatpush.bf16.msra.mxu2 %v7193_v63 }
 0x5b1   :  { %2945 = vmatpush.bf16.msrb.mxu1 %v7274_v31 }
 0x5b3   :  { %2826 = vmatpush.bf16.msra.mxu3 %v7169_v47 }
 0x5b4   :  { %2931 = vmatpush.bf16.msra.mxu2 %v7203_v3 }
 0x5b5   :  { %v2575_v11 = vpop.f32.mrf.mxu3  ;;  %2946 = vmatpush.bf16.msrb.mxu1 %v7287_v51 }
 0x5b6   :  { %5351 = vmatmul.msk.bf16.vlgmr.msra.gmra.mxu0 %vm184_vm1, %v2584_v50 }
 0x5b7   :  { %2775 = vmatpush.bf16.msra.mxu0 %v7160_v45  ;;  %2827 = vmatpush.bf16.msra.mxu3 %v7184_v62 }
 0x5b8   :  { %2932 = vmatpush.bf16.msra.mxu2 %v7213_v18 }
 0x5b9   :  { %2947 = vmatpush.bf16.msrb.mxu1 %v7300_v57 }
 0x5bb   :  { %2776 = vmatpush.bf16.msra.mxu0 %v7169_v47  ;;  %2828 = vmatpush.bf16.msra.mxu3 %v7193_v63  ;;  %v2819_v47 = vld [vmem:[#allocation1 + $0x9] sm:$0xff] }
 0x5bc   :  { %2846 = vmatmul.bf16.vlgmr.msrb.gmra.mxu2 %v2819_v47 }
 0x5bd   :  { %2933 = vmatpush.bf16.msra.mxu2 %v7223_v10 }
 0x5bf   :  { %2777 = vmatpush.bf16.msra.mxu0 %v7184_v62  ;;  %2829 = vmatpush.bf16.msra.mxu3 %v7203_v3  ;;  %v5409_v62 = vld [vmem:[%s8687_s0 + $0x72] sm:$0x7] }
 0x5c0   :  { %2868 = vst [vmem:[#allocation1] ss:$9 sm:$0xff] %v5409_v62 }
 0x5c1   :  { %2934 = vmatpush.bf16.msra.mxu2 %v7324_v59 }
 0x5c3   :  { %2778 = vmatpush.bf16.msra.mxu0 %v7193_v63  ;;  %2830 = vmatpush.bf16.msra.mxu3 %v7213_v18 }
 0x5c5   :  { %3075 = vmatpush.bf16.msrb.mxu2 %v7232_v14 }
 0x5c6   :  { %5353 = vmatmul.msk.bf16.vlgmr.msrb.gmra.mxu0 %vm184_vm1, %v2635_v0 }
 0x5c7   :  { %2779 = vmatpush.bf16.msra.mxu0 %v7203_v3  ;;  %2831 = vmatpush.bf16.msra.mxu3 %v7223_v10  ;;  %v2869_v9 = vld [vmem:[#allocation1] sm:$0xff]  ;;  %v2871_v3 = vld [vmem:[#allocation1 + $0x12] sm:$0xff]  ;;  %v2870_v29 = vld [vmem:[#allocation1 + $0x9] sm:$0xff] }
 0x5c8   :  { %2884 = vmatmul.bf16.vlgmr.msra.gmra.mxu1 %v2869_v9  ;;  %v5466_v9 = vld [vmem:[%s8687_s0 + $0x7b] sm:$0x7] }
 0x5c9   :  { %v2611_v13 = vpop.f32.mrf.mxu3  ;;  %3093 = vmatpush.bf16.msra.mxu1 %v6161_v6  ;;  %3076 = vmatpush.bf16.msrb.mxu2 %v7241_v24 }
 0x5cb   :  { %2780 = vmatpush.bf16.msra.mxu0 %v7213_v18  ;;  %2832 = vmatpush.bf16.msra.mxu3 %v7324_v59 }
 0x5cd   :  { %3094 = vmatpush.bf16.msra.mxu1 %v7281_v49  ;;  %3077 = vmatpush.bf16.msrb.mxu2 %v7249_v30 }
 0x5cf   :  { %2781 = vmatpush.bf16.msra.mxu0 %v7223_v10 }
 0x5d1   :  { %v2613_v22 = vpop.f32.mrf.mxu3  ;;  %3095 = vmatpush.bf16.msra.mxu1 %v7294_v52  ;;  %3078 = vmatpush.bf16.msrb.mxu2 %v7258_v48 }
 0x5d2   :  { %v5915_v22 = vld [vmem:[%s8690_s3 + $0x268] sm:$0xff] }
 0x5d3   :  { %2782 = vmatpush.bf16.msra.mxu0 %v7324_v59 }
 0x5d5   :  { %3079 = vmatpush.bf16.msrb.mxu2 %v7265_v25 }
 0x5d6   :  { %2783 = vmatmul.bf16.vlgmr.msra.gmra.mxu0 %v2768_v35 }
 0x5d7   :  { %2856 = vmatpush.bf16.msrb.mxu0 %v6161_v6 }
 0x5d9   :  { %3080 = vmatpush.bf16.msrb.mxu2 %v7274_v31 }
 0x5db   :  { %2857 = vmatpush.bf16.msrb.mxu0 %v7281_v49 }
 0x5dd   :  { %3081 = vmatpush.bf16.msrb.mxu2 %v7287_v51 }
 0x5df   :  { %2858 = vmatpush.bf16.msrb.mxu0 %v7294_v52 }
 0x5e1   :  { %3082 = vmatpush.bf16.msrb.mxu2 %v7300_v57 }
 0x5e3   :  { %2889 = vmatpush.bf16.msra.mxu0 %v7232_v14  ;;  %v7685_v14 = vld [vmem:[%s8688_s1 + $0x78] sm:$0xff] }
 0x5e6   :  { %5408 = vmatmul.msk.bf16.vlgmr.msrb.gmra.mxu0 %vm184_vm1, %v2820_v43 }
 0x5e7   :  { %2890 = vmatpush.bf16.msra.mxu0 %v7241_v24 }
 0x5eb   :  { %2891 = vmatpush.bf16.msra.mxu0 %v7249_v30 }
 0x5ef   :  { %2892 = vmatpush.bf16.msra.mxu0 %v7258_v48 }
 0x5f3   :  { %2893 = vmatpush.bf16.msra.mxu0 %v7265_v25 }
 0x5f6   :  { %v2598_v5 = vpop.f32.mrf.mxu2 }
 0x5f7   :  { %v2612_v42 = vadd.f32 %v2611_v13, %v2598_v5  ;;  %2894 = vmatpush.bf16.msra.mxu0 %v7274_v31 }
 0x5f8   :  { %v2649_v56 = vpop.f32.mrf.mxu1 }
 0x5fb   :  { %2895 = vmatpush.bf16.msra.mxu0 %v7287_v51 }
 0x5fe   :  { %v2600_v38 = vpop.f32.mrf.mxu2 }
 0x5ff   :  { %2896 = vmatpush.bf16.msra.mxu0 %v7300_v57  ;;  %v5917_v38 = vld [vmem:[%s8690_s3 + $0x278] sm:$0xff] }
 0x600   :  { %v2651_v27 = vpop.f32.mrf.mxu1 }
 0x602   :  { %2897 = vmatmul.bf16.vlgmr.msra.gmra.mxu0 %v2870_v29 }
 0x603   :  { %3037 = vmatpush.bf16.msrb.mxu0 %v5917_v38  ;;  %v7886_v38 = vld [vmem:[%s8688_s1 + $0x40] sm:$0xff] }
 0x606   :  { %v2662_v54 = vpop.f32.mrf.mxu2 }
 0x607   :  { %v2663_v44 = vadd.f32 %v2662_v54, %v2649_v56  ;;  %3038 = vmatpush.bf16.msrb.mxu0 %v5916_v53 }
 0x60b   :  { %3039 = vmatpush.bf16.msrb.mxu0 %v5915_v22 }
 0x613   :  { %v2472_v20 = vpop.f32.mrf.mxu0 }
 0x614   :  { %v7609_v41 = vadd.f32 %v2472_v20, %v7482_v60  ;;  %v2664_v60 = vpop.f32.mrf.mxu2 }
 0x615   :  { %v5913_v60 = vld [vmem:[%s8690_s3 + $0x258] sm:$0xff] }
 0x619   :  { %v2797_v7 = vpop.f32.mrf.mxu1 }
 0x61b   :  { %v2474_v23 = vpop.f32.mrf.mxu0 }
 0x61c   :  { %v5914_v23 = vld [vmem:[%s8690_s3 + $0x260] sm:$0xff] }
 0x61d   :  { %3040 = vmatpush.bf16.msrb.mxu0 %v5914_v23 }
 0x61e   :  { %v2810_v5 = vpop.f32.mrf.mxu2 }
 0x621   :  { %v2799_v19 = vpop.f32.mrf.mxu1  ;;  %3041 = vmatpush.bf16.msrb.mxu0 %v5913_v60 }
 0x623   :  { %v2547_v28 = vpop.f32.mrf.mxu0 }
 0x624   :  { %v2561_v45 = vadd.f32 %v2560_v26, %v2547_v28 }
 0x626   :  { %v2574_v0 = vadd.f32 %v7591_v33, %v2561_v45  ;;  %v5411_v33 = vld [vmem:[%s8687_s0 + $0x75] sm:$0x7]  ;;  %v2812_v13 = vpop.f32.mrf.mxu2 }
 0x627   :  { %2919 = vst [vmem:[#allocation1] ss:$9 sm:$0xff] %v5411_v33 }
 0x628   :  { %v2577_v46 = vmax.f32 %v7589_v17, %v2574_v0  ;;  %v7661_v17 = vld [vmem:[%s8689_s2] ss:$0 sm:$0xff] }
 0x62b   :  { %v2549_v50 = vpop.f32.mrf.mxu0 }
 0x62c   :  { %v5912_v50 = vld [vmem:[%s8690_s3 + $0x250] sm:$0xff] }
 0x62d   :  { %3042 = vmatpush.bf16.msrb.mxu0 %v5912_v50 }
 0x62e   :  { %v2920_v21 = vld [vmem:[#allocation1] sm:$0xff]  ;;  %v2921_v26 = vld [vmem:[#allocation1 + $0x9] sm:$0xff] }
 0x62f   :  { %2935 = vmatmul.bf16.vlgmr.msra.gmra.mxu2 %v2920_v21  ;;  %2948 = vmatmul.bf16.vlgmr.msrb.gmra.mxu1 %v2921_v26  ;;  %v5468_v21 = vld [vmem:[%s8687_s0 + $0x7e] sm:$0x7] }
 0x630   :  { %3125 = vmatpush.bf16.msrb.mxu1 %v7685_v14  ;;  %v7852_v26 = vld [vmem:[%s8688_s1 + $0x58] sm:$0xff] }
 0x631   :  { %3043 = vmatpush.bf16.msrb.mxu0 %v5911_v36 }
 0x633   :  { %v2624_v39 = vpop.f32.mrf.mxu0 }
 0x634   :  { %v2625_v63 = vadd.f32 %v2624_v39, %v2612_v42  ;;  %3126 = vmatpush.bf16.msrb.mxu1 %v7241_v24  ;;  %v7702_v24 = vld [vmem:[%s8688_s1 + $0x38] sm:$0xff] }
 0x635   :  { %3163 = vmatpush.bf16.msra.mxu2 %v7702_v24 }
 0x636   :  { %v2628_v61 = vmax.f32 %v2577_v46, %v2625_v63  ;;  %v7817_v46 = vld [vmem:[%s8688_s1 + $0x70] sm:$0xff] }
 0x638   :  { %3127 = vmatpush.bf16.msrb.mxu1 %v7249_v30  ;;  %v7710_v30 = vld [vmem:[%s8688_s1 + $0x30] sm:$0xff] }
 0x639   :  { %3164 = vmatpush.bf16.msra.mxu2 %v7710_v30 }
 0x63b   :  { %v2626_v40 = vpop.f32.mrf.mxu0 }
 0x63c   :  { %3128 = vmatpush.bf16.msrb.mxu1 %v7258_v48  ;;  %v7718_v48 = vld [vmem:[%s8688_s1 + $0x28] sm:$0xff]  ;;  %v5910_v40 = vld [vmem:[%s8690_s3 + $0x240] sm:$0xff] }
 0x63d   :  { %3165 = vmatpush.bf16.msra.mxu2 %v7718_v48  ;;  %3044 = vmatpush.bf16.msrb.mxu0 %v5910_v40  ;;  %v5925_v40 = vld [vmem:[%s8690_s3 + $0x2b8] sm:$0xff] }
 0x63f   :  { %v2847_v56 = vpop.f32.mrf.mxu2 }
 0x640   :  { %3129 = vmatpush.bf16.msrb.mxu1 %v7265_v25  ;;  %v7726_v25 = vld [vmem:[%s8688_s1 + $0x20] sm:$0xff] }
 0x641   :  { %3166 = vmatpush.bf16.msra.mxu2 %v7726_v25  ;;  %3112 = vmatpush.bf16.msra.mxu0 %v7702_v24 }
 0x643   :  { %v2675_v58 = vpop.f32.mrf.mxu0 }
 0x644   :  { %v2676_v2 = vadd.f32 %v2675_v58, %v2663_v44  ;;  %3130 = vmatpush.bf16.msrb.mxu1 %v7274_v31  ;;  %v7733_v31 = vld [vmem:[%s8688_s1 + $0x18] sm:$0xff] }
 0x645   :  { %3167 = vmatpush.bf16.msra.mxu2 %v7733_v31  ;;  %v7779_v1 = vpop.f32.mrf.mxu1  ;;  %3113 = vmatpush.bf16.msra.mxu0 %v7710_v30 }
 0x646   :  { %v2679_v15 = vmax.f32 %v2628_v61, %v2676_v2 }
 0x647   :  { %v2849_v27 = vpop.f32.mrf.mxu2 }
 0x648   :  { %v2680_v18 = vadd.f32 %v7661_v17, %v2679_v15  ;;  %3131 = vmatpush.bf16.msrb.mxu1 %v7287_v51  ;;  %v7741_v51 = vld [vmem:[%s8688_s1 + $0x10] sm:$0xff]  ;;  %v7828_v15 = vld [vmem:[%s8688_s1 + $0x68] sm:$0xff] }
 0x649   :  { %3168 = vmatpush.bf16.msra.mxu2 %v7741_v51  ;;  %3114 = vmatpush.bf16.msra.mxu0 %v7718_v48 }
 0x64a   :  { %vm2681_vm3 = vcmp.gt.f32.partialorder %v2680_v18, 1.0 }
 0x64b   :  { %vm5403_vm4 = vmpackc.low %vm2681_vm3, %vm2681_vm3  ;;  %v2677_v10 = vpop.f32.mrf.mxu0 }
 0x64c   :  { %5404 = vmatmul.msk.bf16.vlgmr.msrb.gmra.mxu3 %vm5403_vm4, %v6099_v55  ;;  %3132 = vmatpush.bf16.msrb.mxu1 %v7300_v57  ;;  %v7759_v57 = vld [vmem:[%s8688_s1 + $0x88] sm:$0xff] }
 0x64d   :  { %2907 = vmatpush.bf16.msrb.mxu3 %v6161_v6  ;;  %v2887_v28 = vpop.f32.mrf.mxu1  ;;  %3115 = vmatpush.bf16.msra.mxu0 %v7726_v25 }
 0x651   :  { %2908 = vmatpush.bf16.msrb.mxu3 %v7281_v49  ;;  %3116 = vmatpush.bf16.msra.mxu0 %v7733_v31 }
 0x653   :  { %v2784_v11 = vpop.f32.mrf.mxu0 }
 0x655   :  { %2909 = vmatpush.bf16.msrb.mxu3 %v7294_v52  ;;  %3117 = vmatpush.bf16.msra.mxu0 %v7741_v51 }
 0x65b   :  { %v2786_v12 = vpop.f32.mrf.mxu0 }
 0x65c   :  { %2833 = vmatmul.bf16.vlgmr.msra.gmra.mxu3 %v2818_v16  ;;  %v7876_v12 = vld [vmem:[%s8688_s1 + $0x48] sm:$0xff] }
 0x65d   :  { %2958 = vmatpush.bf16.msra.mxu3 %v6161_v6 }
 0x661   :  { %2959 = vmatpush.bf16.msra.mxu3 %v7281_v49  ;;  %v2922_v49 = vld [vmem:[#allocation1 + $0x12] sm:$0xff] }
 0x663   :  { %v2860_v20 = vpop.f32.mrf.mxu0 }
 0x665   :  { %2960 = vmatpush.bf16.msra.mxu3 %v7294_v52  ;;  %v7748_v52 = vld [vmem:[%s8688_s1 + $0x8] sm:$0xff] }
 0x666   :  { %3169 = vmatpush.bf16.msra.mxu2 %v7748_v52  ;;  %3118 = vmatpush.bf16.msra.mxu0 %v7748_v52 }
 0x66a   :  { %3170 = vmatpush.bf16.msra.mxu2 %v7324_v59 }
 0x66b   :  { %v2862_v54 = vpop.f32.mrf.mxu0 }
 0x66c   :  { %5410 = vmatmul.msk.bf16.vlgmr.msrb.gmra.mxu3 %vm184_vm1, %v2871_v3  ;;  %v7837_v3 = vld [vmem:[%s8688_s1 + $0x60] sm:$0xff] }
 0x66d   :  { %3062 = vmatpush.bf16.msrb.mxu3 %v7702_v24 }
 0x671   :  { %3063 = vmatpush.bf16.msrb.mxu3 %v7710_v30 }
 0x675   :  { %3064 = vmatpush.bf16.msrb.mxu3 %v7718_v48 }
 0x679   :  { %3065 = vmatpush.bf16.msrb.mxu3 %v7726_v25 }
 0x67c   :  { %5412 = vmatmul.msk.bf16.vlgmr.msra.gmra.mxu3 %vm184_vm1, %v2922_v49  ;;  %v7860_v49 = vld [vmem:[%s8688_s1] sm:$0xff] }
 0x67d   :  { %3066 = vmatpush.bf16.msrb.mxu3 %v7733_v31  ;;  %3119 = vmatpush.bf16.msra.mxu0 %v7860_v49 }
 0x67f   :  { %v7787_v32 = vpop.f32.mrf.mxu0 }
 0x681   :  { %3067 = vmatpush.bf16.msrb.mxu3 %v7741_v51 }
 0x685   :  { %3068 = vmatpush.bf16.msrb.mxu3 %v7748_v52 }
 0x687   :  { %v2900_v39 = vpop.f32.mrf.mxu0 }
 0x689   :  { %3069 = vmatpush.bf16.msrb.mxu3 %v7324_v59  ;;  %v2798_v59 = vadd.f32 %v2797_v7, %v2784_v11  ;;  %v7866_v11 = vld [vmem:[%s8688_s1 + $0x50] sm:$0xff]  ;;  %v2899_v7 = vadd.f32 %v7787_v32, %v7779_v1 }
 0x68b   :  { %v7768_v4 = vadd.f32 %v2810_v5, %v2798_v59 }
 0x68d   :  { %3143 = vmatpush.bf16.msra.mxu3 %v6161_v6 }
 0x691   :  { %3144 = vmatpush.bf16.msra.mxu3 %v7759_v57 }
 0x695   :  { %3145 = vmatpush.bf16.msra.mxu3 %v7765_v8 }
 0x6ac   :  { %v7798_v37 = vpop.f32.mrf.mxu1 }
 0x6b2   :  { %v7800_v45 = vpop.f32.mrf.mxu2 }
 0x6b3   :  { %v2950_v13 = vadd.f32 %v7798_v37, %v7800_v45 }
 0x6b4   :  { %v2951_v42 = vpop.f32.mrf.mxu1 }
 0x6ba   :  { %v2938_v16 = vpop.f32.mrf.mxu2 }
 0x6bb   :  { %v5924_v16 = vld [vmem:[%s8690_s3 + $0x2b0] sm:$0xff] }
 0x6cf   :  { %v2759_v34 = vpop.f32.mrf.mxu3 }
 0x6d0   :  { %v7793_v35 = vadd.f32 %v2759_v34, %v7609_v41  ;;  %v5464_v41 = vld [vmem:[%s8687_s0 + $0x78] sm:$0x7] }
 0x6d1   :  { %3054 = vst [vmem:[#allocation1] ss:$9 sm:$0xff] %v5464_v41 }
 0x6d7   :  { %v2761_v47 = vpop.f32.mrf.mxu3 }
 0x6d8   :  { %v3055_v62 = vld [vmem:[#allocation1] sm:$0xff]  ;;  %v3056_v61 = vld [vmem:[#allocation1 + $0x9] sm:$0xff]  ;;  %v3057_v2 = vld [vmem:[#allocation1 + $0x12] sm:$0xff] }
 0x6d9   :  { %3070 = vmatmul.bf16.vlgmr.msrb.gmra.mxu3 %v3055_v62  ;;  %3083 = vmatmul.bf16.vlgmr.msrb.gmra.mxu2 %v3056_v61  ;;  %3104 = vst [vmem:[#allocation1] ss:$9 sm:$0xff] %v5466_v9  ;;  %v5923_v62 = vld [vmem:[%s8690_s3 + $0x2a8] sm:$0xff]  ;;  %v5921_v61 = vld [vmem:[%s8690_s3 + $0x298] sm:$0xff] }
 0x6da   :  { %3176 = vmatpush.bf16.msrb.mxu3 %v7685_v14  ;;  %5465 = vmatmul.msk.bf16.vlgmr.msra.gmra.mxu1 %vm184_vm1, %v3057_v2 }
 0x6db   :  { %3227 = vmatpush.bf16.msrb.mxu2 %v7685_v14  ;;  %3214 = vmatpush.bf16.msra.mxu1 %v7702_v24 }
 0x6de   :  { %3177 = vmatpush.bf16.msrb.mxu3 %v7817_v46 }
 0x6df   :  { %v2834_v43 = vpop.f32.mrf.mxu3  ;;  %3228 = vmatpush.bf16.msrb.mxu2 %v7817_v46  ;;  %3215 = vmatpush.bf16.msra.mxu1 %v7710_v30 }
 0x6e0   :  { %v2848_v0 = vadd.f32 %v2847_v56, %v2834_v43  ;;  %v3107_v29 = vld [vmem:[#allocation1 + $0x12] sm:$0xff]  ;;  %v7842_v33 = vld [vmem:[#allocation1] sm:$0xff]  ;;  %v3106_v10 = vld [vmem:[#allocation1 + $0x9] sm:$0xff] }
 0x6e1   :  { %3155 = vst [vmem:[#allocation1] ss:$9 sm:$0xff] %v5468_v21  ;;  %v5470_v56 = vld [vmem:[%s8687_s0 + $0x81] sm:$0x7] }
 0x6e2   :  { %v2861_v63 = vadd.f32 %v2860_v20, %v2848_v0  ;;  %3178 = vmatpush.bf16.msrb.mxu3 %v7828_v15 }
 0x6e3   :  { %3229 = vmatpush.bf16.msrb.mxu2 %v7828_v15  ;;  %3216 = vmatpush.bf16.msra.mxu1 %v7718_v48 }
 0x6e4   :  { %v2864_v44 = vmax.f32 %v7768_v4, %v2861_v63 }
 0x6e6   :  { %3179 = vmatpush.bf16.msrb.mxu3 %v7837_v3 }
 0x6e7   :  { %v2836_v58 = vpop.f32.mrf.mxu3  ;;  %3230 = vmatpush.bf16.msrb.mxu2 %v7837_v3  ;;  %3217 = vmatpush.bf16.msra.mxu1 %v7726_v25 }
 0x6e8   :  { %v3156_v59 = vld [vmem:[#allocation1] sm:$0xff]  ;;  %v3157_v19 = vld [vmem:[#allocation1 + $0x9] sm:$0xff]  ;;  %v3158_v20 = vld [vmem:[#allocation1 + $0x12] sm:$0xff] }
 0x6e9   :  { %5467 = vmatmul.msk.bf16.vlgmr.msra.gmra.mxu3 %vm184_vm1, %v3107_v29  ;;  %3171 = vmatmul.bf16.vlgmr.msra.gmra.mxu2 %v3156_v59  ;;  %3206 = vst [vmem:[#allocation1] ss:$9 sm:$0xff] %v5470_v56  ;;  %v5918_v59 = vld [vmem:[%s8690_s3 + $0x280] sm:$0xff] }
 0x6ea   :  { %3180 = vmatpush.bf16.msrb.mxu3 %v7852_v26  ;;  %3133 = vmatmul.bf16.vlgmr.msrb.gmra.mxu1 %v3106_v10  ;;  %v5919_v10 = vld [vmem:[%s8690_s3 + $0x288] sm:$0xff] }
 0x6eb   :  { %3231 = vmatpush.bf16.msrb.mxu2 %v7852_v26  ;;  %3218 = vmatpush.bf16.msra.mxu1 %v7733_v31 }
 0x6ee   :  { %3181 = vmatpush.bf16.msrb.mxu3 %v7866_v11 }
 0x6ef   :  { %v2911_v18 = vpop.f32.mrf.mxu3  ;;  %3232 = vmatpush.bf16.msrb.mxu2 %v7866_v11  ;;  %3219 = vmatpush.bf16.msra.mxu1 %v7741_v51 }
 0x6f0   :  { %v2912_v4 = vadd.f32 %v2911_v18, %v2899_v7  ;;  %v3208_v60 = vld [vmem:[#allocation1 + $0x9] sm:$0xff]  ;;  %v3207_v28 = vld [vmem:[#allocation1] sm:$0xff]  ;;  %v3209_v32 = vld [vmem:[#allocation1 + $0x12] sm:$0xff] }
 0x6f1   :  { %v5920_v18 = vld [vmem:[%s8690_s3 + $0x290] sm:$0xff] }
 0x6f2   :  { %3182 = vmatpush.bf16.msrb.mxu3 %v7876_v12  ;;  %v2915_v22 = vmax.f32 %v2864_v44, %v2912_v4  ;;  %v5922_v44 = vld [vmem:[%s8690_s3 + $0x2a0] sm:$0xff] }
 0x6f3   :  { %3233 = vmatpush.bf16.msrb.mxu2 %v7876_v12  ;;  %3220 = vmatpush.bf16.msra.mxu1 %v7748_v52 }
 0x6f6   :  { %3183 = vmatpush.bf16.msrb.mxu3 %v7886_v38 }
 0x6f7   :  { %v2913_v5 = vpop.f32.mrf.mxu3  ;;  %3234 = vmatpush.bf16.msrb.mxu2 %v7886_v38  ;;  %3221 = vmatpush.bf16.msra.mxu1 %v7860_v49 }
 0x6f9   :  { %3184 = vmatmul.bf16.vlgmr.msrb.gmra.mxu3 %v3157_v19 }
 0x6fa   :  { %3235 = vmatmul.bf16.vlgmr.msrb.gmra.mxu2 %v3208_v60  ;;  %3222 = vmatmul.bf16.vlgmr.msra.gmra.mxu1 %v3207_v28 }
 0x6fb   :  { %3362 = vmatpush.bf16.msrb.mxu1 %v7685_v14  ;;  %3380 = vmatpush.bf16.msra.mxu2 %v6161_v6 }
 0x6fc   :  { %3324 = vmatpush.bf16.msra.mxu3 %v5925_v40 }
 0x6ff   :  { %v2962_v53 = vpop.f32.mrf.mxu3  ;;  %3363 = vmatpush.bf16.msrb.mxu1 %v7817_v46  ;;  %3381 = vmatpush.bf16.msra.mxu2 %v7759_v57 }
 0x700   :  { %v2963_v54 = vadd.f32 %v2962_v53, %v2950_v13  ;;  %3325 = vmatpush.bf16.msra.mxu3 %v5924_v16 }
 0x702   :  { %v2966_v1 = vmax.f32 %v2915_v22, %v2963_v54 }
 0x703   :  { %3364 = vmatpush.bf16.msrb.mxu1 %v7828_v15  ;;  %3382 = vmatpush.bf16.msra.mxu2 %v7765_v8 }
 0x704   :  { %v2967_v23 = vadd.f32 %v7661_v17, %v2966_v1  ;;  %3326 = vmatpush.bf16.msra.mxu3 %v5923_v62  ;;  %v5525_v1 = vld [vmem:[%s8687_s0 + $0x87] sm:$0x7] }
 0x706   :  { %vm2968_vm5 = vcmp.gt.f32.partialorder %v2967_v23, 1.0 }
 0x707   :  { %vm5462_vm6 = vmpackc.low %vm2968_vm5, %vm2968_vm5  ;;  %v2964_v27 = vpop.f32.mrf.mxu3  ;;  %3412 = vmatpush.bf16.msrb.mxu2 %v7685_v14  ;;  %3365 = vmatpush.bf16.msrb.mxu1 %v7837_v3 }
 0x708   :  { %5463 = vmatmul.msk.bf16.vlgmr.msrb.gmra.mxu0 %vm5462_vm6, %v6099_v55  ;;  %3327 = vmatpush.bf16.msra.mxu3 %v5922_v44  ;;  %v5529_v44 = vld [vmem:[%s8687_s0 + $0x8d] sm:$0x7] }
 0x709   :  { %3194 = vmatpush.bf16.msrb.mxu0 %v6161_v6 }
 0x70b   :  { %3413 = vmatpush.bf16.msrb.mxu2 %v7817_v46  ;;  %3366 = vmatpush.bf16.msrb.mxu1 %v7852_v26 }
 0x70c   :  { %3328 = vmatpush.bf16.msra.mxu3 %v5921_v61 }
 0x70d   :  { %3195 = vmatpush.bf16.msrb.mxu0 %v7759_v57 }
 0x70f   :  { %3414 = vmatpush.bf16.msrb.mxu2 %v7828_v15  ;;  %3367 = vmatpush.bf16.msrb.mxu1 %v7866_v11 }
 0x710   :  { %3329 = vmatpush.bf16.msra.mxu3 %v5920_v18 }
 0x711   :  { %3196 = vmatpush.bf16.msrb.mxu0 %v7765_v8 }
 0x713   :  { %3415 = vmatpush.bf16.msrb.mxu2 %v7837_v3  ;;  %3368 = vmatpush.bf16.msrb.mxu1 %v7876_v12 }
 0x714   :  { %3330 = vmatpush.bf16.msra.mxu3 %v5919_v10 }
 0x717   :  { %3416 = vmatpush.bf16.msrb.mxu2 %v7852_v26  ;;  %3369 = vmatpush.bf16.msrb.mxu1 %v7886_v38 }
 0x718   :  { %3120 = vmatmul.bf16.vlgmr.msra.gmra.mxu0 %v7842_v33  ;;  %3331 = vmatpush.bf16.msra.mxu3 %v5918_v59 }
 0x719   :  { %3245 = vmatpush.bf16.msra.mxu0 %v6161_v6 }
 0x71b   :  { %3450 = vmatpush.bf16.msra.mxu1 %v7702_v24  ;;  %3417 = vmatpush.bf16.msrb.mxu2 %v7866_v11 }
 0x71c   :  { %3399 = vmatpush.bf16.msrb.mxu3 %v7702_v24 }
 0x71d   :  { %3246 = vmatpush.bf16.msra.mxu0 %v7759_v57 }
 0x71f   :  { %3451 = vmatpush.bf16.msra.mxu1 %v7710_v30  ;;  %3418 = vmatpush.bf16.msrb.mxu2 %v7876_v12 }
 0x720   :  { %3400 = vmatpush.bf16.msrb.mxu3 %v7710_v30 }
 0x721   :  { %3247 = vmatpush.bf16.msra.mxu0 %v7765_v8 }
 0x723   :  { %3452 = vmatpush.bf16.msra.mxu1 %v7718_v48  ;;  %3419 = vmatpush.bf16.msrb.mxu2 %v7886_v38 }
 0x724   :  { %3401 = vmatpush.bf16.msrb.mxu3 %v7718_v48 }
 0x727   :  { %3453 = vmatpush.bf16.msra.mxu1 %v7726_v25 }
 0x728   :  { %5469 = vmatmul.msk.bf16.vlgmr.msrb.gmra.mxu0 %vm184_vm1, %v3158_v20  ;;  %v5523_v20 = vld [vmem:[%s8687_s0 + $0x84] sm:$0x7]  ;;  %3402 = vmatpush.bf16.msrb.mxu3 %v7726_v25 }
 0x729   :  { %3349 = vmatpush.bf16.msrb.mxu0 %v7702_v24  ;;  %3341 = vst [vmem:[#allocation1] ss:$9 sm:$0xff] %v5523_v20 }
 0x72b   :  { %3454 = vmatpush.bf16.msra.mxu1 %v7733_v31 }
 0x72c   :  { %3403 = vmatpush.bf16.msrb.mxu3 %v7733_v31 }
 0x72d   :  { %3350 = vmatpush.bf16.msrb.mxu0 %v7710_v30 }
 0x72f   :  { %3455 = vmatpush.bf16.msra.mxu1 %v7741_v51 }
 0x730   :  { %v3344_v56 = vld [vmem:[#allocation1 + $0x12] sm:$0xff]  ;;  %v3342_v22 = vld [vmem:[#allocation1] sm:$0xff]  ;;  %v3343_v54 = vld [vmem:[#allocation1 + $0x9] sm:$0xff]  ;;  %3404 = vmatpush.bf16.msrb.mxu3 %v7741_v51 }
 0x731   :  { %3351 = vmatpush.bf16.msrb.mxu0 %v7718_v48  ;;  %5524 = vmatmul.msk.bf16.vlgmr.msra.gmra.mxu2 %vm184_vm1, %v3344_v56  ;;  %3391 = vst [vmem:[#allocation1] ss:$9 sm:$0xff] %v5525_v1 }
 0x732   :  { %3501 = vmatpush.bf16.msra.mxu2 %v7702_v24  ;;  %3370 = vmatmul.bf16.vlgmr.msrb.gmra.mxu1 %v3343_v54  ;;  %v5930_v54 = vld [vmem:[%s8690_s3 + $0x2e0] sm:$0xff] }
 0x733   :  { %3456 = vmatpush.bf16.msra.mxu1 %v7748_v52 }
 0x734   :  { %3405 = vmatpush.bf16.msrb.mxu3 %v7748_v52 }
 0x735   :  { %3352 = vmatpush.bf16.msrb.mxu0 %v7726_v25 }
 0x736   :  { %3502 = vmatpush.bf16.msra.mxu2 %v7710_v30 }
 0x737   :  { %3457 = vmatpush.bf16.msra.mxu1 %v7860_v49 }
 0x738   :  { %5471 = vmatmul.msk.bf16.vlgmr.msra.gmra.mxu0 %vm184_vm1, %v3209_v32  ;;  %3406 = vmatpush.bf16.msrb.mxu3 %v7860_v49  ;;  %v3393_v28 = vld [vmem:[#allocation1 + $0x9] sm:$0xff] }
 0x739   :  { %3353 = vmatpush.bf16.msrb.mxu0 %v7733_v31 }
 0x73a   :  { %3503 = vmatpush.bf16.msra.mxu2 %v7718_v48 }
 0x73b   :  { %3514 = vmatpush.bf16.msrb.mxu1 %v7685_v14 }
 0x73d   :  { %3354 = vmatpush.bf16.msrb.mxu0 %v7741_v51 }
 0x73e   :  { %3504 = vmatpush.bf16.msra.mxu2 %v7726_v25 }
 0x73f   :  { %3515 = vmatpush.bf16.msrb.mxu1 %v7817_v46 }
 0x741   :  { %3355 = vmatpush.bf16.msrb.mxu0 %v7748_v52  ;;  %3420 = vmatmul.bf16.vlgmr.msrb.gmra.mxu2 %v3393_v28  ;;  %v5928_v28 = vld [vmem:[%s8690_s3 + $0x2d0] sm:$0xff] }
 0x742   :  { %3505 = vmatpush.bf16.msra.mxu2 %v7733_v31 }
 0x743   :  { %3516 = vmatpush.bf16.msrb.mxu1 %v7828_v15 }
 0x745   :  { %3356 = vmatpush.bf16.msrb.mxu0 %v7860_v49 }
 0x746   :  { %3506 = vmatpush.bf16.msra.mxu2 %v7741_v51 }
 0x747   :  { %3517 = vmatpush.bf16.msrb.mxu1 %v7837_v3 }
 0x748   :  { %3357 = vmatmul.bf16.vlgmr.msrb.gmra.mxu0 %v3342_v22 }
 0x749   :  { %3430 = vmatpush.bf16.msra.mxu0 %v6161_v6 }
 0x74a   :  { %3507 = vmatpush.bf16.msra.mxu2 %v7748_v52 }
 0x74b   :  { %3518 = vmatpush.bf16.msrb.mxu1 %v7852_v26 }
 0x74d   :  { %3431 = vmatpush.bf16.msra.mxu0 %v7759_v57 }
 0x74e   :  { %3508 = vmatpush.bf16.msra.mxu2 %v7860_v49 }
 0x74f   :  { %3519 = vmatpush.bf16.msrb.mxu1 %v7866_v11 }
 0x751   :  { %3432 = vmatpush.bf16.msra.mxu0 %v7765_v8 }
 0x752   :  { %3649 = vmatpush.bf16.msrb.mxu2 %v7685_v14 }
 0x753   :  { %3520 = vmatpush.bf16.msrb.mxu1 %v7876_v12 }
 0x755   :  { %3463 = vmatpush.bf16.msrb.mxu0 %v7685_v14 }
 0x756   :  { %3650 = vmatpush.bf16.msrb.mxu2 %v7817_v46 }
 0x757   :  { %v3097_v34 = vpop.f32.mrf.mxu1  ;;  %3521 = vmatpush.bf16.msrb.mxu1 %v7886_v38 }
 0x759   :  { %3464 = vmatpush.bf16.msrb.mxu0 %v7817_v46 }
 0x75a   :  { %3651 = vmatpush.bf16.msrb.mxu2 %v7828_v15 }
 0x75c   :  { %v3071_v50 = vpop.f32.mrf.mxu3  ;;  %v3084_v37 = vpop.f32.mrf.mxu2 }
 0x75d   :  { %v3085_v39 = vadd.f32 %v3084_v37, %v3071_v50  ;;  %3465 = vmatpush.bf16.msrb.mxu0 %v7828_v15  ;;  %v3392_v50 = vld [vmem:[#allocation1] sm:$0xff] }
 0x75e   :  { %3652 = vmatpush.bf16.msrb.mxu2 %v7837_v3 }
 0x75f   :  { %v3099_v45 = vpop.f32.mrf.mxu1  ;;  %v7950_v47 = vadd.f32 %v3097_v34, %v3085_v39  ;;  %v3394_v34 = vld [vmem:[#allocation1 + $0x12] sm:$0xff] }
 0x760   :  { %5526 = vmatmul.msk.bf16.vlgmr.msra.gmra.mxu0 %vm184_vm1, %v3394_v34  ;;  %v5927_v34 = vld [vmem:[%s8690_s3 + $0x2c8] sm:$0xff] }
 0x761   :  { %3466 = vmatpush.bf16.msrb.mxu0 %v7837_v3 }
 0x762   :  { %3653 = vmatpush.bf16.msrb.mxu2 %v7852_v26 }
 0x764   :  { %v3073_v36 = vpop.f32.mrf.mxu3  ;;  %v3086_v41 = vpop.f32.mrf.mxu2 }
 0x765   :  { %v5527_v36 = vld [vmem:[%s8687_s0 + $0x8a] sm:$0x7]  ;;  %3467 = vmatpush.bf16.msrb.mxu0 %v7852_v26 }
 0x766   :  { %3442 = vst [vmem:[#allocation1] ss:$9 sm:$0xff] %v5527_v36  ;;  %3654 = vmatpush.bf16.msrb.mxu2 %v7866_v11 }
 0x767   :  { %v3134_v43 = vpop.f32.mrf.mxu1 }
 0x769   :  { %3468 = vmatpush.bf16.msrb.mxu0 %v7866_v11 }
 0x76a   :  { %3655 = vmatpush.bf16.msrb.mxu2 %v7876_v12 }
 0x76c   :  { %v7952_v42 = vpop.f32.mrf.mxu3  ;;  %v3172_v63 = vpop.f32.mrf.mxu2 }
 0x76d   :  { %v3443_v62 = vld [vmem:[#allocation1] sm:$0xff]  ;;  %3469 = vmatpush.bf16.msrb.mxu0 %v7876_v12 }
 0x76e   :  { %3458 = vmatmul.bf16.vlgmr.msra.gmra.mxu1 %v3443_v62  ;;  %3656 = vmatpush.bf16.msrb.mxu2 %v7886_v38 }
 0x76f   :  { %v3136_v58 = vpop.f32.mrf.mxu1  ;;  %3667 = vmatpush.bf16.msra.mxu1 %v6161_v6 }
 0x771   :  { %3470 = vmatpush.bf16.msrb.mxu0 %v7886_v38 }
 0x773   :  { %3668 = vmatpush.bf16.msra.mxu1 %v7759_v57 }
 0x774   :  { %v3149_v0 = vpop.f32.mrf.mxu3  ;;  %v3174_v9 = vpop.f32.mrf.mxu2 }
 0x775   :  { %v3445_v0 = vld [vmem:[#allocation1 + $0x12] sm:$0xff] }
 0x777   :  { %v3223_v21 = vpop.f32.mrf.mxu1  ;;  %3669 = vmatpush.bf16.msra.mxu1 %v7765_v8 }
 0x77c   :  { %v3185_v2 = vpop.f32.mrf.mxu3 }
 0x77d   :  { %v3236_v7 = vpop.f32.mrf.mxu2  ;;  %v3186_v32 = vadd.f32 %v3185_v2, %v3172_v63 }
 0x77e   :  { %v3237_v45 = vadd.f32 %v3236_v7, %v3223_v21 }
 0x77f   :  { %v3225_v13 = vpop.f32.mrf.mxu1 }
 0x784   :  { %v3187_v5 = vpop.f32.mrf.mxu3 }
 0x785   :  { %v3046_v29 = vpop.f32.mrf.mxu0 }
 0x786   :  { %v7970_v33 = vadd.f32 %v3046_v29, %v7793_v35  ;;  %v3238_v35 = vpop.f32.mrf.mxu2 }
 0x78d   :  { %v3048_v4 = vpop.f32.mrf.mxu0 }
 0x78e   :  { %v5933_v4 = vld [vmem:[%s8690_s3 + $0x2f8] sm:$0xff] }
 0x78f   :  { %3611 = vmatpush.bf16.msra.mxu0 %v5933_v4 }
 0x795   :  { %v3121_v19 = vpop.f32.mrf.mxu0 }
 0x796   :  { %v3135_v27 = vadd.f32 %v3134_v43, %v3121_v19  ;;  %v5932_v19 = vld [vmem:[%s8690_s3 + $0x2f0] sm:$0xff] }
 0x797   :  { %3612 = vmatpush.bf16.msra.mxu0 %v5932_v19 }
 0x798   :  { %v3148_v37 = vadd.f32 %v7952_v42, %v3135_v27 }
 0x79a   :  { %v3151_v40 = vmax.f32 %v7950_v47, %v3148_v37  ;;  %v3444_v47 = vld [vmem:[#allocation1 + $0x9] sm:$0xff] }
 0x79b   :  { %3493 = vst [vmem:[#allocation1] ss:$9 sm:$0xff] %v5529_v44  ;;  %3471 = vmatmul.bf16.vlgmr.msrb.gmra.mxu0 %v3444_v47 }
 0x79d   :  { %v3123_v53 = vpop.f32.mrf.mxu0 }
 0x79e   :  { %v5931_v53 = vld [vmem:[%s8690_s3 + $0x2e8] sm:$0xff] }
 0x79f   :  { %3613 = vmatpush.bf16.msra.mxu0 %v5931_v53 }
 0x7a2   :  { %v3494_v61 = vld [vmem:[#allocation1] sm:$0xff]  ;;  %v3495_v2 = vld [vmem:[#allocation1 + $0x9] sm:$0xff]  ;;  %v3496_v9 = vld [vmem:[#allocation1 + $0x12] sm:$0xff] }
 0x7a3   :  { %3509 = vmatmul.bf16.vlgmr.msra.gmra.mxu2 %v3494_v61  ;;  %3522 = vmatmul.bf16.vlgmr.msrb.gmra.mxu1 %v3495_v2  ;;  %v5584_v61 = vld [vmem:[%s8687_s0 + $0x93] sm:$0x7] }
 0x7a4   :  { %3699 = vmatpush.bf16.msrb.mxu1 %v7685_v14  ;;  %3737 = vmatpush.bf16.msra.mxu2 %v7702_v24 }
 0x7a5   :  { %v3198_v23 = vpop.f32.mrf.mxu0  ;;  %3614 = vmatpush.bf16.msra.mxu0 %v5930_v54 }
 0x7a6   :  { %v3199_v39 = vadd.f32 %v3198_v23, %v3186_v32  ;;  %v5929_v23 = vld [vmem:[%s8690_s3 + $0x2d8] sm:$0xff] }
 0x7a8   :  { %v3202_v16 = vmax.f32 %v3151_v40, %v3199_v39  ;;  %3700 = vmatpush.bf16.msrb.mxu1 %v7817_v46  ;;  %3738 = vmatpush.bf16.msra.mxu2 %v7710_v30 }
 0x7a9   :  { %3615 = vmatpush.bf16.msra.mxu0 %v5929_v23 }
 0x7ac   :  { %3701 = vmatpush.bf16.msrb.mxu1 %v7828_v15  ;;  %3739 = vmatpush.bf16.msra.mxu2 %v7718_v48 }
 0x7ad   :  { %v3200_v60 = vpop.f32.mrf.mxu0  ;;  %3616 = vmatpush.bf16.msra.mxu0 %v5928_v28 }
 0x7af   :  { %v3371_v10 = vpop.f32.mrf.mxu1 }
 0x7b0   :  { %3702 = vmatpush.bf16.msrb.mxu1 %v7837_v3  ;;  %3740 = vmatpush.bf16.msra.mxu2 %v7726_v25 }
 0x7b1   :  { %3617 = vmatpush.bf16.msra.mxu0 %v5927_v34 }
 0x7b4   :  { %3703 = vmatpush.bf16.msrb.mxu1 %v7852_v26  ;;  %3741 = vmatpush.bf16.msra.mxu2 %v7733_v31  ;;  %v3384_v29 = vpop.f32.mrf.mxu2 }
 0x7b5   :  { %v3249_v41 = vpop.f32.mrf.mxu0 }
 0x7b6   :  { %v3250_v43 = vadd.f32 %v3249_v41, %v3237_v45  ;;  %v5926_v45 = vld [vmem:[%s8690_s3 + $0x2c0] sm:$0xff]  ;;  %v5582_v41 = vld [vmem:[%s8687_s0 + $0x90] sm:$0x7] }
 0x7b7   :  { %v3373_v13 = vpop.f32.mrf.mxu1  ;;  %3618 = vmatpush.bf16.msra.mxu0 %v5926_v45  ;;  %3628 = vst [vmem:[#allocation1] ss:$9 sm:$0xff] %v5582_v41  ;;  %v5937_v45 = vld [vmem:[%s8690_s3 + $0x318] sm:$0xff] }
 0x7b8   :  { %v3253_v42 = vmax.f32 %v3202_v16, %v3250_v43  ;;  %3704 = vmatpush.bf16.msrb.mxu1 %v7866_v11  ;;  %3742 = vmatpush.bf16.msra.mxu2 %v7741_v51 }
 0x7ba   :  { %v3254_v63 = vadd.f32 %v7661_v17, %v3253_v42 }
 0x7bb   :  { %3686 = vmatpush.bf16.msrb.mxu0 %v7702_v24 }
 0x7bc   :  { %vm3255_vm7 = vcmp.gt.f32.partialorder %v3254_v63, 1.0  ;;  %3705 = vmatpush.bf16.msrb.mxu1 %v7876_v12  ;;  %3743 = vmatpush.bf16.msra.mxu2 %v7748_v52  ;;  %v3386_v59 = vpop.f32.mrf.mxu2 }
 0x7bd   :  { %vm5521_vm8 = vmpackc.low %vm3255_vm7, %vm3255_vm7  ;;  %v3251_v58 = vpop.f32.mrf.mxu0 }
 0x7be   :  { %5522 = vmatmul.msk.bf16.vlgmr.msra.gmra.mxu3 %vm5521_vm8, %v6099_v55  ;;  %v3629_v62 = vld [vmem:[#allocation1] sm:$0xff]  ;;  %v3630_v44 = vld [vmem:[#allocation1 + $0x9] sm:$0xff]  ;;  %v3631_v58 = vld [vmem:[#allocation1 + $0x12] sm:$0xff] }
 0x7bf   :  { %3481 = vmatpush.bf16.msra.mxu3 %v6161_v6  ;;  %3687 = vmatpush.bf16.msrb.mxu0 %v7710_v30  ;;  %3678 = vst [vmem:[#allocation1] ss:$9 sm:$0xff] %v5584_v61  ;;  %v8247_v61 = vld [vmem:[%s8688_s1 + $0x30] sm:$0xff] }
 0x7c0   :  { %3706 = vmatpush.bf16.msrb.mxu1 %v7886_v38  ;;  %3744 = vmatpush.bf16.msra.mxu2 %v7860_v49 }
 0x7c1   :  { %3657 = vmatmul.bf16.vlgmr.msrb.gmra.mxu2 %v3630_v44  ;;  %5583 = vmatmul.msk.bf16.vlgmr.msra.gmra.mxu1 %vm184_vm1, %v3631_v58 }
 0x7c3   :  { %3482 = vmatpush.bf16.msra.mxu3 %v7759_v57  ;;  %3688 = vmatpush.bf16.msrb.mxu0 %v7718_v48 }
 0x7c4   :  { %v3421_v20 = vpop.f32.mrf.mxu2  ;;  %3801 = vmatpush.bf16.msrb.mxu2 %v7685_v14  ;;  %3788 = vmatpush.bf16.msra.mxu1 %v7702_v24 }
 0x7c5   :  { %v3358_v18 = vpop.f32.mrf.mxu0 }
 0x7c6   :  { %v3372_v21 = vadd.f32 %v3371_v10, %v3358_v18  ;;  %v3679_v18 = vld [vmem:[#allocation1] sm:$0xff]  ;;  %v5586_v10 = vld [vmem:[%s8687_s0 + $0x96] sm:$0x7] }
 0x7c7   :  { %3483 = vmatpush.bf16.msra.mxu3 %v7765_v8  ;;  %3689 = vmatpush.bf16.msrb.mxu0 %v7726_v25 }
 0x7c8   :  { %v8074_v7 = vadd.f32 %v3384_v29, %v3372_v21  ;;  %3802 = vmatpush.bf16.msrb.mxu2 %v7817_v46  ;;  %3789 = vmatpush.bf16.msra.mxu1 %v7710_v30  ;;  %v3680_v29 = vld [vmem:[#allocation1 + $0x9] sm:$0xff] }
 0x7cb   :  { %3690 = vmatpush.bf16.msrb.mxu0 %v7733_v31 }
 0x7cc   :  { %v3423_v1 = vpop.f32.mrf.mxu2  ;;  %3803 = vmatpush.bf16.msrb.mxu2 %v7828_v15  ;;  %3790 = vmatpush.bf16.msra.mxu1 %v7718_v48 }
 0x7cd   :  { %v3360_v5 = vpop.f32.mrf.mxu0 }
 0x7ce   :  { %3407 = vmatmul.bf16.vlgmr.msrb.gmra.mxu3 %v3392_v50 }
 0x7cf   :  { %3532 = vmatpush.bf16.msrb.mxu3 %v6161_v6  ;;  %3691 = vmatpush.bf16.msrb.mxu0 %v7741_v51 }
 0x7d0   :  { %3804 = vmatpush.bf16.msrb.mxu2 %v7837_v3  ;;  %3791 = vmatpush.bf16.msra.mxu1 %v7726_v25 }
 0x7d1   :  { %3707 = vmatmul.bf16.vlgmr.msrb.gmra.mxu1 %v3680_v29  ;;  %v8256_v29 = vld [vmem:[%s8688_s1 + $0x28] sm:$0xff] }
 0x7d3   :  { %3533 = vmatpush.bf16.msrb.mxu3 %v7759_v57  ;;  %3692 = vmatpush.bf16.msrb.mxu0 %v7748_v52 }
 0x7d4   :  { %3805 = vmatpush.bf16.msrb.mxu2 %v7852_v26  ;;  %3792 = vmatpush.bf16.msra.mxu1 %v7733_v31 }
 0x7d7   :  { %3534 = vmatpush.bf16.msrb.mxu3 %v7765_v8  ;;  %3693 = vmatpush.bf16.msrb.mxu0 %v7860_v49 }
 0x7d8   :  { %3806 = vmatpush.bf16.msrb.mxu2 %v7866_v11  ;;  %3793 = vmatpush.bf16.msra.mxu1 %v7741_v51 }
 0x7dc   :  { %3807 = vmatpush.bf16.msrb.mxu2 %v7876_v12  ;;  %3794 = vmatpush.bf16.msra.mxu1 %v7748_v52 }
 0x7dd   :  { %v3434_v35 = vpop.f32.mrf.mxu0 }
 0x7de   :  { %5528 = vmatmul.msk.bf16.vlgmr.msra.gmra.mxu3 %vm184_vm1, %v3445_v0 }
 0x7df   :  { %3636 = vmatpush.bf16.msra.mxu3 %v7702_v24 }
 0x7e0   :  { %3808 = vmatpush.bf16.msrb.mxu2 %v7886_v38  ;;  %3795 = vmatpush.bf16.msra.mxu1 %v7860_v49 }
 0x7e3   :  { %3637 = vmatpush.bf16.msra.mxu3 %v7710_v30 }
 0x7e4   :  { %3936 = vmatpush.bf16.msrb.mxu1 %v7685_v14 }
 0x7e5   :  { %v3436_v56 = vpop.f32.mrf.mxu0 }
 0x7e7   :  { %3638 = vmatpush.bf16.msra.mxu3 %v7718_v48 }
 0x7e8   :  { %3937 = vmatpush.bf16.msrb.mxu1 %v7817_v46 }
 0x7eb   :  { %3639 = vmatpush.bf16.msra.mxu3 %v7726_v25  ;;  %v8085_v22 = vpop.f32.mrf.mxu1 }
 0x7ec   :  { %3938 = vmatpush.bf16.msrb.mxu1 %v7828_v15 }
 0x7ee   :  { %5530 = vmatmul.msk.bf16.vlgmr.msrb.gmra.mxu3 %vm184_vm1, %v3496_v9  ;;  %v3681_v9 = vld [vmem:[#allocation1 + $0x12] sm:$0xff] }
 0x7ef   :  { %3640 = vmatpush.bf16.msra.mxu3 %v7733_v31  ;;  %3729 = vst [vmem:[#allocation1] ss:$9 sm:$0xff] %v5586_v10  ;;  %v8262_v10 = vld [vmem:[%s8688_s1 + $0x20] sm:$0xff] }
 0x7f0   :  { %3939 = vmatpush.bf16.msrb.mxu1 %v7837_v3 }
 0x7f3   :  { %3641 = vmatpush.bf16.msra.mxu3 %v7741_v51  ;;  %v3461_v27 = vpop.f32.mrf.mxu1 }
 0x7f4   :  { %3940 = vmatpush.bf16.msrb.mxu1 %v7852_v26 }
 0x7f6   :  { %v3731_v13 = vld [vmem:[#allocation1 + $0x9] sm:$0xff] }
 0x7f7   :  { %3642 = vmatpush.bf16.msra.mxu3 %v7748_v52 }
 0x7f8   :  { %3941 = vmatpush.bf16.msrb.mxu1 %v7866_v11 }
 0x7fb   :  { %3643 = vmatpush.bf16.msra.mxu3 %v7860_v49 }
 0x7fc   :  { %3942 = vmatpush.bf16.msrb.mxu1 %v7876_v12 }
 0x7fe   :  { %3644 = vmatmul.bf16.vlgmr.msra.gmra.mxu3 %v3629_v62  ;;  %v5935_v62 = vld [vmem:[%s8690_s3 + $0x308] sm:$0xff] }
 0x7ff   :  { %3717 = vmatpush.bf16.msrb.mxu3 %v6161_v6 }
 0x800   :  { %3943 = vmatpush.bf16.msrb.mxu1 %v7886_v38 }
 0x803   :  { %3718 = vmatpush.bf16.msrb.mxu3 %v7759_v57 }
 0x807   :  { %3719 = vmatpush.bf16.msrb.mxu3 %v7765_v8 }
 0x80b   :  { %3750 = vmatpush.bf16.msra.mxu3 %v7685_v14 }
 0x80e   :  { %5585 = vmatmul.msk.bf16.vlgmr.msrb.gmra.mxu3 %vm184_vm1, %v3681_v9 }
 0x80f   :  { %3751 = vmatpush.bf16.msra.mxu3 %v7817_v46 }
 0x813   :  { %3752 = vmatpush.bf16.msra.mxu3 %v7828_v15 }
 0x817   :  { %3753 = vmatpush.bf16.msra.mxu3 %v7837_v3 }
 0x818   :  { %v3472_v60 = vpop.f32.mrf.mxu0 }
 0x819   :  { %v3473_v5 = vadd.f32 %v3472_v60, %v8085_v22 }
 0x81b   :  { %3754 = vmatpush.bf16.msra.mxu3 %v7852_v26 }
 0x81f   :  { %3755 = vmatpush.bf16.msra.mxu3 %v7866_v11 }
 0x820   :  { %v3523_v36 = vpop.f32.mrf.mxu1  ;;  %v3474_v37 = vpop.f32.mrf.mxu0 }
 0x821   :  { %v5938_v37 = vld [vmem:[%s8690_s3 + $0x320] sm:$0xff] }
 0x823   :  { %3756 = vmatpush.bf16.msra.mxu3 %v7876_v12 }
 0x826   :  { %v3510_v39 = vpop.f32.mrf.mxu2 }
 0x827   :  { %v3524_v4 = vadd.f32 %v3523_v36, %v3510_v39  ;;  %3757 = vmatpush.bf16.msra.mxu3 %v7886_v38 }
 0x82a   :  { %3758 = vmatmul.bf16.vlgmr.msra.gmra.mxu3 %v3731_v13  ;;  %v8272_v13 = vld [vmem:[%s8688_s1 + $0x18] sm:$0xff] }
 0x82e   :  { %v3512_v16 = vpop.f32.mrf.mxu2 }
 0x841   :  { %v3333_v32 = vpop.f32.mrf.mxu3 }
 0x842   :  { %v8097_v50 = vadd.f32 %v3333_v32, %v7970_v33  ;;  %v3525_v33 = vpop.f32.mrf.mxu1  ;;  %v5939_v32 = vld [vmem:[%s8690_s3 + $0x328] sm:$0xff] }
 0x843   :  { %v5936_v33 = vld [vmem:[%s8690_s3 + $0x310] sm:$0xff] }
 0x849   :  { %v3335_v40 = vpop.f32.mrf.mxu3 }
 0x851   :  { %v3408_v43 = vpop.f32.mrf.mxu3 }
 0x852   :  { %v3422_v42 = vadd.f32 %v3421_v20, %v3408_v43  ;;  %v5588_v20 = vld [vmem:[%s8687_s0 + $0x99] sm:$0x7] }
 0x854   :  { %v3435_v0 = vadd.f32 %v3434_v35, %v3422_v42  ;;  %v3732_v35 = vld [vmem:[#allocation1 + $0x12] sm:$0xff] }
 0x856   :  { %v3438_v63 = vmax.f32 %v8074_v7, %v3435_v0  ;;  %v3730_v7 = vld [vmem:[#allocation1] sm:$0xff] }
 0x857   :  { %3745 = vmatmul.bf16.vlgmr.msra.gmra.mxu2 %v3730_v7  ;;  %3780 = vst [vmem:[#allocation1] ss:$9 sm:$0xff] %v5588_v20 }
 0x858   :  { %3954 = vmatpush.bf16.msra.mxu2 %v6161_v6 }
 0x859   :  { %v3410_v47 = vpop.f32.mrf.mxu3 }
 0x85a   :  { %v5934_v47 = vld [vmem:[%s8690_s3 + $0x300] sm:$0xff] }
 0x85c   :  { %3955 = vmatpush.bf16.msra.mxu2 %v7759_v57 }
 0x85e   :  { %v3782_v23 = vld [vmem:[#allocation1 + $0x9] sm:$0xff]  ;;  %v3781_v27 = vld [vmem:[#allocation1] sm:$0xff] }
 0x85f   :  { %3796 = vmatmul.bf16.vlgmr.msra.gmra.mxu1 %v3781_v27 }
 0x860   :  { %3956 = vmatpush.bf16.msra.mxu2 %v7765_v8  ;;  %4024 = vmatpush.bf16.msra.mxu1 %v7702_v24 }
 0x861   :  { %v3485_v2 = vpop.f32.mrf.mxu3 }
 0x862   :  { %v3486_v59 = vadd.f32 %v3485_v2, %v3473_v5 }
 0x864   :  { %v3489_v53 = vmax.f32 %v3438_v63, %v3486_v59  ;;  %4025 = vmatpush.bf16.msra.mxu1 %v7710_v30 }
 0x867   :  { %3809 = vmatmul.bf16.vlgmr.msrb.gmra.mxu2 %v3782_v23 }
 0x868   :  { %3986 = vmatpush.bf16.msrb.mxu2 %v7685_v14  ;;  %4026 = vmatpush.bf16.msra.mxu1 %v7718_v48 }
 0x869   :  { %v3487_v21 = vpop.f32.mrf.mxu3 }
 0x86c   :  { %3987 = vmatpush.bf16.msrb.mxu2 %v7817_v46  ;;  %4027 = vmatpush.bf16.msra.mxu1 %v7726_v25 }
 0x870   :  { %3988 = vmatpush.bf16.msrb.mxu2 %v7828_v15  ;;  %4028 = vmatpush.bf16.msra.mxu1 %v7733_v31 }
 0x871   :  { %v3536_v19 = vpop.f32.mrf.mxu3 }
 0x872   :  { %v3537_v56 = vadd.f32 %v3536_v19, %v3524_v4  ;;  %v5643_v4 = vld [vmem:[%s8687_s0 + $0x9f] sm:$0x7]  ;;  %v8286_v19 = vld [vmem:[%s8688_s1 + $0x10] sm:$0xff] }
 0x874   :  { %v3540_v22 = vmax.f32 %v3489_v53, %v3537_v56  ;;  %3989 = vmatpush.bf16.msrb.mxu2 %v7837_v3  ;;  %4029 = vmatpush.bf16.msra.mxu1 %v7741_v51  ;;  %v8295_v53 = vld [vmem:[%s8688_s1 + $0x8] sm:$0xff] }
 0x876   :  { %v3541_v54 = vadd.f32 %v7661_v17, %v3540_v22  ;;  %v3783_v17 = vld [vmem:[#allocation1 + $0x12] sm:$0xff] }
 0x878   :  { %vm3542_vm9 = vcmp.gt.f32.partialorder %v3541_v54, 1.0  ;;  %3990 = vmatpush.bf16.msrb.mxu2 %v7852_v26  ;;  %4030 = vmatpush.bf16.msra.mxu1 %v7748_v52 }
 0x879   :  { %vm5580_vm10 = vmpackc.low %vm3542_vm9, %vm3542_vm9  ;;  %v3538_v1 = vpop.f32.mrf.mxu3 }
 0x87a   :  { %5581 = vmatmul.msk.bf16.vlgmr.msra.gmra.mxu0 %vm5580_vm10, %v6099_v55 }
 0x87b   :  { %3768 = vmatpush.bf16.msra.mxu0 %v6161_v6 }
 0x87c   :  { %3991 = vmatpush.bf16.msrb.mxu2 %v7866_v11  ;;  %4031 = vmatpush.bf16.msra.mxu1 %v7860_v49 }
 0x87f   :  { %3769 = vmatpush.bf16.msra.mxu0 %v7759_v57 }
 0x880   :  { %3992 = vmatpush.bf16.msrb.mxu2 %v7876_v12 }
 0x881   :  { %v3645_v14 = vpop.f32.mrf.mxu3 }
 0x883   :  { %3770 = vmatpush.bf16.msra.mxu0 %v7765_v8 }
 0x884   :  { %3993 = vmatpush.bf16.msrb.mxu2 %v7886_v38 }
 0x88a   :  { %3694 = vmatmul.bf16.vlgmr.msrb.gmra.mxu0 %v3679_v18  ;;  %v5641_v18 = vld [vmem:[%s8687_s0 + $0x9c] sm:$0x7] }
 0x88b   :  { %3819 = vmatpush.bf16.msrb.mxu0 %v6161_v6  ;;  %3915 = vst [vmem:[#allocation1] ss:$9 sm:$0xff] %v5641_v18 }
 0x88f   :  { %3820 = vmatpush.bf16.msrb.mxu0 %v7759_v57 }
 0x892   :  { %v3918_v5 = vld [vmem:[#allocation1 + $0x12] sm:$0xff]  ;;  %v3916_v7 = vld [vmem:[#allocation1] sm:$0xff]  ;;  %v3917_v59 = vld [vmem:[#allocation1 + $0x9] sm:$0xff] }
 0x893   :  { %3821 = vmatpush.bf16.msrb.mxu0 %v7765_v8  ;;  %5642 = vmatmul.msk.bf16.vlgmr.msra.gmra.mxu2 %vm184_vm1, %v3918_v5  ;;  %3965 = vst [vmem:[#allocation1] ss:$9 sm:$0xff] %v5643_v4 }
 0x894   :  { %3944 = vmatmul.bf16.vlgmr.msrb.gmra.mxu1 %v3917_v59  ;;  %v5946_v59 = vld [vmem:[%s8690_s3 + $0x360] sm:$0xff] }
 0x89a   :  { %5587 = vmatmul.msk.bf16.vlgmr.msra.gmra.mxu0 %vm184_vm1, %v3732_v35  ;;  %v8278_v35 = vld [vmem:[%s8688_s1 + $0x78] sm:$0xff]  ;;  %v3967_v22 = vld [vmem:[#allocation1 + $0x9] sm:$0xff]  ;;  %v8306_v1 = vld [vmem:[#allocation1] sm:$0xff] }
 0x89b   :  { %3923 = vmatpush.bf16.msra.mxu0 %v7702_v24  ;;  %v3671_v24 = vpop.f32.mrf.mxu1  ;;  %4088 = vmatpush.bf16.msrb.mxu1 %v8278_v35  ;;  %v3968_v23 = vld [vmem:[#allocation1 + $0x12] sm:$0xff] }
 0x89f   :  { %3924 = vmatpush.bf16.msra.mxu0 %v7710_v30  ;;  %v3647_v30 = vpop.f32.mrf.mxu3  ;;  %4089 = vmatpush.bf16.msrb.mxu1 %v7817_v46 }
 0x8a3   :  { %3925 = vmatpush.bf16.msra.mxu0 %v7718_v48  ;;  %v3658_v48 = vpop.f32.mrf.mxu2  ;;  %4090 = vmatpush.bf16.msrb.mxu1 %v7828_v15 }
 0x8a4   :  { %3994 = vmatmul.bf16.vlgmr.msrb.gmra.mxu2 %v3967_v22  ;;  %v5944_v22 = vld [vmem:[%s8690_s3 + $0x350] sm:$0xff] }
 0x8a7   :  { %3926 = vmatpush.bf16.msra.mxu0 %v7726_v25  ;;  %v3659_v25 = vadd.f32 %v3658_v48, %v3645_v14  ;;  %v8206_v28 = vpop.f32.mrf.mxu3  ;;  %4091 = vmatpush.bf16.msrb.mxu1 %v7837_v3 }
 0x8a9   :  { %v8204_v60 = vadd.f32 %v3671_v24, %v3659_v25  ;;  %v8324_v25 = vld [vmem:[%s8688_s1 + $0x50] sm:$0xff] }
 0x8aa   :  { %5589 = vmatmul.msk.bf16.vlgmr.msrb.gmra.mxu0 %vm184_vm1, %v3783_v17 }
 0x8ab   :  { %3927 = vmatpush.bf16.msra.mxu0 %v7733_v31  ;;  %v3673_v31 = vpop.f32.mrf.mxu1  ;;  %4092 = vmatpush.bf16.msrb.mxu1 %v7852_v26 }
 0x8af   :  { %3928 = vmatpush.bf16.msra.mxu0 %v7741_v51  ;;  %v5941_v51 = vld [vmem:[%s8690_s3 + $0x338] sm:$0xff]  ;;  %v3723_v34 = vpop.f32.mrf.mxu3  ;;  %4093 = vmatpush.bf16.msrb.mxu1 %v8324_v25 }
 0x8b0   :  { %3898 = vmatpush.bf16.msrb.mxu3 %v5941_v51 }
 0x8b3   :  { %3929 = vmatpush.bf16.msra.mxu0 %v7748_v52  ;;  %v3660_v52 = vpop.f32.mrf.mxu2 }
 0x8b7   :  { %3930 = vmatpush.bf16.msra.mxu0 %v7860_v49  ;;  %v3759_v40 = vpop.f32.mrf.mxu3 }
 0x8ba   :  { %3931 = vmatmul.bf16.vlgmr.msra.gmra.mxu0 %v3916_v7 }
 0x8bb   :  { %4004 = vmatpush.bf16.msrb.mxu0 %v6161_v6 }
 0x8bf   :  { %4005 = vmatpush.bf16.msrb.mxu0 %v7759_v57  ;;  %v5940_v57 = vld [vmem:[%s8690_s3 + $0x330] sm:$0xff]  ;;  %v3761_v0 = vpop.f32.mrf.mxu3 }
 0x8c0   :  { %3899 = vmatpush.bf16.msrb.mxu3 %v5940_v57 }
 0x8c3   :  { %4006 = vmatpush.bf16.msrb.mxu0 %v7765_v8  ;;  %v8211_v8 = vpop.f32.mrf.mxu1 }
 0x8c4   :  { %3900 = vmatpush.bf16.msrb.mxu3 %v5939_v32  ;;  %v8370_v32 = vld [vmem:[%s8688_s1 + $0x88] sm:$0xff] }
 0x8c7   :  { %4037 = vmatpush.bf16.msra.mxu0 %v8278_v35 }
 0x8c8   :  { %3901 = vmatpush.bf16.msrb.mxu3 %v5938_v37  ;;  %v8377_v37 = vld [vmem:[%s8688_s1 + $0x68] sm:$0xff] }
 0x8ca   :  { %5644 = vmatmul.msk.bf16.vlgmr.msrb.gmra.mxu0 %vm184_vm1, %v3968_v23  ;;  %v5943_v23 = vld [vmem:[%s8690_s3 + $0x348] sm:$0xff] }
 0x8cb   :  { %v3710_v39 = vpop.f32.mrf.mxu1  ;;  %4038 = vmatpush.bf16.msra.mxu0 %v7817_v46 }
 0x8cc   :  { %3902 = vmatpush.bf16.msrb.mxu3 %v5937_v45  ;;  %v8383_v39 = vld [vmem:[%s8688_s1 + $0x80] sm:$0xff] }
 0x8cd   :  { %v8390_v45 = vld [vmem:[%s8688_s1 + $0x60] sm:$0xff] }
 0x8cf   :  { %4039 = vmatpush.bf16.msra.mxu0 %v7828_v15  ;;  %v5645_v15 = vld [vmem:[%s8687_s0 + $0xa2] sm:$0x7] }
 0x8d0   :  { %3903 = vmatpush.bf16.msrb.mxu3 %v5936_v33  ;;  %4016 = vst [vmem:[#allocation1] ss:$9 sm:$0xff] %v5645_v15 }
 0x8d3   :  { %4040 = vmatpush.bf16.msra.mxu0 %v7837_v3 }
 0x8d4   :  { %3904 = vmatpush.bf16.msrb.mxu3 %v5935_v62 }
 0x8d7   :  { %4041 = vmatpush.bf16.msra.mxu0 %v7852_v26  ;;  %v4017_v48 = vld [vmem:[#allocation1] sm:$0xff]  ;;  %v4019_v26 = vld [vmem:[#allocation1 + $0x12] sm:$0xff]  ;;  %v4018_v52 = vld [vmem:[#allocation1 + $0x9] sm:$0xff] }
 0x8d8   :  { %3905 = vmatpush.bf16.msrb.mxu3 %v5934_v47  ;;  %4032 = vmatmul.bf16.vlgmr.msra.gmra.mxu1 %v4017_v48 }
 0x8da   :  { %v8216_v36 = vpop.f32.mrf.mxu2 }
 0x8db   :  { %v3760_v54 = vadd.f32 %v3759_v40, %v8216_v36  ;;  %4042 = vmatpush.bf16.msra.mxu0 %v7866_v11  ;;  %v8332_v11 = vld [vmem:[%s8689_s2] ss:$0 sm:$0xff]  ;;  %v8397_v40 = vld [vmem:[%s8688_s1 + $0x58] sm:$0xff] }
 0x8dc   :  { %v8233_v42 = vpop.f32.mrf.mxu1 }
 0x8df   :  { %4043 = vmatpush.bf16.msra.mxu0 %v7876_v12  ;;  %v5647_v12 = vld [vmem:[%s8687_s0 + $0xa5] sm:$0x7] }
 0x8e0   :  { %4067 = vst [vmem:[#allocation1] ss:$9 sm:$0xff] %v5647_v12 }
 0x8e2   :  { %v3748_v41 = vpop.f32.mrf.mxu2 }
 0x8e3   :  { %4044 = vmatpush.bf16.msra.mxu0 %v7886_v38  ;;  %v8364_v38 = vld [vmem:[%s8688_s1 + $0x70] sm:$0xff] }
 0x8e4   :  { %v3799_v58 = vpop.f32.mrf.mxu1 }
 0x8e6   :  { %4045 = vmatmul.bf16.vlgmr.msra.gmra.mxu0 %v4018_v52 }
 0x8e7   :  { %v4068_v34 = vld [vmem:[#allocation1] sm:$0xff]  ;;  %v4069_v36 = vld [vmem:[#allocation1 + $0x9] sm:$0xff]  ;;  %v4070_v41 = vld [vmem:[#allocation1 + $0x12] sm:$0xff] }
 0x8ea   :  { %v3810_v63 = vpop.f32.mrf.mxu2 }
 0x8eb   :  { %v3811_v17 = vadd.f32 %v3810_v63, %v8233_v42 }
 0x8f2   :  { %v3812_v2 = vpop.f32.mrf.mxu2 }
 0x8f7   :  { %v3620_v16 = vpop.f32.mrf.mxu0 }
 0x8f8   :  { %v8228_v43 = vadd.f32 %v3620_v16, %v8097_v50  ;;  %v8241_v50 = vld [vmem:[%s8688_s1 + $0x38] sm:$0xff] }
 0x8f9   :  { %3973 = vmatpush.bf16.msra.mxu3 %v8241_v50  ;;  %4075 = vmatpush.bf16.msra.mxu2 %v8241_v50 }
 0x8fd   :  { %3974 = vmatpush.bf16.msra.mxu3 %v8247_v61  ;;  %4076 = vmatpush.bf16.msra.mxu2 %v8247_v61 }
 0x8ff   :  { %v3622_v44 = vpop.f32.mrf.mxu0 }
 0x900   :  { %v5949_v44 = vld [vmem:[%s8690_s3 + $0x378] sm:$0xff] }
 0x901   :  { %3975 = vmatpush.bf16.msra.mxu3 %v8256_v29  ;;  %4077 = vmatpush.bf16.msra.mxu2 %v8256_v29 }
 0x902   :  { %4185 = vmatpush.bf16.msrb.mxu0 %v5949_v44 }
 0x905   :  { %3976 = vmatpush.bf16.msra.mxu3 %v8262_v10  ;;  %4078 = vmatpush.bf16.msra.mxu2 %v8262_v10 }
 0x907   :  { %v3695_v9 = vpop.f32.mrf.mxu0 }
 0x908   :  { %v3709_v56 = vadd.f32 %v8211_v8, %v3695_v9  ;;  %v8356_v8 = vld [vmem:[%s8688_s1 + $0x40] sm:$0xff]  ;;  %v5948_v9 = vld [vmem:[%s8690_s3 + $0x370] sm:$0xff] }
 0x909   :  { %3977 = vmatpush.bf16.msra.mxu3 %v8272_v13  ;;  %4079 = vmatpush.bf16.msra.mxu2 %v8272_v13 }
 0x90a   :  { %4186 = vmatpush.bf16.msrb.mxu0 %v5948_v9 }
 0x90d   :  { %3978 = vmatpush.bf16.msra.mxu3 %v8286_v19  ;;  %4080 = vmatpush.bf16.msra.mxu2 %v8286_v19 }
 0x90f   :  { %v3697_v21 = vpop.f32.mrf.mxu0 }
 0x910   :  { %v5947_v21 = vld [vmem:[%s8690_s3 + $0x368] sm:$0xff] }
 0x911   :  { %3979 = vmatpush.bf16.msra.mxu3 %v8295_v53  ;;  %4081 = vmatpush.bf16.msra.mxu2 %v8295_v53  ;;  %v3945_v62 = vpop.f32.mrf.mxu1 }
 0x912   :  { %4187 = vmatpush.bf16.msrb.mxu0 %v5947_v21 }
 0x915   :  { %3980 = vmatpush.bf16.msra.mxu3 %v7860_v49  ;;  %v3722_v49 = vadd.f32 %v8206_v28, %v3709_v56  ;;  %v8348_v28 = vld [vmem:[%s8688_s1] sm:$0xff] }
 0x916   :  { %4082 = vmatpush.bf16.msra.mxu2 %v8348_v28  ;;  %v3958_v16 = vpop.f32.mrf.mxu2  ;;  %4188 = vmatpush.bf16.msrb.mxu0 %v5946_v59 }
 0x917   :  { %v3772_v20 = vpop.f32.mrf.mxu0  ;;  %v3725_v3 = vmax.f32 %v8204_v60, %v3722_v49  ;;  %v8338_v60 = vld [vmem:[%s8688_s1 + $0x48] sm:$0xff] }
 0x918   :  { %v3773_v27 = vadd.f32 %v3772_v20, %v3760_v54  ;;  %4094 = vmatpush.bf16.msrb.mxu1 %v8338_v60  ;;  %v5945_v20 = vld [vmem:[%s8690_s3 + $0x358] sm:$0xff] }
 0x919   :  { %4083 = vmatmul.bf16.vlgmr.msra.gmra.mxu2 %v4068_v34  ;;  %v3947_v58 = vpop.f32.mrf.mxu1  ;;  %v5702_v34 = vld [vmem:[%s8687_s0 + $0xab] sm:$0x7] }
 0x91a   :  { %v3776_v24 = vmax.f32 %v3725_v3, %v3773_v27  ;;  %4223 = vmatpush.bf16.msrb.mxu2 %v8278_v35  ;;  %4189 = vmatpush.bf16.msrb.mxu0 %v5945_v20 }
 0x91c   :  { %4095 = vmatpush.bf16.msrb.mxu1 %v8356_v8 }
 0x91e   :  { %4224 = vmatpush.bf16.msrb.mxu2 %v8364_v38  ;;  %v3960_v47 = vpop.f32.mrf.mxu2  ;;  %4190 = vmatpush.bf16.msrb.mxu0 %v5944_v22 }
 0x91f   :  { %v3774_v46 = vpop.f32.mrf.mxu0  ;;  %4096 = vmatmul.bf16.vlgmr.msrb.gmra.mxu1 %v4069_v36 }
 0x920   :  { %4241 = vmatpush.bf16.msra.mxu1 %v6161_v6 }
 0x922   :  { %4225 = vmatpush.bf16.msrb.mxu2 %v8377_v37  ;;  %4191 = vmatpush.bf16.msrb.mxu0 %v5943_v23 }
 0x924   :  { %4242 = vmatpush.bf16.msra.mxu1 %v8370_v32 }
 0x926   :  { %4226 = vmatpush.bf16.msrb.mxu2 %v8390_v45 }
 0x927   :  { %v3823_v14 = vpop.f32.mrf.mxu0  ;;  %v3995_v18 = vpop.f32.mrf.mxu2 }
 0x928   :  { %v3824_v30 = vadd.f32 %v3823_v14, %v3811_v17  ;;  %4243 = vmatpush.bf16.msra.mxu1 %v8383_v39  ;;  %v5942_v17 = vld [vmem:[%s8690_s3 + $0x340] sm:$0xff]  ;;  %v5700_v14 = vld [vmem:[%s8687_s0 + $0xa8] sm:$0x7] }
 0x929   :  { %4192 = vmatpush.bf16.msrb.mxu0 %v5942_v17  ;;  %4202 = vst [vmem:[#allocation1] ss:$9 sm:$0xff] %v5700_v14  ;;  %v5957_v17 = vld [vmem:[%s8690_s3 + $0x3b8] sm:$0xff] }
 0x92a   :  { %v3827_v31 = vmax.f32 %v3776_v24, %v3824_v30  ;;  %4227 = vmatpush.bf16.msrb.mxu2 %v8397_v40 }
 0x92c   :  { %v3828_v51 = vadd.f32 %v8332_v11, %v3827_v31  ;;  %4273 = vmatpush.bf16.msrb.mxu1 %v8278_v35 }
 0x92d   :  { %4260 = vmatpush.bf16.msra.mxu0 %v8241_v50 }
 0x92e   :  { %vm3829_vm11 = vcmp.gt.f32.partialorder %v3828_v51, 1.0  ;;  %4228 = vmatpush.bf16.msrb.mxu2 %v8324_v25 }
 0x92f   :  { %vm5639_vm12 = vmpackc.low %vm3829_vm11, %vm3829_vm11  ;;  %v3825_v57 = vpop.f32.mrf.mxu0  ;;  %v3997_v4 = vpop.f32.mrf.mxu2 }
 0x930   :  { %5640 = vmatmul.msk.bf16.vlgmr.msrb.gmra.mxu3 %vm5639_vm12, %v6099_v55  ;;  %4274 = vmatpush.bf16.msrb.mxu1 %v8364_v38  ;;  %v4203_v48 = vld [vmem:[#allocation1] sm:$0xff]  ;;  %v4204_v12 = vld [vmem:[#allocation1 + $0x9] sm:$0xff]  ;;  %v4205_v57 = vld [vmem:[#allocation1 + $0x12] sm:$0xff] }
 0x931   :  { %4055 = vmatpush.bf16.msrb.mxu3 %v6161_v6  ;;  %4261 = vmatpush.bf16.msra.mxu0 %v8247_v61  ;;  %4252 = vst [vmem:[#allocation1] ss:$9 sm:$0xff] %v5702_v34 }
 0x932   :  { %4229 = vmatpush.bf16.msrb.mxu2 %v8338_v60  ;;  %5701 = vmatmul.msk.bf16.vlgmr.msra.gmra.mxu1 %vm184_vm1, %v4205_v57 }
 0x934   :  { %4275 = vmatpush.bf16.msrb.mxu1 %v8377_v37 }
 0x935   :  { %4056 = vmatpush.bf16.msrb.mxu3 %v8370_v32  ;;  %4262 = vmatpush.bf16.msra.mxu0 %v8256_v29 }
 0x936   :  { %4230 = vmatpush.bf16.msrb.mxu2 %v8356_v8 }
 0x937   :  { %v3932_v33 = vpop.f32.mrf.mxu0 }
 0x938   :  { %4276 = vmatpush.bf16.msrb.mxu1 %v8390_v45  ;;  %v3946_v42 = vadd.f32 %v3945_v62, %v3932_v33  ;;  %v4253_v33 = vld [vmem:[#allocation1] sm:$0xff]  ;;  %v5704_v62 = vld [vmem:[%s8687_s0 + $0xae] sm:$0x7] }
 0x939   :  { %4057 = vmatpush.bf16.msrb.mxu3 %v8383_v39  ;;  %4263 = vmatpush.bf16.msra.mxu0 %v8262_v10 }
 0x93a   :  { %4311 = vmatpush.bf16.msra.mxu2 %v8241_v50  ;;  %v8435_v63 = vadd.f32 %v3958_v16, %v3946_v42  ;;  %v4254_v16 = vld [vmem:[#allocation1 + $0x9] sm:$0xff] }
 0x93b   :  { %4231 = vmatmul.bf16.vlgmr.msrb.gmra.mxu2 %v4204_v12  ;;  %v5953_v12 = vld [vmem:[%s8690_s3 + $0x398] sm:$0xff] }
 0x93c   :  { %4277 = vmatpush.bf16.msrb.mxu1 %v8397_v40 }
 0x93d   :  { %4264 = vmatpush.bf16.msra.mxu0 %v8272_v13 }
 0x93e   :  { %4312 = vmatpush.bf16.msra.mxu2 %v8247_v61 }
 0x93f   :  { %v3934_v0 = vpop.f32.mrf.mxu0 }
 0x940   :  { %3981 = vmatmul.bf16.vlgmr.msra.gmra.mxu3 %v8306_v1  ;;  %4278 = vmatpush.bf16.msrb.mxu1 %v8324_v25 }
 0x941   :  { %4106 = vmatpush.bf16.msra.mxu3 %v6161_v6  ;;  %4265 = vmatpush.bf16.msra.mxu0 %v8286_v19 }
 0x942   :  { %4313 = vmatpush.bf16.msra.mxu2 %v8256_v29 }
 0x944   :  { %4279 = vmatpush.bf16.msrb.mxu1 %v8338_v60 }
 0x945   :  { %4107 = vmatpush.bf16.msra.mxu3 %v8370_v32  ;;  %4266 = vmatpush.bf16.msra.mxu0 %v8295_v53 }
 0x946   :  { %4314 = vmatpush.bf16.msra.mxu2 %v8262_v10 }
 0x947   :  { %v4008_v2 = vpop.f32.mrf.mxu0 }
 0x948   :  { %4280 = vmatpush.bf16.msrb.mxu1 %v8356_v8 }
 0x949   :  { %4108 = vmatpush.bf16.msra.mxu3 %v8383_v39  ;;  %4267 = vmatpush.bf16.msra.mxu0 %v8348_v28 }
 0x94a   :  { %4315 = vmatpush.bf16.msra.mxu2 %v8272_v13 }
 0x94b   :  { %4281 = vmatmul.bf16.vlgmr.msrb.gmra.mxu1 %v4254_v16  ;;  %v5951_v16 = vld [vmem:[%s8690_s3 + $0x388] sm:$0xff] }
 0x94c   :  { %4362 = vmatpush.bf16.msra.mxu1 %v8241_v50 }
 0x94e   :  { %4316 = vmatpush.bf16.msra.mxu2 %v8286_v19 }
 0x94f   :  { %v4010_v5 = vpop.f32.mrf.mxu0 }
 0x950   :  { %5646 = vmatmul.msk.bf16.vlgmr.msrb.gmra.mxu3 %vm184_vm1, %v4019_v26  ;;  %4363 = vmatpush.bf16.msra.mxu1 %v8247_v61 }
 0x951   :  { %4210 = vmatpush.bf16.msrb.mxu3 %v8241_v50 }
 0x952   :  { %4317 = vmatpush.bf16.msra.mxu2 %v8295_v53 }
 0x954   :  { %4364 = vmatpush.bf16.msra.mxu1 %v8256_v29 }
 0x955   :  { %4211 = vmatpush.bf16.msrb.mxu3 %v8247_v61  ;;  %v8446_v7 = vpop.f32.mrf.mxu1 }
 0x956   :  { %4318 = vmatpush.bf16.msra.mxu2 %v8348_v28 }
 0x958   :  { %4365 = vmatpush.bf16.msra.mxu1 %v8262_v10 }
 0x959   :  { %4212 = vmatpush.bf16.msrb.mxu3 %v8256_v29 }
 0x95a   :  { %4375 = vmatpush.bf16.msrb.mxu2 %v8278_v35 }
 0x95c   :  { %4366 = vmatpush.bf16.msra.mxu1 %v8272_v13 }
 0x95d   :  { %4213 = vmatpush.bf16.msrb.mxu3 %v8262_v10  ;;  %v4035_v56 = vpop.f32.mrf.mxu1 }
 0x95e   :  { %4376 = vmatpush.bf16.msrb.mxu2 %v8364_v38 }
 0x960   :  { %5648 = vmatmul.msk.bf16.vlgmr.msra.gmra.mxu3 %vm184_vm1, %v4070_v41  ;;  %v4255_v41 = vld [vmem:[#allocation1 + $0x12] sm:$0xff]  ;;  %4367 = vmatpush.bf16.msra.mxu1 %v8286_v19 }
 0x961   :  { %4214 = vmatpush.bf16.msrb.mxu3 %v8272_v13  ;;  %4303 = vst [vmem:[#allocation1] ss:$9 sm:$0xff] %v5704_v62 }
 0x962   :  { %4377 = vmatpush.bf16.msrb.mxu2 %v8377_v37 }
 0x963   :  { %v4046_v46 = vpop.f32.mrf.mxu0 }
 0x964   :  { %v4047_v0 = vadd.f32 %v4046_v46, %v8446_v7  ;;  %4368 = vmatpush.bf16.msra.mxu1 %v8295_v53 }
 0x965   :  { %4215 = vmatpush.bf16.msrb.mxu3 %v8286_v19 }
 0x966   :  { %4378 = vmatpush.bf16.msrb.mxu2 %v8390_v45 }
 0x968   :  { %v4305_v58 = vld [vmem:[#allocation1 + $0x9] sm:$0xff]  ;;  %4369 = vmatpush.bf16.msra.mxu1 %v8348_v28 }
 0x969   :  { %4216 = vmatpush.bf16.msrb.mxu3 %v8295_v53 }
 0x96a   :  { %4379 = vmatpush.bf16.msrb.mxu2 %v8397_v40 }
 0x96b   :  { %v4048_v49 = vpop.f32.mrf.mxu0 }
 0x96c   :  { %4510 = vmatpush.bf16.msrb.mxu1 %v8278_v35 }
 0x96d   :  { %4217 = vmatpush.bf16.msrb.mxu3 %v8348_v28 }
 0x96e   :  { %4380 = vmatpush.bf16.msrb.mxu2 %v8324_v25 }
 0x970   :  { %4218 = vmatmul.bf16.vlgmr.msrb.gmra.mxu3 %v4203_v48  ;;  %4511 = vmatpush.bf16.msrb.mxu1 %v8364_v38  ;;  %v5955_v48 = vld [vmem:[%s8690_s3 + $0x3a8] sm:$0xff] }
 0x971   :  { %4291 = vmatpush.bf16.msra.mxu3 %v6161_v6 }
 0x972   :  { %4381 = vmatpush.bf16.msrb.mxu2 %v8338_v60 }
 0x974   :  { %4512 = vmatpush.bf16.msrb.mxu1 %v8377_v37 }
 0x975   :  { %4292 = vmatpush.bf16.msra.mxu3 %v8370_v32 }
 0x976   :  { %4382 = vmatpush.bf16.msrb.mxu2 %v8356_v8 }
 0x978   :  { %4513 = vmatpush.bf16.msrb.mxu1 %v8390_v45 }
 0x979   :  { %4293 = vmatpush.bf16.msra.mxu3 %v8383_v39 }
 0x97c   :  { %4514 = vmatpush.bf16.msrb.mxu1 %v8397_v40 }
 0x97d   :  { %4324 = vmatpush.bf16.msrb.mxu3 %v8278_v35 }
 0x980   :  { %5703 = vmatmul.msk.bf16.vlgmr.msra.gmra.mxu3 %vm184_vm1, %v4255_v41  ;;  %4515 = vmatpush.bf16.msrb.mxu1 %v8324_v25 }
 0x981   :  { %4325 = vmatpush.bf16.msrb.mxu3 %v8364_v38 }
 0x984   :  { %4516 = vmatpush.bf16.msrb.mxu1 %v8338_v60 }
 0x985   :  { %4326 = vmatpush.bf16.msrb.mxu3 %v8377_v37 }
 0x988   :  { %4517 = vmatpush.bf16.msrb.mxu1 %v8356_v8 }
 0x989   :  { %4327 = vmatpush.bf16.msrb.mxu3 %v8390_v45 }
 0x98d   :  { %4328 = vmatpush.bf16.msrb.mxu3 %v8397_v40 }
 0x991   :  { %4329 = vmatpush.bf16.msrb.mxu3 %v8324_v25 }
 0x995   :  { %4330 = vmatpush.bf16.msrb.mxu3 %v8338_v60 }
 0x999   :  { %4331 = vmatpush.bf16.msrb.mxu3 %v8356_v8 }
 0x99c   :  { %v4097_v15 = vpop.f32.mrf.mxu1  ;;  %v4084_v27 = vpop.f32.mrf.mxu2  ;;  %4332 = vmatmul.bf16.vlgmr.msrb.gmra.mxu3 %v4305_v58 }
 0x99d   :  { %v4098_v44 = vadd.f32 %v4097_v15, %v4084_v27  ;;  %4472 = vmatpush.bf16.msra.mxu3 %v5957_v17 }
 0x9a4   :  { %v4086_v24 = vpop.f32.mrf.mxu2 }
 0x9a5   :  { %v5956_v24 = vld [vmem:[%s8690_s3 + $0x3b0] sm:$0xff] }
 0x9a6   :  { %4473 = vmatpush.bf16.msra.mxu3 %v5956_v24 }
 0x9aa   :  { %4474 = vmatpush.bf16.msra.mxu3 %v5955_v48 }
 0x9b3   :  { %v3907_v54 = vpop.f32.mrf.mxu3 }
 0x9b4   :  { %v8458_v1 = vadd.f32 %v3907_v54, %v8228_v43  ;;  %v4099_v43 = vpop.f32.mrf.mxu1 }
 0x9bb   :  { %v3909_v3 = vpop.f32.mrf.mxu3 }
 0x9bc   :  { %v4245_v54 = vpop.f32.mrf.mxu1 }
 0x9be   :  { %v4232_v15 = vpop.f32.mrf.mxu2 }
 0x9c3   :  { %v3982_v30 = vpop.f32.mrf.mxu3 }
 0x9c4   :  { %v3996_v31 = vadd.f32 %v3995_v18, %v3982_v30  ;;  %v5706_v18 = vld [vmem:[%s8687_s0 + $0xb1] sm:$0x7]  ;;  %v4247_v27 = vpop.f32.mrf.mxu1 }
 0x9c6   :  { %v4009_v26 = vadd.f32 %v4008_v2, %v3996_v31  ;;  %v4306_v2 = vld [vmem:[#allocation1 + $0x12] sm:$0xff]  ;;  %v4234_v14 = vpop.f32.mrf.mxu2 }
 0x9c8   :  { %v4012_v51 = vmax.f32 %v8435_v63, %v4009_v26  ;;  %v4304_v63 = vld [vmem:[#allocation1] sm:$0xff] }
 0x9c9   :  { %4319 = vmatmul.bf16.vlgmr.msra.gmra.mxu2 %v4304_v63  ;;  %4354 = vst [vmem:[#allocation1] ss:$9 sm:$0xff] %v5706_v18  ;;  %v5950_v63 = vld [vmem:[%s8690_s3 + $0x380] sm:$0xff] }
 0x9ca   :  { %4528 = vmatpush.bf16.msra.mxu2 %v6161_v6 }
 0x9cb   :  { %v3984_v52 = vpop.f32.mrf.mxu3 }
 0x9cc   :  { %v4282_v30 = vpop.f32.mrf.mxu1 }
 0x9ce   :  { %4529 = vmatpush.bf16.msra.mxu2 %v8370_v32 }
 0x9d0   :  { %v4356_v20 = vld [vmem:[#allocation1 + $0x9] sm:$0xff]  ;;  %v4355_v56 = vld [vmem:[#allocation1] sm:$0xff]  ;;  %v4357_v46 = vld [vmem:[#allocation1 + $0x12] sm:$0xff] }
 0x9d1   :  { %4370 = vmatmul.bf16.vlgmr.msra.gmra.mxu1 %v4355_v56 }
 0x9d2   :  { %4530 = vmatpush.bf16.msra.mxu2 %v8383_v39  ;;  %4598 = vmatpush.bf16.msra.mxu1 %v8241_v50 }
 0x9d3   :  { %v4059_v36 = vpop.f32.mrf.mxu3 }
 0x9d4   :  { %v4060_v47 = vadd.f32 %v4059_v36, %v4047_v0  ;;  %v4284_v52 = vpop.f32.mrf.mxu1  ;;  %v5952_v36 = vld [vmem:[%s8690_s3 + $0x390] sm:$0xff] }
 0x9d6   :  { %v4063_v21 = vmax.f32 %v4012_v51, %v4060_v47  ;;  %4599 = vmatpush.bf16.msra.mxu1 %v8247_v61  ;;  %v5954_v51 = vld [vmem:[%s8690_s3 + $0x3a0] sm:$0xff] }
 0x9d7   :  { %4475 = vmatpush.bf16.msra.mxu3 %v5954_v51  ;;  %v5964_v51 = vld [vmem:[%s8690_s3 + $0x3f0] sm:$0xff] }
 0x9d9   :  { %4383 = vmatmul.bf16.vlgmr.msrb.gmra.mxu2 %v4356_v20 }
 0x9da   :  { %4560 = vmatpush.bf16.msrb.mxu2 %v8278_v35  ;;  %4600 = vmatpush.bf16.msra.mxu1 %v8256_v29 }
 0x9db   :  { %v4061_v42 = vpop.f32.mrf.mxu3  ;;  %4476 = vmatpush.bf16.msra.mxu3 %v5953_v12 }
 0x9de   :  { %4561 = vmatpush.bf16.msrb.mxu2 %v8364_v38  ;;  %4601 = vmatpush.bf16.msra.mxu1 %v8262_v10 }
 0x9df   :  { %4477 = vmatpush.bf16.msra.mxu3 %v5952_v36 }
 0x9e2   :  { %4562 = vmatpush.bf16.msrb.mxu2 %v8377_v37  ;;  %4602 = vmatpush.bf16.msra.mxu1 %v8272_v13 }
 0x9e3   :  { %v4110_v9 = vpop.f32.mrf.mxu3  ;;  %4478 = vmatpush.bf16.msra.mxu3 %v5951_v16  ;;  %v5962_v16 = vld [vmem:[%s8690_s3 + $0x3e0] sm:$0xff] }
 0x9e4   :  { %v4111_v5 = vadd.f32 %v4110_v9, %v4098_v44 }
 0x9e6   :  { %v4114_v7 = vmax.f32 %v4063_v21, %v4111_v5  ;;  %4563 = vmatpush.bf16.msrb.mxu2 %v8390_v45  ;;  %4603 = vmatpush.bf16.msra.mxu1 %v8286_v19 }
 0x9e7   :  { %4479 = vmatpush.bf16.msra.mxu3 %v5950_v63  ;;  %v5961_v63 = vld [vmem:[%s8690_s3 + $0x3d8] sm:$0xff] }
 0x9e8   :  { %v4115_v59 = vadd.f32 %v8332_v11, %v4114_v7  ;;  %v5761_v7 = vld [vmem:[%s8687_s0 + $0xb7] sm:$0x7] }
 0x9ea   :  { %vm4116_vm13 = vcmp.gt.f32.partialorder %v4115_v59, 1.0  ;;  %4564 = vmatpush.bf16.msrb.mxu2 %v8397_v40  ;;  %4604 = vmatpush.bf16.msra.mxu1 %v8295_v53 }
 0x9eb   :  { %vm5698_vm14 = vmpackc.low %vm4116_vm13, %vm4116_vm13  ;;  %v4112_v4 = vpop.f32.mrf.mxu3  ;;  %4547 = vmatpush.bf16.msrb.mxu3 %v8241_v50 }
 0x9ec   :  { %5699 = vmatmul.msk.bf16.vlgmr.msrb.gmra.mxu0 %vm5698_vm14, %v6099_v55 }
 0x9ed   :  { %4342 = vmatpush.bf16.msrb.mxu0 %v6161_v6 }
 0x9ee   :  { %4565 = vmatpush.bf16.msrb.mxu2 %v8324_v25  ;;  %4605 = vmatpush.bf16.msra.mxu1 %v8348_v28 }
 0x9ef   :  { %4548 = vmatpush.bf16.msrb.mxu3 %v8247_v61 }
 0x9f1   :  { %4343 = vmatpush.bf16.msrb.mxu0 %v8370_v32 }
 0x9f2   :  { %4566 = vmatpush.bf16.msrb.mxu2 %v8338_v60 }
 0x9f3   :  { %v4219_v22 = vpop.f32.mrf.mxu3  ;;  %4549 = vmatpush.bf16.msrb.mxu3 %v8256_v29 }
 0x9f4   :  { %v4233_v49 = vadd.f32 %v4232_v15, %v4219_v22 }
 0x9f5   :  { %4344 = vmatpush.bf16.msrb.mxu0 %v8383_v39 }
 0x9f6   :  { %4567 = vmatpush.bf16.msrb.mxu2 %v8356_v8  ;;  %v8565_v3 = vadd.f32 %v4245_v54, %v4233_v49 }
 0x9f7   :  { %4550 = vmatpush.bf16.msrb.mxu3 %v8262_v10 }
 0x9fb   :  { %v4221_v23 = vpop.f32.mrf.mxu3  ;;  %4551 = vmatpush.bf16.msrb.mxu3 %v8272_v13 }
 0x9fc   :  { %4268 = vmatmul.bf16.vlgmr.msra.gmra.mxu0 %v4253_v33 }
 0x9fd   :  { %4393 = vmatpush.bf16.msra.mxu0 %v6161_v6 }
 0x9ff   :  { %4552 = vmatpush.bf16.msrb.mxu3 %v8286_v19 }
 0xa01   :  { %4394 = vmatpush.bf16.msra.mxu0 %v8370_v32 }
 0xa03   :  { %v8567_v43 = vpop.f32.mrf.mxu3  ;;  %4553 = vmatpush.bf16.msrb.mxu3 %v8295_v53 }
 0xa05   :  { %4395 = vmatpush.bf16.msra.mxu0 %v8383_v39 }
 0xa07   :  { %4554 = vmatpush.bf16.msrb.mxu3 %v8348_v28 }
 0xa0b   :  { %v4297_v31 = vpop.f32.mrf.mxu3 }
 0xa0c   :  { %5705 = vmatmul.msk.bf16.vlgmr.msrb.gmra.mxu0 %vm184_vm1, %v4306_v2  ;;  %v5759_v2 = vld [vmem:[%s8687_s0 + $0xb4] sm:$0x7] }
 0xa0d   :  { %4497 = vmatpush.bf16.msrb.mxu0 %v8241_v50  ;;  %4489 = vst [vmem:[#allocation1] ss:$9 sm:$0xff] %v5759_v2 }
 0xa11   :  { %4498 = vmatpush.bf16.msrb.mxu0 %v8247_v61 }
 0xa14   :  { %v4492_v18 = vld [vmem:[#allocation1 + $0x12] sm:$0xff]  ;;  %v4490_v21 = vld [vmem:[#allocation1] sm:$0xff]  ;;  %v4491_v5 = vld [vmem:[#allocation1 + $0x9] sm:$0xff] }
 0xa15   :  { %4499 = vmatpush.bf16.msrb.mxu0 %v8256_v29  ;;  %5760 = vmatmul.msk.bf16.vlgmr.msra.gmra.mxu2 %vm184_vm1, %v4492_v18  ;;  %4539 = vst [vmem:[#allocation1] ss:$9 sm:$0xff] %v5761_v7  ;;  %v5958_v18 = vld [vmem:[%s8690_s3 + $0x3c0] sm:$0xff] }
 0xa16   :  { %4649 = vmatpush.bf16.msra.mxu2 %v8241_v50  ;;  %4518 = vmatmul.bf16.vlgmr.msrb.gmra.mxu1 %v4491_v5 }
 0xa17   :  { %4662 = vmatpush.bf16.msrb.mxu1 %v8278_v35 }
 0xa19   :  { %4500 = vmatpush.bf16.msrb.mxu0 %v8262_v10 }
 0xa1a   :  { %4650 = vmatpush.bf16.msra.mxu2 %v8247_v61 }
 0xa1b   :  { %4663 = vmatpush.bf16.msrb.mxu1 %v8364_v38 }
 0xa1c   :  { %5707 = vmatmul.msk.bf16.vlgmr.msra.gmra.mxu0 %vm184_vm1, %v4357_v46  ;;  %v4541_v61 = vld [vmem:[#allocation1 + $0x9] sm:$0xff]  ;;  %v4540_v20 = vld [vmem:[#allocation1] sm:$0xff] }
 0xa1d   :  { %4501 = vmatpush.bf16.msrb.mxu0 %v8272_v13 }
 0xa1e   :  { %4651 = vmatpush.bf16.msra.mxu2 %v8256_v29  ;;  %v5763_v29 = vld [vmem:[%s8687_s0 + $0xba] sm:$0x7] }
 0xa1f   :  { %v4333_v57 = vpop.f32.mrf.mxu3  ;;  %4664 = vmatpush.bf16.msrb.mxu1 %v8377_v37 }
 0xa21   :  { %4502 = vmatpush.bf16.msrb.mxu0 %v8286_v19 }
 0xa22   :  { %4652 = vmatpush.bf16.msra.mxu2 %v8262_v10 }
 0xa23   :  { %4665 = vmatpush.bf16.msrb.mxu1 %v8390_v45 }
 0xa25   :  { %4503 = vmatpush.bf16.msrb.mxu0 %v8295_v53  ;;  %4568 = vmatmul.bf16.vlgmr.msrb.gmra.mxu2 %v4541_v61 }
 0xa26   :  { %4653 = vmatpush.bf16.msra.mxu2 %v8272_v13 }
 0xa27   :  { %v4335_v42 = vpop.f32.mrf.mxu3  ;;  %4666 = vmatpush.bf16.msrb.mxu1 %v8397_v40 }
 0xa29   :  { %4504 = vmatpush.bf16.msrb.mxu0 %v8348_v28 }
 0xa2a   :  { %4654 = vmatpush.bf16.msra.mxu2 %v8286_v19  ;;  %v5765_v19 = vld [vmem:[%s8687_s0 + $0xbd] sm:$0x7] }
 0xa2b   :  { %4667 = vmatpush.bf16.msrb.mxu1 %v8324_v25 }
 0xa2c   :  { %4505 = vmatmul.bf16.vlgmr.msrb.gmra.mxu0 %v4490_v21 }
 0xa2d   :  { %4578 = vmatpush.bf16.msra.mxu0 %v6161_v6 }
 0xa2e   :  { %4655 = vmatpush.bf16.msra.mxu2 %v8295_v53 }
 0xa2f   :  { %4668 = vmatpush.bf16.msrb.mxu1 %v8338_v60 }
 0xa31   :  { %4579 = vmatpush.bf16.msra.mxu0 %v8370_v32 }
 0xa32   :  { %4656 = vmatpush.bf16.msra.mxu2 %v8348_v28 }
 0xa33   :  { %4669 = vmatpush.bf16.msrb.mxu1 %v8356_v8 }
 0xa35   :  { %4580 = vmatpush.bf16.msra.mxu0 %v8383_v39 }
 0xa39   :  { %4611 = vmatpush.bf16.msrb.mxu0 %v8278_v35 }
 0xa3d   :  { %4612 = vmatpush.bf16.msrb.mxu0 %v8364_v38  ;;  %v4542_v38 = vld [vmem:[#allocation1 + $0x12] sm:$0xff] }
 0xa3e   :  { %5762 = vmatmul.msk.bf16.vlgmr.msra.gmra.mxu0 %vm184_vm1, %v4542_v38  ;;  %4590 = vst [vmem:[#allocation1] ss:$9 sm:$0xff] %v5763_v29 }
 0xa41   :  { %4613 = vmatpush.bf16.msrb.mxu0 %v8377_v37 }
 0xa45   :  { %4614 = vmatpush.bf16.msrb.mxu0 %v8390_v45  ;;  %v4591_v23 = vld [vmem:[#allocation1] sm:$0xff]  ;;  %v4593_v13 = vld [vmem:[#allocation1 + $0x12] sm:$0xff]  ;;  %v4592_v49 = vld [vmem:[#allocation1 + $0x9] sm:$0xff] }
 0xa46   :  { %4606 = vmatmul.bf16.vlgmr.msra.gmra.mxu1 %v4591_v23  ;;  %4641 = vst [vmem:[#allocation1] ss:$9 sm:$0xff] %v5765_v19 }
 0xa49   :  { %4615 = vmatpush.bf16.msrb.mxu0 %v8397_v40 }
 0xa4c   :  { %v4320_v26 = vpop.f32.mrf.mxu2 }
 0xa4d   :  { %v4334_v4 = vadd.f32 %v4333_v57, %v4320_v26  ;;  %4616 = vmatpush.bf16.msrb.mxu0 %v8324_v25  ;;  %v4642_v53 = vld [vmem:[#allocation1] sm:$0xff]  ;;  %v4644_v28 = vld [vmem:[#allocation1 + $0x12] sm:$0xff] }
 0xa4e   :  { %v4371_v62 = vpop.f32.mrf.mxu1  ;;  %4657 = vmatmul.bf16.vlgmr.msra.gmra.mxu2 %v4642_v53 }
 0xa51   :  { %4617 = vmatpush.bf16.msrb.mxu0 %v8338_v60  ;;  %v4643_v60 = vld [vmem:[#allocation1 + $0x9] sm:$0xff] }
 0xa54   :  { %v4322_v34 = vpop.f32.mrf.mxu2 }
 0xa55   :  { %4618 = vmatpush.bf16.msrb.mxu0 %v8356_v8  ;;  %v5963_v34 = vld [vmem:[%s8690_s3 + $0x3e8] sm:$0xff] }
 0xa56   :  { %v4373_v44 = vpop.f32.mrf.mxu1  ;;  %4670 = vmatmul.bf16.vlgmr.msrb.gmra.mxu1 %v4643_v60 }
 0xa58   :  { %4619 = vmatmul.bf16.vlgmr.msrb.gmra.mxu0 %v4592_v49 }
 0xa5c   :  { %v4384_v0 = vpop.f32.mrf.mxu2 }
 0xa5d   :  { %v4385_v56 = vadd.f32 %v4384_v0, %v4371_v62 }
 0xa69   :  { %v4194_v41 = vpop.f32.mrf.mxu0 }
 0xa6a   :  { %v8585_v33 = vadd.f32 %v4194_v41, %v8458_v1  ;;  %v4386_v1 = vpop.f32.mrf.mxu2 }
 0xa71   :  { %v4196_v47 = vpop.f32.mrf.mxu0 }
 0xa72   :  { %v5960_v47 = vld [vmem:[%s8690_s3 + $0x3d0] sm:$0xff] }
 0xa79   :  { %v4269_v58 = vpop.f32.mrf.mxu0 }
 0xa7a   :  { %v4283_v50 = vadd.f32 %v4282_v30, %v4269_v58  ;;  %v5959_v58 = vld [vmem:[%s8690_s3 + $0x3c8] sm:$0xff] }
 0xa7c   :  { %v4296_v37 = vadd.f32 %v8567_v43, %v4283_v50 }
 0xa7e   :  { %v4299_v46 = vmax.f32 %v8565_v3, %v4296_v37 }
 0xa81   :  { %v4271_v9 = vpop.f32.mrf.mxu0 }
 0xa89   :  { %v4346_v59 = vpop.f32.mrf.mxu0 }
 0xa8a   :  { %v4347_v10 = vadd.f32 %v4346_v59, %v4334_v4 }
 0xa8c   :  { %v4350_v22 = vmax.f32 %v4299_v46, %v4347_v10 }
 0xa91   :  { %v4348_v35 = vpop.f32.mrf.mxu0 }
 0xa93   :  { %v4519_v17 = vpop.f32.mrf.mxu1 }
 0xa98   :  { %v4532_v27 = vpop.f32.mrf.mxu2 }
 0xa99   :  { %v4397_v45 = vpop.f32.mrf.mxu0 }
 0xa9a   :  { %v4398_v54 = vadd.f32 %v4397_v45, %v4385_v56  ;;  %v5971_v56 = vld [vmem:[%s8691_s4] ss:$0 sm:$0xff] }
 0xa9b   :  { %v4521_v30 = vpop.f32.mrf.mxu1 }
 0xa9c   :  { %v4401_v15 = vmax.f32 %v4350_v22, %v4398_v54 }
 0xa9e   :  { %v4402_v40 = vadd.f32 %v8332_v11, %v4401_v15 }
 0xaa0   :  { %vm4403_vm15 = vcmp.gt.f32.partialorder %v4402_v40, 1.0  ;;  %v4534_v24 = vpop.f32.mrf.mxu2 }
 0xaa1   :  { %vm5757_vm0 = vmpackc.low %vm4403_vm15, %vm4403_vm15  ;;  %v4399_v25 = vpop.f32.mrf.mxu0 }
 0xaa2   :  { %5758 = vmatmul.msk.bf16.vlgmr.msra.gmra.mxu3 %vm5757_vm0, %v6099_v55 }
 0xaa3   :  { %4629 = vmatpush.bf16.msra.mxu3 %v6161_v6 }
 0xaa7   :  { %4630 = vmatpush.bf16.msra.mxu3 %v8370_v32 }
 0xaa8   :  { %v4569_v31 = vpop.f32.mrf.mxu2 }
 0xaa9   :  { %v4506_v8 = vpop.f32.mrf.mxu0 }
 0xaaa   :  { %v4520_v3 = vadd.f32 %v4519_v17, %v4506_v8 }
 0xaab   :  { %4631 = vmatpush.bf16.msra.mxu3 %v8383_v39 }
 0xaac   :  { %v4533_v43 = vadd.f32 %v4532_v27, %v4520_v3 }
 0xab1   :  { %v4508_v14 = vpop.f32.mrf.mxu0 }
 0xab2   :  { %4555 = vmatmul.bf16.vlgmr.msrb.gmra.mxu3 %v4540_v20 }
 0xab3   :  { %4680 = vmatpush.bf16.msrb.mxu3 %v6161_v6 }
 0xab7   :  { %4681 = vmatpush.bf16.msrb.mxu3 %v8370_v32  ;;  %v5965_v32 = vld [vmem:[%s8690_s3 + $0x3f8] sm:$0xff] }
 0xab8   :  { %4759 = vmatpush.bf16.msra.mxu0 %v5965_v32 }
 0xabb   :  { %4682 = vmatpush.bf16.msrb.mxu3 %v8383_v39  ;;  %v4582_v48 = vpop.f32.mrf.mxu0  ;;  %v4571_v39 = vpop.f32.mrf.mxu2 }
 0xabc   :  { %4760 = vmatpush.bf16.msra.mxu0 %v5964_v51 }
 0xac0   :  { %4761 = vmatpush.bf16.msra.mxu0 %v5963_v34 }
 0xac2   :  { %5764 = vmatmul.msk.bf16.vlgmr.msra.gmra.mxu3 %vm184_vm1, %v4593_v13 }
 0xac3   :  { %v4584_v6 = vpop.f32.mrf.mxu0  ;;  %v4607_v26 = vpop.f32.mrf.mxu1 }
 0xac4   :  { %4762 = vmatpush.bf16.msra.mxu0 %v5962_v16 }
 0xac8   :  { %4763 = vmatpush.bf16.msra.mxu0 %v5961_v63 }
 0xacb   :  { %v4609_v52 = vpop.f32.mrf.mxu1 }
 0xacc   :  { %4764 = vmatpush.bf16.msra.mxu0 %v5960_v47 }
 0xad0   :  { %4765 = vmatpush.bf16.msra.mxu0 %v5959_v58 }
 0xad1   :  { %v4658_v42 = vpop.f32.mrf.mxu2 }
 0xad2   :  { %5766 = vmatmul.msk.bf16.vlgmr.msrb.gmra.mxu3 %vm184_vm1, %v4644_v28 }
 0xad3   :  { %v4671_v41 = vpop.f32.mrf.mxu1 }
 0xad4   :  { %4766 = vmatpush.bf16.msra.mxu0 %v5958_v18  ;;  %v4672_v61 = vadd.f32 %v4671_v41, %v4658_v42 }
 0xad5   :  { %v4620_v12 = vpop.f32.mrf.mxu0 }
 0xad6   :  { %v4621_v50 = vadd.f32 %v4620_v12, %v4607_v26 }
 0xad9   :  { %v4660_v44 = vpop.f32.mrf.mxu2 }
 0xadd   :  { %v4622_v62 = vpop.f32.mrf.mxu0 }
 0xb25   :  { %v4481_v57 = vpop.f32.mrf.mxu3 }
 0xb26   :  { %v4485_v36 = vadd.f32 %v4481_v57, %v8585_v33  ;;  %v4673_v33 = vpop.f32.mrf.mxu1 }
 0xb2d   :  { %v4483_v0 = vpop.f32.mrf.mxu3 }
 0xb35   :  { %v4556_v1 = vpop.f32.mrf.mxu3 }
 0xb36   :  { %v4570_v2 = vadd.f32 %v4569_v31, %v4556_v1 }
 0xb38   :  { %v4583_v9 = vadd.f32 %v4582_v48, %v4570_v2 }
 0xb3a   :  { %v4586_v21 = vmax.f32 %v4533_v43, %v4583_v9 }
 0xb3d   :  { %v4558_v5 = vpop.f32.mrf.mxu3 }
 0xb45   :  { %v4633_v7 = vpop.f32.mrf.mxu3 }
 0xb46   :  { %v4634_v35 = vadd.f32 %v4633_v7, %v4621_v50 }
 0xb48   :  { %v4637_v20 = vmax.f32 %v4586_v21, %v4634_v35 }
 0xb4d   :  { %v4635_v59 = vpop.f32.mrf.mxu3 }
 0xb55   :  { %v4684_v4 = vpop.f32.mrf.mxu3 }
 0xb56   :  { %v4685_v38 = vadd.f32 %v4684_v4, %v4672_v61 }
 0xb58   :  { %v4688_v29 = vmax.f32 %v4637_v20, %v4685_v38 }
 0xb5a   :  { %v4689_v37 = vadd.f32 %v8332_v11, %v4688_v29 }
 0xb5c   :  { %vm4690_vm1 = vcmp.gt.f32.partialorder %v4689_v37, 1.0 }
 0xb5d   :  { %vm5816_vm2 = vmpackc.low %vm4690_vm1, %vm4690_vm1  ;;  %v4686_v10 = vpop.f32.mrf.mxu3 }
 0xb5e   :  { %5817 = vmatmul.msk.bf16.vlgmr.msra.gmra.mxu0 %vm5816_vm2, %v6099_v55  ;;  %v6102_v55 = vmov 0.0  }
 0xbdb   :  { %v4768_v46 = vpop.f32.mrf.mxu0 }
 0xbdc   :  { %v4772_v45 = vadd.f32 %v4768_v46, %v4485_v36 }
 0xbde   :  { %v4777_v11 = vadd.f32 %v5971_v56, %v4772_v45 }
 0xbe0   :  { %4782 = vst [vmem:[#allocation4] sm:$0x3] %v4777_v11  ;;  %vm4778_vm3 = vcmp.gt.f32.partialorder %v4777_v11, 1.0 }
 0xbe1   :  { %v5818_v22 = vsel %vm4778_vm3, 1.0, %v6102_v55  ;;  %4804 = dma.vmem_to_hbm [thread:$0]  %s4800_s15, 32, %s4802_s18, [#allocation5]  }
 0xbe2   :  { %4781 = vst [vmem:[#allocation2] sm:$0x3] %v5818_v22 }
 0xbe3   :  { %v4770_v54 = vpop.f32.mrf.mxu0  ;;  %4793 = dma.vmem_to_hbm [thread:$0]  %s4789_s20, 32, %s4791_s23, [#allocation3]  }
 0xbe4   :  { %6095 = dma.done.wait [#allocation3], 32  }
 0xbe5   :  { %6096 = vsyncadd [#allocation3], 4294967264 }
 0xbe6   :  { %6097 = dma.done.wait [#allocation5], 32  }
 0xbe7   :  { %6098 = vsyncadd [#allocation5], 4294967264 }
 0xbe8   :  { %4813 = vsyncpa [#allocation3], 1 }
 0xbe9   :  { %4814 = vsyncpa [#allocation5], 1 }

</bundles_post_ra>
